<compile_context>
chip_gen: v7x
topology: tpu7x:2x2x1
jax: 0.10.0
libtpu: 0.0.40
codegen_flags: <defaults>
</compile_context>

<pallas_src>
import functools

import jax
import jax.numpy as jnp
from jax import lax
from jax.experimental import pallas as pl
from jax.experimental.pallas import tpu as pltpu

C1, C2 = 128, 64  # hidden widths fixed by the module


def _det_head_kernel(x_ref, w1_ref, b1_ref, w2_ref, b2_ref, w3t_ref, b3_ref,
                     o_ref, xpad, patch1, y1pad, *, H, W, Cin):
    """Fused Det_Head for one image.

    x_ref   : (1, H, W, Cin)       bf16  NHWC input (unpadded)
    w1_ref  : (9*Cin, C1)          bf16  layer-1 weights, im2col layout
    b1_ref  : (1, C1)              f32
    w2_ref  : (9*C1, C2)           bf16  layer-2 weights, per-tap stacked
    b2_ref  : (1, C2)              f32
    w3t_ref : (Cout, C2)           bf16  layer-3 weights, transposed
    b3_ref  : (Cout, 1)            f32
    o_ref   : (1, Cout, H*W)       f32   lane-dense, channel-major output
    xpad    : VMEM (H+2, W+2, Cin) bf16  scratch (padded input)
    patch1  : VMEM (H*W, 9*Cin)    bf16  scratch (layer-1 im2col patches)
    y1pad   : VMEM (H+2, W+2, C1)  bf16  scratch (padded layer-1 activation)
    """
    HW = H * W
    Hp, Wp = H + 2, W + 2

    # ---- fuse the zero pad into the kernel: zero ONLY the 1-pixel halo ----
    xpad[0:1, :, :] = jnp.zeros((1, Wp, Cin), jnp.bfloat16)
    xpad[H + 1:H + 2, :, :] = jnp.zeros((1, Wp, Cin), jnp.bfloat16)
    xpad[1:H + 1, 0:1, :] = jnp.zeros((H, 1, Cin), jnp.bfloat16)
    xpad[1:H + 1, W + 1:W + 2, :] = jnp.zeros((H, 1, Cin), jnp.bfloat16)
    xpad[1:H + 1, 1:W + 1, :] = x_ref[0]

    # ---- layer 1: 3x3 conv (Cin -> C1) + ReLU as ONE deep im2col matmul ----
    # One ref read per dy; dx windows sliced from the in-register row slab.
    for dy in range(3):
        row = xpad[dy:dy + H, :, :]                        # (H, Wp, Cin) bf16
        for dx in range(3):
            k = dy * 3 + dx
            patch1[:, k * Cin:(k + 1) * Cin] = (
                row[:, dx:dx + W, :].reshape(HW, Cin))
    acc1 = jnp.dot(patch1[...], w1_ref[...],
                   preferred_element_type=jnp.float32) + b1_ref[...]
    y1 = jnp.maximum(acc1, 0.0).astype(jnp.bfloat16)       # (HW, C1) bf16

    # ---- padded layer-1 activation: zero halo only, write interior ----
    y1pad[0:1, :, :] = jnp.zeros((1, Wp, C1), jnp.bfloat16)
    y1pad[H + 1:H + 2, :, :] = jnp.zeros((1, Wp, C1), jnp.bfloat16)
    y1pad[1:H + 1, 0:1, :] = jnp.zeros((H, 1, C1), jnp.bfloat16)
    y1pad[1:H + 1, W + 1:W + 2, :] = jnp.zeros((H, 1, C1), jnp.bfloat16)
    y1pad[1:H + 1, 1:W + 1, :] = y1.reshape(H, W, C1)

    # ---- layer 2: 3x3 conv (C1 -> C2) + ReLU as 9 accumulated K=128 dots ----
    # Bias folded into the accumulator init; no patch buffer, no per-tap cast.
    acc2 = jnp.broadcast_to(b2_ref[...], (HW, C2))          # (HW, C2) f32
    for dy in range(3):
        row = y1pad[dy:dy + H, :, :]                        # (H, Wp, C1) bf16
        for dx in range(3):
            k = dy * 3 + dx
            tap = row[:, dx:dx + W, :].reshape(HW, C1)
            acc2 = acc2 + jnp.dot(tap, w2_ref[k * C1:(k + 1) * C1, :],
                                  preferred_element_type=jnp.float32)
    y2 = jnp.maximum(acc2, 0.0).astype(jnp.bfloat16)        # (HW, C2) bf16

    # ---- layer 3: 1x1 conv (C2 -> Cout), computed transposed so the output
    # store is lane-dense (H*W on the lane axis) and NCHW layout is free ----
    out = lax.dot_general(w3t_ref[...], y2,
                          dimension_numbers=(((1,), (1,)), ((), ())),
                          preferred_element_type=jnp.float32)    # (Cout, HW)
    out = out + b3_ref[...]
    o_ref[0] = out.astype(o_ref.dtype)


def det_head_forward(x_nchw, params):
    """Matches Det_Head.forward: NCHW in, NCHW out."""
    (w1, b1), (w2, b2), (w3, b3) = params
    N, Cin, H, W = x_nchw.shape
    Cout = w3.shape[-1]

    # NHWC + bf16 (reference quantizes the input to bf16 as well); the zero
    # pad is fused into the kernel, so no extra HBM pass over the input here.
    x = jnp.transpose(x_nchw, (0, 2, 3, 1)).astype(jnp.bfloat16)

    w1r = w1.reshape(9 * Cin, C1).astype(jnp.bfloat16)       # im2col layout
    w2r = w2.reshape(9 * C1, C2).astype(jnp.bfloat16)        # per-tap stacked
    w3t = jnp.transpose(w3.reshape(C2, Cout)).astype(jnp.bfloat16)
    b1r = b1.reshape(1, C1)
    b2r = b2.reshape(1, C2)
    b3r = b3.reshape(Cout, 1)

    # TODO(synk): at production resolutions, add an H-tiled (halo-aware)
    # second "parallel" grid axis so v7x's two TensorCores stay busy for
    # N==1/odd N, and size the tile so scratch stays within v7x's 64 MiB
    # VMEM (set vmem_limit_bytes explicitly).
    kernel = functools.partial(_det_head_kernel, H=H, W=W, Cin=Cin)
    out = pl.pallas_call(
        kernel,
        out_shape=jax.ShapeDtypeStruct((N, Cout, H * W), jnp.float32),
        grid_spec=pltpu.PrefetchScalarGridSpec(
            num_scalar_prefetch=0,
            grid=(N,),
            in_specs=[
                pl.BlockSpec((1, H, W, Cin), lambda n: (n, 0, 0, 0)),
                pl.BlockSpec((9 * Cin, C1), lambda n: (0, 0)),
                pl.BlockSpec((1, C1), lambda n: (0, 0)),
                pl.BlockSpec((9 * C1, C2), lambda n: (0, 0)),
                pl.BlockSpec((1, C2), lambda n: (0, 0)),
                pl.BlockSpec((Cout, C2), lambda n: (0, 0)),
                pl.BlockSpec((Cout, 1), lambda n: (0, 0)),
            ],
            out_specs=pl.BlockSpec((1, Cout, H * W), lambda n: (n, 0, 0)),
            scratch_shapes=[
                pltpu.VMEM((H + 2, W + 2, Cin), jnp.bfloat16),  # padded input
                pltpu.VMEM((H * W, 9 * Cin), jnp.bfloat16),     # layer-1 patches
                pltpu.VMEM((H + 2, W + 2, C1), jnp.bfloat16),   # padded act. 1
            ],
        ),
        compiler_params=pltpu.CompilerParams(
            dimension_semantics=("parallel",),
        ),
    )(x, w1r, b1r, w2r, b2r, w3t, b3r)
    return out.reshape(N, Cout, H, W)


def init_det_head_params(key, in_channels, num_classes=1):
    """Deterministic synthetic weights (Kaiming-ish scaling); HWIO layout."""
    c_out_final = 4 + 1 + num_classes
    dims = [(3, 3, in_channels, C1), (3, 3, C1, C2), (1, 1, C2, c_out_final)]
    params = []
    keys = jax.random.split(key, 2 * len(dims))
    for i, (kh, kw, ci, co) in enumerate(dims):
        fan_in = kh * kw * ci
        w = jax.random.normal(keys[2 * i], (kh, kw, ci, co), jnp.float32)
        w = w * (2.0 / fan_in) ** 0.5
        b = 0.01 * jax.random.normal(keys[2 * i + 1], (co,), jnp.float32)
        params.append((w, b))
    return params


def _reference_forward(x_nchw, params):
    """Pure-JAX reference with the same bf16 quantization points as the kernel."""
    q = lambda a: a.astype(jnp.bfloat16).astype(jnp.float32)
    x = q(jnp.transpose(x_nchw, (0, 2, 3, 1)))
    dn = ("NHWC", "HWIO", "NHWC")
    for i, (w, b) in enumerate(params):
        pad = "SAME" if w.shape[0] == 3 else "VALID"
        x = lax.conv_general_dilated(x, q(w), (1, 1), pad, dimension_numbers=dn)
        x = x + b
        if i < 2:
            x = q(jnp.maximum(x, 0.0))
    return jnp.transpose(x, (0, 3, 1, 2))


if __name__ == "__main__":
    key = jax.random.PRNGKey(0)
    k_x, k_p = jax.random.split(key)

    # Small, module-consistent shapes: batch=2, in_channels=32, spatial=16x16.
    in_channels, num_classes = 32, 1
    x = jax.random.normal(k_x, (2, in_channels, 16, 16), jnp.float32)
    params = init_det_head_params(k_p, in_channels, num_classes)

    out = jax.block_until_ready(det_head_forward(x, params))
    assert out.shape == (2, 4 + 1 + num_classes, 16, 16), out.shape

    ref = jax.block_until_ready(_reference_forward(x, params))
    err = float(jnp.max(jnp.abs(out - ref)))
    assert jnp.allclose(out, ref, atol=1e-2, rtol=1e-2), f"mismatch, max err={err}"

    print("KERNEL_OK")
</pallas_src>

<mosaic_0001>
module attributes {stable_mosaic.version = 11 : i64} {
  func.func @_det_head_kernel(%arg0: i32, %arg1: memref<1x16x16x32xbf16, #tpu.memory_space<vmem>>, %arg2: memref<288x128xbf16, #tpu.memory_space<vmem>>, %arg3: memref<1x128xf32, #tpu.memory_space<vmem>>, %arg4: memref<1152x64xbf16, #tpu.memory_space<vmem>>, %arg5: memref<1x64xf32, #tpu.memory_space<vmem>>, %arg6: memref<6x64xbf16, #tpu.memory_space<vmem>>, %arg7: memref<6x1xf32, #tpu.memory_space<vmem>>, %arg8: memref<1x6x256xf32, #tpu.memory_space<vmem>>, %arg9: memref<18x18x32xbf16, #tpu.memory_space<vmem>>, %arg10: memref<256x288xbf16, #tpu.memory_space<vmem>>, %arg11: memref<18x18x128xbf16, #tpu.memory_space<vmem>>) attributes {dimension_semantics = [#tpu.dimension_semantics<parallel>], iteration_bounds = array<i64: 2>, scalar_prefetch = 0 : i64, scratch_operands = 3 : i64, tpu.core_type = #tpu.core_type<tc>, window_params = [{transform_indices = @transform_0, window_bounds = array<i64: 1, 16, 16, 32>}, {pipeline_mode = #tpu.pipeline_mode<synchronous>, transform_indices = @transform_1, window_bounds = array<i64: 288, 128>}, {pipeline_mode = #tpu.pipeline_mode<synchronous>, transform_indices = @transform_2, window_bounds = array<i64: 1, 128>}, {pipeline_mode = #tpu.pipeline_mode<synchronous>, transform_indices = @transform_3, window_bounds = array<i64: 1152, 64>}, {pipeline_mode = #tpu.pipeline_mode<synchronous>, transform_indices = @transform_4, window_bounds = array<i64: 1, 64>}, {pipeline_mode = #tpu.pipeline_mode<synchronous>, transform_indices = @transform_5, window_bounds = array<i64: 6, 64>}, {pipeline_mode = #tpu.pipeline_mode<synchronous>, transform_indices = @transform_6, window_bounds = array<i64: 6, 1>}, {transform_indices = @transform_7, window_bounds = array<i64: 1, 6, 256>}]} {
    %cst = arith.constant 0.000000e+00 : bf16
    %0 = vector.broadcast %cst : bf16 to vector<1x18x32xbf16>
    %c0 = arith.constant 0 : index
    %c0_0 = arith.constant 0 : index
    %c0_1 = arith.constant 0 : index
    %1 = vector.load %arg9[%c0, %c0_0, %c0_1] : memref<18x18x32xbf16, #tpu.memory_space<vmem>>, vector<1x18x32xbf16>
    tpu.vector_store %arg9[%c0, %c0_0, %c0_1], %0 {strides = array<i32>} : memref<18x18x32xbf16, #tpu.memory_space<vmem>>, vector<1x18x32xbf16>,
    %cst_2 = arith.constant 0.000000e+00 : bf16
    %2 = vector.broadcast %cst_2 : bf16 to vector<1x18x32xbf16>
    %c17 = arith.constant 17 : index
    %c0_3 = arith.constant 0 : index
    %c0_4 = arith.constant 0 : index
    %3 = vector.load %arg9[%c17, %c0_3, %c0_4] : memref<18x18x32xbf16, #tpu.memory_space<vmem>>, vector<1x18x32xbf16>
    tpu.vector_store %arg9[%c17, %c0_3, %c0_4], %2 {strides = array<i32>} : memref<18x18x32xbf16, #tpu.memory_space<vmem>>, vector<1x18x32xbf16>,
    %cst_5 = arith.constant 0.000000e+00 : bf16
    %4 = vector.broadcast %cst_5 : bf16 to vector<16x1x32xbf16>
    %c1 = arith.constant 1 : index
    %c0_6 = arith.constant 0 : index
    %c0_7 = arith.constant 0 : index
    %5 = vector.load %arg9[%c1, %c0_6, %c0_7] : memref<18x18x32xbf16, #tpu.memory_space<vmem>>, vector<16x1x32xbf16>
    tpu.vector_store %arg9[%c1, %c0_6, %c0_7], %4 {strides = array<i32>} : memref<18x18x32xbf16, #tpu.memory_space<vmem>>, vector<16x1x32xbf16>,
    %cst_8 = arith.constant 0.000000e+00 : bf16
    %6 = vector.broadcast %cst_8 : bf16 to vector<16x1x32xbf16>
    %c1_9 = arith.constant 1 : index
    %c17_10 = arith.constant 17 : index
    %c0_11 = arith.constant 0 : index
    %7 = vector.load %arg9[%c1_9, %c17_10, %c0_11] : memref<18x18x32xbf16, #tpu.memory_space<vmem>>, vector<16x1x32xbf16>
    tpu.vector_store %arg9[%c1_9, %c17_10, %c0_11], %6 {strides = array<i32>} : memref<18x18x32xbf16, #tpu.memory_space<vmem>>, vector<16x1x32xbf16>,
    %c0_12 = arith.constant 0 : index
    %c0_13 = arith.constant 0 : index
    %c0_14 = arith.constant 0 : index
    %c0_15 = arith.constant 0 : index
    %8 = vector.load %arg1[%c0_12, %c0_13, %c0_14, %c0_15] : memref<1x16x16x32xbf16, #tpu.memory_space<vmem>>, vector<1x16x16x32xbf16>
    %9 = vector.shape_cast %8 : vector<1x16x16x32xbf16> to vector<16x16x32xbf16>
    %c1_16 = arith.constant 1 : index
    %c1_17 = arith.constant 1 : index
    %c0_18 = arith.constant 0 : index
    %10 = vector.load %arg9[%c1_16, %c1_17, %c0_18] : memref<18x18x32xbf16, #tpu.memory_space<vmem>>, vector<16x16x32xbf16>
    tpu.vector_store %arg9[%c1_16, %c1_17, %c0_18], %9 {strides = array<i32>} : memref<18x18x32xbf16, #tpu.memory_space<vmem>>, vector<16x16x32xbf16>,
    %c0_19 = arith.constant 0 : index
    %c0_20 = arith.constant 0 : index
    %c0_21 = arith.constant 0 : index
    %11 = vector.load %arg9[%c0_19, %c0_20, %c0_21] : memref<18x18x32xbf16, #tpu.memory_space<vmem>>, vector<16x18x32xbf16>
    %12 = vector.extract_strided_slice %11 {offsets = [0, 0, 0], sizes = [16, 16, 32], strides = [1, 1, 1]} : vector<16x18x32xbf16> to vector<16x16x32xbf16>
    %13 = vector.shape_cast %12 : vector<16x16x32xbf16> to vector<256x32xbf16>
    %c0_22 = arith.constant 0 : index
    %c0_23 = arith.constant 0 : index
    %14 = vector.load %arg10[%c0_22, %c0_23] : memref<256x288xbf16, #tpu.memory_space<vmem>>, vector<256x32xbf16>
    tpu.vector_store %arg10[%c0_22, %c0_23], %13 {strides = array<i32>} : memref<256x288xbf16, #tpu.memory_space<vmem>>, vector<256x32xbf16>,
    %15 = vector.extract_strided_slice %11 {offsets = [0, 1, 0], sizes = [16, 16, 32], strides = [1, 1, 1]} : vector<16x18x32xbf16> to vector<16x16x32xbf16>
    %16 = vector.shape_cast %15 : vector<16x16x32xbf16> to vector<256x32xbf16>
    %c0_24 = arith.constant 0 : index
    %c32 = arith.constant 32 : index
    %17 = vector.load %arg10[%c0_24, %c32] : memref<256x288xbf16, #tpu.memory_space<vmem>>, vector<256x32xbf16>
    tpu.vector_store %arg10[%c0_24, %c32], %16 {strides = array<i32>} : memref<256x288xbf16, #tpu.memory_space<vmem>>, vector<256x32xbf16>,
    %18 = vector.extract_strided_slice %11 {offsets = [0, 2, 0], sizes = [16, 16, 32], strides = [1, 1, 1]} : vector<16x18x32xbf16> to vector<16x16x32xbf16>
    %19 = vector.shape_cast %18 : vector<16x16x32xbf16> to vector<256x32xbf16>
    %c0_25 = arith.constant 0 : index
    %c64 = arith.constant 64 : index
    %20 = vector.load %arg10[%c0_25, %c64] : memref<256x288xbf16, #tpu.memory_space<vmem>>, vector<256x32xbf16>
    tpu.vector_store %arg10[%c0_25, %c64], %19 {strides = array<i32>} : memref<256x288xbf16, #tpu.memory_space<vmem>>, vector<256x32xbf16>,
    %c1_26 = arith.constant 1 : index
    %c0_27 = arith.constant 0 : index
    %c0_28 = arith.constant 0 : index
    %21 = vector.load %arg9[%c1_26, %c0_27, %c0_28] : memref<18x18x32xbf16, #tpu.memory_space<vmem>>, vector<16x18x32xbf16>
    %22 = vector.extract_strided_slice %21 {offsets = [0, 0, 0], sizes = [16, 16, 32], strides = [1, 1, 1]} : vector<16x18x32xbf16> to vector<16x16x32xbf16>
    %23 = vector.shape_cast %22 : vector<16x16x32xbf16> to vector<256x32xbf16>
    %c0_29 = arith.constant 0 : index
    %c96 = arith.constant 96 : index
    %24 = vector.load %arg10[%c0_29, %c96] : memref<256x288xbf16, #tpu.memory_space<vmem>>, vector<256x32xbf16>
    tpu.vector_store %arg10[%c0_29, %c96], %23 {strides = array<i32>} : memref<256x288xbf16, #tpu.memory_space<vmem>>, vector<256x32xbf16>,
    %25 = vector.extract_strided_slice %21 {offsets = [0, 1, 0], sizes = [16, 16, 32], strides = [1, 1, 1]} : vector<16x18x32xbf16> to vector<16x16x32xbf16>
    %26 = vector.shape_cast %25 : vector<16x16x32xbf16> to vector<256x32xbf16>
    %c0_30 = arith.constant 0 : index
    %c128 = arith.constant 128 : index
    %27 = vector.load %arg10[%c0_30, %c128] : memref<256x288xbf16, #tpu.memory_space<vmem>>, vector<256x32xbf16>
    tpu.vector_store %arg10[%c0_30, %c128], %26 {strides = array<i32>} : memref<256x288xbf16, #tpu.memory_space<vmem>>, vector<256x32xbf16>,
    %28 = vector.extract_strided_slice %21 {offsets = [0, 2, 0], sizes = [16, 16, 32], strides = [1, 1, 1]} : vector<16x18x32xbf16> to vector<16x16x32xbf16>
    %29 = vector.shape_cast %28 : vector<16x16x32xbf16> to vector<256x32xbf16>
    %c0_31 = arith.constant 0 : index
    %c160 = arith.constant 160 : index
    %30 = vector.load %arg10[%c0_31, %c160] : memref<256x288xbf16, #tpu.memory_space<vmem>>, vector<256x32xbf16>
    tpu.vector_store %arg10[%c0_31, %c160], %29 {strides = array<i32>} : memref<256x288xbf16, #tpu.memory_space<vmem>>, vector<256x32xbf16>,
    %c2 = arith.constant 2 : index
    %c0_32 = arith.constant 0 : index
    %c0_33 = arith.constant 0 : index
    %31 = vector.load %arg9[%c2, %c0_32, %c0_33] : memref<18x18x32xbf16, #tpu.memory_space<vmem>>, vector<16x18x32xbf16>
    %32 = vector.extract_strided_slice %31 {offsets = [0, 0, 0], sizes = [16, 16, 32], strides = [1, 1, 1]} : vector<16x18x32xbf16> to vector<16x16x32xbf16>
    %33 = vector.shape_cast %32 : vector<16x16x32xbf16> to vector<256x32xbf16>
    %c0_34 = arith.constant 0 : index
    %c192 = arith.constant 192 : index
    %34 = vector.load %arg10[%c0_34, %c192] : memref<256x288xbf16, #tpu.memory_space<vmem>>, vector<256x32xbf16>
    tpu.vector_store %arg10[%c0_34, %c192], %33 {strides = array<i32>} : memref<256x288xbf16, #tpu.memory_space<vmem>>, vector<256x32xbf16>,
    %35 = vector.extract_strided_slice %31 {offsets = [0, 1, 0], sizes = [16, 16, 32], strides = [1, 1, 1]} : vector<16x18x32xbf16> to vector<16x16x32xbf16>
    %36 = vector.shape_cast %35 : vector<16x16x32xbf16> to vector<256x32xbf16>
    %c0_35 = arith.constant 0 : index
    %c224 = arith.constant 224 : index
    %37 = vector.load %arg10[%c0_35, %c224] : memref<256x288xbf16, #tpu.memory_space<vmem>>, vector<256x32xbf16>
    tpu.vector_store %arg10[%c0_35, %c224], %36 {strides = array<i32>} : memref<256x288xbf16, #tpu.memory_space<vmem>>, vector<256x32xbf16>,
    %38 = vector.extract_strided_slice %31 {offsets = [0, 2, 0], sizes = [16, 16, 32], strides = [1, 1, 1]} : vector<16x18x32xbf16> to vector<16x16x32xbf16>
    %39 = vector.shape_cast %38 : vector<16x16x32xbf16> to vector<256x32xbf16>
    %c0_36 = arith.constant 0 : index
    %c256 = arith.constant 256 : index
    %40 = vector.load %arg10[%c0_36, %c256] : memref<256x288xbf16, #tpu.memory_space<vmem>>, vector<256x32xbf16>
    tpu.vector_store %arg10[%c0_36, %c256], %39 {strides = array<i32>} : memref<256x288xbf16, #tpu.memory_space<vmem>>, vector<256x32xbf16>,
    %c0_37 = arith.constant 0 : index
    %c0_38 = arith.constant 0 : index
    %41 = vector.load %arg10[%c0_37, %c0_38] : memref<256x288xbf16, #tpu.memory_space<vmem>>, vector<256x288xbf16>
    %c0_39 = arith.constant 0 : index
    %c0_40 = arith.constant 0 : index
    %42 = vector.load %arg2[%c0_39, %c0_40] : memref<288x128xbf16, #tpu.memory_space<vmem>>, vector<288x128xbf16>
    %cst_41 = arith.constant dense<0.000000e+00> : vector<256x128xf32>
    %43 = tpu.matmul %41, %42, %cst_41 {dimension_numbers = #tpu.dot_dimension_numbers<[1], [0], [0], [1], [0, 0, 1, 1], [], []>} : vector<256x288xbf16>, vector<288x128xbf16>, vector<256x128xf32> -> vector<256x128xf32>
    %c0_42 = arith.constant 0 : index
    %c0_43 = arith.constant 0 : index
    %44 = vector.load %arg3[%c0_42, %c0_43] : memref<1x128xf32, #tpu.memory_space<vmem>>, vector<1x128xf32>
    %45 = vector.broadcast %44 : vector<1x128xf32> to vector<256x128xf32>
    %46 = arith.addf %43, %45 : vector<256x128xf32>
    %cst_44 = arith.constant 0.000000e+00 : f32
    %47 = vector.broadcast %cst_44 : f32 to vector<256x128xf32>
    %48 = arith.maximumf %46, %47 : vector<256x128xf32>
    %49 = arith.truncf %48 : vector<256x128xf32> to vector<256x128xbf16>
    %cst_45 = arith.constant 0.000000e+00 : bf16
    %50 = vector.broadcast %cst_45 : bf16 to vector<1x18x128xbf16>
    %c0_46 = arith.constant 0 : index
    %c0_47 = arith.constant 0 : index
    %c0_48 = arith.constant 0 : index
    %51 = vector.load %arg11[%c0_46, %c0_47, %c0_48] : memref<18x18x128xbf16, #tpu.memory_space<vmem>>, vector<1x18x128xbf16>
    tpu.vector_store %arg11[%c0_46, %c0_47, %c0_48], %50 {strides = array<i32>} : memref<18x18x128xbf16, #tpu.memory_space<vmem>>, vector<1x18x128xbf16>,
    %cst_49 = arith.constant 0.000000e+00 : bf16
    %52 = vector.broadcast %cst_49 : bf16 to vector<1x18x128xbf16>
    %c17_50 = arith.constant 17 : index
    %c0_51 = arith.constant 0 : index
    %c0_52 = arith.constant 0 : index
    %53 = vector.load %arg11[%c17_50, %c0_51, %c0_52] : memref<18x18x128xbf16, #tpu.memory_space<vmem>>, vector<1x18x128xbf16>
    tpu.vector_store %arg11[%c17_50, %c0_51, %c0_52], %52 {strides = array<i32>} : memref<18x18x128xbf16, #tpu.memory_space<vmem>>, vector<1x18x128xbf16>,
    %cst_53 = arith.constant 0.000000e+00 : bf16
    %54 = vector.broadcast %cst_53 : bf16 to vector<16x1x128xbf16>
    %c1_54 = arith.constant 1 : index
    %c0_55 = arith.constant 0 : index
    %c0_56 = arith.constant 0 : index
    %55 = vector.load %arg11[%c1_54, %c0_55, %c0_56] : memref<18x18x128xbf16, #tpu.memory_space<vmem>>, vector<16x1x128xbf16>
    tpu.vector_store %arg11[%c1_54, %c0_55, %c0_56], %54 {strides = array<i32>} : memref<18x18x128xbf16, #tpu.memory_space<vmem>>, vector<16x1x128xbf16>,
    %cst_57 = arith.constant 0.000000e+00 : bf16
    %56 = vector.broadcast %cst_57 : bf16 to vector<16x1x128xbf16>
    %c1_58 = arith.constant 1 : index
    %c17_59 = arith.constant 17 : index
    %c0_60 = arith.constant 0 : index
    %57 = vector.load %arg11[%c1_58, %c17_59, %c0_60] : memref<18x18x128xbf16, #tpu.memory_space<vmem>>, vector<16x1x128xbf16>
    tpu.vector_store %arg11[%c1_58, %c17_59, %c0_60], %56 {strides = array<i32>} : memref<18x18x128xbf16, #tpu.memory_space<vmem>>, vector<16x1x128xbf16>,
    %58 = vector.shape_cast %49 : vector<256x128xbf16> to vector<16x16x128xbf16>
    %c1_61 = arith.constant 1 : index
    %c1_62 = arith.constant 1 : index
    %c0_63 = arith.constant 0 : index
    %59 = vector.load %arg11[%c1_61, %c1_62, %c0_63] : memref<18x18x128xbf16, #tpu.memory_space<vmem>>, vector<16x16x128xbf16>
    tpu.vector_store %arg11[%c1_61, %c1_62, %c0_63], %58 {strides = array<i32>} : memref<18x18x128xbf16, #tpu.memory_space<vmem>>, vector<16x16x128xbf16>,
    %c0_64 = arith.constant 0 : index
    %c0_65 = arith.constant 0 : index
    %60 = vector.load %arg5[%c0_64, %c0_65] : memref<1x64xf32, #tpu.memory_space<vmem>>, vector<1x64xf32>
    %61 = vector.shape_cast %60 : vector<1x64xf32> to vector<1x64xf32>
    %62 = vector.broadcast %61 : vector<1x64xf32> to vector<256x64xf32>
    %c0_66 = arith.constant 0 : index
    %c0_67 = arith.constant 0 : index
    %c0_68 = arith.constant 0 : index
    %63 = vector.load %arg11[%c0_66, %c0_67, %c0_68] : memref<18x18x128xbf16, #tpu.memory_space<vmem>>, vector<16x18x128xbf16>
    %64 = vector.extract_strided_slice %63 {offsets = [0, 0, 0], sizes = [16, 16, 128], strides = [1, 1, 1]} : vector<16x18x128xbf16> to vector<16x16x128xbf16>
    %65 = vector.shape_cast %64 : vector<16x16x128xbf16> to vector<256x128xbf16>
    %c0_69 = arith.constant 0 : index
    %c0_70 = arith.constant 0 : index
    %66 = vector.load %arg4[%c0_69, %c0_70] : memref<1152x64xbf16, #tpu.memory_space<vmem>>, vector<128x64xbf16>
    %cst_71 = arith.constant dense<0.000000e+00> : vector<256x64xf32>
    %67 = tpu.matmul %65, %66, %cst_71 {dimension_numbers = #tpu.dot_dimension_numbers<[1], [0], [0], [1], [0, 0, 1, 1], [], []>} : vector<256x128xbf16>, vector<128x64xbf16>, vector<256x64xf32> -> vector<256x64xf32>
    %68 = arith.addf %62, %67 : vector<256x64xf32>
    %69 = vector.extract_strided_slice %63 {offsets = [0, 1, 0], sizes = [16, 16, 128], strides = [1, 1, 1]} : vector<16x18x128xbf16> to vector<16x16x128xbf16>
    %70 = vector.shape_cast %69 : vector<16x16x128xbf16> to vector<256x128xbf16>
    %c128_72 = arith.constant 128 : index
    %c0_73 = arith.constant 0 : index
    %71 = vector.load %arg4[%c128_72, %c0_73] : memref<1152x64xbf16, #tpu.memory_space<vmem>>, vector<128x64xbf16>
    %cst_74 = arith.constant dense<0.000000e+00> : vector<256x64xf32>
    %72 = tpu.matmul %70, %71, %cst_74 {dimension_numbers = #tpu.dot_dimension_numbers<[1], [0], [0], [1], [0, 0, 1, 1], [], []>} : vector<256x128xbf16>, vector<128x64xbf16>, vector<256x64xf32> -> vector<256x64xf32>
    %73 = arith.addf %68, %72 : vector<256x64xf32>
    %74 = vector.extract_strided_slice %63 {offsets = [0, 2, 0], sizes = [16, 16, 128], strides = [1, 1, 1]} : vector<16x18x128xbf16> to vector<16x16x128xbf16>
    %75 = vector.shape_cast %74 : vector<16x16x128xbf16> to vector<256x128xbf16>
    %c256_75 = arith.constant 256 : index
    %c0_76 = arith.constant 0 : index
    %76 = vector.load %arg4[%c256_75, %c0_76] : memref<1152x64xbf16, #tpu.memory_space<vmem>>, vector<128x64xbf16>
    %cst_77 = arith.constant dense<0.000000e+00> : vector<256x64xf32>
    %77 = tpu.matmul %75, %76, %cst_77 {dimension_numbers = #tpu.dot_dimension_numbers<[1], [0], [0], [1], [0, 0, 1, 1], [], []>} : vector<256x128xbf16>, vector<128x64xbf16>, vector<256x64xf32> -> vector<256x64xf32>
    %78 = arith.addf %73, %77 : vector<256x64xf32>
    %c1_78 = arith.constant 1 : index
    %c0_79 = arith.constant 0 : index
    %c0_80 = arith.constant 0 : index
    %79 = vector.load %arg11[%c1_78, %c0_79, %c0_80] : memref<18x18x128xbf16, #tpu.memory_space<vmem>>, vector<16x18x128xbf16>
    %80 = vector.extract_strided_slice %79 {offsets = [0, 0, 0], sizes = [16, 16, 128], strides = [1, 1, 1]} : vector<16x18x128xbf16> to vector<16x16x128xbf16>
    %81 = vector.shape_cast %80 : vector<16x16x128xbf16> to vector<256x128xbf16>
    %c384 = arith.constant 384 : index
    %c0_81 = arith.constant 0 : index
    %82 = vector.load %arg4[%c384, %c0_81] : memref<1152x64xbf16, #tpu.memory_space<vmem>>, vector<128x64xbf16>
    %cst_82 = arith.constant dense<0.000000e+00> : vector<256x64xf32>
    %83 = tpu.matmul %81, %82, %cst_82 {dimension_numbers = #tpu.dot_dimension_numbers<[1], [0], [0], [1], [0, 0, 1, 1], [], []>} : vector<256x128xbf16>, vector<128x64xbf16>, vector<256x64xf32> -> vector<256x64xf32>
    %84 = arith.addf %78, %83 : vector<256x64xf32>
    %85 = vector.extract_strided_slice %79 {offsets = [0, 1, 0], sizes = [16, 16, 128], strides = [1, 1, 1]} : vector<16x18x128xbf16> to vector<16x16x128xbf16>
    %86 = vector.shape_cast %85 : vector<16x16x128xbf16> to vector<256x128xbf16>
    %c512 = arith.constant 512 : index
    %c0_83 = arith.constant 0 : index
    %87 = vector.load %arg4[%c512, %c0_83] : memref<1152x64xbf16, #tpu.memory_space<vmem>>, vector<128x64xbf16>
    %cst_84 = arith.constant dense<0.000000e+00> : vector<256x64xf32>
    %88 = tpu.matmul %86, %87, %cst_84 {dimension_numbers = #tpu.dot_dimension_numbers<[1], [0], [0], [1], [0, 0, 1, 1], [], []>} : vector<256x128xbf16>, vector<128x64xbf16>, vector<256x64xf32> -> vector<256x64xf32>
    %89 = arith.addf %84, %88 : vector<256x64xf32>
    %90 = vector.extract_strided_slice %79 {offsets = [0, 2, 0], sizes = [16, 16, 128], strides = [1, 1, 1]} : vector<16x18x128xbf16> to vector<16x16x128xbf16>
    %91 = vector.shape_cast %90 : vector<16x16x128xbf16> to vector<256x128xbf16>
    %c640 = arith.constant 640 : index
    %c0_85 = arith.constant 0 : index
    %92 = vector.load %arg4[%c640, %c0_85] : memref<1152x64xbf16, #tpu.memory_space<vmem>>, vector<128x64xbf16>
    %cst_86 = arith.constant dense<0.000000e+00> : vector<256x64xf32>
    %93 = tpu.matmul %91, %92, %cst_86 {dimension_numbers = #tpu.dot_dimension_numbers<[1], [0], [0], [1], [0, 0, 1, 1], [], []>} : vector<256x128xbf16>, vector<128x64xbf16>, vector<256x64xf32> -> vector<256x64xf32>
    %94 = arith.addf %89, %93 : vector<256x64xf32>
    %c2_87 = arith.constant 2 : index
    %c0_88 = arith.constant 0 : index
    %c0_89 = arith.constant 0 : index
    %95 = vector.load %arg11[%c2_87, %c0_88, %c0_89] : memref<18x18x128xbf16, #tpu.memory_space<vmem>>, vector<16x18x128xbf16>
    %96 = vector.extract_strided_slice %95 {offsets = [0, 0, 0], sizes = [16, 16, 128], strides = [1, 1, 1]} : vector<16x18x128xbf16> to vector<16x16x128xbf16>
    %97 = vector.shape_cast %96 : vector<16x16x128xbf16> to vector<256x128xbf16>
    %c768 = arith.constant 768 : index
    %c0_90 = arith.constant 0 : index
    %98 = vector.load %arg4[%c768, %c0_90] : memref<1152x64xbf16, #tpu.memory_space<vmem>>, vector<128x64xbf16>
    %cst_91 = arith.constant dense<0.000000e+00> : vector<256x64xf32>
    %99 = tpu.matmul %97, %98, %cst_91 {dimension_numbers = #tpu.dot_dimension_numbers<[1], [0], [0], [1], [0, 0, 1, 1], [], []>} : vector<256x128xbf16>, vector<128x64xbf16>, vector<256x64xf32> -> vector<256x64xf32>
    %100 = arith.addf %94, %99 : vector<256x64xf32>
    %101 = vector.extract_strided_slice %95 {offsets = [0, 1, 0], sizes = [16, 16, 128], strides = [1, 1, 1]} : vector<16x18x128xbf16> to vector<16x16x128xbf16>
    %102 = vector.shape_cast %101 : vector<16x16x128xbf16> to vector<256x128xbf16>
    %c896 = arith.constant 896 : index
    %c0_92 = arith.constant 0 : index
    %103 = vector.load %arg4[%c896, %c0_92] : memref<1152x64xbf16, #tpu.memory_space<vmem>>, vector<128x64xbf16>
    %cst_93 = arith.constant dense<0.000000e+00> : vector<256x64xf32>
    %104 = tpu.matmul %102, %103, %cst_93 {dimension_numbers = #tpu.dot_dimension_numbers<[1], [0], [0], [1], [0, 0, 1, 1], [], []>} : vector<256x128xbf16>, vector<128x64xbf16>, vector<256x64xf32> -> vector<256x64xf32>
    %105 = arith.addf %100, %104 : vector<256x64xf32>
    %106 = vector.extract_strided_slice %95 {offsets = [0, 2, 0], sizes = [16, 16, 128], strides = [1, 1, 1]} : vector<16x18x128xbf16> to vector<16x16x128xbf16>
    %107 = vector.shape_cast %106 : vector<16x16x128xbf16> to vector<256x128xbf16>
    %c1024 = arith.constant 1024 : index
    %c0_94 = arith.constant 0 : index
    %108 = vector.load %arg4[%c1024, %c0_94] : memref<1152x64xbf16, #tpu.memory_space<vmem>>, vector<128x64xbf16>
    %cst_95 = arith.constant dense<0.000000e+00> : vector<256x64xf32>
    %109 = tpu.matmul %107, %108, %cst_95 {dimension_numbers = #tpu.dot_dimension_numbers<[1], [0], [0], [1], [0, 0, 1, 1], [], []>} : vector<256x128xbf16>, vector<128x64xbf16>, vector<256x64xf32> -> vector<256x64xf32>
    %110 = arith.addf %105, %109 : vector<256x64xf32>
    %cst_96 = arith.constant 0.000000e+00 : f32
    %111 = vector.broadcast %cst_96 : f32 to vector<256x64xf32>
    %112 = arith.maximumf %110, %111 : vector<256x64xf32>
    %113 = arith.truncf %112 : vector<256x64xf32> to vector<256x64xbf16>
    %c0_97 = arith.constant 0 : index
    %c0_98 = arith.constant 0 : index
    %114 = vector.load %arg6[%c0_97, %c0_98] : memref<6x64xbf16, #tpu.memory_space<vmem>>, vector<6x64xbf16>
    %cst_99 = arith.constant dense<0.000000e+00> : vector<6x256xf32>
    %115 = tpu.matmul %114, %113, %cst_99 {dimension_numbers = #tpu.dot_dimension_numbers<[1], [1], [0], [0], [0, 0, 1, 0], [], []>} : vector<6x64xbf16>, vector<256x64xbf16>, vector<6x256xf32> -> vector<6x256xf32>
    %c0_100 = arith.constant 0 : index
    %c0_101 = arith.constant 0 : index
    %116 = vector.load %arg7[%c0_100, %c0_101] : memref<6x1xf32, #tpu.memory_space<vmem>>, vector<6x1xf32>
    %117 = vector.broadcast %116 : vector<6x1xf32> to vector<6x256xf32>
    %118 = arith.addf %115, %117 : vector<6x256xf32>
    %c0_102 = arith.constant 0 : index
    %c0_103 = arith.constant 0 : index
    %c0_104 = arith.constant 0 : index
    %119 = vector.load %arg8[%c0_102, %c0_103, %c0_104] : memref<1x6x256xf32, #tpu.memory_space<vmem>>, vector<1x6x256xf32>
    %120 = vector.shape_cast %119 : vector<1x6x256xf32> to vector<6x256xf32>
    %121 = vector.shape_cast %118 : vector<6x256xf32> to vector<1x6x256xf32>
    tpu.vector_store %arg8[%c0_102, %c0_103, %c0_104], %121 {strides = array<i32>} : memref<1x6x256xf32, #tpu.memory_space<vmem>>, vector<1x6x256xf32>,
    return
  }
  func.func @transform_0(%arg0: i32) -> (i32, i32, i32, i32) {
    %c0_i32 = arith.constant 0 : i32
    %c0_i32_0 = arith.constant 0 : i32
    %c0_i32_1 = arith.constant 0 : i32
    %c0_i32_2 = arith.constant 0 : i32
    return %arg0, %c0_i32, %c0_i32_0, %c0_i32_1 : i32, i32, i32, i32
  }
  func.func @transform_1(%arg0: i32) -> (i32, i32) {
    %c0_i32 = arith.constant 0 : i32
    %c0_i32_0 = arith.constant 0 : i32
    %c0_i32_1 = arith.constant 0 : i32
    return %c0_i32, %c0_i32_0 : i32, i32
  }
  func.func @transform_2(%arg0: i32) -> (i32, i32) {
    %c0_i32 = arith.constant 0 : i32
    %c0_i32_0 = arith.constant 0 : i32
    %c0_i32_1 = arith.constant 0 : i32
    return %c0_i32, %c0_i32_0 : i32, i32
  }
  func.func @transform_3(%arg0: i32) -> (i32, i32) {
    %c0_i32 = arith.constant 0 : i32
    %c0_i32_0 = arith.constant 0 : i32
    %c0_i32_1 = arith.constant 0 : i32
    return %c0_i32, %c0_i32_0 : i32, i32
  }
  func.func @transform_4(%arg0: i32) -> (i32, i32) {
    %c0_i32 = arith.constant 0 : i32
    %c0_i32_0 = arith.constant 0 : i32
    %c0_i32_1 = arith.constant 0 : i32
    return %c0_i32, %c0_i32_0 : i32, i32
  }
  func.func @transform_5(%arg0: i32) -> (i32, i32) {
    %c0_i32 = arith.constant 0 : i32
    %c0_i32_0 = arith.constant 0 : i32
    %c0_i32_1 = arith.constant 0 : i32
    return %c0_i32, %c0_i32_0 : i32, i32
  }
  func.func @transform_6(%arg0: i32) -> (i32, i32) {
    %c0_i32 = arith.constant 0 : i32
    %c0_i32_0 = arith.constant 0 : i32
    %c0_i32_1 = arith.constant 0 : i32
    return %c0_i32, %c0_i32_0 : i32, i32
  }
  func.func @transform_7(%arg0: i32) -> (i32, i32, i32) {
    %c0_i32 = arith.constant 0 : i32
    %c0_i32_0 = arith.constant 0 : i32
    %c0_i32_1 = arith.constant 0 : i32
    return %arg0, %c0_i32, %c0_i32_0 : i32, i32, i32
  }
}

</mosaic_0001>

<bundles_post_ra>
// kernel: tpu_custom_call.1
= control target key start
LH: loop header
LB: loop body
LE: loop exit
PB: predicated region body
PF: predicated region fallthrough
CT: control target
= control target key end

     0   :  { %s11708_s24 = smov 0   ;;  %s15972_s0 = inlined_call_operand.vmem [shape: bf16[2,16,16,32], index: 0, kind: input, shape index: {}]   ;;  %s15973_s1 = inlined_call_operand.vmem [shape: bf16[288,128], index: 1, kind: input, shape index: {}]   ;;  %s15974_s2 = inlined_call_operand.vmem [shape: f32[1,128], index: 2, kind: input, shape index: {}]   ;;  %s15975_s3 = inlined_call_operand.vmem [shape: bf16[1152,64], index: 3, kind: input, shape index: {}]   ;;  %s15976_s4 = inlined_call_operand.vmem [shape: f32[1,64], index: 4, kind: input, shape index: {}]   ;;  %s15977_s5 = inlined_call_operand.vmem [shape: bf16[6,64], index: 5, kind: input, shape index: {}]   ;;  %s15978_s6 = inlined_call_operand.vmem [shape: f32[6,1], index: 6, kind: input, shape index: {}]   ;;  %s15979_s7 = inlined_call_operand.vmem [shape: f32[2,6,256], index: 7, kind: output, shape index: {}]  }
   0x1 LB: > { %s9674_s25 = sadd.s32 4294967295, %s11662_s24   ;;  %p9678_p0 = scmp.ge.s32.totalorder %s11662_s24, 1  ;;  %s11662_s24 = sphi %s11708_s24, %s17_s24  }
   0x2   : > { %p237_p1 = scmp.lt.s32.totalorder %s11662_s24, 3 }
   0x4   : > { %p238_p2 = pnand %p9678_p0, %p237_p1 }
   0x6   : > { %241 = sbr.rel (%p238_p2) target bundleno = 1687 (0x697), region = 48 }
   0xd   : > { %vm280_vm0 = vcmask 257024   ;;  %vm283_vm1 = vcmask 253952   ;;  %vm291_vm2 = vsmask.f32 256  ;;  %v11664_v0 = vmov 0   ;;  %p269_p3 = scmp.lt.s32.totalorder %s9674_s25, 1 }
   0xe   : > { %281 = vst.msk [vmem:[#allocation2] sm:$0xf] %vm280_vm0, %v11664_v0  ;;  %282 = vst.msk [vmem:[#allocation2 + $0x4] sm:$0xf] %vm280_vm0, %v11664_v0  ;;  %vm341_vm4 = vsmask.f32 7938  ;;  %11384 = vset.pattern.permute.xlu0 %v11664_v0 }
   0xf   : > { %284 = vst.msk [vmem:[#allocation2 + $0x8] sm:$0x1] %vm283_vm1, %v11664_v0  ;;  %vm11721_vm3 = vmand %vm283_vm1, %vm291_vm2  ;;  %vm1536_vm6 = vcmask 1042432   ;;  %v299_v3 = vld [vmem:[#allocation2 + $0x24] sm:$0x1]  ;;  %vm1537_vm7 = vcmask 1046532  }
  0x10   : > { %286 = vst.msk [vmem:[#allocation2 + $0xcc] sm:$0xf] %vm280_vm0, %v11664_v0  ;;  %287 = vst.msk [vmem:[#allocation2 + $0xd0] sm:$0xf] %vm280_vm0, %v11664_v0  ;;  %v296_v4 = vld [vmem:[#allocation2 + $0x18] sm:$0x1] }
  0x11   : > { %288 = vst.msk [vmem:[#allocation2 + $0xd4] sm:$0x1] %vm283_vm1, %v11664_v0  ;;  %4175 = vst [vmem:[#allocation4] sm:$0xf] %v11664_v0  ;;  %vm1020_vm8 = vsmask.f32 3328 }
  0x12   : > { %4176 = vst [vmem:[#allocation4 + $0x4] sm:$0xf] %v11664_v0  ;;  %4177 = vst [vmem:[#allocation4 + $0x8] sm:$0x1] %v11664_v0  ;;  %s16345_s25 = smov (!%p269_p3, %s9674_s25), 1  ;;  %v300_v5 = vsel %vm11721_vm3, 0, %v299_v3 }
  0x13   : > { %4179 = vst [vmem:[#allocation4 + $0xcc] sm:$0xf] %v11664_v0  ;;  %4180 = vst [vmem:[#allocation4 + $0xd0] sm:$0xf] %v11664_v0  ;;  %v297_v6 = vsel %vm11721_vm3, 0, %v296_v4  ;;  %s10210_s26 = sshll.u32 %s16345_s25, 7 }
  0x14   : > { %4181 = vst [vmem:[#allocation4 + $0xd4] sm:$0x1] %v11664_v0  ;;  %vm11732_vm5 = vmand %vm283_vm1, %vm341_vm4  ;;  %v302_v7 = vld [vmem:[#allocation2 + $0x30] sm:$0x1]  ;;  %v293_v9 = vld [vmem:[#allocation2 + $0xc] sm:$0x1]  ;;  %s11760_s29 = scalar_lea.vmem %s15972_s0, %s10210_s26 }
  0x15   : > { %301 = vst [vmem:[#allocation2 + $0x24] sm:$0x1] %v300_v5  ;;  %298 = vst [vmem:[#allocation2 + $0x18] sm:$0x1] %v297_v6  ;;  %v303_v8 = vsel %vm11721_vm3, 0, %v302_v7  ;;  %v294_v11 = vsel %vm11721_vm3, 0, %v293_v9 }
  0x16   : > { %v343_v10 = vld [vmem:[#allocation2 + $0x14] sm:$0x1]  ;;  %304 = vst [vmem:[#allocation2 + $0x30] sm:$0x1] %v303_v8  ;;  %v346_v13 = vld [vmem:[#allocation2 + $0x20] sm:$0x1]  ;;  %vm11753_vm9 = vmor %vm1536_vm6, %vm1537_vm7 }
  0x17   : > { %v344_v12 = vsel %vm11732_vm5, 0, %v343_v10  ;;  %v16065_v14 = vmov 0  ;;  %vm1021_vm10 = vsmask.f32 7440  ;;  %vm423_vm11 = vsmask.f32 4368  ;;  %vm11784_vm12 = vmand %vm280_vm0, %vm341_vm4 }
  0x18   : > { %v16066_v14 = vsel %vm11753_vm9, 4294967295, %v16065_v14  ;;  %295 = vst [vmem:[#allocation2 + $0xc] sm:$0x1] %v294_v11  ;;  %345 = vst [vmem:[#allocation2 + $0x14] sm:$0x1] %v344_v12  ;;  %v347_v15 = vsel %vm11732_vm5, 0, %v346_v13 }
  0x19   : > { %16067 = vst [vmem:[#allocation5_spill] sm:$0xff] %v16066_v14  ;;  %v11764_v16 = vld [vmem:[#allocation2] sm:$0xf]  ;;  %v11766_v17 = vld [vmem:[#allocation2 + $0x4] sm:$0xf]  ;;  %vm11790_vm13 = vmor %vm1020_vm8, %vm1021_vm10  ;;  %s11665_s30 = smov 64  }
  0x1a   : > { %v861_v18 = vld [vmem:[#allocation2 + $0x8] sm:$0x1]  ;;  %348 = vst [vmem:[#allocation2 + $0x20] sm:$0x1] %v347_v15  ;;  %v9715_v19 = vrot.slane %v11764_v16, 9  ;;  %v1541_v20 = vrot.slane %v11766_v17, 5  ;;  %vm11799_vm14 = vmor %vm291_vm2, %vm423_vm11 }
  0x1b   : > { %v1544_v21 = vrot.slane %v861_v18, 5  ;;  %v1024_v22 = vshrl.u32 %v11764_v16, 16  ;;  %v395_v23 = vld [vmem:[%s11760_s29 + $0x10] sm:$0xf]  ;;  %v1027_v24 = vshll.u32 %v11764_v16, 16  ;;  %v1033_v25 = vshll.u32 %v11766_v17, 16 }
  0x1c   : > { %v1037_v26 = vshrl.u32 %v11766_v17, 16  ;;  %v1043_v27 = vshll.u32 %v861_v18, 16  ;;  %v396_v28 = vld [vmem:[%s11760_s29 + $0x14] sm:$0xf]  ;;  %v1542_v29 = vsel %vm11753_vm9, %v9715_v19, %v1541_v20  ;;  %v1543_v30 = vrot.slane %v1541_v20, 4  ;;  %s11666_s8 = smov 32  }
  0x1d   : > { %v1026_v31 = vrot.slane %v1024_v22, 4  ;;  %v460_v32 = vshrl.u32 %v395_v23, 16  ;;  %v1029_v33 = vrot.slane %v1027_v24, 5  ;;  %v1035_v34 = vrot.slane %v1033_v25, 5  ;;  %v393_v37 = vld [vmem:[%s11760_s29 + $0x8] sm:$0xf] }
  0x1e   : > { %v1039_v35 = vrot.slane %v1037_v26, 4  ;;  %v1045_v36 = vrot.slane %v1043_v27, 5  ;;  %v1545_v38 = vsel %vm11753_vm9, %v1543_v30, %v1544_v21  ;;  %v463_v40 = vshll.u32 %v395_v23, 16  ;;  %v394_v42 = vld [vmem:[%s11760_s29 + $0xc] sm:$0xf]  ;;  %s11667_s9 = smov 96  }
  0x1f   : > { %v462_v39 = vrot.slane %v460_v32, 7  ;;  %v468_v41 = vshrl.u32 %v396_v28, 16  ;;  %v9731_v44 = vcombine.low %v1542_v29, %v1545_v38  ;;  %v1030_v45 = vor.u32 %v1029_v33, %v1026_v31  ;;  %v761_v48 = vld [vmem:[#allocation2 + $0x24] sm:$0xf]  ;;  %v754_v62 = vld [vmem:[#allocation2 + $0x18] sm:$0xf] }
  0x20   : > { %v1040_v46 = vor.u32 %v1039_v35, %v1035_v34  ;;  %v471_v47 = vshll.u32 %v396_v28, 16  ;;  %v443_v53 = vshrl.u32 %v393_v37, 16  ;;  %v446_v57 = vshll.u32 %v393_v37, 16  ;;  %v397_v63 = vld [vmem:[%s11760_s29 + $0x18] sm:$0xf]  ;;  %s10211_s13 = sshll.u32 %s16345_s25, 4 }
  0x21   : > { %v465_v50 = vor.u32 %v463_v40, %v462_v39  ;;  %v466_v51 = vrot.slane %v462_v39, 4  ;;  %v11794_v52 = vrot.slane %v468_v41, 7  ;;  %1699 = vrot.lane.b32.xlu1 %v9731_v44, %s11665_s30  ;;  %v1031_v54 = vrot.slane %v1030_v45, 4  ;;  %v398_v6 = vld [vmem:[%s11760_s29 + $0x1c] sm:$0xf]  ;;  %s278_s16 = scalar_lea.vmem %s15979_s7, %s10211_s13 }
  0x22   : > { %v1041_v55 = vrot.slane %v1040_v46, 4  ;;  %v451_v58 = vshrl.u32 %v394_v42, 16  ;;  %v445_v61 = vrot.slane %v443_v53, 7  ;;  %v454_v5 = vshll.u32 %v394_v42, 16  ;;  %v391_v7 = vld [vmem:[%s11760_s29] sm:$0xf] }
  0x23   : > { %v473_v59 = vor.u32 %v471_v47, %v11794_v52  ;;  %v762_v60 = vsel %vm11784_vm12, %v465_v50, %v761_v48  ;;  %v1036_v0 = vsel %vm11790_vm13, %v1031_v54, %v1035_v34  ;;  %v392_v12 = vld [vmem:[%s11760_s29 + $0x4] sm:$0xf]  ;;  %v477_v18 = vshrl.u32 %v397_v63, 16  ;;  %v758_v20 = vld [vmem:[#allocation2 + $0x20] sm:$0x1] }
  0x24   : > { %v1046_v3 = vsel %vm11790_vm13, %v1041_v55, %v1045_v36  ;;  %763 = vst [vmem:[#allocation2 + $0x24] sm:$0xf] %v762_v60  ;;  %v453_v4 = vrot.slane %v451_v58, 7  ;;  %v448_v10 = vor.u32 %v446_v57, %v445_v61  ;;  %v449_v11 = vrot.slane %v445_v61, 4  ;;  %v349_v25 = vld [vmem:[#allocation2 + $0x2c] sm:$0x1] }
  0x25   : > { %v9699_v8 = vcombine.low %v1036_v0, %v1046_v3  ;;  %v474_v9 = vsel %vm11799_vm14, %v466_v51, %v473_v59  ;;  %v480_v19 = vshll.u32 %v397_v63, 16  ;;  %v485_v22 = vshrl.u32 %v398_v6, 16  ;;  %v768_v31 = vld [vmem:[#allocation2 + $0x30] sm:$0xf]  ;;  %v747_v38 = vld [vmem:[#allocation2 + $0xc] sm:$0xf] }
  0x26   : > { %764 = vst.msk [vmem:[#allocation2 + $0x28] sm:$0xf] %vm280_vm0, %v474_v9  ;;  %v456_v13 = vor.u32 %v454_v5, %v453_v4  ;;  %v458_v15 = vrot.slane %v453_v4, 4  ;;  %v755_v21 = vsel %vm11784_vm12, %v448_v10, %v754_v62  ;;  %v488_v23 = vshll.u32 %v398_v6, 16  ;;  %v751_v46 = vld [vmem:[#allocation2 + $0x14] sm:$0x1] }
  0x27   : > { %1455 = vrot.lane.b32.xlu0 %v9699_v8, %s11666_s8  ;;  %v426_v24 = vshrl.u32 %v391_v7, 16  ;;  %756 = vst [vmem:[#allocation2 + $0x18] sm:$0xf] %v755_v21  ;;  %v479_v27 = vrot.slane %v477_v18, 7  ;;  %v429_v28 = vshll.u32 %v391_v7, 16  ;;  %v434_v29 = vshrl.u32 %v392_v12, 16 }
  0x28   : > { %v457_v26 = vsel %vm11799_vm14, %v449_v11, %v456_v13  ;;  %v11823_v30 = vrot.slane %v485_v22, 7  ;;  %v437_v33 = vshll.u32 %v392_v12, 16  ;;  %v759_v34 = vsel %vm11721_vm3, %v458_v15, %v758_v20 }
  0x29   : > { %757 = vst.msk [vmem:[#allocation2 + $0x1c] sm:$0xf] %vm280_vm0, %v457_v26  ;;  %v428_v32 = vrot.slane %v426_v24, 7  ;;  %v482_v35 = vor.u32 %v480_v19, %v479_v27  ;;  %v483_v36 = vrot.slane %v479_v27, 4  ;;  %v436_v37 = vrot.slane %v434_v29, 7 }
  0x2a   : > { %760 = vst [vmem:[#allocation2 + $0x20] sm:$0x1] %v759_v34  ;;  %v350_v39 = vsel %vm11732_vm5, 0, %v349_v25  ;;  %v490_v41 = vor.u32 %v488_v23, %v11823_v30  ;;  %v475_v54 = vrot.slane %v11794_v52, 4  ;;  %vm1003_vm15 = vcmask 261120  }
  0x2b   : > { %v11829_v40 = vld [vmem:[#allocation2 + $0x24] sm:$0xf]  ;;  %v431_v42 = vor.u32 %v429_v28, %v428_v32  ;;  %v432_v44 = vrot.slane %v428_v32, 4  ;;  %351 = vst [vmem:[#allocation2 + $0x2c] sm:$0x1] %v350_v39  ;;  %v769_v45 = vsel %vm11784_vm12, %v482_v35, %v768_v31  ;;  %v439_v50 = vor.u32 %v437_v33, %v436_v37 }
  0x2c   : > { %v491_v48 = vsel %vm11799_vm14, %v483_v36, %v490_v41  ;;  %770 = vst [vmem:[#allocation2 + $0x30] sm:$0xf] %v769_v45  ;;  %v441_v51 = vrot.slane %v436_v37, 4  ;;  %v2879_v58 = vshrl.u32 %v11829_v40, 16  ;;  %v11853_v62 = vld [vmem:[#allocation2 + $0x24] sm:$0xf] }
  0x2d   : > { %v11834_v47 = vld [vmem:[#allocation2 + $0x28] sm:$0xf]  ;;  %v748_v53 = vsel %vm11784_vm12, %v431_v42, %v747_v38  ;;  %771 = vst.msk [vmem:[#allocation2 + $0x34] sm:$0xf] %vm280_vm0, %v491_v48  ;;  %v440_v61 = vsel %vm11799_vm14, %v432_v44, %v439_v50  ;;  %v2882_v63 = vshll.u32 %v11829_v40, 16  ;;  %v9844_v0 = vrot.slane %v11829_v40, 9 }
  0x2e   : > { %v9812_v55 = vcombine.low %v11829_v40, %v11834_v47  ;;  %v3375_v57 = vrot.slane %v11834_v47, 5  ;;  %749 = vst [vmem:[#allocation2 + $0xc] sm:$0xf] %v748_v53  ;;  %v11846_v59 = vld [vmem:[#allocation2 + $0x18] sm:$0xf]  ;;  %v752_v52 = vsel %vm11721_vm3, %v441_v51, %v751_v46  ;;  %v2892_v5 = vshrl.u32 %v11834_v47, 16 }
  0x2f   : > { %750 = vst.msk [vmem:[#allocation2 + $0x10] sm:$0xf] %vm280_vm0, %v440_v61  ;;  %753 = vst [vmem:[#allocation2 + $0x14] sm:$0x1] %v752_v52  ;;  %v11861_v4 = vld [vmem:[#allocation2 + $0x28] sm:$0xf] }
  0x30   : > { %2792 = vrot.lane.b32.xlu0 %v9812_v55, %s11665_s30  ;;  %v11858_v3 = vld [vmem:[#allocation2 + $0x1c] sm:$0xf]  ;;  %v11867_v8 = vld [vmem:[#allocation2 + $0x18] sm:$0xf]  ;;  %v11870_v10 = vrot.slane %v3375_v57, 4  ;;  %v2855_v11 = vshrl.u32 %v11846_v59, 16  ;;  %v11884_v22 = vsel %vm11753_vm9, %v9844_v0, %v3375_v57  ;;  %v9749_v25 = vcombine.low %v11853_v62, %v11861_v4 }
  0x31   : > { %v9811_v6 = vcombine.low %v11846_v59, %v11858_v3  ;;  %v3368_v7 = vrot.slane %v11858_v3, 5  ;;  %v11873_v12 = vld [vmem:[#allocation2 + $0x1c] sm:$0xf]  ;;  %v1982_v13 = vshrl.u32 %v11867_v8, 16  ;;  %v2858_v18 = vshll.u32 %v11846_v59, 16 }
  0x32   : > { %v9843_v19 = vrot.slane %v11846_v59, 9  ;;  %v1985_v20 = vshll.u32 %v11867_v8, 16  ;;  %v1995_v21 = vshrl.u32 %v11873_v12, 16  ;;  %v11888_v24 = vld [vmem:[#allocation2 + $0x20] sm:$0x1]  ;;  %v2868_v27 = vshrl.u32 %v11858_v3, 16 }
  0x33   : > { %2790 = vrot.lane.b32.xlu1 %v9811_v6, %s11665_s30  ;;  %v11886_v23 = vld [vmem:[#allocation2 + $0x30] sm:$0xf]  ;;  %v765_v26 = vld [vmem:[#allocation2 + $0x2c] sm:$0x1]  ;;  %v11893_v28 = vrot.slane %v3368_v7, 4  ;;  %v9748_v31 = vcombine.low %v11867_v8, %v11873_v12  ;;  %v11904_v35 = vrot.slane %v1982_v13, 4 }
  0x34   : > { %v11895_v29 = vld [vmem:[#allocation2 + $0x34] sm:$0xf]  ;;  %v9780_v36 = vrot.slane %v11867_v8, 9  ;;  %v2446_v37 = vrot.slane %v11873_v12, 5  ;;  %v11910_v38 = vsel %vm11753_vm9, %v9843_v19, %v3368_v7  ;;  %v11917_v44 = vrot.slane %v1985_v20, 5 }
  0x35   : > { %v9813_v33 = vcombine.low %v11886_v23, %v11895_v29  ;;  %v11902_v34 = vld [vmem:[#allocation2 + $0xc] sm:$0xf]  ;;  %v15980_v39 = vrot.slane %v11895_v29, 5  ;;  %v766_v45 = vsel %vm11721_vm3, %v475_v54, %v765_v26  ;;  %v2903_v46 = vshrl.u32 %v11886_v23, 16 }
  0x36   : > { %v11913_v41 = vld [vmem:[#allocation2 + $0x10] sm:$0xf]  ;;  %v11915_v42 = vld [vmem:[#allocation2 + $0x14] sm:$0x1]  ;;  %v11925_v50 = vrot.slane %v1995_v21, 4  ;;  %v2449_v51 = vrot.slane %v11888_v24, 5  ;;  %v2447_v19 = vsel %vm11753_vm9, %v9780_v36, %v2446_v37 }
  0x37   : > { %2794 = vrot.lane.b32.xlu0 %v9813_v33, %s11665_s30  ;;  %v9747_v48 = vcombine.low %v11902_v34, %v11913_v41  ;;  %767 = vst [vmem:[#allocation2 + $0x2c] sm:$0x1] %v766_v45  ;;  %v2906_v53 = vshll.u32 %v11886_v23, 16  ;;  %v1958_v57 = vshrl.u32 %v11902_v34, 16  ;;  %v9779_v54 = vrot.slane %v11902_v34, 9 }
  0x38   : > { %v11932_v61 = vld [vmem:[#allocation2 + $0xc] sm:$0xf]  ;;  %v2439_v0 = vrot.slane %v11913_v41, 5  ;;  %v2442_v6 = vrot.slane %v11915_v42, 5  ;;  %v2448_v7 = vrot.slane %v2446_v37, 4  ;;  %v11942_v12 = vrot.slane %v15980_v39, 4 }
  0x39   : > { %1892 = vrot.lane.b32.xlu1 %v9747_v48, %s11667_s9  ;;  %v11938_v8 = vld [vmem:[#allocation2 + $0x10] sm:$0xf]  ;;  %v9781_v20 = vrot.slane %v11853_v62, 9  ;;  %v11948_v21 = vld [vmem:[#allocation2 + $0x14] sm:$0x1]  ;;  %v2453_v48 = vrot.slane %v11861_v4, 5 }
  0x3a   : > { %v2440_v26 = vsel %vm11753_vm9, %v9779_v54, %v2439_v0  ;;  %v2441_v33 = vrot.slane %v2439_v0, 4  ;;  %v2450_v45 = vsel %vm11753_vm9, %v2448_v7, %v2449_v51  ;;  %v11955_v32 = vrot.slane %v1958_v57, 4  ;;  %v2664_v7 = vld [vmem:[#allocation2 + $0x20] sm:$0x1] }
  0x3b   : > { %v9716_v9 = vrot.slane %v11932_v61, 9  ;;  %v1548_v36 = vrot.slane %v11938_v8, 5  ;;  %v9796_v54 = vcombine.low %v2447_v19, %v2450_v45  ;;  %v2455_v0 = vrot.slane %v2453_v48, 4 }
  0x3c   : > { %v2443_v37 = vsel %vm11753_vm9, %v2441_v33, %v2442_v6  ;;  %v1551_v51 = vrot.slane %v11948_v21, 5  ;;  %v2857_v39 = vrot.slane %v2855_v11, 4  ;;  %v2454_v6 = vsel %vm11753_vm9, %v9781_v20, %v2453_v48  ;;  %v11983_v20 = vld [vmem:[#allocation2 + $0x1c] sm:$0xf] }
  0x3d   : > { %1894 = vrot.lane.b32.xlu1 %v9748_v31, %s11667_s9  ;;  %v9795_v60 = vcombine.low %v2440_v26, %v2443_v37  ;;  %v1549_v15 = vsel %vm11753_vm9, %v9716_v9, %v1548_v36  ;;  %v1550_v55 = vrot.slane %v1548_v36, 4  ;;  %v2860_v19 = vrot.slane %v2858_v18, 5  ;;  %v11976_v26 = vld [vmem:[#allocation2 + $0x18] sm:$0xf]  ;;  %v11991_v37 = vld [vmem:[#allocation2 + $0x20] sm:$0x1] }
  0x3e   : > { %v11964_v57 = vld [vmem:[#allocation2 + $0x2c] sm:$0x1]  ;;  %v2864_v33 = vshll.u32 %v11858_v3, 16  ;;  %v2870_v11 = vrot.slane %v2868_v27, 4  ;;  %v2874_v45 = vshll.u32 %v2664_v7, 16  ;;  %v3371_v36 = vrot.slane %v2664_v7, 5 }
  0x3f   : > { %16074 = vst [vmem:[#allocation6_spill] sm:$0xff] %v11964_v57  ;;  %v2456_v31 = vrot.slane %v11964_v57, 5  ;;  %2597 = vrot.lane.b32.xlu0 %v9795_v60, %s11666_s8  ;;  %v1552_v9 = vsel %vm11753_vm9, %v1550_v55, %v1551_v51  ;;  %v2861_v60 = vor.u32 %v2860_v19, %v2857_v39  ;;  %v9717_v51 = vrot.slane %v11976_v26, 9 }
  0x40   : > { %v9732_v18 = vcombine.low %v1549_v15, %v1552_v9  ;;  %v2866_v48 = vrot.slane %v2864_v33, 5  ;;  %v2876_v3 = vrot.slane %v2874_v45, 5  ;;  %v3372_v27 = vsel %vm11753_vm9, %v11893_v28, %v3371_v36 }
  0x41   : > { %1896 = vrot.lane.b32.xlu1 %v9749_v25, %s11667_s9  ;;  %v2457_v59 = vsel %vm11753_vm9, %v2455_v0, %v2456_v31  ;;  %v2862_v7 = vrot.slane %v2861_v60, 4  ;;  %v9859_v25 = vcombine.low %v11910_v38, %v3372_v27  ;;  %v1555_v52 = vrot.slane %v11983_v20, 5  ;;  %v2667_v0 = vld [vmem:[#allocation2 + $0x2c] sm:$0x1]  ;;  %v352_v60 = vld [vmem:[#allocation2 + $0x38] sm:$0x1] }
  0x42   : > { %v9797_v55 = vcombine.low %v2454_v6, %v2457_v59  ;;  %v2871_v13 = vor.u32 %v2870_v11, %v2866_v48  ;;  %v1558_v15 = vrot.slane %v11991_v37, 5  ;;  %v2881_v39 = vrot.slane %v2879_v58, 4 }
  0x43   : > { %2599 = vrot.lane.b32.xlu0 %v9796_v54, %s11666_s8  ;;  %v2884_v6 = vrot.slane %v2882_v63, 5  ;;  %v2888_v28 = vshll.u32 %v11834_v47, 16  ;;  %v2867_v38 = vsel %vm11790_vm13, %v2862_v7, %v2866_v48  ;;  %3542 = vst.msk [vmem:[#allocation3 + $0x10] sm:$0xff] %vm1003_vm15, %v9859_v25  ;;  %v1556_v54 = vsel %vm11753_vm9, %v9717_v51, %v1555_v52 }
  0x44   : > { %v2872_v31 = vrot.slane %v2871_v13, 4  ;;  %v1557_v19 = vrot.slane %v1555_v52, 4  ;;  %v2894_v40 = vrot.slane %v2892_v5, 4  ;;  %v2898_v58 = vshll.u32 %v2667_v0, 16 }
  0x45   : > { %1701 = vrot.lane.b32.xlu1 %v9732_v18, %s11665_s30  ;;  %v2885_v33 = vor.u32 %v2884_v6, %v2881_v39  ;;  %v2890_v9 = vrot.slane %v2888_v28, 5  ;;  %v3378_v45 = vrot.slane %v2667_v0, 5  ;;  %v1048_v13 = vshrl.u32 %v11932_v61, 16 }
  0x46   : > { %v2877_v63 = vsel %vm11790_vm13, %v2872_v31, %v2876_v3  ;;  %v1559_v11 = vsel %vm11753_vm9, %v1557_v19, %v1558_v15  ;;  %v2900_v48 = vrot.slane %v2898_v58, 5  ;;  %v1051_v3 = vshll.u32 %v11932_v61, 16 }
  0x47   : > { %2601 = vrot.lane.b32.xlu0 %v9797_v55, %s11666_s8  ;;  %v9827_v36 = vcombine.low %v2867_v38, %v2877_v63  ;;  %v9733_v59 = vcombine.low %v1556_v54, %v1559_v11  ;;  %v2886_v52 = vrot.slane %v2885_v33, 4  ;;  %v2895_v18 = vor.u32 %v2894_v40, %v2890_v9  ;;  %v12047_v11 = vld [vmem:[#allocation2 + $0x30] sm:$0xf] }
  0x48   : > { %v3379_v47 = vsel %vm11753_vm9, %v11870_v10, %v3378_v45  ;;  %v1050_v5 = vrot.slane %v1048_v13, 4  ;;  %v1057_v7 = vshll.u32 %v11938_v8, 16  ;;  %v1053_v25 = vrot.slane %v1051_v3, 5 }
  0x49   : > { %1703 = vrot.lane.b32.xlu1 %v9733_v59, %s11665_s30  ;;  %v2891_v27 = vsel %vm11790_vm13, %v2886_v52, %v2890_v9  ;;  %v2896_v51 = vrot.slane %v2895_v18, 4  ;;  %v9860_v55 = vcombine.low %v11884_v22, %v3379_v47  ;;  %v1061_v0 = vshrl.u32 %v11938_v8, 16  ;;  %v12057_v52 = vld [vmem:[#allocation2 + $0x34] sm:$0xf]  ;;  %v12061_v47 = vld [vmem:[#allocation2 + $0x24] sm:$0xf] }
  0x4a   : > { %v1067_v15 = vshll.u32 %v11948_v21, 16  ;;  %v353_v10 = vsel %vm11732_vm5, 0, %v352_v60  ;;  %v1059_v39 = vrot.slane %v1057_v7, 5  ;;  %v2905_v22 = vrot.slane %v2903_v46, 4  ;;  %v12075_v7 = vld [vmem:[#allocation2 + $0x2c] sm:$0x1] }
  0x4b   : > { %3286 = vrot.lane.b32.xlu0 %v9827_v36, %s11667_s9  ;;  %v2901_v61 = vsel %vm11790_vm13, %v2896_v51, %v2900_v48  ;;  %3543 = vst.msk [vmem:[#allocation3 + $0x28] sm:$0xff] %vm1003_vm15, %v9860_v55  ;;  %354 = vst [vmem:[#allocation2 + $0x38] sm:$0x1] %v353_v10  ;;  %v2908_v8 = vrot.slane %v2906_v53, 5  ;;  %v1054_v21 = vor.u32 %v1053_v25, %v1050_v5  ;;  %v1063_v28 = vrot.slane %v1061_v0, 4 }
  0x4c   : > { %v9828_v6 = vcombine.low %v2891_v27, %v2901_v61  ;;  %v1069_v38 = vrot.slane %v1067_v15, 5  ;;  %v2912_v54 = vshll.u32 %v11895_v29, 16  ;;  %v16075_v19 = vshrl.u32 %v11895_v29, 16  ;;  %v305_v25 = vld [vmem:[#allocation2 + $0x3c] sm:$0x1] }
  0x4d   : > { %v2909_v31 = vor.u32 %v2908_v8, %v2905_v22  ;;  %v1072_v9 = vshrl.u32 %v11976_v26, 16  ;;  %v1055_v40 = vrot.slane %v1054_v21, 4  ;;  %v1064_v58 = vor.u32 %v1063_v28, %v1059_v39 }
  0x4e   : > { %v2918_v33 = vrot.slane %v16075_v19, 4  ;;  %v1075_v63 = vshll.u32 %v11976_v26, 16  ;;  %v1081_v46 = vshll.u32 %v11983_v20, 16  ;;  %v16076_v53 = vshll.u32 %v11902_v34, 16  ;;  %v12063_v34 = vld [vmem:[#allocation2 + $0x28] sm:$0xf] }
  0x4f   : > { %3288 = vrot.lane.b32.xlu0 %v9828_v6, %s11667_s9  ;;  %v12054_v13 = vrot.slane %v2912_v54, 5  ;;  %v1074_v36 = vrot.slane %v1072_v9, 4  ;;  %v1085_v59 = vshrl.u32 %v11983_v20, 16  ;;  %v1060_v26 = vsel %vm11790_vm13, %v1055_v40, %v1059_v39  ;;  %v399_v6 = vld [vmem:[%s11760_s29 + $0x20] sm:$0xf] }
  0x50   : > { %v12051_v45 = vrot.slane %v16076_v53, 5  ;;  %v1065_v18 = vrot.slane %v1064_v58, 4  ;;  %v1077_v60 = vrot.slane %v1075_v63, 5  ;;  %v1083_v48 = vrot.slane %v1081_v46, 5 }
  0x51   : > { %v16077_v5 = vrot.slane %v11895_v29, 5  ;;  %v16078_v3 = vrot.slane %v11886_v23, 9  ;;  %v2919_v27 = vor.u32 %v2918_v33, %v12054_v13  ;;  %v1087_v51 = vrot.slane %v1085_v59, 4 }
  0x52   : > { %v1091_v55 = vshll.u32 %v11991_v37, 16  ;;  %v2019_v0 = vshrl.u32 %v11861_v4, 16  ;;  %v1070_v29 = vsel %vm11790_vm13, %v1065_v18, %v1069_v38  ;;  %v772_v23 = vld [vmem:[#allocation2 + $0x38] sm:$0x1]  ;;  %v12080_v15 = vrot.slane %v2909_v31, 4 }
  0x53   : > { %v12071_v20 = vsel %vm11753_vm9, %v16078_v3, %v16077_v5  ;;  %v1078_v10 = vor.u32 %v1077_v60, %v1074_v36  ;;  %v9700_v61 = vcombine.low %v1060_v26, %v1070_v29  ;;  %v16079_v39 = vrot.slane %v11823_v30, 4  ;;  %v400_v31 = vld [vmem:[%s11760_s29 + $0x24] sm:$0xf] }
  0x54   : > { %v1088_v37 = vor.u32 %v1087_v51, %v1083_v48  ;;  %v9782_v8 = vrot.slane %v12047_v11, 9  ;;  %v12088_v21 = vrot.slane %v2919_v27, 4  ;;  %v1093_v54 = vrot.slane %v1091_v55, 5 }
  0x55   : > { %v773_v22 = vsel %vm11721_vm3, %v16079_v39, %v772_v23  ;;  %v1079_v28 = vrot.slane %v1078_v10, 4  ;;  %v2460_v38 = vrot.slane %v12057_v52, 5  ;;  %1457 = vrot.lane.b32.xlu1 %v9700_v61, %s11666_s8  ;;  %v1096_v30 = vshrl.u32 %v12061_v47, 16 }
  0x56   : > { %774 = vst [vmem:[#allocation2 + $0x38] sm:$0x1] %v773_v22  ;;  %v1089_v19 = vrot.slane %v1088_v37, 4  ;;  %v1099_v33 = vshll.u32 %v12061_v47, 16  ;;  %v1105_v9 = vshll.u32 %v12063_v34, 16  ;;  %v1109_v58 = vshrl.u32 %v12063_v34, 16 }
  0x57   : > { %v1084_v40 = vsel %vm11790_vm13, %v1079_v28, %v1083_v48  ;;  %v1115_v63 = vshll.u32 %v12075_v7, 16  ;;  %v306_v46 = vsel %vm11721_vm3, 0, %v305_v25  ;;  %v1098_v36 = vrot.slane %v1096_v30, 4 }
  0x58   : > { %v1094_v53 = vsel %vm11790_vm13, %v1089_v19, %v1093_v54  ;;  %v1101_v59 = vrot.slane %v1099_v33, 5  ;;  %v1107_v26 = vrot.slane %v1105_v9, 5  ;;  %307 = vst [vmem:[#allocation2 + $0x3c] sm:$0x1] %v306_v46  ;;  %v2462_v60 = vrot.slane %v2460_v38, 4  ;;  %v11398_v46 = vld [vmem:[%s15973_s1 + $0x40] sm:$0xff]  }
  0x59   : > { %v9701_v18 = vcombine.low %v1084_v40, %v1094_v53  ;;  %v1111_v5 = vrot.slane %v1109_v58, 4  ;;  %v494_v3 = vshrl.u32 %v399_v6, 16  ;;  %v1117_v48 = vrot.slane %v1115_v63, 5  ;;  %v355_v9 = vld [vmem:[#allocation2 + $0x44] sm:$0x1]  ;;  %10244 = vmatprep.subr.bf16.mxu0 %v11398_v46 }
  0x5a   : > { %v1102_v27 = vor.u32 %v1101_v59, %v1098_v36  ;;  %v497_v51 = vshll.u32 %v399_v6, 16  ;;  %v502_v55 = vshrl.u32 %v400_v31, 16  ;;  %v505_v25 = vshll.u32 %v400_v31, 16 }
  0x5b   : > { %1459 = vrot.lane.b32.xlu1 %v9701_v18, %s11666_s8  ;;  %v1112_v29 = vor.u32 %v1111_v5, %v1107_v26  ;;  %v496_v23 = vrot.slane %v494_v3, 7  ;;  %v9718_v10 = vrot.slane %v12061_v47, 9  ;;  %v2915_v39 = vsel %vm11790_vm13, %v12080_v15, %v12054_v13 }
  0x5c   : > { %v12114_v37 = vsel %vm11753_vm9, %v9782_v8, %v2460_v38  ;;  %v1103_v6 = vrot.slane %v1102_v27, 4  ;;  %v12116_v28 = vrot.slane %v502_v55, 7  ;;  %v1562_v47 = vrot.slane %v12063_v34, 5  ;;  %v308_v34 = vld [vmem:[#allocation2 + $0x48] sm:$0x1] }
  0x5d   : > { %v2670_v61 = vld [vmem:[#allocation2 + $0x38] sm:$0x1]  ;;  %v1113_v33 = vrot.slane %v1112_v29, 4  ;;  %v499_v13 = vor.u32 %v497_v51, %v496_v23  ;;  %v500_v15 = vrot.slane %v496_v23, 4  ;;  %v12149_v27 = vld [vmem:[%s11760_s29 + $0x28] sm:$0xf] }
  0x5e   : > { %v12110_v22 = vld [vmem:[#allocation2 + $0x38] sm:$0x1]  ;;  %v2922_v54 = vshll.u32 %v2670_v61, 16  ;;  %v3385_v19 = vrot.slane %v2670_v61, 5  ;;  %v1108_v30 = vsel %vm11790_vm13, %v1103_v6, %v1107_v26  ;;  %v507_v58 = vor.u32 %v505_v25, %v12116_v28  ;;  %v12137_v26 = vld [vmem:[#allocation2 + $0x34] sm:$0xf] }
  0x5f   : > { %16080 = vst [vmem:[#allocation7_spill] sm:$0xff] %v12110_v22  ;;  %v2463_v31 = vrot.slane %v12110_v22, 5  ;;  %v775_v63 = vld [vmem:[#allocation2 + $0x3c] sm:$0xf]  ;;  %v1118_v59 = vsel %vm11790_vm13, %v1113_v33, %v1117_v48  ;;  %v12139_v18 = vld [vmem:[#allocation2 + $0x38] sm:$0x1] }
  0x60   : > { %v2924_v40 = vrot.slane %v2922_v54, 5  ;;  %v3386_v8 = vsel %vm11753_vm9, %v11942_v12, %v3385_v19  ;;  %v12135_v12 = vld [vmem:[#allocation2 + $0x30] sm:$0xf]  ;;  %v9702_v5 = vcombine.low %v1108_v30, %v1118_v59  ;;  %v508_v3 = vsel %vm11799_vm14, %v500_v15, %v507_v58  ;;  %v12170_v6 = vld [vmem:[%s11760_s29 + $0x2c] sm:$0xf] }
  0x61   : > { %v2464_v38 = vsel %vm11753_vm9, %v2462_v60, %v2463_v31  ;;  %v9861_v53 = vcombine.low %v12071_v20, %v3386_v8  ;;  %v776_v20 = vsel %vm11784_vm12, %v499_v13, %v775_v63  ;;  %778 = vst.msk [vmem:[#allocation2 + $0x40] sm:$0xf] %vm280_vm0, %v508_v3  ;;  %v1564_v51 = vrot.slane %v1562_v47, 4 }
  0x62   : > { %v9798_v36 = vcombine.low %v12114_v37, %v2464_v38  ;;  %v2925_v60 = vsel %vm11790_vm13, %v12088_v21, %v2924_v40  ;;  %777 = vst [vmem:[#allocation2 + $0x3c] sm:$0xf] %v776_v20  ;;  %v1563_v21 = vsel %vm11753_vm9, %v9718_v10, %v1562_v47  ;;  %v1565_v55 = vrot.slane %v12075_v7, 5  ;;  %1461 = vrot.lane.b32.xlu1 %v9702_v5, %s11666_s8 }
  0x63   : > { %v9829_v48 = vcombine.low %v2915_v39, %v2925_v60  ;;  %3544 = vst.msk [vmem:[#allocation3 + $0x40] sm:$0xff] %vm1003_vm15, %v9861_v53  ;;  %v356_v29 = vsel %vm11732_vm5, 0, %v355_v9  ;;  %v1120_v23 = vshrl.u32 %v12135_v12, 16  ;;  %v1123_v25 = vshll.u32 %v12135_v12, 16 }
  0x64   : > { %v1129_v61 = vshll.u32 %v12137_v26, 16  ;;  %v1566_v39 = vsel %vm11753_vm9, %v1564_v51, %v1565_v55  ;;  %357 = vst [vmem:[#allocation2 + $0x44] sm:$0x1] %v356_v29  ;;  %v1133_v10 = vshrl.u32 %v12137_v26, 16  ;;  %v1139_v7 = vshll.u32 %v12139_v18, 16 }
  0x65   : > { %3290 = vrot.lane.b32.xlu0 %v9829_v48, %s11667_s9  ;;  %v309_v37 = vsel %vm11721_vm3, 0, %v308_v34  ;;  %v9734_v54 = vcombine.low %v1563_v21, %v1566_v39  ;;  %v1122_v19 = vrot.slane %v1120_v23, 4  ;;  %v1125_v31 = vrot.slane %v1123_v25, 5 }
  0x66   : > { %v12172_v47 = vrot.slane %v1129_v61, 5  ;;  %310 = vst [vmem:[#allocation2 + $0x48] sm:$0x1] %v309_v37  ;;  %v16081_v30 = vshrl.u32 %v11913_v41, 16  ;;  %v1135_v15 = vrot.slane %v1133_v10, 4  ;;  %v511_v9 = vshrl.u32 %v12149_v27, 16 }
  0x67   : > { %v16082_v40 = vshrl.u32 %v11853_v62, 16  ;;  %v16083_v38 = vshll.u32 %v11853_v62, 16  ;;  %v12190_v63 = vrot.slane %v2019_v0, 4  ;;  %1705 = vrot.lane.b32.xlu1 %v9734_v54, %s11665_s30  ;;  %v9750_v41 = vcombine.low %v12047_v11, %v12057_v52 }
  0x68   : > { %v12176_v33 = vrot.slane %v16081_v30, 4  ;;  %v509_v34 = vrot.slane %v12116_v28, 4  ;;  %v1126_v46 = vor.u32 %v1125_v31, %v1122_v19  ;;  %v1141_v53 = vrot.slane %v1139_v7, 5  ;;  %v2672_v60 = vld [vmem:[#allocation2 + $0x40] sm:$0xf]  ;;  %v11400_v30 = vld [vmem:[%s15973_s1 + $0x48] sm:$0xff]  }
  0x69   : > { %v12182_v8 = vrot.slane %v16082_v40, 4  ;;  %v12186_v58 = vrot.slane %v16083_v38, 5  ;;  %16084 = vst [vmem:[#allocation8_spill] sm:$0xff] %v12190_v63  ;;  %2603 = vrot.lane.b32.xlu0 %v9798_v36, %s11666_s8  ;;  %v514_v59 = vshll.u32 %v12149_v27, 16  ;;  %v2671_v62 = vld [vmem:[#allocation2 + $0x3c] sm:$0xf]  ;;  %v1136_v5 = vor.u32 %v1135_v15, %v12172_v47 }
  0x6a   : > { %v12199_v4 = vrot.slane %v511_v9, 7  ;;  %v519_v0 = vshrl.u32 %v12170_v6, 16  ;;  %v9683_v3 = vcombine.low %v11764_v16, %v11766_v17  ;;  %v9814_v11 = vcombine.low %v2671_v62, %v2672_v60  ;;  %v12204_v28 = vld [vmem:[#allocation2 + $0x40] sm:$0xf]  ;;  %v12214_v25 = vld [vmem:[#allocation2 + $0x3c] sm:$0xf] }
  0x6b   : > { %v2927_v52 = vshrl.u32 %v2671_v62, 16  ;;  %v2930_v36 = vshll.u32 %v2671_v62, 16  ;;  %v2940_v20 = vshrl.u32 %v2672_v60, 16  ;;  %v779_v48 = vld [vmem:[#allocation2 + $0x44] sm:$0x1]  ;;  %v2936_v21 = vshll.u32 %v2672_v60, 16  ;;  %1898 = vrot.lane.b32.xlu1 %v9750_v41, %s11667_s9 }
  0x6c   : > { %v522_v27 = vshll.u32 %v12170_v6, 16  ;;  %v9719_v51 = vrot.slane %v12135_v12, 9  ;;  %v1569_v55 = vrot.slane %v12137_v26, 5  ;;  %1004 = vst.msk [vmem:[#allocation3] sm:$0xff] %vm1003_vm15, %v9683_v3  ;;  %v780_v16 = vsel %vm11721_vm3, %v509_v34, %v779_v48  ;;  %v11399_v26 = vld [vmem:[%s15973_s1] sm:$0xff]  }
  0x6d   : > { %2796 = vrot.lane.b32.xlu0 %v9814_v11, %s11665_s30  ;;  %v2929_v17 = vrot.slane %v2927_v52, 4  ;;  %v2932_v29 = vrot.slane %v2930_v36, 5  ;;  %v2942_v23 = vrot.slane %v2940_v20, 4  ;;  %v9846_v61 = vrot.slane %v2671_v62, 9  ;;  %781 = vst [vmem:[#allocation2 + $0x44] sm:$0x1] %v780_v16  ;;  %10245 = vmatpush3.bf16.msra.mxu0 %v11399_v26 }
  0x6e   : > { %v3389_v39 = vrot.slane %v2672_v60, 5  ;;  %v12216_v10 = vrot.slane %v2936_v21, 5  ;;  %v2467_v12 = vrot.slane %v12204_v28, 5  ;;  %v1127_v37 = vrot.slane %v1126_v46, 4  ;;  %v782_v19 = vld [vmem:[#allocation2 + $0x48] sm:$0xf]  ;;  %10246 = vmatprep.subr.bf16.mxu0 %v11400_v30 }
  0x6f   : > { %v2933_v7 = vor.u32 %v2932_v29, %v2929_v17  ;;  %v1137_v6 = vrot.slane %v1136_v5, 4  ;;  %v516_v54 = vor.u32 %v514_v59, %v12199_v4  ;;  %v358_v31 = vld [vmem:[#allocation2 + $0x50] sm:$0x1]  ;;  %v9783_v9 = vrot.slane %v12214_v25, 9  ;;  %v12229_v38 = vld [vmem:[#allocation2 + $0x3c] sm:$0xf] }
  0x70   : > { %v2943_v15 = vor.u32 %v2942_v23, %v12216_v10  ;;  %v1572_v40 = vrot.slane %v12139_v18, 5  ;;  %v1132_v41 = vsel %vm11790_vm13, %v1127_v37, %v12172_v47  ;;  %v517_v46 = vrot.slane %v12199_v4, 4  ;;  %v12243_v3 = vld [vmem:[#allocation2 + $0x40] sm:$0xf]  ;;  %v11401_v47 = vld [vmem:[%s15973_s1 + $0x8] sm:$0xff]   ;;  %v11402_v52 = vld [vmem:[%s15973_s1 + $0x50] sm:$0xff]  }
  0x71   : > { %v1142_v34 = vsel %vm11790_vm13, %v1137_v6, %v1141_v53  ;;  %v12237_v59 = vrot.slane %v519_v0, 7  ;;  %v3390_v62 = vsel %vm11753_vm9, %v9846_v61, %v3389_v39  ;;  %v3391_v60 = vrot.slane %v3389_v39, 4  ;;  %10247 = vmatpush3.bf16.msra.mxu0 %v11401_v47  ;;  %v11404_v37 = vld [vmem:[%s15973_s1 + $0x10] sm:$0xff]   ;;  %v11405_v30 = vld [vmem:[%s15973_s1 + $0x58] sm:$0xff]  }
  0x72   : > { %v9703_v18 = vcombine.low %v1132_v41, %v1142_v34  ;;  %v783_v5 = vsel %vm11784_vm12, %v516_v54, %v782_v19  ;;  %v2934_v53 = vrot.slane %v2933_v7, 4  ;;  %v2469_v11 = vrot.slane %v2467_v12, 4  ;;  %10248 = vmatprep.subr.bf16.mxu0 %v11402_v52 }
  0x73   : > { %v524_v4 = vor.u32 %v522_v27, %v12237_v59  ;;  %784 = vst [vmem:[#allocation2 + $0x48] sm:$0xf] %v783_v5  ;;  %v1571_v0 = vrot.slane %v1569_v55, 4  ;;  %v1570_v36 = vsel %vm11753_vm9, %v9719_v51, %v1569_v55  ;;  %v359_v20 = vsel %vm11732_vm5, 0, %v358_v31 }
  0x74   : > { %1463 = vrot.lane.b32.xlu1 %v9703_v18, %s11666_s8  ;;  %v1144_v48 = vshrl.u32 %v12229_v38, 16  ;;  %v1147_v21 = vshll.u32 %v12229_v38, 16  ;;  %v2673_v27 = vld [vmem:[#allocation2 + $0x44] sm:$0x1]  ;;  %v2944_v16 = vrot.slane %v2943_v15, 4  ;;  %v526_v23 = vrot.slane %v12237_v59, 4 }
  0x75   : > { %v12259_v17 = vld [vmem:[#allocation2 + $0x44] sm:$0x1]  ;;  %v525_v29 = vsel %vm11799_vm14, %v517_v46, %v524_v4  ;;  %v1573_v51 = vsel %vm11753_vm9, %v1571_v0, %v1572_v40  ;;  %360 = vst [vmem:[#allocation2 + $0x50] sm:$0x1] %v359_v20  ;;  %v2946_v55 = vshll.u32 %v2673_v27, 16  ;;  %v3392_v61 = vrot.slane %v2673_v27, 5  ;;  %10249 = vmatpush3.bf16.msra.mxu0 %v11404_v37 }
  0x76   : > { %16085 = vst [vmem:[#allocation9_spill] sm:$0xff] %v12259_v17  ;;  %v2468_v39 = vsel %vm11753_vm9, %v9783_v9, %v2467_v12  ;;  %v2470_v26 = vrot.slane %v12259_v17, 5  ;;  %785 = vst.msk [vmem:[#allocation2 + $0x4c] sm:$0xf] %vm280_vm0, %v525_v29  ;;  %v12270_v7 = vld [vmem:[#allocation2 + $0x44] sm:$0x1]  ;;  %v9735_v6 = vcombine.low %v1570_v36, %v1573_v51  ;;  %v2939_v12 = vsel %vm11790_vm13, %v2934_v53, %v12216_v10 }
  0x77   : > { %v1146_v54 = vrot.slane %v1144_v48, 4  ;;  %v1149_v19 = vrot.slane %v1147_v21, 5  ;;  %v1153_v31 = vshll.u32 %v12243_v3, 16  ;;  %v2948_v15 = vrot.slane %v2946_v55, 5  ;;  %10250 = vmatprep.subr.bf16.mxu0 %v11405_v30 }
  0x78   : > { %v3393_v9 = vsel %vm11753_vm9, %v3391_v60, %v3392_v61  ;;  %v1157_v40 = vshrl.u32 %v12243_v3, 16  ;;  %1707 = vrot.lane.b32.xlu1 %v9735_v6, %s11665_s30  ;;  %v9751_v34 = vcombine.low %v12214_v25, %v12204_v28  ;;  %v2471_v10 = vsel %vm11753_vm9, %v2469_v11, %v2470_v26 }
  0x79   : > { %v9862_v41 = vcombine.low %v3390_v62, %v3393_v9  ;;  %v1150_v46 = vor.u32 %v1149_v19, %v1146_v54  ;;  %v1155_v59 = vrot.slane %v1153_v31, 5  ;;  %v2949_v18 = vsel %vm11790_vm13, %v2944_v16, %v2948_v15  ;;  %v311_v19 = vld [vmem:[#allocation2 + $0x54] sm:$0x1]  ;;  %v403_v31 = vld [vmem:[%s11760_s29 + $0x30] sm:$0xf] }
  0x7a   : > { %v2674_v5 = vld [vmem:[#allocation2 + $0x48] sm:$0xf]  ;;  %v1159_v60 = vrot.slane %v1157_v40, 4  ;;  %v1163_v47 = vshll.u32 %v12270_v7, 16  ;;  %v9830_v53 = vcombine.low %v2939_v12, %v2949_v18  ;;  %v9799_v11 = vcombine.low %v2468_v39, %v2471_v10  ;;  %v404_v40 = vld [vmem:[%s11760_s29 + $0x34] sm:$0xf] }
  0x7b   : > { %3545 = vst.msk [vmem:[#allocation3 + $0x58] sm:$0xff] %vm1003_vm15, %v9862_v41  ;;  %v2951_v4 = vshrl.u32 %v2674_v5, 16  ;;  %v2954_v28 = vshll.u32 %v2674_v5, 16  ;;  %v12295_v25 = vld [vmem:[#allocation2 + $0x48] sm:$0xf]  ;;  %v9847_v0 = vrot.slane %v2674_v5, 9 }
  0x7c   : > { %v786_v52 = vld [vmem:[#allocation2 + $0x50] sm:$0x1]  ;;  %v1151_v36 = vrot.slane %v1150_v46, 4  ;;  %v1160_v20 = vor.u32 %v1159_v60, %v1155_v59  ;;  %v1165_v48 = vrot.slane %v1163_v47, 5  ;;  %3292 = vrot.lane.b32.xlu0 %v9830_v53, %s11667_s9  ;;  %1900 = vrot.lane.b32.xlu1 %v9751_v34, %s11667_s9  ;;  %v9784_v15 = vrot.slane %v12295_v25, 9  ;;  %v11406_v18 = vld [vmem:[%s15973_s1 + $0x18] sm:$0xff]  }
  0x7d   : > { %v2675_v21 = vld [vmem:[#allocation2 + $0x4c] sm:$0xf]  ;;  %v787_v27 = vsel %vm11721_vm3, %v526_v23, %v786_v52  ;;  %v2953_v16 = vrot.slane %v2951_v4, 4  ;;  %v2956_v29 = vrot.slane %v2954_v28, 5  ;;  %v312_v47 = vsel %vm11721_vm3, 0, %v311_v19  ;;  %10251 = vmatpush3.bf16.msra.mxu0 %v11406_v18 }
  0x7e   : > { %v12301_v51 = vld [vmem:[#allocation2 + $0x4c] sm:$0xf]  ;;  %v2964_v26 = vshrl.u32 %v2675_v21, 16  ;;  %788 = vst [vmem:[#allocation2 + $0x50] sm:$0x1] %v787_v27  ;;  %v2960_v37 = vshll.u32 %v2675_v21, 16  ;;  %v1156_v54 = vsel %vm11790_vm13, %v1151_v36, %v1155_v59  ;;  %v9815_v41 = vcombine.low %v2674_v5, %v2675_v21 }
  0x7f   : > { %v3396_v39 = vrot.slane %v2675_v21, 5  ;;  %v2957_v6 = vor.u32 %v2956_v29, %v2953_v16  ;;  %v1161_v23 = vrot.slane %v1160_v20, 4  ;;  %v2474_v9 = vrot.slane %v12301_v51, 5  ;;  %v11407_v5 = vld [vmem:[%s15973_s1 + $0x60] sm:$0xff]   ;;  %313 = vst [vmem:[#allocation2 + $0x54] sm:$0x1] %v312_v47 }
  0x80   : > { %v12308_v30 = vrot.slane %v2960_v37, 5  ;;  %v2966_v12 = vrot.slane %v2964_v26, 4  ;;  %2605 = vrot.lane.b32.xlu0 %v9799_v11, %s11666_s8  ;;  %v528_v53 = vshrl.u32 %v403_v31, 16  ;;  %v531_v28 = vshll.u32 %v403_v31, 16  ;;  %10252 = vmatprep.subr.bf16.mxu0 %v11407_v5  ;;  %v12348_v31 = vld [vmem:[#allocation2 + $0x4c] sm:$0xf] }
  0x81   : > { %v12316_v34 = vsel %vm11753_vm9, %v9847_v0, %v3396_v39  ;;  %v2958_v46 = vrot.slane %v2957_v6, 4  ;;  %v1166_v59 = vsel %vm11790_vm13, %v1161_v23, %v1165_v48  ;;  %v3398_v4 = vrot.slane %v3396_v39, 4  ;;  %v361_v39 = vld [vmem:[#allocation2 + $0x5c] sm:$0x1]  ;;  %v314_v18 = vld [vmem:[#allocation2 + $0x60] sm:$0x1] }
  0x82   : > { %v2967_v10 = vor.u32 %v2966_v12, %v12308_v30  ;;  %v9704_v60 = vcombine.low %v1156_v54, %v1166_v59  ;;  %v536_v0 = vshrl.u32 %v404_v40, 16  ;;  %v539_v52 = vshll.u32 %v404_v40, 16  ;;  %v11409_v40 = vld [vmem:[%s15973_s1 + $0x68] sm:$0xff]  }
  0x83   : > { %v2476_v20 = vrot.slane %v2474_v9, 4  ;;  %v530_v48 = vrot.slane %v528_v53, 7  ;;  %v9720_v11 = vrot.slane %v12229_v38, 9  ;;  %v2963_v27 = vsel %vm11790_vm13, %v2958_v46, %v12308_v30  ;;  %v12344_v38 = vld [vmem:[#allocation2 + $0x48] sm:$0xf] }
  0x84   : > { %v2968_v36 = vrot.slane %v2967_v10, 4  ;;  %1465 = vrot.lane.b32.xlu1 %v9704_v60, %s11666_s8  ;;  %2798 = vrot.lane.b32.xlu0 %v9815_v41, %s11665_s30  ;;  %v12339_v29 = vsel %vm11753_vm9, %v9784_v15, %v2474_v9  ;;  %v12341_v26 = vrot.slane %v536_v0, 7  ;;  %v1576_v37 = vrot.slane %v12243_v3, 5  ;;  %v11408_v9 = vld [vmem:[%s15973_s1 + $0x20] sm:$0xff]   ;;  %v405_v10 = vld [vmem:[%s11760_s29 + $0x38] sm:$0xf] }
  0x85   : > { %v2676_v21 = vld [vmem:[#allocation2 + $0x50] sm:$0x1]  ;;  %v1579_v19 = vrot.slane %v12270_v7, 5  ;;  %v533_v30 = vor.u32 %v531_v28, %v530_v48  ;;  %v534_v12 = vrot.slane %v530_v48, 4  ;;  %v9752_v3 = vcombine.low %v12295_v25, %v12301_v51  ;;  %v406_v0 = vld [vmem:[%s11760_s29 + $0x3c] sm:$0xf]  ;;  %10253 = vmatpush3.bf16.msra.mxu0 %v11408_v9 }
  0x86   : > { %v12335_v16 = vld [vmem:[#allocation2 + $0x50] sm:$0x1]  ;;  %v2970_v6 = vshll.u32 %v2676_v21, 16  ;;  %v3399_v54 = vrot.slane %v2676_v21, 5  ;;  %v541_v15 = vor.u32 %v539_v52, %v12341_v26  ;;  %v1577_v59 = vsel %vm11753_vm9, %v9720_v11, %v1576_v37  ;;  %v789_v52 = vld [vmem:[#allocation2 + $0x54] sm:$0xf]  ;;  %10254 = vmatprep.subr.bf16.mxu0 %v11409_v40 }
  0x87   : > { %16086 = vst [vmem:[#allocation10_spill] sm:$0xff] %v12335_v16  ;;  %v2477_v23 = vrot.slane %v12335_v16, 5  ;;  %v1578_v5 = vrot.slane %v1576_v37, 4  ;;  %v12370_v28 = vld [vmem:[#allocation2 + $0x50] sm:$0x1]  ;;  %v1171_v48 = vshll.u32 %v12344_v38, 16  ;;  %v790_v21 = vsel %vm11784_vm12, %v533_v30, %v789_v52 }
  0x88   : > { %v2972_v41 = vrot.slane %v2970_v6, 5  ;;  %v3400_v7 = vsel %vm11753_vm9, %v3398_v4, %v3399_v54  ;;  %v542_v53 = vsel %vm11799_vm14, %v534_v12, %v541_v15  ;;  %791 = vst [vmem:[#allocation2 + $0x54] sm:$0xf] %v790_v21  ;;  %v1181_v54 = vshrl.u32 %v12348_v31, 16  ;;  %v364_v25 = vld [vmem:[#allocation2 + $0x68] sm:$0x1] }
  0x89   : > { %v2478_v46 = vsel %vm11753_vm9, %v2476_v20, %v2477_v23  ;;  %v9863_v60 = vcombine.low %v12316_v34, %v3400_v7  ;;  %792 = vst.msk [vmem:[#allocation2 + $0x58] sm:$0xf] %vm280_vm0, %v542_v53  ;;  %v362_v20 = vsel %vm11732_vm5, 0, %v361_v39  ;;  %v1168_v34 = vshrl.u32 %v12344_v38, 16 }
  0x8a   : > { %v9800_v47 = vcombine.low %v12339_v29, %v2478_v46  ;;  %v2973_v4 = vsel %vm11790_vm13, %v2968_v36, %v2972_v41  ;;  %v1580_v36 = vsel %vm11753_vm9, %v1578_v5, %v1579_v19  ;;  %363 = vst [vmem:[#allocation2 + $0x5c] sm:$0x1] %v362_v20  ;;  %v1177_v29 = vshll.u32 %v12348_v31, 16 }
  0x8b   : > { %v9831_v11 = vcombine.low %v2963_v27, %v2973_v4  ;;  %3546 = vst.msk [vmem:[#allocation3 + $0x70] sm:$0xff] %vm1003_vm15, %v9863_v60  ;;  %v9736_v37 = vcombine.low %v1577_v59, %v1580_v36  ;;  %v1170_v39 = vrot.slane %v1168_v34, 4  ;;  %v1173_v6 = vrot.slane %v1171_v48, 5  ;;  %v11411_v60 = vld [vmem:[%s15973_s1 + $0x28] sm:$0xff]  }
  0x8c   : > { %v1179_v27 = vrot.slane %v1177_v29, 5  ;;  %v1187_v23 = vshll.u32 %v12370_v28, 16  ;;  %v315_v30 = vsel %vm11721_vm3, 0, %v314_v18  ;;  %v545_v12 = vshrl.u32 %v405_v10, 16  ;;  %v11412_v18 = vld [vmem:[%s15973_s1 + $0x70] sm:$0xff]   ;;  %10255 = vmatpush3.bf16.msra.mxu0 %v11411_v60 }
  0x8d   : > { %3294 = vrot.lane.b32.xlu0 %v9831_v11, %s11667_s9  ;;  %1709 = vrot.lane.b32.xlu1 %v9736_v37, %s11665_s30  ;;  %v1174_v19 = vor.u32 %v1173_v6, %v1170_v39  ;;  %v1183_v15 = vrot.slane %v1181_v54, 4  ;;  %316 = vst [vmem:[#allocation2 + $0x60] sm:$0x1] %v315_v30  ;;  %v548_v9 = vshll.u32 %v405_v10, 16  ;;  %v553_v40 = vshrl.u32 %v406_v0, 16 }
  0x8e   : > { %v543_v7 = vrot.slane %v12341_v26, 4  ;;  %v547_v46 = vrot.slane %v545_v12, 7  ;;  %v556_v59 = vshll.u32 %v406_v0, 16  ;;  %v1189_v5 = vrot.slane %v1187_v23, 5  ;;  %10256 = vmatprep.subr.bf16.mxu0 %v11412_v18  ;;  %v16106_v2 = vld [vmem:[#allocation10_spill] sm:$0xff] }
  0x8f   : > { %v1184_v53 = vor.u32 %v1183_v15, %v1179_v27  ;;  %v12400_v4 = vrot.slane %v553_v40, 7  ;;  %v9721_v10 = vrot.slane %v12344_v38, 9  ;;  %v1175_v0 = vrot.slane %v1174_v19, 4  ;;  %v2677_v38 = vld [vmem:[#allocation2 + $0x54] sm:$0xf] }
  0x90   : > { %v2678_v52 = vld [vmem:[#allocation2 + $0x58] sm:$0xf]  ;;  %v1583_v20 = vrot.slane %v12348_v31, 5  ;;  %v550_v21 = vor.u32 %v548_v9, %v547_v46  ;;  %v551_v36 = vrot.slane %v547_v46, 4  ;;  %v12413_v29 = vld [vmem:[#allocation2 + $0x54] sm:$0xf] }
  0x91   : > { %2607 = vrot.lane.b32.xlu0 %v9800_v47, %s11666_s8  ;;  %v12404_v26 = vld [vmem:[#allocation2 + $0x58] sm:$0xf]  ;;  %v2988_v34 = vshrl.u32 %v2678_v52, 16  ;;  %v793_v48 = vld [vmem:[#allocation2 + $0x5c] sm:$0x1]  ;;  %v2984_v11 = vshll.u32 %v2678_v52, 16  ;;  %1902 = vrot.lane.b32.xlu1 %v9752_v3, %s11667_s9  ;;  %v558_v31 = vor.u32 %v556_v59, %v12400_v4  ;;  %v9816_v6 = vcombine.low %v2677_v38, %v2678_v52 }
  0x92   : > { %v794_v47 = vsel %vm11721_vm3, %v543_v7, %v793_v48  ;;  %v1185_v37 = vrot.slane %v1184_v53, 4  ;;  %v1586_v39 = vrot.slane %v12370_v28, 5  ;;  %v2975_v54 = vshrl.u32 %v2677_v38, 16  ;;  %v12424_v46 = vld [vmem:[#allocation2 + $0x54] sm:$0xf] }
  0x93   : > { %v2978_v23 = vshll.u32 %v2677_v38, 16  ;;  %v3403_v30 = vrot.slane %v2678_v52, 5  ;;  %795 = vst [vmem:[#allocation2 + $0x5c] sm:$0x1] %v794_v47  ;;  %v9848_v51 = vrot.slane %v2677_v38, 9  ;;  %v12417_v3 = vrot.slane %v2984_v11, 5 }
  0x94   : > { %v2990_v12 = vrot.slane %v2988_v34, 4  ;;  %v1180_v19 = vsel %vm11790_vm13, %v1175_v0, %v1179_v27  ;;  %v796_v15 = vld [vmem:[#allocation2 + $0x60] sm:$0xf]  ;;  %v2977_v9 = vrot.slane %v2975_v54, 4  ;;  %v9785_v28 = vrot.slane %v12413_v29, 9 }
  0x95   : > { %2800 = vrot.lane.b32.xlu0 %v9816_v6, %s11665_s30  ;;  %v2980_v40 = vrot.slane %v2978_v23, 5  ;;  %v2481_v7 = vrot.slane %v12404_v26, 5  ;;  %v1190_v59 = vsel %vm11790_vm13, %v1185_v37, %v1189_v5  ;;  %v559_v60 = vsel %vm11799_vm14, %v551_v36, %v558_v31  ;;  %v12441_v38 = vld [vmem:[#allocation2 + $0x58] sm:$0xf]  ;;  %v11413_v37 = vld [vmem:[%s15973_s1 + $0x30] sm:$0xff]  }
  0x96   : > { %v2991_v27 = vor.u32 %v2990_v12, %v12417_v3  ;;  %v9705_v53 = vcombine.low %v1180_v19, %v1190_v59  ;;  %v797_v52 = vsel %vm11784_vm12, %v550_v21, %v796_v15  ;;  %799 = vst.msk [vmem:[#allocation2 + $0x64] sm:$0xf] %vm280_vm0, %v559_v60  ;;  %v3404_v0 = vsel %vm11753_vm9, %v9848_v51, %v3403_v30 }
  0x97   : > { %v2981_v18 = vor.u32 %v2980_v40, %v2977_v9  ;;  %v3405_v34 = vrot.slane %v3403_v30, 4  ;;  %798 = vst [vmem:[#allocation2 + $0x60] sm:$0xf] %v797_v52  ;;  %v1585_v48 = vrot.slane %v1583_v20, 4  ;;  %v365_v5 = vsel %vm11732_vm5, 0, %v364_v25  ;;  %10257 = vmatpush3.bf16.msra.mxu0 %v11413_v37  ;;  %v11414_v9 = vld [vmem:[%s15973_s1 + $0x78] sm:$0xff]   ;;  %v12489_v37 = vpop.permute.xlu1 %1699 }
  0x98   : > { %1467 = vrot.lane.b32.xlu1 %v9705_v53, %s11666_s8  ;;  %v1584_v36 = vsel %vm11753_vm9, %v9721_v10, %v1583_v20  ;;  %366 = vst [vmem:[#allocation2 + $0x68] sm:$0x1] %v365_v5  ;;  %v1192_v21 = vshrl.u32 %v12424_v46, 16  ;;  %v1195_v47 = vshll.u32 %v12424_v46, 16  ;;  %v2483_v54 = vrot.slane %v2481_v7, 4  ;;  %10258 = vmatprep.subr.bf16.mxu0 %v11414_v9  ;;  %v11415_v53 = vld [vmem:[%s15973_s1 + $0x38] sm:$0xff]  }
  0x99   : > { %v2982_v11 = vrot.slane %v2981_v18, 4  ;;  %v560_v23 = vrot.slane %v12400_v4, 4  ;;  %v1587_v10 = vsel %vm11753_vm9, %v1585_v48, %v1586_v39  ;;  %v11542_v20 = vld [vmem:[#allocation2 + $0xc] sm:$0xf]  ;;  %v11543_v30 = vld [vmem:[#allocation2 + $0x10] sm:$0xf]  ;;  %v12455_v15 = vsel %vm11753_vm9, %v9785_v28, %v2481_v7 }
  0x9a   : > { %v2679_v31 = vld [vmem:[#allocation2 + $0x5c] sm:$0x1]  ;;  %v9684_v25 = vcombine.low %v11542_v20, %v11543_v30  ;;  %v2992_v51 = vrot.slane %v2991_v27, 4  ;;  %v9737_v40 = vcombine.low %v1584_v36, %v1587_v10  ;;  %v1194_v59 = vrot.slane %v1192_v21, 4  ;;  %v317_v9 = vld [vmem:[#allocation2 + $0x6c] sm:$0x1] }
  0x9b   : > { %v12448_v6 = vld [vmem:[#allocation2 + $0x5c] sm:$0x1]  ;;  %v2994_v12 = vshll.u32 %v2679_v31, 16  ;;  %v3406_v19 = vrot.slane %v2679_v31, 5  ;;  %v1197_v39 = vrot.slane %v1195_v47, 5  ;;  %v2987_v60 = vsel %vm11790_vm13, %v2982_v11, %v12417_v3  ;;  %10259 = vmatpush3.bf16.msra.mxu0 %v11415_v53 }
  0x9c   : > { %16087 = vst [vmem:[#allocation11_spill] sm:$0xff] %v12448_v6  ;;  %v2484_v4 = vrot.slane %v12448_v6, 5  ;;  %1005 = vst.msk [vmem:[#allocation3 + $0x18] sm:$0xff] %vm1003_vm15, %v9684_v25  ;;  %v9753_v7 = vcombine.low %v12413_v29, %v12404_v26  ;;  %v12469_v27 = vld [vmem:[#allocation2 + $0x5c] sm:$0x1]  ;;  %1711 = vrot.lane.b32.xlu1 %v9737_v40, %s11665_s30  ;;  %v1205_v26 = vshrl.u32 %v12441_v38, 16 }
  0x9d   : > { %v2996_v18 = vrot.slane %v2994_v12, 5  ;;  %v3407_v28 = vsel %vm11753_vm9, %v3405_v34, %v3406_v19  ;;  %v12476_v5 = vld [vmem:[#allocation2 + $0x64] sm:$0xf]  ;;  %v1201_v34 = vshll.u32 %v12441_v38, 16  ;;  %v1198_v47 = vor.u32 %v1197_v39, %v1194_v59 }
  0x9e   : > { %v9864_v52 = vcombine.low %v3404_v0, %v3407_v28  ;;  %v2485_v48 = vsel %vm11753_vm9, %v2483_v54, %v2484_v4  ;;  %v12479_v3 = vld [vmem:[#allocation2 + $0x64] sm:$0xf]  ;;  %v2680_v11 = vld [vmem:[#allocation2 + $0x60] sm:$0xf]  ;;  %v3012_v36 = vshrl.u32 %v12476_v5, 16  ;;  %v3410_v0 = vrot.slane %v12476_v5, 5 }
  0x9f   : > { %v2997_v29 = vsel %vm11790_vm13, %v2992_v51, %v2996_v18  ;;  %v12487_v21 = vld [vmem:[#allocation2 + $0x60] sm:$0xf]  ;;  %v2999_v54 = vshrl.u32 %v2680_v11, 16  ;;  %v3002_v10 = vshll.u32 %v2680_v11, 16  ;;  %v800_v20 = vld [vmem:[#allocation2 + $0x68] sm:$0x1]  ;;  %v9801_v25 = vcombine.low %v12455_v15, %v2485_v48 }
  0xa0   : > { %v9832_v31 = vcombine.low %v2987_v60, %v2997_v29  ;;  %3547 = vst.msk [vmem:[#allocation3 + $0x88] sm:$0xff] %vm1003_vm15, %v9864_v52  ;;  %v1211_v30 = vshll.u32 %v12469_v27, 16  ;;  %v9849_v51 = vrot.slane %v2680_v11, 9  ;;  %v801_v12 = vsel %vm11721_vm3, %v560_v23, %v800_v20  ;;  %v407_v4 = vld [vmem:[%s11760_s29 + $0x40] sm:$0xf]  ;;  %1904 = vrot.lane.b32.xlu1 %v9753_v7, %s11667_s9 }
  0xa1   : > { %v3008_v19 = vshll.u32 %v12476_v5, 16  ;;  %802 = vst [vmem:[#allocation2 + $0x68] sm:$0x1] %v801_v12  ;;  %v3001_v40 = vrot.slane %v2999_v54, 4  ;;  %v3004_v59 = vrot.slane %v3002_v10, 5  ;;  %v3014_v39 = vrot.slane %v3012_v36, 4 }
  0xa2   : > { %3296 = vrot.lane.b32.xlu0 %v9832_v31, %s11667_s9  ;;  %v9786_v60 = vrot.slane %v12487_v21, 9  ;;  %v408_v18 = vld [vmem:[%s11760_s29 + $0x44] sm:$0xf]  ;;  %v9817_v15 = vcombine.low %v2680_v11, %v12476_v5  ;;  %v3412_v28 = vrot.slane %v3410_v0, 4  ;;  %v2488_v23 = vrot.slane %v12479_v3, 5 }
  0xa3   : > { %v12503_v53 = vrot.slane %v3008_v19, 5  ;;  %v3005_v52 = vor.u32 %v3004_v59, %v3001_v40  ;;  %v1199_v48 = vrot.slane %v1198_v47, 4  ;;  %v1203_v29 = vrot.slane %v1201_v34, 5 }
  0xa4   : > { %v1207_v31 = vrot.slane %v1205_v26, 4  ;;  %v3411_v54 = vsel %vm11753_vm9, %v9849_v51, %v3410_v0  ;;  %v1213_v7 = vrot.slane %v1211_v30, 5  ;;  %v318_v10 = vsel %vm11721_vm3, 0, %v317_v9 }
  0xa5   : > { %v3015_v36 = vor.u32 %v3014_v39, %v12503_v53  ;;  %v12511_v20 = vpop.permute.xlu1 %2790  ;;  %v3006_v5 = vrot.slane %v3005_v52, 4  ;;  %v12516_v11 = vsel %vm11753_vm9, %v9786_v60, %v2488_v23  ;;  %319 = vst [vmem:[#allocation2 + $0x6c] sm:$0x1] %v318_v10  ;;  %v562_v26 = vshrl.u32 %v407_v4, 16  ;;  %v11545_v52 = vld [vmem:[#allocation2 + $0x1c] sm:$0xf] }
  0xa6   : > { %2609 = vrot.lane.b32.xlu0 %v9801_v25, %s11666_s8  ;;  %v1208_v34 = vor.u32 %v1207_v31, %v1203_v29  ;;  %v2490_v47 = vrot.slane %v2488_v23, 4  ;;  %v565_v0 = vshll.u32 %v407_v4, 16  ;;  %v570_v51 = vshrl.u32 %v408_v18, 16  ;;  %v11544_v4 = vld [vmem:[#allocation2 + $0x18] sm:$0xf] }
  0xa7   : > { %v573_v12 = vshll.u32 %v408_v18, 16  ;;  %v3016_v30 = vrot.slane %v3015_v36, 4  ;;  %v1204_v19 = vsel %vm11790_vm13, %v1199_v48, %v1203_v29  ;;  %v564_v40 = vrot.slane %v562_v26, 7  ;;  %v367_v10 = vld [vmem:[#allocation2 + $0x74] sm:$0x1] }
  0xa8   : > { %v1209_v9 = vrot.slane %v1208_v34, 4  ;;  %v2682_v59 = vld [vmem:[#allocation2 + $0x68] sm:$0x1]  ;;  %v3011_v25 = vsel %vm11790_vm13, %v3006_v5, %v12503_v53  ;;  %v12525_v60 = vrot.slane %v570_v51, 7  ;;  %v9722_v23 = vrot.slane %v12424_v46, 9 }
  0xa9   : > { %v12523_v39 = vld [vmem:[#allocation2 + $0x68] sm:$0x1]  ;;  %v9685_v18 = vcombine.low %v11544_v4, %v11545_v52  ;;  %v3018_v31 = vshll.u32 %v2682_v59, 16  ;;  %v3413_v48 = vrot.slane %v2682_v59, 5  ;;  %v1590_v36 = vrot.slane %v12441_v38, 5 }
  0xaa   : > { %16088 = vst [vmem:[#allocation12_spill] sm:$0xff] %v12523_v39  ;;  %2802 = vrot.lane.b32.xlu0 %v9817_v15, %s11665_s30  ;;  %v2491_v29 = vrot.slane %v12523_v39, 5  ;;  %v12531_v53 = vld [vmem:[#allocation2 + $0x60] sm:$0xf]  ;;  %v1214_v5 = vsel %vm11790_vm13, %v1209_v9, %v1213_v7  ;;  %v567_v34 = vor.u32 %v565_v0, %v564_v40  ;;  %v568_v46 = vrot.slane %v564_v40, 4 }
  0xab   : > { %v575_v26 = vor.u32 %v573_v12, %v12525_v60  ;;  %v12536_v51 = vld [vmem:[#allocation2 + $0x64] sm:$0xf]  ;;  %v12538_v15 = vpop.permute.xlu1 %1892  ;;  %1006 = vst.msk [vmem:[#allocation3 + $0x30] sm:$0xff] %vm1003_vm15, %v9685_v18  ;;  %v3020_v59 = vrot.slane %v3018_v31, 5  ;;  %v3414_v38 = vsel %vm11753_vm9, %v3412_v28, %v3413_v48  ;;  %v9706_v52 = vcombine.low %v1204_v19, %v1214_v5  ;;  %v320_v7 = vld [vmem:[#allocation2 + $0x78] sm:$0x1] }
  0xac   : > { %v2492_v4 = vsel %vm11753_vm9, %v2490_v47, %v2491_v29  ;;  %v12546_v0 = vld [vmem:[%s11760_s29 + $0x48] sm:$0xf]  ;;  %v9865_v9 = vcombine.low %v3411_v54, %v3414_v38  ;;  %v803_v41 = vld [vmem:[#allocation2 + $0x6c] sm:$0xf]  ;;  %v1591_v54 = vsel %vm11753_vm9, %v9722_v23, %v1590_v36  ;;  %v1593_v48 = vrot.slane %v12469_v27, 5 }
  0xad   : > { %v9802_v12 = vcombine.low %v12516_v11, %v2492_v4  ;;  %v576_v40 = vsel %vm11799_vm14, %v568_v46, %v575_v26  ;;  %v12551_v18 = vld [vmem:[#allocation2 + $0x68] sm:$0x1]  ;;  %v3021_v28 = vsel %vm11790_vm13, %v3016_v30, %v3020_v59  ;;  %1469 = vrot.lane.b32.xlu1 %v9706_v52, %s11666_s8  ;;  %v804_v47 = vsel %vm11784_vm12, %v567_v34, %v803_v41  ;;  %v12562_v19 = vld [vmem:[%s11760_s29 + $0x4c] sm:$0xf] }
  0xae   : > { %806 = vst.msk [vmem:[#allocation2 + $0x70] sm:$0xf] %vm280_vm0, %v576_v40  ;;  %v1592_v11 = vrot.slane %v1590_v36, 4  ;;  %v9833_v31 = vcombine.low %v3011_v25, %v3021_v28  ;;  %805 = vst [vmem:[#allocation2 + $0x6c] sm:$0xf] %v804_v47  ;;  %v368_v30 = vsel %vm11732_vm5, 0, %v367_v10 }
  0xaf   : > { %3548 = vst.msk [vmem:[#allocation3 + $0xa0] sm:$0xff] %vm1003_vm15, %v9865_v9  ;;  %v1216_v29 = vshrl.u32 %v12531_v53, 16  ;;  %369 = vst [vmem:[#allocation2 + $0x74] sm:$0x1] %v368_v30  ;;  %v1219_v41 = vshll.u32 %v12531_v53, 16  ;;  %v1225_v5 = vshll.u32 %v12536_v51, 16  ;;  %v12579_v46 = vpop.permute.xlu1 %1894 }
  0xb0   : > { %v1229_v23 = vshrl.u32 %v12536_v51, 16  ;;  %v1235_v36 = vshll.u32 %v12551_v18, 16  ;;  %3298 = vrot.lane.b32.xlu0 %v9833_v31, %s11667_s9  ;;  %v1594_v25 = vsel %vm11753_vm9, %v1592_v11, %v1593_v48  ;;  %v321_v10 = vsel %vm11721_vm3, 0, %v320_v7  ;;  %v12591_v11 = vpop.permute.xlu0 %1455 }
  0xb1   : > { %v1218_v27 = vrot.slane %v1216_v29, 4  ;;  %v579_v34 = vshrl.u32 %v12546_v0, 16  ;;  %v9738_v26 = vcombine.low %v1591_v54, %v1594_v25  ;;  %v1221_v59 = vrot.slane %v1219_v41, 5  ;;  %322 = vst [vmem:[#allocation2 + $0x78] sm:$0x1] %v321_v10 }
  0xb2   : > { %v12581_v38 = vrot.slane %v1225_v5, 5  ;;  %v1231_v4 = vrot.slane %v1229_v23, 4  ;;  %v577_v40 = vrot.slane %v12525_v60, 4  ;;  %v587_v28 = vshrl.u32 %v12562_v19, 16  ;;  %v11546_v41 = vld [vmem:[#allocation2 + $0x24] sm:$0xf] }
  0xb3   : > { %1713 = vrot.lane.b32.xlu1 %v9738_v26, %s11665_s30  ;;  %v9754_v7 = vcombine.low %v12487_v21, %v12479_v3  ;;  %v581_v47 = vrot.slane %v579_v34, 7  ;;  %v582_v54 = vshll.u32 %v12546_v0, 16  ;;  %v1222_v30 = vor.u32 %v1221_v59, %v1218_v27  ;;  %v11547_v5 = vld [vmem:[#allocation2 + $0x28] sm:$0xf] }
  0xb4   : > { %2611 = vrot.lane.b32.xlu0 %v9802_v12, %s11666_s8  ;;  %v1232_v60 = vor.u32 %v1231_v4, %v12581_v38  ;;  %v1237_v29 = vrot.slane %v1235_v36, 5  ;;  %v9686_v23 = vcombine.low %v11546_v41, %v11547_v5  ;;  %v12601_v0 = vrot.slane %v587_v28, 7  ;;  %v12606_v36 = vpop.permute.xlu1 %1896 }
  0xb5   : > { %v12594_v31 = vld [vmem:[#allocation2 + $0x70] sm:$0xf]  ;;  %v2683_v25 = vld [vmem:[#allocation2 + $0x6c] sm:$0xf]  ;;  %v590_v12 = vshll.u32 %v12562_v19, 16  ;;  %v584_v5 = vor.u32 %v582_v54, %v581_v47  ;;  %v585_v61 = vrot.slane %v581_v47, 4 }
  0xb6   : > { %v12596_v48 = vld [vmem:[#allocation2 + $0x70] sm:$0xf]  ;;  %v3036_v3 = vshrl.u32 %v12594_v31, 16  ;;  %v3032_v21 = vshll.u32 %v12594_v31, 16  ;;  %v9818_v10 = vcombine.low %v2683_v25, %v12594_v31  ;;  %v3023_v34 = vshrl.u32 %v2683_v25, 16  ;;  %1007 = vst.msk [vmem:[#allocation3 + $0x48] sm:$0xff] %vm1003_vm15, %v9686_v23 }
  0xb7   : > { %v3026_v26 = vshll.u32 %v2683_v25, 16  ;;  %v3417_v27 = vrot.slane %v12594_v31, 5  ;;  %v807_v59 = vld [vmem:[#allocation2 + $0x74] sm:$0x1]  ;;  %1906 = vrot.lane.b32.xlu1 %v9754_v7, %s11667_s9  ;;  %v12614_v19 = vld [vmem:[#allocation2 + $0x6c] sm:$0xf] }
  0xb8   : > { %v808_v4 = vsel %vm11721_vm3, %v577_v40, %v807_v59  ;;  %v12611_v41 = vrot.slane %v3032_v21, 5  ;;  %v3038_v28 = vrot.slane %v3036_v3, 4  ;;  %2804 = vrot.lane.b32.xlu0 %v9818_v10, %s11665_s30  ;;  %v3025_v31 = vrot.slane %v3023_v34, 4  ;;  %v810_v23 = vld [vmem:[#allocation2 + $0x78] sm:$0xf]  ;;  %v12619_v3 = vpop.permute.xlu0 %2792 }
  0xb9   : > { %809 = vst [vmem:[#allocation2 + $0x74] sm:$0x1] %v808_v4  ;;  %v3028_v9 = vrot.slane %v3026_v26, 5  ;;  %v2495_v52 = vrot.slane %v12596_v48, 5  ;;  %v9850_v55 = vrot.slane %v2683_v25, 9  ;;  %v1223_v62 = vrot.slane %v1222_v30, 4 }
  0xba   : > { %v1233_v40 = vrot.slane %v1232_v60, 4  ;;  %v9723_v21 = vrot.slane %v12531_v53, 9  ;;  %16089 = vst [vmem:[#allocation13_spill] sm:$0xff] %v12619_v3  ;;  %v3419_v7 = vrot.slane %v3417_v27, 4  ;;  %v9787_v54 = vrot.slane %v12614_v19, 9 }
  0xbb   : > { %v3029_v59 = vor.u32 %v3028_v9, %v3025_v31  ;;  %v592_v10 = vor.u32 %v590_v12, %v12601_v0  ;;  %v370_v4 = vld [vmem:[#allocation2 + $0x80] sm:$0x1]  ;;  %v12623_v34 = vld [vmem:[#allocation2 + $0x6c] sm:$0xf]  ;;  %v3039_v26 = vor.u32 %v3038_v28, %v12611_v41  ;;  %v1228_v47 = vsel %vm11790_vm13, %v1223_v62, %v12581_v38  ;;  %v12636_v31 = vpop.permute.xlu1 %1701 }
  0xbc   : > { %v1238_v53 = vsel %vm11790_vm13, %v1233_v40, %v1237_v29  ;;  %v811_v30 = vsel %vm11784_vm12, %v584_v5, %v810_v23  ;;  %v2497_v9 = vrot.slane %v2495_v52, 4  ;;  %v1597_v12 = vrot.slane %v12536_v51, 5 }
  0xbd   : > { %v9707_v60 = vcombine.low %v1228_v47, %v1238_v53  ;;  %v593_v25 = vsel %vm11799_vm14, %v585_v61, %v592_v10  ;;  %812 = vst [vmem:[#allocation2 + $0x78] sm:$0xf] %v811_v30  ;;  %v3030_v28 = vrot.slane %v3029_v59, 4  ;;  %v1600_v62 = vrot.slane %v12551_v18, 5  ;;  %v12659_v47 = vld [vmem:[#allocation2 + $0x70] sm:$0xf]  ;;  %v12661_v53 = vpop.permute.xlu0 %2794 }
  0xbe   : > { %813 = vst.msk [vmem:[#allocation2 + $0x7c] sm:$0xf] %vm280_vm0, %v593_v25  ;;  %v371_v38 = vsel %vm11732_vm5, 0, %v370_v4  ;;  %v1240_v29 = vshrl.u32 %v12623_v34, 16  ;;  %v1599_v5 = vrot.slane %v1597_v12, 4  ;;  %v1243_v61 = vshll.u32 %v12623_v34, 16 }
  0xbf   : > { %1471 = vrot.lane.b32.xlu1 %v9707_v60, %s11666_s8  ;;  %372 = vst [vmem:[#allocation2 + $0x80] sm:$0x1] %v371_v38  ;;  %v3418_v18 = vsel %vm11753_vm9, %v9850_v55, %v3417_v27  ;;  %v12655_v10 = vsel %vm11753_vm9, %v9787_v54, %v2495_v52  ;;  %v1598_v4 = vsel %vm11753_vm9, %v9723_v21, %v1597_v12  ;;  %16090 = vst [vmem:[#allocation14_spill] sm:$0xff] %v12661_v53  ;;  %v11548_v30 = vld [vmem:[#allocation2 + $0x30] sm:$0xf]  ;;  %vm1503_vm1 = vcmask 523520  }
  0xc0   : > { %v2685_v40 = vld [vmem:[#allocation2 + $0x74] sm:$0x1]  ;;  %v3040_v38 = vrot.slane %v3039_v26, 4  ;;  %v594_v13 = vrot.slane %v12601_v0, 4  ;;  %v1601_v52 = vsel %vm11753_vm9, %v1599_v5, %v1600_v62  ;;  %v1242_v54 = vrot.slane %v1240_v29, 4  ;;  %1504 = vst.msk [vmem:[#allocation3] sm:$0xff] %vm1503_vm1, %v12591_v11 }
  0xc1   : > { %v12651_v59 = vld [vmem:[#allocation2 + $0x74] sm:$0x1]  ;;  %v3042_v23 = vshll.u32 %v2685_v40, 16  ;;  %v3420_v55 = vrot.slane %v2685_v40, 5  ;;  %v1245_v51 = vrot.slane %v1243_v61, 5  ;;  %v3035_v21 = vsel %vm11790_vm13, %v3030_v28, %v12611_v41 }
  0xc2   : > { %v11549_v60 = vld [vmem:[#allocation2 + $0x34] sm:$0xf]  ;;  %v2498_v27 = vrot.slane %v12651_v59, 5  ;;  %v9739_v40 = vcombine.low %v1598_v4, %v1601_v52  ;;  %v9755_v5 = vcombine.low %v12614_v19, %v12596_v48  ;;  %v1249_v61 = vshll.u32 %v12659_v47, 16  ;;  %v12691_v4 = vld [vmem:[%s11760_s29 + $0x50] sm:$0xf] }
  0xc3   : > { %v9687_v25 = vcombine.low %v11548_v30, %v11549_v60  ;;  %v3044_v12 = vrot.slane %v3042_v23, 5  ;;  %v3421_v26 = vsel %vm11753_vm9, %v3419_v7, %v3420_v55  ;;  %v12673_v30 = vpop.permute.xlu1 %1703  ;;  %v1246_v55 = vor.u32 %v1245_v51, %v1242_v54 }
  0xc4   : > { %v9866_v0 = vcombine.low %v3418_v18, %v3421_v26  ;;  %v2499_v62 = vsel %vm11753_vm9, %v2497_v9, %v2498_v27  ;;  %v12677_v29 = vld [vmem:[#allocation2 + $0x78] sm:$0xf]  ;;  %1715 = vrot.lane.b32.xlu1 %v9739_v40, %s11665_s30  ;;  %v323_v9 = vld [vmem:[#allocation2 + $0x84] sm:$0x1]  ;;  %v12698_v27 = vpop.permute.xlu0 %2597  ;;  %v12703_v40 = vld [vmem:[#allocation2 + $0x74] sm:$0x1] }
  0xc5   : > { %1008 = vst.msk [vmem:[#allocation3 + $0x60] sm:$0xff] %vm1003_vm15, %v9687_v25  ;;  %v3045_v41 = vsel %vm11790_vm13, %v3040_v38, %v3044_v12  ;;  %v12684_v28 = vld [vmem:[#allocation2 + $0x7c] sm:$0xf]  ;;  %v3047_v7 = vshrl.u32 %v12677_v29, 16  ;;  %v3050_v23 = vshll.u32 %v12677_v29, 16  ;;  %v9851_v18 = vrot.slane %v12677_v29, 9 }
  0xc6   : > { %v9834_v60 = vcombine.low %v3035_v21, %v3045_v41  ;;  %3549 = vst.msk [vmem:[#allocation3 + $0xb8] sm:$0xff] %vm1003_vm15, %v9866_v0  ;;  %v3060_v48 = vshrl.u32 %v12684_v28, 16  ;;  %v3424_v19 = vrot.slane %v12684_v28, 5  ;;  %v814_v25 = vld [vmem:[#allocation2 + $0x80] sm:$0x1]  ;;  %v3056_v21 = vshll.u32 %v12684_v28, 16 }
  0xc7   : > { %v12696_v38 = vld [vmem:[#allocation2 + $0x7c] sm:$0xf]  ;;  %v815_v52 = vsel %vm11721_vm3, %v594_v13, %v814_v25  ;;  %v3049_v12 = vrot.slane %v3047_v7, 4  ;;  %v3052_v26 = vrot.slane %v3050_v23, 5  ;;  %v9803_v0 = vcombine.low %v12655_v10, %v2499_v62  ;;  %v12709_v54 = vld [vmem:[#allocation2 + $0x78] sm:$0xf]  ;;  %v12718_v6 = vpop.permute.xlu1 %1457 }
  0xc8   : > { %3300 = vrot.lane.b32.xlu0 %v9834_v60, %s11667_s9  ;;  %v9819_v41 = vcombine.low %v12677_v29, %v12684_v28  ;;  %816 = vst [vmem:[#allocation2 + $0x80] sm:$0x1] %v815_v52  ;;  %v3062_v51 = vrot.slane %v3060_v48, 4  ;;  %v12711_v39 = vrot.slane %v1249_v61, 5  ;;  %v412_v13 = vld [vmem:[%s11760_s29 + $0x54] sm:$0xf]  ;;  %1908 = vrot.lane.b32.xlu1 %v9755_v5, %s11667_s9  ;;  %v3425_v28 = vsel %vm11753_vm9, %v9851_v18, %v3424_v19  ;;  %v12730_v17 = vpop.permute.xlu0 %2599 }
  0xc9   : > { %v3426_v7 = vrot.slane %v3424_v19, 4  ;;  %v3053_v23 = vor.u32 %v3052_v26, %v3049_v12  ;;  %v12714_v25 = vrot.slane %v3056_v21, 5  ;;  %v2502_v60 = vrot.slane %v12696_v38, 5  ;;  %16091 = vst [vmem:[#allocation15_spill] sm:$0xff] %v12730_v17  ;;  %v12749_v57 = vld [vmem:[#allocation2 + $0x78] sm:$0xf] }
  0xca   : > { %v1253_v10 = vshrl.u32 %v12659_v47, 16  ;;  %v1259_v62 = vshll.u32 %v12703_v40, 16  ;;  %v324_v29 = vsel %vm11721_vm3, 0, %v323_v9  ;;  %v596_v61 = vshrl.u32 %v12691_v4, 16  ;;  %1505 = vst.msk [vmem:[#allocation3 + $0x18] sm:$0xff] %vm1503_vm1, %v12718_v6 }
  0xcb   : > { %v3063_v48 = vor.u32 %v3062_v51, %v12714_v25  ;;  %v9788_v5 = vrot.slane %v12709_v54, 9  ;;  %v1247_v52 = vrot.slane %v1246_v55, 4  ;;  %325 = vst [vmem:[#allocation2 + $0x84] sm:$0x1] %v324_v29  ;;  %v3054_v12 = vrot.slane %v3053_v23, 4 }
  0xcc   : > { %2613 = vrot.lane.b32.xlu0 %v9803_v0, %s11666_s8  ;;  %v2504_v26 = vrot.slane %v2502_v60, 4  ;;  %v1255_v21 = vrot.slane %v1253_v10, 4  ;;  %v598_v16 = vrot.slane %v596_v61, 7  ;;  %v1261_v22 = vrot.slane %v1259_v62, 5 }
  0xcd   : > { %v3064_v9 = vrot.slane %v3063_v48, 4  ;;  %v599_v53 = vshll.u32 %v12691_v4, 16  ;;  %v604_v63 = vshrl.u32 %v412_v13, 16  ;;  %v607_v51 = vshll.u32 %v412_v13, 16  ;;  %v1460_v62 = vpop.permute.xlu1 %1459 }
  0xce   : > { %v1256_v18 = vor.u32 %v1255_v21, %v12711_v39  ;;  %v602_v19 = vrot.slane %v598_v16, 4  ;;  %v9724_v55 = vrot.slane %v12623_v34, 9  ;;  %v12739_v0 = vsel %vm11753_vm9, %v9788_v5, %v2502_v60  ;;  %v373_v21 = vld [vmem:[#allocation2 + $0x8c] sm:$0x1]  ;;  %v12757_v5 = vld [vmem:[#allocation2 + $0x7c] sm:$0xf] }
  0xcf   : > { %v2688_v29 = vld [vmem:[#allocation2 + $0x80] sm:$0x1]  ;;  %v1252_v23 = vsel %vm11790_vm13, %v1247_v52, %v12711_v39  ;;  %v12744_v10 = vrot.slane %v604_v63, 7  ;;  %v1604_v4 = vrot.slane %v12659_v47, 5  ;;  %v601_v48 = vor.u32 %v599_v53, %v598_v16  ;;  %1506 = vst.msk [vmem:[#allocation3 + $0x30] sm:$0xff] %vm1503_vm1, %v1460_v62 }
  0xd0   : > { %v12735_v3 = vld [vmem:[#allocation2 + $0x80] sm:$0x1]  ;;  %2806 = vrot.lane.b32.xlu0 %v9819_v41, %s11665_s30  ;;  %v3066_v13 = vshll.u32 %v2688_v29, 16  ;;  %v3427_v34 = vrot.slane %v2688_v29, 5  ;;  %v3059_v60 = vsel %vm11790_vm13, %v3054_v12, %v12714_v25  ;;  %v1257_v39 = vrot.slane %v1256_v18, 4  ;;  %v12765_v25 = vpop.permute.xlu0 %2601 }
  0xd1   : > { %v2505_v61 = vrot.slane %v12735_v3, 5  ;;  %v609_v63 = vor.u32 %v607_v51, %v12744_v10  ;;  %v1605_v47 = vsel %vm11753_vm9, %v9724_v55, %v1604_v4  ;;  %v1606_v29 = vrot.slane %v1604_v4, 4  ;;  %v12763_v17 = vld [vmem:[#allocation2 + $0x80] sm:$0x1] }
  0xd2   : > { %v3068_v41 = vrot.slane %v3066_v13, 5  ;;  %v3428_v52 = vsel %vm11753_vm9, %v3426_v7, %v3427_v34  ;;  %v817_v53 = vld [vmem:[#allocation2 + $0x84] sm:$0xf]  ;;  %v1262_v51 = vsel %vm11790_vm13, %v1257_v39, %v1261_v22  ;;  %v1607_v4 = vrot.slane %v12703_v40, 5  ;;  %v12779_v34 = vld [vmem:[%s11760_s29 + $0x58] sm:$0xf] }
  0xd3   : > { %v2506_v16 = vsel %vm11753_vm9, %v2504_v26, %v2505_v61  ;;  %v9867_v12 = vcombine.low %v3425_v28, %v3428_v52  ;;  %v610_v55 = vsel %vm11799_vm14, %v602_v19, %v609_v63  ;;  %v9708_v13 = vcombine.low %v1252_v23, %v1262_v51  ;;  %v326_v28 = vld [vmem:[#allocation2 + $0x90] sm:$0x1]  ;;  %v12802_v39 = vld [vmem:[%s11760_s29 + $0x5c] sm:$0xf] }
  0xd4   : > { %v9804_v18 = vcombine.low %v12739_v0, %v2506_v16  ;;  %v3069_v7 = vsel %vm11790_vm13, %v3064_v9, %v3068_v41  ;;  %v818_v26 = vsel %vm11784_vm12, %v601_v48, %v817_v53  ;;  %820 = vst.msk [vmem:[#allocation2 + $0x88] sm:$0xf] %vm280_vm0, %v610_v55  ;;  %v374_v22 = vsel %vm11732_vm5, 0, %v373_v21  ;;  %v1462_v19 = vpop.permute.xlu1 %1461  ;;  %v12808_v6 = vpop.permute.xlu0 %3286  ;;  %v11550_v55 = vld [vmem:[#allocation2 + $0x3c] sm:$0xf] }
  0xd5   : > { %v9835_v0 = vcombine.low %v3059_v60, %v3069_v7  ;;  %3550 = vst.msk [vmem:[#allocation3 + $0xd0] sm:$0xff] %vm1003_vm15, %v9867_v12  ;;  %819 = vst [vmem:[#allocation2 + $0x84] sm:$0xf] %v818_v26  ;;  %v1264_v9 = vshrl.u32 %v12749_v57, 16  ;;  %1473 = vrot.lane.b32.xlu1 %v9708_v13, %s11666_s8  ;;  %v1608_v40 = vsel %vm11753_vm9, %v1606_v29, %v1607_v4  ;;  %v1267_v23 = vshll.u32 %v12749_v57, 16 }
  0xd6   : > { %375 = vst [vmem:[#allocation2 + $0x8c] sm:$0x1] %v374_v22  ;;  %v1273_v61 = vshll.u32 %v12757_v5, 16  ;;  %v1277_v48 = vshrl.u32 %v12757_v5, 16  ;;  %1507 = vst.msk [vmem:[#allocation3 + $0x48] sm:$0xff] %vm1503_vm1, %v1462_v19  ;;  %v9740_v21 = vcombine.low %v1605_v47, %v1608_v40  ;;  %v1283_v11 = vshll.u32 %v12763_v17, 16 }
  0xd7   : > { %3302 = vrot.lane.b32.xlu0 %v9835_v0, %s11667_s9  ;;  %v12798_v60 = vrot.slane %v1264_v9, 4  ;;  %vm1747_vm6 = vcmask 785920   ;;  %v1269_v63 = vrot.slane %v1267_v23, 5  ;;  %vm1940_vm7 = vcmask 1048320  }
  0xd8   : > { %v12804_v41 = vrot.slane %v1273_v61, 5  ;;  %v1279_v52 = vrot.slane %v1277_v48, 4  ;;  %1748 = vst.msk [vmem:[#allocation3] sm:$0xff] %vm1747_vm6, %v12489_v37  ;;  %1749 = vst.msk [vmem:[#allocation3 + $0x18] sm:$0xff] %vm1747_vm6, %v12636_v31  ;;  %v2169_v62 = vshll.u32 %v12651_v59, 16  ;;  %v327_v16 = vsel %vm11721_vm3, 0, %v326_v28 }
  0xd9   : > { %1750 = vst.msk [vmem:[#allocation3 + $0x30] sm:$0xff] %vm1747_vm6, %v12673_v30  ;;  %v613_v37 = vshrl.u32 %v12779_v34, 16  ;;  %v1706_v31 = vpop.permute.xlu1 %1705  ;;  %v611_v30 = vrot.slane %v12744_v10, 4  ;;  %1717 = vrot.lane.b32.xlu1 %v9740_v21, %s11665_s30  ;;  %v9756_v53 = vcombine.low %v12709_v54, %v12696_v38  ;;  %328 = vst [vmem:[#allocation2 + $0x90] sm:$0x1] %v327_v16  ;;  %v2012_v29 = vor.u32 %v12186_v58, %v12182_v8 }
  0xda   : > { %1941 = vst.msk [vmem:[#allocation3] sm:$0xff] %vm1940_vm7, %v12538_v15  ;;  %1942 = vst.msk [vmem:[#allocation3 + $0x18] sm:$0xff] %vm1940_vm7, %v12579_v46  ;;  %v1285_v15 = vrot.slane %v1283_v11, 5  ;;  %v1280_v10 = vor.u32 %v1279_v52, %v12804_v41  ;;  %v616_v51 = vshll.u32 %v12779_v34, 16  ;;  %v11551_v38 = vld [vmem:[#allocation2 + $0x40] sm:$0xf] }
  0xdb   : > { %1943 = vst.msk [vmem:[#allocation3 + $0x30] sm:$0xff] %vm1940_vm7, %v12606_v36  ;;  %2615 = vrot.lane.b32.xlu0 %v9804_v18, %s11666_s8  ;;  %v2690_v46 = vld [vmem:[#allocation2 + $0x88] sm:$0xf]  ;;  %v1270_v36 = vor.u32 %v1269_v63, %v12798_v60  ;;  %v9688_v54 = vcombine.low %v11550_v55, %v11551_v38  ;;  %v621_v28 = vshrl.u32 %v12802_v39, 16  ;;  %v615_v19 = vrot.slane %v613_v37, 7  ;;  %v12848_v60 = vpop.permute.xlu0 %3288 }
  0xdc   : > { %1751 = vst.msk [vmem:[#allocation3 + $0x48] sm:$0xff] %vm1747_vm6, %v1706_v31  ;;  %v12833_v12 = vld [vmem:[#allocation2 + $0x88] sm:$0xf]  ;;  %v2689_v7 = vld [vmem:[#allocation2 + $0x84] sm:$0xf]  ;;  %v3084_v13 = vshrl.u32 %v2690_v46, 16 }
  0xdd   : > { %v3431_v26 = vrot.slane %v2690_v46, 5  ;;  %v3080_v4 = vshll.u32 %v2690_v46, 16  ;;  %v9820_v0 = vcombine.low %v2689_v7, %v2690_v46  ;;  %v3071_v18 = vshrl.u32 %v2689_v7, 16  ;;  %v821_v9 = vld [vmem:[#allocation2 + $0x8c] sm:$0x1]  ;;  %v1899_v40 = vpop.permute.xlu1 %1898  ;;  %1009 = vst.msk [vmem:[#allocation3 + $0x78] sm:$0xff] %vm1003_vm15, %v9688_v54  ;;  %1910 = vrot.lane.b32.xlu1 %v9756_v53, %s11667_s9 }
  0xde   : > { %v3074_v22 = vshll.u32 %v2689_v7, 16  ;;  %v822_v34 = vsel %vm11721_vm3, %v611_v30, %v821_v9  ;;  %v3086_v61 = vrot.slane %v3084_v13, 4  ;;  %v12845_v48 = vld [vmem:[#allocation2 + $0x84] sm:$0xf]  ;;  %v624_v21 = vshll.u32 %v12802_v39, 16  ;;  %1944 = vst.msk [vmem:[#allocation3 + $0x48] sm:$0xff] %vm1940_vm7, %v1899_v40 }
  0xdf   : > { %v12842_v23 = vrot.slane %v3080_v4, 5  ;;  %v9852_v11 = vrot.slane %v2689_v7, 9  ;;  %2808 = vrot.lane.b32.xlu0 %v9820_v0, %s11665_s30  ;;  %823 = vst [vmem:[#allocation2 + $0x8c] sm:$0x1] %v822_v34  ;;  %v3073_v63 = vrot.slane %v3071_v18, 4  ;;  %v9725_v16 = vrot.slane %v12749_v57, 9 }
  0xe0   : > { %v3076_v52 = vrot.slane %v3074_v22, 5  ;;  %v3433_v37 = vrot.slane %v3431_v26, 4  ;;  %v2509_v31 = vrot.slane %v12833_v12, 5  ;;  %v1271_v30 = vrot.slane %v1270_v36, 4  ;;  %v824_v54 = vld [vmem:[#allocation2 + $0x90] sm:$0xf] }
  0xe1   : > { %v1281_v53 = vrot.slane %v1280_v10, 4  ;;  %v3087_v39 = vor.u32 %v3086_v61, %v12842_v23  ;;  %v9789_v55 = vrot.slane %v12845_v48, 9  ;;  %v618_v38 = vor.u32 %v616_v51, %v615_v19  ;;  %v376_v22 = vld [vmem:[#allocation2 + $0x98] sm:$0x1] }
  0xe2   : > { %v3077_v46 = vor.u32 %v3076_v52, %v3073_v63  ;;  %v1276_v7 = vsel %vm11790_vm13, %v1271_v30, %v12804_v41  ;;  %v619_v4 = vrot.slane %v615_v19, 4  ;;  %v12861_v0 = vrot.slane %v621_v28, 7  ;;  %v12870_v28 = vpop.permute.xlu0 %3290 }
  0xe3   : > { %v1286_v13 = vsel %vm11790_vm13, %v1281_v53, %v1285_v15  ;;  %v3432_v36 = vsel %vm11753_vm9, %v9852_v11, %v3431_v26  ;;  %v825_v18 = vsel %vm11784_vm12, %v618_v38, %v824_v54  ;;  %v1611_v51 = vrot.slane %v12757_v5, 5  ;;  %v11552_v15 = vld [vmem:[#allocation2 + $0x10] sm:$0xf] }
  0xe4   : > { %v9709_v10 = vcombine.low %v1276_v7, %v1286_v13  ;;  %v3078_v9 = vrot.slane %v3077_v46, 4  ;;  %v626_v40 = vor.u32 %v624_v21, %v12861_v0  ;;  %826 = vst [vmem:[#allocation2 + $0x90] sm:$0xf] %v825_v18  ;;  %v1614_v41 = vrot.slane %v12763_v17, 5 }
  0xe5   : > { %v1967_v19 = vshll.u32 %v11552_v15, 16  ;;  %v3088_v34 = vrot.slane %v3087_v39, 4  ;;  %v12874_v26 = vsel %vm11753_vm9, %v9789_v55, %v2509_v31  ;;  %v2511_v61 = vrot.slane %v2509_v31, 4 }
  0xe6   : > { %1475 = vrot.lane.b32.xlu1 %v9709_v10, %s11666_s8  ;;  %v1613_v11 = vrot.slane %v1611_v51, 4  ;;  %v1464_v63 = vpop.permute.xlu1 %1463  ;;  %v2691_v52 = vld [vmem:[#allocation2 + $0x8c] sm:$0x1]  ;;  %v627_v17 = vsel %vm11799_vm14, %v619_v4, %v626_v40  ;;  %v628_v21 = vrot.slane %v12861_v0, 4  ;;  %v1612_v53 = vsel %vm11753_vm9, %v9725_v16, %v1611_v51 }
  0xe7   : > { %v12877_v30 = vld [vmem:[#allocation2 + $0x8c] sm:$0x1]  ;;  %v1969_v46 = vrot.slane %v1967_v19, 5  ;;  %1508 = vst.msk [vmem:[#allocation3 + $0x60] sm:$0xff] %vm1503_vm1, %v1464_v63  ;;  %v3090_v39 = vshll.u32 %v2691_v52, 16  ;;  %v3434_v31 = vrot.slane %v2691_v52, 5  ;;  %v16092_v38 = vor.u32 %v12051_v45, %v11955_v32 }
  0xe8   : > { %v2512_v55 = vrot.slane %v12877_v30, 5  ;;  %827 = vst.msk [vmem:[#allocation2 + $0x94] sm:$0xf] %vm280_vm0, %v627_v17  ;;  %v3083_v7 = vsel %vm11790_vm13, %v3078_v9, %v12842_v23  ;;  %v1615_v16 = vsel %vm11753_vm9, %v1613_v11, %v1614_v41  ;;  %v377_v4 = vsel %vm11732_vm5, 0, %v376_v22  ;;  %v12906_v41 = vpop.permute.xlu0 %2603  ;;  %v12928_v17 = vld [vmem:[#allocation2 + $0x84] sm:$0xf] }
  0xe9   : > { %v1965_v54 = vrot.slane %v16092_v38, 4  ;;  %v1974_v13 = vor.u32 %v12176_v33, %v1969_v46  ;;  %v3092_v10 = vrot.slane %v3090_v39, 5  ;;  %v3435_v18 = vsel %vm11753_vm9, %v3433_v37, %v3434_v31  ;;  %378 = vst [vmem:[#allocation2 + $0x98] sm:$0x1] %v377_v4  ;;  %v12911_v37 = vld [vmem:[%s15973_s1 + $0x80] sm:$0xff]  }
  0xea   : > { %v9741_v51 = vcombine.low %v1612_v53, %v1615_v16  ;;  %v16093_v32 = vshll.u32 %v11915_v42, 16  ;;  %v9868_v40 = vcombine.low %v3432_v36, %v3435_v18  ;;  %v2513_v23 = vsel %vm11753_vm9, %v2511_v61, %v2512_v55  ;;  %v1708_v22 = vpop.permute.xlu1 %1707  ;;  %10608 = vmatprep.subr.bf16.mxu0 %v12911_v37  ;;  %v11555_v4 = vld [vmem:[#allocation2 + $0x4c] sm:$0xf] }
  0xeb   : > { %v1975_v9 = vrot.slane %v1974_v13, 4  ;;  %v9757_v33 = vcombine.low %v12845_v48, %v12833_v12  ;;  %v3093_v42 = vsel %vm11790_vm13, %v3088_v34, %v3092_v10  ;;  %v12916_v15 = vld [vmem:[#allocation2 + $0x90] sm:$0xf]  ;;  %v1970_v12 = vsel %vm11790_vm13, %v1965_v54, %v1969_v46  ;;  %v11553_v48 = vld [vmem:[#allocation2 + $0x1c] sm:$0xf]  ;;  %1752 = vst.msk [vmem:[#allocation3 + $0x60] sm:$0xff] %vm1747_vm6, %v1708_v22 }
  0xec   : > { %v1979_v45 = vrot.slane %v16093_v32, 5  ;;  %1719 = vrot.lane.b32.xlu1 %v9741_v51, %s11665_s30  ;;  %v1991_v19 = vshll.u32 %v11553_v48, 16  ;;  %v9836_v61 = vcombine.low %v3083_v7, %v3093_v42  ;;  %3551 = vst.msk [vmem:[#allocation3 + $0xe8] sm:$0xff] %vm1003_vm15, %v9868_v40  ;;  %v3095_v11 = vshrl.u32 %v12916_v15, 16  ;;  %v12935_v55 = vld [vmem:[#allocation2 + $0x90] sm:$0xf] }
  0xed   : > { %v3098_v34 = vshll.u32 %v12916_v15, 16  ;;  %v16094_v63 = vor.u32 %v11917_v44, %v11904_v35  ;;  %v9805_v53 = vcombine.low %v12874_v26, %v2513_v23  ;;  %v9853_v46 = vrot.slane %v12916_v15, 9  ;;  %v12938_v7 = vld [vmem:[#allocation2 + $0x88] sm:$0xf]  ;;  %v12950_v48 = vld [vmem:[#allocation2 + $0x8c] sm:$0x1] }
  0xee   : > { %v1980_v39 = vsel %vm11790_vm13, %v1975_v9, %v1979_v45  ;;  %v1993_v31 = vrot.slane %v1991_v19, 5  ;;  %3304 = vrot.lane.b32.xlu0 %v9836_v61, %s11667_s9  ;;  %v3097_v35 = vrot.slane %v3095_v11, 4  ;;  %v1901_v16 = vpop.permute.xlu1 %1900  ;;  %v11554_v13 = vld [vmem:[#allocation2 + $0x48] sm:$0xf]  ;;  %v1288_v45 = vshrl.u32 %v12928_v17, 16 }
  0xef   : > { %v1989_v52 = vrot.slane %v16094_v63, 4  ;;  %v2693_v38 = vld [vmem:[#allocation2 + $0x94] sm:$0xf]  ;;  %v9763_v54 = vcombine.low %v1970_v12, %v1980_v39  ;;  %v3100_v44 = vrot.slane %v3098_v34, 5  ;;  %v9689_v26 = vcombine.low %v11554_v13, %v11555_v4  ;;  %1945 = vst.msk [vmem:[#allocation3 + $0x60] sm:$0xff] %vm1940_vm7, %v1901_v16 }
  0xf0   : > { %v3108_v10 = vshrl.u32 %v2693_v38, 16  ;;  %v3438_v18 = vrot.slane %v2693_v38, 5  ;;  %v3104_v51 = vshll.u32 %v2693_v38, 16  ;;  %1912 = vrot.lane.b32.xlu1 %v9757_v33, %s11667_s9  ;;  %v12941_v32 = vld [vmem:[#allocation2 + $0x94] sm:$0xf]  ;;  %v1998_v9 = vor.u32 %v11925_v50, %v1993_v31  ;;  %v12952_v33 = vpop.permute.xlu0 %2796 }
  0xf1   : > { %2405 = vst.msk [vmem:[#allocation3 + $0x8] sm:$0xff] %vm1003_vm15, %v9763_v54  ;;  %v828_v40 = vld [vmem:[#allocation2 + $0x98] sm:$0x1]  ;;  %v3101_v23 = vor.u32 %v3100_v44, %v3097_v35  ;;  %v16095_v22 = vshll.u32 %v11888_v24, 16  ;;  %v9790_v12 = vrot.slane %v12935_v55, 9  ;;  %1010 = vst.msk [vmem:[#allocation3 + $0x90] sm:$0xff] %vm1003_vm15, %v9689_v26  ;;  %v9821_v19 = vcombine.low %v12916_v15, %v2693_v38 }
  0xf2   : > { %2645 = vst.msk [vmem:[#allocation3 + $0x8] sm:$0xff] %vm1503_vm1, %v12698_v27  ;;  %v829_v24 = vsel %vm11721_vm3, %v628_v21, %v828_v40  ;;  %v12962_v50 = vrot.slane %v3104_v51, 5  ;;  %v1994_v61 = vsel %vm11790_vm13, %v1989_v52, %v1993_v31  ;;  %2617 = vrot.lane.b32.xlu0 %v9805_v53, %s11666_s8  ;;  %v12969_v11 = vsel %vm11753_vm9, %v9853_v46, %v3438_v18  ;;  %v329_v21 = vld [vmem:[#allocation2 + $0x9c] sm:$0x1]  ;;  %v12977_v53 = vld [vmem:[%s11760_s29 + $0x60] sm:$0xf] }
  0xf3   : > { %v2003_v42 = vrot.slane %v16095_v22, 5  ;;  %2838 = vst.msk [vmem:[#allocation3 + $0x8] sm:$0xff] %vm1747_vm6, %v12511_v20  ;;  %830 = vst [vmem:[#allocation2 + $0x98] sm:$0x1] %v829_v24  ;;  %v3110_v27 = vrot.slane %v3108_v10, 4  ;;  %v1999_v0 = vrot.slane %v1998_v9, 4 }
  0xf4   : > { %v2516_v15 = vrot.slane %v12941_v32, 5  ;;  %v3440_v34 = vrot.slane %v3438_v18, 4  ;;  %v1290_v63 = vrot.slane %v1288_v45, 4  ;;  %v1291_v39 = vshll.u32 %v12928_v17, 16  ;;  %3334 = vst.msk [vmem:[#allocation3 + $0x8] sm:$0xff] %vm1940_vm7, %v12808_v6  ;;  %v12992_v45 = vpop.permute.xlu0 %3292 }
  0xf5   : > { %v1297_v52 = vshll.u32 %v12938_v7, 16  ;;  %v12981_v46 = vrot.slane %v3101_v23, 4  ;;  %v3111_v20 = vor.u32 %v3110_v27, %v12962_v50  ;;  %v2004_v31 = vsel %vm11790_vm13, %v1999_v0, %v2003_v42  ;;  %v11556_v10 = vld [vmem:[#allocation2 + $0x28] sm:$0xf]  ;;  %v12990_v51 = vld [vmem:[%s11760_s29 + $0x64] sm:$0xf] }
  0xf6   : > { %v1301_v38 = vshrl.u32 %v12938_v7, 16  ;;  %v9764_v54 = vcombine.low %v1994_v61, %v2004_v31  ;;  %v1293_v35 = vrot.slane %v1291_v39, 5  ;;  %v1307_v16 = vshll.u32 %v12950_v48, 16  ;;  %v1466_v13 = vpop.permute.xlu1 %1465  ;;  %2810 = vrot.lane.b32.xlu0 %v9821_v19, %s11665_s30  ;;  %v16096_v42 = vld [vmem:[#allocation15_spill] sm:$0xff]  ;;  %v16097_v61 = vld [vmem:[#allocation6_spill] sm:$0xff] }
  0xf7   : > { %v1299_v44 = vrot.slane %v1297_v52, 5  ;;  %v3112_v4 = vrot.slane %v3111_v20, 4  ;;  %v2518_v6 = vrot.slane %v2516_v15, 4  ;;  %v2015_v18 = vshll.u32 %v11556_v10, 16  ;;  %1509 = vst.msk [vmem:[#allocation3 + $0x78] sm:$0xff] %vm1503_vm1, %v1466_v13  ;;  %v16099_v52 = vld [vmem:[#allocation13_spill] sm:$0xff] }
  0xf8   : > { %v1303_v26 = vrot.slane %v1301_v38, 4  ;;  %2406 = vst.msk [vmem:[#allocation3 + $0x20] sm:$0xff] %vm1003_vm15, %v9764_v54  ;;  %v1294_v40 = vor.u32 %v1293_v35, %v1290_v63  ;;  %v1309_v23 = vrot.slane %v1307_v16, 5  ;;  %v2013_v9 = vrot.slane %v2012_v29, 4  ;;  %v11557_v20 = vld [vmem:[#allocation2 + $0x54] sm:$0xf] }
  0xf9   : > { %v330_v22 = vsel %vm11721_vm3, 0, %v329_v21  ;;  %2646 = vst.msk [vmem:[#allocation3 + $0x20] sm:$0xff] %vm1503_vm1, %v16096_v42  ;;  %v2017_v24 = vrot.slane %v2015_v18, 5  ;;  %v16098_v27 = vshll.u32 %v16097_v61, 16  ;;  %v630_v39 = vshrl.u32 %v12977_v53, 16  ;;  %v16100_v10 = vld [vmem:[#allocation8_spill] sm:$0xff] }
  0xfa   : > { %v1304_v19 = vor.u32 %v1303_v26, %v1299_v44  ;;  %331 = vst [vmem:[#allocation2 + $0x9c] sm:$0x1] %v330_v22  ;;  %v2694_v63 = vld [vmem:[#allocation2 + $0x98] sm:$0x1]  ;;  %2839 = vst.msk [vmem:[#allocation3 + $0x20] sm:$0xff] %vm1747_vm6, %v16099_v52  ;;  %v13012_v58 = vsel %vm11753_vm9, %v9790_v12, %v2516_v15  ;;  %v1295_v29 = vrot.slane %v1294_v40, 4  ;;  %v3107_v12 = vsel %vm11790_vm13, %v12981_v46, %v12962_v50  ;;  %v13031_v50 = vpop.permute.xlu0 %2605 }
  0xfb   : > { %v2027_v0 = vrot.slane %v16098_v27, 5  ;;  %v13008_v8 = vld [vmem:[#allocation2 + $0x98] sm:$0x1]  ;;  %v633_v21 = vshll.u32 %v12977_v53, 16  ;;  %v3114_v54 = vshll.u32 %v2694_v63, 16  ;;  %v3441_v35 = vrot.slane %v2694_v63, 5 }
  0xfc   : > { %v11558_v31 = vld [vmem:[#allocation2 + $0x58] sm:$0xf]  ;;  %v2519_v16 = vrot.slane %v13008_v8, 5  ;;  %v638_v13 = vshrl.u32 %v12990_v51, 16  ;;  %3335 = vst.msk [vmem:[#allocation3 + $0x20] sm:$0xff] %vm1940_vm7, %v12848_v60  ;;  %v1300_v15 = vsel %vm11790_vm13, %v1295_v29, %v1299_v44  ;;  %v1305_v53 = vrot.slane %v1304_v19, 4 }
  0xfd   : > { %v9690_v38 = vcombine.low %v11557_v20, %v11558_v31  ;;  %v3558_v26 = vld [vmem:[#allocation3] sm:$0xff]  ;;  %v2022_v18 = vor.u32 %v16100_v10, %v2017_v24  ;;  %v3559_v40 = vld [vmem:[#allocation3 + $0x8] sm:$0xff]  ;;  %v3116_v22 = vrot.slane %v3114_v54, 5  ;;  %v3442_v42 = vsel %vm11753_vm9, %v3440_v34, %v3441_v35  ;;  %v13038_v52 = vld [vmem:[#allocation2 + $0x90] sm:$0xf] }
  0xfe   : > { %v2018_v60 = vsel %vm11790_vm13, %v2013_v9, %v2017_v24  ;;  %v632_v61 = vrot.slane %v630_v39, 7  ;;  %v379_v27 = vld [vmem:[#allocation2 + $0xa4] sm:$0x1]  ;;  %3837 = vmatprep.mubr.bf16.mxu0 %v3559_v40  ;;  %v9869_v46 = vcombine.low %v12969_v11, %v3442_v42  ;;  %v2520_v44 = vsel %vm11753_vm9, %v2518_v6, %v2519_v16  ;;  %v13042_v29 = vld [vmem:[#allocation2 + $0x94] sm:$0xf] }
  0xff   : > { %1011 = vst.msk [vmem:[#allocation3 + $0xa8] sm:$0xff] %vm1003_vm15, %v9690_v38  ;;  %v1310_v19 = vsel %vm11790_vm13, %v1305_v53, %v1309_v23  ;;  %v2023_v63 = vrot.slane %v2022_v18, 4  ;;  %3838 = vmatmul.mubr.bf16.vlgmr.msra.gmra.mrb[0].mxu0 %v3558_v26  ;;  %v3117_v34 = vsel %vm11790_vm13, %v3112_v4, %v3116_v22  ;;  %v13044_v20 = vld [vmem:[#allocation2 + $0x98] sm:$0x1]  ;;  %v13050_v23 = vrot.slane %v638_v13, 7  ;;  %v1710_v38 = vpop.permute.xlu1 %1709 }
 0x100   : > { %v9710_v9 = vcombine.low %v1300_v15, %v1310_v19  ;;  %v635_v24 = vor.u32 %v633_v21, %v632_v61  ;;  %v636_v39 = vrot.slane %v632_v61, 4  ;;  %10609 = vmatpush3.bf16.msra.mxu0 %v12911_v37  ;;  %v9837_v11 = vcombine.low %v3107_v12, %v3117_v34  ;;  %3552 = vst.msk [vmem:[#allocation3 + $0x100] sm:$0xff] %vm1003_vm15, %v9869_v46  ;;  %v332_v21 = vld [vmem:[#allocation2 + $0xa8] sm:$0x1]  ;;  %v13074_v40 = vld [vmem:[%s11760_s29 + $0x6c] sm:$0xf] }
 0x101   : > { %v2028_v6 = vsel %vm11790_vm13, %v2023_v63, %v2027_v0  ;;  %v641_v31 = vshll.u32 %v12990_v51, 16  ;;  %v831_v4 = vld [vmem:[#allocation2 + $0x9c] sm:$0xf]  ;;  %v9726_v35 = vrot.slane %v12928_v17, 9  ;;  %v1618_v16 = vrot.slane %v12938_v7, 5  ;;  %1753 = vst.msk [vmem:[#allocation3 + $0x78] sm:$0xff] %vm1747_vm6, %v1710_v38 }
 0x102   : > { %1477 = vrot.lane.b32.xlu1 %v9710_v9, %s11666_s8  ;;  %v9765_v54 = vcombine.low %v2018_v60, %v2028_v6  ;;  %v832_v37 = vsel %vm11784_vm12, %v635_v24, %v831_v4  ;;  %3306 = vrot.lane.b32.xlu0 %v9837_v11, %s11667_s9  ;;  %v9806_v51 = vcombine.low %v13012_v58, %v2520_v44  ;;  %v1621_v13 = vrot.slane %v12950_v48, 5  ;;  %v13066_v12 = vld [vmem:[%s11760_s29 + $0x68] sm:$0xf]  ;;  %v13076_v48 = vpop.permute.xlu0 %2798  ;;  %v16101_v46 = vld [vmem:[#allocation14_spill] sm:$0xff]  ;;  %v3561_v34 = vld [vmem:[#allocation3 + $0x18] sm:$0xff] }
 0x103   : > { %v643_v0 = vor.u32 %v641_v31, %v13050_v23  ;;  %833 = vst [vmem:[#allocation2 + $0x9c] sm:$0xf] %v832_v37  ;;  %v380_v26 = vsel %vm11732_vm5, 0, %v379_v27  ;;  %v3562_v15 = vld [vmem:[#allocation3 + $0x20] sm:$0xff]  ;;  %v1619_v53 = vsel %vm11753_vm9, %v9726_v35, %v1618_v16  ;;  %v1620_v10 = vrot.slane %v1618_v16, 4  ;;  %v1903_v27 = vpop.permute.xlu1 %1902 }
 0x104   : > { %2407 = vst.msk [vmem:[#allocation3 + $0x38] sm:$0xff] %vm1003_vm15, %v9765_v54  ;;  %381 = vst [vmem:[#allocation2 + $0xa4] sm:$0x1] %v380_v26  ;;  %v1312_v58 = vshrl.u32 %v13038_v52, 16  ;;  %v1315_v18 = vshll.u32 %v13038_v52, 16  ;;  %3845 = vmatprep.mubr.bf16.mxu0 %v3562_v15  ;;  %v1321_v42 = vshll.u32 %v13042_v29, 16  ;;  %v9758_v24 = vcombine.low %v12935_v55, %v12941_v32 }
 0x105   : > { %2647 = vst.msk [vmem:[#allocation3 + $0x38] sm:$0xff] %vm1503_vm1, %v12765_v25  ;;  %v644_v22 = vsel %vm11799_vm14, %v636_v39, %v643_v0  ;;  %v1325_v60 = vshrl.u32 %v13042_v29, 16  ;;  %v1331_v61 = vshll.u32 %v13044_v20, 16  ;;  %v1622_v44 = vsel %vm11753_vm9, %v1620_v10, %v1621_v13  ;;  %v11559_v0 = vld [vmem:[#allocation2 + $0x60] sm:$0xf] }
 0x106   : > { %2840 = vst.msk [vmem:[#allocation3 + $0x38] sm:$0xff] %vm1747_vm6, %v16101_v46  ;;  %v1314_v19 = vrot.slane %v1312_v58, 4  ;;  %v1317_v25 = vrot.slane %v1315_v18, 5  ;;  %v333_v63 = vsel %vm11721_vm3, 0, %v332_v21  ;;  %2619 = vrot.lane.b32.xlu0 %v9806_v51, %s11666_s8  ;;  %v9742_v9 = vcombine.low %v1619_v53, %v1622_v44  ;;  %v13113_v16 = vpop.permute.xlu0 %3294  ;;  %v13115_v51 = vld [vmem:[#allocation2 + $0xd0] sm:$0xf] }
 0x107   : > { %834 = vst.msk [vmem:[#allocation2 + $0xa0] sm:$0xf] %vm280_vm0, %v644_v22  ;;  %v13096_v39 = vrot.slane %v1321_v42, 5  ;;  %v1327_v11 = vrot.slane %v1325_v60, 4  ;;  %334 = vst [vmem:[#allocation2 + $0xa8] sm:$0x1] %v333_v63  ;;  %3846 = vmatmul.mubr.bf16.gmra.mrb[4].mxu0 %v3561_v34 }
 0x108   : > { %1946 = vst.msk [vmem:[#allocation3 + $0x78] sm:$0xff] %vm1940_vm7, %v1903_v27  ;;  %3336 = vst.msk [vmem:[#allocation3 + $0x38] sm:$0xff] %vm1940_vm7, %v12870_v28  ;;  %v645_v6 = vrot.slane %v13050_v23, 4  ;;  %v1318_v31 = vor.u32 %v1317_v25, %v1314_v19  ;;  %v13101_v4 = vrot.slane %v1331_v61, 5  ;;  %v647_v21 = vshrl.u32 %v13066_v12, 16  ;;  %1721 = vrot.lane.b32.xlu1 %v9742_v9, %s11665_s30 }
 0x109   : > { %v1328_v38 = vor.u32 %v1327_v11, %v13096_v39  ;;  %v650_v55 = vshll.u32 %v13066_v12, 16  ;;  %v655_v32 = vshrl.u32 %v13074_v40, 16  ;;  %v658_v54 = vshll.u32 %v13074_v40, 16  ;;  %v13109_v28 = vld [vmem:[#allocation2 + $0xcc] sm:$0xf] }
 0x10a   : > { %v2695_v37 = vld [vmem:[#allocation2 + $0x9c] sm:$0xf]  ;;  %v1319_v35 = vrot.slane %v1318_v31, 4  ;;  %v13111_v23 = vrot.slane %v647_v21, 7  ;;  %v11560_v13 = vld [vmem:[#allocation2 + $0x64] sm:$0xf]  ;;  %v9826_v44 = vcombine.low %v13109_v28, %v13115_v51  ;;  %v1468_v11 = vpop.permute.xlu1 %1467 }
 0x10b   : > { %v9691_v26 = vcombine.low %v11559_v0, %v11560_v13  ;;  %v11561_v15 = vld [vmem:[#allocation2 + $0x6c] sm:$0xf]  ;;  %v11562_v53 = vld [vmem:[#allocation2 + $0x70] sm:$0xf]  ;;  %v3119_v10 = vshrl.u32 %v2695_v37, 16  ;;  %v3122_v58 = vshll.u32 %v2695_v37, 16 }
 0x10c   : > { %v9692_v12 = vcombine.low %v11561_v15, %v11562_v53  ;;  %v835_v18 = vld [vmem:[#allocation2 + $0xa4] sm:$0x1]  ;;  %v9727_v22 = vrot.slane %v13038_v52, 9  ;;  %v1625_v42 = vrot.slane %v13042_v29, 5  ;;  %v9854_v60 = vrot.slane %v2695_v37, 9  ;;  %1914 = vrot.lane.b32.xlu1 %v9758_v24, %s11667_s9  ;;  %1510 = vst.msk [vmem:[#allocation3 + $0x90] sm:$0xff] %vm1503_vm1, %v1468_v11 }
 0x10d   : > { %v836_v61 = vsel %vm11721_vm3, %v645_v6, %v835_v18  ;;  %v13121_v27 = vld [vmem:[#allocation2 + $0x9c] sm:$0xf]  ;;  %v1329_v46 = vrot.slane %v1328_v38, 4  ;;  %1012 = vst.msk [vmem:[#allocation3 + $0xc0] sm:$0xff] %vm1003_vm15, %v9691_v26  ;;  %v3121_v25 = vrot.slane %v3119_v10, 4  ;;  %v3124_v63 = vrot.slane %v3122_v58, 5 }
 0x10e   : > { %1013 = vst.msk [vmem:[#allocation3 + $0xd8] sm:$0xff] %vm1003_vm15, %v9692_v12  ;;  %v2696_v19 = vld [vmem:[#allocation2 + $0xa0] sm:$0xf]  ;;  %837 = vst [vmem:[#allocation2 + $0xa4] sm:$0x1] %v836_v61  ;;  %v1324_v9 = vsel %vm11790_vm13, %v1319_v35, %v13096_v39  ;;  %v9693_v6 = vcombine.low %v12749_v57, %v12757_v5  ;;  %v652_v0 = vor.u32 %v650_v55, %v13111_v23  ;;  %v9791_v15 = vrot.slane %v13121_v27, 9  ;;  %v13146_v12 = vpop.permute.xlu0 %2607 }
 0x10f   : > { %v13128_v34 = vld [vmem:[#allocation2 + $0xa0] sm:$0xf]  ;;  %v9822_v31 = vcombine.low %v2695_v37, %v2696_v19  ;;  %v3132_v21 = vshrl.u32 %v2696_v19, 16  ;;  %v3128_v38 = vshll.u32 %v2696_v19, 16  ;;  %v3565_v13 = vld [vmem:[#allocation3 + $0x38] sm:$0xff]  ;;  %v3445_v26 = vrot.slane %v2696_v19, 5 }
 0x110   : > { %v3125_v24 = vor.u32 %v3124_v63, %v3121_v25  ;;  %v1334_v39 = vsel %vm11790_vm13, %v1329_v46, %v13101_v4  ;;  %v838_v35 = vld [vmem:[#allocation2 + $0xa8] sm:$0xf]  ;;  %3853 = vmatprep.mubr.bf16.mxu0 %v3565_v13  ;;  %1014 = vst.msk [vmem:[#allocation3 + $0xf0] sm:$0xff] %vm1003_vm15, %v9693_v6  ;;  %v2523_v55 = vrot.slane %v13128_v34, 5  ;;  %v1626_v37 = vsel %vm11753_vm9, %v9727_v22, %v1625_v42  ;;  %v1712_v63 = vpop.permute.xlu1 %1711  ;;  %v11563_v6 = vld [vmem:[#allocation2 + $0x30] sm:$0xf] }
 0x111   : > { %v3564_v53 = vld [vmem:[#allocation3 + $0x30] sm:$0xff]  ;;  %2812 = vrot.lane.b32.xlu0 %v9822_v31, %s11665_s30  ;;  %v3130_v57 = vrot.slane %v3128_v38, 5  ;;  %v3134_v5 = vrot.slane %v3132_v21, 4  ;;  %v3446_v4 = vsel %vm11753_vm9, %v9854_v60, %v3445_v26  ;;  %v9711_v58 = vcombine.low %v1324_v9, %v1334_v39  ;;  %1754 = vst.msk [vmem:[#allocation3 + $0x90] sm:$0xff] %vm1747_vm6, %v1712_v63 }
 0x112   : > { %3854 = vmatmul.mubr.bf16.gmra.mrb[8].mxu0 %v3564_v53  ;;  %v3126_v10 = vrot.slane %v3125_v24, 4  ;;  %v653_v18 = vrot.slane %v13111_v23, 4  ;;  %v13151_v46 = vrot.slane %v655_v32, 7  ;;  %v839_v19 = vsel %vm11784_vm12, %v652_v0, %v838_v35  ;;  %v382_v24 = vld [vmem:[#allocation2 + $0xb0] sm:$0x1]  ;;  %v11421_v40 = vld [vmem:[%s15973_s1 + $0x88] sm:$0xff]  }
 0x113   : > { %v3135_v61 = vor.u32 %v3134_v5, %v3130_v57  ;;  %v1627_v25 = vrot.slane %v1625_v42, 4  ;;  %v3447_v11 = vrot.slane %v3445_v26, 4  ;;  %1479 = vrot.lane.b32.xlu1 %v9711_v58, %s11666_s8  ;;  %840 = vst [vmem:[#allocation2 + $0xa8] sm:$0xf] %v839_v19  ;;  %v1628_v22 = vrot.slane %v13044_v20, 5  ;;  %10610 = vmatprep.subr.bf16.mxu0 %v11421_v40 }
 0x114   : > { %v2030_v60 = vshrl.u32 %v11563_v6, 16  ;;  %v2033_v31 = vshll.u32 %v11563_v6, 16  ;;  %v3131_v32 = vsel %vm11790_vm13, %v3126_v10, %v3130_v57  ;;  %v13164_v42 = vsel %vm11753_vm9, %v9791_v15, %v2523_v55  ;;  %v13174_v57 = vpop.permute.xlu0 %2800  ;;  %v1905_v5 = vpop.permute.xlu1 %1904  ;;  %10611 = vmatpush3.bf16.msra.mxu0 %v11421_v40 }
 0x115   : > { %v2697_v23 = vld [vmem:[#allocation2 + $0xa4] sm:$0x1]  ;;  %v2525_v21 = vrot.slane %v2523_v55, 4  ;;  %v660_v20 = vor.u32 %v658_v54, %v13151_v46  ;;  %v3136_v38 = vrot.slane %v3135_v61, 4  ;;  %v1629_v35 = vsel %vm11753_vm9, %v1627_v25, %v1628_v22  ;;  %1947 = vst.msk [vmem:[#allocation3 + $0x90] sm:$0xff] %vm1940_vm7, %v1905_v5 }
 0x116   : > { %v13160_v9 = vld [vmem:[#allocation2 + $0xa4] sm:$0x1]  ;;  %v3138_v0 = vshll.u32 %v2697_v23, 16  ;;  %v3448_v13 = vrot.slane %v2697_v23, 5  ;;  %v2032_v53 = vrot.slane %v2030_v60, 4  ;;  %v2035_v15 = vrot.slane %v2033_v31, 5 }
 0x117   : > { %v2526_v26 = vrot.slane %v13160_v9, 5  ;;  %v661_v39 = vsel %vm11799_vm14, %v653_v18, %v660_v20  ;;  %v662_v10 = vrot.slane %v13151_v46, 4  ;;  %v9743_v58 = vcombine.low %v1626_v37, %v1629_v35  ;;  %v11564_v25 = vld [vmem:[#allocation2 + $0x34] sm:$0xf] }
 0x118   : > { %v3140_v54 = vrot.slane %v3138_v0, 5  ;;  %v3449_v55 = vsel %vm11753_vm9, %v3447_v11, %v3448_v13  ;;  %841 = vst.msk [vmem:[#allocation2 + $0xac] sm:$0xf] %vm280_vm0, %v661_v39  ;;  %v2036_v19 = vor.u32 %v2035_v15, %v2032_v53  ;;  %v2039_v63 = vshll.u32 %v11564_v25, 16  ;;  %v13208_v5 = vpop.permute.xlu0 %3296 }
 0x119   : > { %v9870_v18 = vcombine.low %v3446_v4, %v3449_v55  ;;  %v2527_v61 = vsel %vm11753_vm9, %v2525_v21, %v2526_v26  ;;  %1723 = vrot.lane.b32.xlu1 %v9743_v58, %s11665_s30  ;;  %v2043_v11 = vshrl.u32 %v11564_v25, 16  ;;  %v383_v6 = vsel %vm11732_vm5, 0, %v382_v24  ;;  %v13193_v4 = vld [vmem:[#allocation2 + $0x9c] sm:$0xf]  ;;  %v16102_v24 = vld [vmem:[#allocation7_spill] sm:$0xff] }
 0x11a   : > { %v3141_v22 = vsel %vm11790_vm13, %v3136_v38, %v3140_v54  ;;  %v9759_v37 = vcombine.low %v13121_v27, %v13128_v34  ;;  %v2698_v31 = vld [vmem:[#allocation2 + $0xa8] sm:$0xf]  ;;  %v2037_v23 = vrot.slane %v2036_v19, 4  ;;  %v2041_v21 = vrot.slane %v2039_v63, 5  ;;  %384 = vst [vmem:[#allocation2 + $0xb0] sm:$0x1] %v383_v6 }
 0x11b   : > { %v9838_v60 = vcombine.low %v3131_v32, %v3141_v22  ;;  %3553 = vst.msk [vmem:[#allocation3 + $0x118] sm:$0xff] %vm1003_vm15, %v9870_v18  ;;  %v13196_v20 = vld [vmem:[#allocation2 + $0xa8] sm:$0xf]  ;;  %v9694_v38 = vcombine.low %v12928_v17, %v12938_v7  ;;  %v9807_v0 = vcombine.low %v13164_v42, %v2527_v61  ;;  %v3143_v13 = vshrl.u32 %v2698_v31, 16  ;;  %v13201_v34 = vld [vmem:[#allocation2 + $0xa0] sm:$0xf] }
 0x11c   : > { %v3146_v26 = vshll.u32 %v2698_v31, 16  ;;  %v2045_v27 = vrot.slane %v2043_v11, 4  ;;  %v9855_v32 = vrot.slane %v2698_v31, 9  ;;  %v16103_v39 = vshll.u32 %v16102_v24, 16  ;;  %v13219_v11 = vld [vmem:[#allocation2 + $0xa4] sm:$0x1] }
 0x11d   : > { %3308 = vrot.lane.b32.xlu0 %v9838_v60, %s11667_s9  ;;  %v1336_v53 = vshrl.u32 %v13193_v4, 16  ;;  %v1339_v15 = vshll.u32 %v13193_v4, 16  ;;  %1015 = vst.msk [vmem:[#allocation3 + $0x108] sm:$0xff] %vm1003_vm15, %v9694_v38  ;;  %v3145_v7 = vrot.slane %v3143_v13, 4  ;;  %1916 = vrot.lane.b32.xlu1 %v9759_v37, %s11667_s9  ;;  %v9792_v40 = vrot.slane %v13196_v20, 9 }
 0x11e   : > { %v2051_v35 = vrot.slane %v16103_v39, 5  ;;  %v2046_v17 = vor.u32 %v2045_v27, %v2041_v21  ;;  %v3148_v42 = vrot.slane %v3146_v26, 5  ;;  %v2042_v55 = vsel %vm11790_vm13, %v2037_v23, %v2041_v21  ;;  %v335_v38 = vld [vmem:[#allocation2 + $0xb4] sm:$0x1]  ;;  %v419_v13 = vld [vmem:[%s11760_s29 + $0x70] sm:$0xf] }
 0x11f   : > { %v2699_v54 = vld [vmem:[#allocation2 + $0xac] sm:$0xf]  ;;  %v1338_v18 = vrot.slane %v1336_v53, 4  ;;  %v1341_v61 = vrot.slane %v1339_v15, 5  ;;  %v9695_v19 = vcombine.low %v13038_v52, %v13042_v29  ;;  %v1345_v6 = vshll.u32 %v13201_v34, 16 }
 0x120   : > { %v13215_v58 = vld [vmem:[#allocation2 + $0xac] sm:$0xf]  ;;  %v3156_v25 = vshrl.u32 %v2699_v54, 16  ;;  %v3452_v63 = vrot.slane %v2699_v54, 5  ;;  %v2047_v22 = vrot.slane %v2046_v17, 4  ;;  %v9823_v37 = vcombine.low %v2698_v31, %v2699_v54  ;;  %v13237_v17 = vpop.permute.xlu0 %2609 }
 0x121   : > { %2621 = vrot.lane.b32.xlu0 %v9807_v0, %s11666_s8  ;;  %v3149_v60 = vor.u32 %v3148_v42, %v3145_v7  ;;  %v3152_v23 = vshll.u32 %v2699_v54, 16  ;;  %v2530_v21 = vrot.slane %v13215_v58, 5  ;;  %1016 = vst.msk [vmem:[#allocation3 + $0x120] sm:$0xff] %vm1003_vm15, %v9695_v19  ;;  %v842_v26 = vld [vmem:[#allocation2 + $0xb0] sm:$0x1]  ;;  %v1342_v24 = vor.u32 %v1341_v61, %v1338_v18  ;;  %v1470_v7 = vpop.permute.xlu1 %1469 }
 0x122   : > { %v2052_v29 = vsel %vm11790_vm13, %v2047_v22, %v2051_v35  ;;  %v3158_v27 = vrot.slane %v3156_v25, 4  ;;  %v420_v39 = vld [vmem:[%s11760_s29 + $0x74] sm:$0xf]  ;;  %v843_v53 = vsel %vm11721_vm3, %v662_v10, %v842_v26  ;;  %v3454_v42 = vrot.slane %v3452_v63, 4  ;;  %1511 = vst.msk [vmem:[#allocation3 + $0xa8] sm:$0xff] %vm1503_vm1, %v1470_v7 }
 0x123   : > { %v9766_v31 = vcombine.low %v2042_v55, %v2052_v29  ;;  %v13235_v15 = vrot.slane %v3152_v23, 5  ;;  %844 = vst [vmem:[#allocation2 + $0xb0] sm:$0x1] %v843_v53  ;;  %v13239_v35 = vrot.slane %v3149_v60, 4  ;;  %v13241_v54 = vrot.slane %v2530_v21, 4 }
 0x124   : > { %v1347_v18 = vrot.slane %v1345_v6, 5  ;;  %v13246_v46 = vsel %vm11753_vm9, %v9855_v32, %v3452_v63  ;;  %v13252_v10 = vsel %vm11753_vm9, %v9792_v40, %v2530_v21  ;;  %v1349_v55 = vshrl.u32 %v13201_v34, 16 }
 0x125   : > { %2814 = vrot.lane.b32.xlu0 %v9823_v37, %s11665_s30  ;;  %2408 = vst.msk [vmem:[#allocation3 + $0x50] sm:$0xff] %vm1003_vm15, %v9766_v31  ;;  %v1355_v61 = vshll.u32 %v13219_v11, 16  ;;  %v3159_v19 = vor.u32 %v3158_v27, %v13235_v15  ;;  %v1343_v25 = vrot.slane %v1342_v24, 4  ;;  %v336_v32 = vsel %vm11721_vm3, 0, %v335_v38  ;;  %v13270_v24 = vpop.permute.xlu0 %2802 }
 0x126   : > { %2648 = vst.msk [vmem:[#allocation3 + $0x50] sm:$0xff] %vm1503_vm1, %v12906_v41  ;;  %v664_v63 = vshrl.u32 %v419_v13, 16  ;;  %v1351_v22 = vrot.slane %v1349_v55, 4  ;;  %337 = vst [vmem:[#allocation2 + $0xb4] sm:$0x1] %v336_v32  ;;  %v667_v6 = vshll.u32 %v419_v13, 16  ;;  %v1714_v13 = vpop.permute.xlu1 %1713 }
 0x127   : > { %2841 = vst.msk [vmem:[#allocation3 + $0x50] sm:$0xff] %vm1747_vm6, %v12952_v33  ;;  %v1357_v40 = vrot.slane %v1355_v61, 5  ;;  %v672_v37 = vshrl.u32 %v420_v39, 16  ;;  %v675_v41 = vshll.u32 %v420_v39, 16  ;;  %v9728_v23 = vrot.slane %v13193_v4, 9  ;;  %1755 = vst.msk [vmem:[#allocation3 + $0xa8] sm:$0xff] %vm1747_vm6, %v1714_v13 }
 0x128   : > { %3337 = vst.msk [vmem:[#allocation3 + $0x50] sm:$0xff] %vm1940_vm7, %v12992_v45  ;;  %v666_v60 = vrot.slane %v664_v63, 7  ;;  %v1632_v21 = vrot.slane %v13201_v34, 5  ;;  %v1352_v29 = vor.u32 %v1351_v22, %v1347_v18  ;;  %v1635_v26 = vrot.slane %v13219_v11, 5  ;;  %v11565_v33 = vld [vmem:[#allocation2 + $0x3c] sm:$0xf] }
 0x129   : > { %v13267_v38 = vrot.slane %v672_v37, 7  ;;  %v2054_v27 = vshrl.u32 %v11565_v33, 16  ;;  %v3155_v45 = vsel %vm11790_vm13, %v13239_v35, %v13235_v15  ;;  %v1348_v39 = vsel %vm11790_vm13, %v1343_v25, %v1347_v18  ;;  %v385_v35 = vld [vmem:[#allocation2 + $0xbc] sm:$0x1]  ;;  %v13285_v18 = vld [vmem:[#allocation2 + $0xa8] sm:$0xf] }
 0x12a   : > { %v670_v31 = vrot.slane %v666_v60, 4  ;;  %v1634_v53 = vrot.slane %v1632_v21, 4  ;;  %v2700_v7 = vld [vmem:[#allocation2 + $0xb0] sm:$0x1]  ;;  %v3160_v55 = vrot.slane %v3159_v19, 4  ;;  %v1353_v61 = vrot.slane %v1352_v29, 4 }
 0x12b   : > { %v13279_v11 = vld [vmem:[#allocation2 + $0xb0] sm:$0x1]  ;;  %v669_v32 = vor.u32 %v667_v6, %v666_v60  ;;  %v677_v63 = vor.u32 %v675_v41, %v13267_v38  ;;  %v3162_v22 = vshll.u32 %v2700_v7, 16  ;;  %v3455_v37 = vrot.slane %v2700_v7, 5  ;;  %v1907_v41 = vpop.permute.xlu1 %1906 }
 0x12c   : > { %v2533_v0 = vrot.slane %v13279_v11, 5  ;;  %v1633_v15 = vsel %vm11753_vm9, %v9728_v23, %v1632_v21  ;;  %v1358_v25 = vsel %vm11790_vm13, %v1353_v61, %v1357_v40  ;;  %v679_v6 = vrot.slane %v13267_v38, 4  ;;  %1948 = vst.msk [vmem:[#allocation3 + $0xa8] sm:$0xff] %vm1940_vm7, %v1907_v41  ;;  %v422_v38 = vld [vmem:[%s11760_s29 + $0x7c] sm:$0xf] }
 0x12d   : > { %v678_v19 = vsel %vm11799_vm14, %v670_v31, %v677_v63  ;;  %v1636_v60 = vsel %vm11753_vm9, %v1634_v53, %v1635_v26  ;;  %v3164_v29 = vrot.slane %v3162_v22, 5  ;;  %v3456_v13 = vsel %vm11753_vm9, %v3454_v42, %v3455_v37  ;;  %v845_v21 = vld [vmem:[#allocation2 + $0xb4] sm:$0xf]  ;;  %v13304_v63 = vpop.permute.xlu0 %3298  ;;  %v13309_v37 = vld [vmem:[#allocation2 + $0xac] sm:$0xf] }
 0x12e   : > { %v9712_v23 = vcombine.low %v1348_v39, %v1358_v25  ;;  %848 = vst.msk [vmem:[#allocation2 + $0xb8] sm:$0xf] %vm280_vm0, %v678_v19  ;;  %v2056_v7 = vrot.slane %v2054_v27, 4  ;;  %v9871_v40 = vcombine.low %v13246_v46, %v3456_v13  ;;  %v2534_v31 = vsel %vm11753_vm9, %v13241_v54, %v2533_v0  ;;  %v11566_v39 = vld [vmem:[#allocation2 + $0x40] sm:$0xf] }
 0x12f   : > { %v846_v26 = vsel %vm11784_vm12, %v669_v32, %v845_v21  ;;  %v9744_v53 = vcombine.low %v1633_v15, %v1636_v60  ;;  %v3568_v61 = vld [vmem:[#allocation3 + $0x50] sm:$0xff]  ;;  %v3165_v42 = vsel %vm11790_vm13, %v3160_v55, %v3164_v29  ;;  %v2057_v27 = vshll.u32 %v11565_v33, 16  ;;  %v3567_v0 = vld [vmem:[#allocation3 + $0x48] sm:$0xff]  ;;  %v13320_v29 = vld [vmem:[#allocation2 + $0xb0] sm:$0x1] }
 0x130   : > { %1481 = vrot.lane.b32.xlu1 %v9712_v23, %s11666_s8  ;;  %847 = vst [vmem:[#allocation2 + $0xb4] sm:$0xf] %v846_v26  ;;  %v2063_v46 = vshll.u32 %v11566_v39, 16  ;;  %v2067_v22 = vshrl.u32 %v11566_v39, 16  ;;  %3861 = vmatprep.mubr.bf16.mxu0 %v3568_v61  ;;  %v9839_v54 = vcombine.low %v3155_v45, %v3165_v42  ;;  %3554 = vst.msk [vmem:[#allocation3 + $0x130] sm:$0xff] %vm1003_vm15, %v9871_v40  ;;  %v386_v32 = vsel %vm11732_vm5, 0, %v385_v35 }
 0x131   : > { %v9760_v55 = vcombine.low %v13196_v20, %v13215_v58  ;;  %v1360_v15 = vshrl.u32 %v13285_v18, 16  ;;  %v338_v25 = vld [vmem:[#allocation2 + $0xc0] sm:$0x1]  ;;  %3862 = vmatmul.mubr.bf16.gmra.mrb[12].mxu0 %v3567_v0  ;;  %v2059_v33 = vrot.slane %v2057_v27, 5  ;;  %387 = vst [vmem:[#allocation2 + $0xbc] sm:$0x1] %v386_v32  ;;  %v9808_v45 = vcombine.low %v13252_v10, %v2534_v31  ;;  %v1472_v26 = vpop.permute.xlu1 %1471 }
 0x132   : > { %v2065_v19 = vrot.slane %v2063_v46, 5  ;;  %v2069_v60 = vrot.slane %v2067_v22, 4  ;;  %v1363_v41 = vshll.u32 %v13285_v18, 16  ;;  %3310 = vrot.lane.b32.xlu0 %v9839_v54, %s11667_s9  ;;  %v1369_v13 = vshll.u32 %v13309_v37, 16  ;;  %v16104_v42 = vld [vmem:[#allocation9_spill] sm:$0xff]  ;;  %v13331_v46 = vpop.permute.xlu0 %2611  ;;  %1512 = vst.msk [vmem:[#allocation3 + $0xc0] sm:$0xff] %vm1503_vm1, %v1472_v26 }
 0x133   : > { %v1362_v35 = vrot.slane %v1360_v15, 4  ;;  %v1373_v20 = vshrl.u32 %v13309_v37, 16  ;;  %v2060_v58 = vor.u32 %v2059_v33, %v2056_v7  ;;  %v339_v40 = vsel %vm11721_vm3, 0, %v338_v25 }
 0x134   : > { %1725 = vrot.lane.b32.xlu1 %v9744_v53, %s11665_s30  ;;  %v2070_v23 = vor.u32 %v2069_v60, %v2065_v19  ;;  %v1365_v21 = vrot.slane %v1363_v41, 5  ;;  %v16105_v27 = vshll.u32 %v16104_v42, 16  ;;  %v13329_v31 = vrot.slane %v1369_v13, 5  ;;  %340 = vst [vmem:[#allocation2 + $0xc0] sm:$0x1] %v339_v40 }
 0x135   : > { %v2702_v61 = vld [vmem:[#allocation2 + $0xb8] sm:$0xf]  ;;  %v1375_v39 = vrot.slane %v1373_v20, 4  ;;  %v9696_v7 = vcombine.low %v13193_v4, %v13201_v34  ;;  %v2061_v22 = vrot.slane %v2060_v58, 4  ;;  %v1379_v54 = vshll.u32 %v13320_v29, 16 }
 0x136   : > { %v2075_v10 = vrot.slane %v16105_v27, 5  ;;  %v3180_v53 = vshrl.u32 %v2702_v61, 16  ;;  %v2071_v0 = vrot.slane %v2070_v23, 4  ;;  %2623 = vrot.lane.b32.xlu0 %v9808_v45, %s11666_s8  ;;  %v3459_v15 = vrot.slane %v2702_v61, 5  ;;  %v13338_v33 = vld [vmem:[#allocation2 + $0xb8] sm:$0xf] }
 0x137   : > { %v2701_v32 = vld [vmem:[#allocation2 + $0xb4] sm:$0xf]  ;;  %v3176_v25 = vshll.u32 %v2702_v61, 16  ;;  %v1366_v60 = vor.u32 %v1365_v21, %v1362_v35  ;;  %v1376_v41 = vor.u32 %v1375_v39, %v13329_v31  ;;  %1017 = vst.msk [vmem:[#allocation3 + $0x138] sm:$0xff] %vm1003_vm15, %v9696_v7  ;;  %v2066_v45 = vsel %vm11790_vm13, %v2061_v22, %v2065_v19  ;;  %v421_v40 = vld [vmem:[%s11760_s29 + $0x78] sm:$0xf]  ;;  %v1716_v19 = vpop.permute.xlu1 %1715 }
 0x138   : > { %v9824_v13 = vcombine.low %v2701_v32, %v2702_v61  ;;  %v3167_v4 = vshrl.u32 %v2701_v32, 16  ;;  %v3170_v34 = vshll.u32 %v2701_v32, 16  ;;  %v9856_v20 = vrot.slane %v2701_v32, 9  ;;  %1918 = vrot.lane.b32.xlu1 %v9760_v55, %s11667_s9  ;;  %v849_v35 = vld [vmem:[#allocation2 + $0xbc] sm:$0x1]  ;;  %1756 = vst.msk [vmem:[#allocation3 + $0xc0] sm:$0xff] %vm1747_vm6, %v1716_v19 }
 0x139   : > { %v2076_v23 = vsel %vm11790_vm13, %v2071_v0, %v2075_v10  ;;  %v13348_v21 = vrot.slane %v3176_v25, 5  ;;  %v850_v61 = vsel %vm11721_vm3, %v679_v6, %v849_v35  ;;  %v13355_v42 = vld [vmem:[#allocation2 + $0xb4] sm:$0xf]  ;;  %v2537_v27 = vrot.slane %v13338_v33, 5  ;;  %v13364_v0 = vpop.permute.xlu0 %2804 }
 0x13a   : > { %v9767_v26 = vcombine.low %v2066_v45, %v2076_v23  ;;  %v3169_v55 = vrot.slane %v3167_v4, 4  ;;  %v13360_v10 = vsel %vm11753_vm9, %v9856_v20, %v3459_v15  ;;  %v3461_v39 = vrot.slane %v3459_v15, 4  ;;  %2816 = vrot.lane.b32.xlu0 %v9824_v13, %s11665_s30  ;;  %851 = vst [vmem:[#allocation2 + $0xbc] sm:$0x1] %v850_v61 }
 0x13b   : > { %v3172_v7 = vrot.slane %v3170_v34, 5  ;;  %v3182_v22 = vrot.slane %v3180_v53, 4  ;;  %v1367_v6 = vrot.slane %v1366_v60, 4  ;;  %v1377_v32 = vrot.slane %v1376_v41, 4  ;;  %v1909_v45 = vpop.permute.xlu1 %1908 }
 0x13c   : > { %2409 = vst.msk [vmem:[#allocation3 + $0x68] sm:$0xff] %vm1003_vm15, %v9767_v26  ;;  %v1381_v25 = vrot.slane %v1379_v54, 5  ;;  %v681_v4 = vshrl.u32 %v421_v40, 16  ;;  %v9793_v34 = vrot.slane %v13355_v42, 9  ;;  %v684_v53 = vshll.u32 %v421_v40, 16 }
 0x13d   : > { %2649 = vst.msk [vmem:[#allocation3 + $0x68] sm:$0xff] %vm1503_vm1, %v13031_v50  ;;  %v3173_v15 = vor.u32 %v3172_v7, %v3169_v55  ;;  %v3183_v13 = vor.u32 %v3182_v22, %v13348_v21  ;;  %v1372_v20 = vsel %vm11790_vm13, %v1367_v6, %v13329_v31  ;;  %v689_v41 = vshrl.u32 %v422_v38, 16  ;;  %v852_v26 = vld [vmem:[#allocation2 + $0xc0] sm:$0xf]  ;;  %v13391_v6 = vpop.permute.xlu0 %3300 }
 0x13e   : > { %2842 = vst.msk [vmem:[#allocation3 + $0x68] sm:$0xff] %vm1747_vm6, %v13076_v48  ;;  %v1382_v54 = vsel %vm11790_vm13, %v1377_v32, %v1381_v25  ;;  %v683_v60 = vrot.slane %v681_v4, 7  ;;  %v2539_v23 = vrot.slane %v2537_v27, 4  ;;  %v692_v40 = vshll.u32 %v422_v38, 16 }
 0x13f   : > { %v3174_v50 = vrot.slane %v3173_v15, 4  ;;  %v9713_v35 = vcombine.low %v1372_v20, %v1382_v54  ;;  %3338 = vst.msk [vmem:[#allocation3 + $0x68] sm:$0xff] %vm1940_vm7, %v13113_v16  ;;  %1949 = vst.msk [vmem:[#allocation3 + $0xc0] sm:$0xff] %vm1940_vm7, %v1909_v45  ;;  %v13382_v55 = vrot.slane %v689_v41, 7  ;;  %v9729_v31 = vrot.slane %v13285_v18, 9 }
 0x140   : > { %v686_v48 = vor.u32 %v684_v53, %v683_v60  ;;  %v687_v61 = vrot.slane %v683_v60, 4  ;;  %v3184_v19 = vrot.slane %v3183_v13, 4  ;;  %v13387_v7 = vsel %vm11753_vm9, %v9793_v34, %v2537_v27  ;;  %v11567_v16 = vld [vmem:[#allocation2 + $0x48] sm:$0xf] }
 0x141   : > { %1483 = vrot.lane.b32.xlu1 %v9713_v35, %s11666_s8  ;;  %v1639_v22 = vrot.slane %v13309_v37, 5  ;;  %v2078_v38 = vshrl.u32 %v11567_v16, 16  ;;  %v2703_v32 = vld [vmem:[#allocation2 + $0xbc] sm:$0x1]  ;;  %v694_v4 = vor.u32 %v692_v40, %v13382_v55  ;;  %v1642_v13 = vrot.slane %v13320_v29, 5 }
 0x142   : > { %v13393_v25 = vld [vmem:[#allocation2 + $0xbc] sm:$0x1]  ;;  %v853_v15 = vsel %vm11784_vm12, %v686_v48, %v852_v26  ;;  %v2081_v27 = vshll.u32 %v11567_v16, 16  ;;  %v3179_v34 = vsel %vm11790_vm13, %v3174_v50, %v13348_v21  ;;  %v3186_v53 = vshll.u32 %v2703_v32, 16  ;;  %v388_v50 = vld [vmem:[#allocation2 + $0xc8] sm:$0x1] }
 0x143   : > { %v3462_v20 = vrot.slane %v2703_v32, 5  ;;  %v2540_v54 = vrot.slane %v13393_v25, 5  ;;  %854 = vst [vmem:[#allocation2 + $0xc0] sm:$0xf] %v853_v15  ;;  %v695_v60 = vsel %vm11799_vm14, %v687_v61, %v694_v4  ;;  %v1640_v41 = vsel %vm11753_vm9, %v9729_v31, %v1639_v22  ;;  %v3570_v26 = vld [vmem:[#allocation3 + $0x60] sm:$0xff] }
 0x144   : > { %v1641_v43 = vrot.slane %v1639_v22, 4  ;;  %v2080_v45 = vrot.slane %v2078_v38, 4  ;;  %v3188_v35 = vrot.slane %v3186_v53, 5  ;;  %v696_v40 = vrot.slane %v13382_v55, 4  ;;  %855 = vst.msk [vmem:[#allocation2 + $0xc4] sm:$0xf] %vm280_vm0, %v695_v60  ;;  %v13420_v53 = vpop.permute.xlu0 %2613 }
 0x145   : > { %v3463_v29 = vsel %vm11753_vm9, %v3461_v39, %v3462_v20  ;;  %v2083_v21 = vrot.slane %v2081_v27, 5  ;;  %v2541_v61 = vsel %vm11753_vm9, %v2539_v23, %v2540_v54  ;;  %v11568_v22 = vld [vmem:[#allocation2 + $0x4c] sm:$0xf]  ;;  %v13416_v32 = vld [vmem:[#allocation2 + $0xb4] sm:$0xf]  ;;  %v389_v20 = vsel %vm11732_vm5, 0, %v388_v50 }
 0x146   : > { %v9872_v48 = vcombine.low %v13360_v10, %v3463_v29  ;;  %v1643_v31 = vsel %vm11753_vm9, %v1641_v43, %v1642_v13  ;;  %v2087_v16 = vshll.u32 %v11568_v22, 16  ;;  %v3571_v38 = vld [vmem:[#allocation3 + $0x68] sm:$0xff]  ;;  %v3189_v39 = vsel %vm11790_vm13, %v3184_v19, %v3188_v35  ;;  %v13426_v54 = vld [vmem:[#allocation2 + $0xb8] sm:$0xf]  ;;  %390 = vst [vmem:[#allocation2 + $0xc8] sm:$0x1] %v389_v20 }
 0x147   : > { %v9745_v4 = vcombine.low %v1640_v41, %v1643_v31  ;;  %v2084_v15 = vor.u32 %v2083_v21, %v2080_v45  ;;  %v2091_v27 = vshrl.u32 %v11568_v22, 16  ;;  %3869 = vmatprep.mubr.bf16.mxu0 %v3571_v38  ;;  %v9840_v10 = vcombine.low %v3179_v34, %v3189_v39  ;;  %v1474_v38 = vpop.permute.xlu1 %1473 }
 0x148   : > { %3555 = vst.msk [vmem:[#allocation3 + $0x148] sm:$0xff] %vm1003_vm15, %v9872_v48  ;;  %v2089_v13 = vrot.slane %v2087_v16, 5  ;;  %3870 = vmatmul.mubr.bf16.gmra.mrb[16].mxu0 %v3570_v26  ;;  %v9761_v41 = vcombine.low %v13355_v42, %v13338_v33  ;;  %v1384_v34 = vshrl.u32 %v13416_v32, 16  ;;  %v9809_v43 = vcombine.low %v13387_v7, %v2541_v61 }
 0x149   : > { %1727 = vrot.lane.b32.xlu1 %v9745_v4, %s11665_s30  ;;  %v2085_v19 = vrot.slane %v2084_v15, 4  ;;  %v2093_v60 = vrot.slane %v2091_v27, 4  ;;  %3312 = vrot.lane.b32.xlu0 %v9840_v10, %s11667_s9  ;;  %v16107_v35 = vshll.u32 %v16106_v2, 16  ;;  %v1387_v50 = vshll.u32 %v13416_v32, 16  ;;  %1513 = vst.msk [vmem:[#allocation3 + $0xd8] sm:$0xff] %vm1503_vm1, %v1474_v38  ;;  %v13450_v2 = vpop.permute.xlu0 %2806 }
 0x14a   : > { %v2704_v45 = vld [vmem:[#allocation2 + $0xc0] sm:$0xf]  ;;  %v9697_v26 = vcombine.low %v13285_v18, %v13309_v37  ;;  %v1393_v16 = vshll.u32 %v13426_v54, 16  ;;  %v1386_v27 = vrot.slane %v1384_v34, 4  ;;  %v3215_v55 = vshrl.u32 %v13109_v28, 16 }
 0x14b   : > { %v2099_v29 = vrot.slane %v16107_v35, 5  ;;  %v13436_v21 = vld [vmem:[#allocation2 + $0xc0] sm:$0xf]  ;;  %v3191_v48 = vshrl.u32 %v2704_v45, 16  ;;  %v3194_v31 = vshll.u32 %v2704_v45, 16  ;;  %v9857_v22 = vrot.slane %v2704_v45, 9 }
 0x14c   : > { %v2705_v39 = vld [vmem:[#allocation2 + $0xc4] sm:$0xf]  ;;  %v2090_v7 = vsel %vm11790_vm13, %v2085_v19, %v2089_v13  ;;  %v2094_v61 = vor.u32 %v2093_v60, %v2089_v13  ;;  %v9794_v15 = vrot.slane %v13436_v21, 9  ;;  %1018 = vst.msk [vmem:[#allocation3 + $0x150] sm:$0xff] %vm1003_vm15, %v9697_v26  ;;  %v1389_v38 = vrot.slane %v1387_v50, 5 }
 0x14d   : > { %v13444_v4 = vld [vmem:[#allocation2 + $0xc4] sm:$0xf]  ;;  %v9825_v18 = vcombine.low %v2704_v45, %v2705_v39  ;;  %v3204_v37 = vshrl.u32 %v2705_v39, 16  ;;  %v3466_v10 = vrot.slane %v2705_v39, 5  ;;  %v3193_v20 = vrot.slane %v3191_v48, 4  ;;  %1920 = vrot.lane.b32.xlu1 %v9761_v41, %s11667_s9  ;;  %2625 = vrot.lane.b32.xlu0 %v9809_v43, %s11666_s8  ;;  %v1718_v48 = vpop.permute.xlu1 %1717 }
 0x14e   : > { %v2095_v13 = vrot.slane %v2094_v61, 4  ;;  %v3196_v19 = vrot.slane %v3194_v31, 5  ;;  %v3200_v60 = vshll.u32 %v2705_v39, 16  ;;  %v2544_v35 = vrot.slane %v13444_v4, 5  ;;  %v856_v23 = vld [vmem:[#allocation2 + $0xc8] sm:$0x1] }
 0x14f   : > { %v13456_v34 = vsel %vm11753_vm9, %v9857_v22, %v3466_v10  ;;  %v13458_v26 = vrot.slane %v3466_v10, 4  ;;  %v3206_v45 = vrot.slane %v3204_v37, 4  ;;  %v906_v39 = vld [vmem:[#allocation2 + $0xbc] sm:$0x1]  ;;  %1757 = vst.msk [vmem:[#allocation3 + $0xd8] sm:$0xff] %vm1747_vm6, %v1718_v48  ;;  %v857_v50 = vsel %vm11721_vm3, %v696_v40, %v856_v23  ;;  %v13481_v40 = vpop.permute.xlu0 %3302 }
 0x150   : > { %v2100_v41 = vsel %vm11790_vm13, %v2095_v13, %v2099_v29  ;;  %v3197_v58 = vor.u32 %v3196_v19, %v3193_v20  ;;  %v13462_v43 = vrot.slane %v3200_v60, 5  ;;  %v13466_v31 = vsel %vm11753_vm9, %v9794_v15, %v2544_v35  ;;  %858 = vst [vmem:[#allocation2 + $0xc8] sm:$0x1] %v857_v50 }
 0x151   : > { %v9768_v22 = vcombine.low %v2090_v7, %v2100_v41  ;;  %v2546_v61 = vrot.slane %v2544_v35, 4  ;;  %v1390_v37 = vor.u32 %v1389_v38, %v1386_v27  ;;  %2818 = vrot.lane.b32.xlu0 %v9825_v18, %s11665_s30  ;;  %v1395_v15 = vrot.slane %v1393_v16, 5  ;;  %v1911_v23 = vpop.permute.xlu1 %1910 }
 0x152   : > { %v13474_v29 = vrot.slane %v3197_v58, 4  ;;  %v3207_v10 = vor.u32 %v3206_v45, %v13462_v43  ;;  %v1397_v20 = vshrl.u32 %v13426_v54, 16  ;;  %v1403_v13 = vshll.u32 %v906_v39, 16  ;;  %1950 = vst.msk [vmem:[#allocation3 + $0xd8] sm:$0xff] %vm1940_vm7, %v1911_v23 }
 0x153   : > { %2410 = vst.msk [vmem:[#allocation3 + $0x80] sm:$0xff] %vm1003_vm15, %v9768_v22  ;;  %v1391_v7 = vrot.slane %v1390_v37, 4  ;;  %v3218_v1 = vshll.u32 %v13109_v28, 16  ;;  %v3228_v18 = vshrl.u32 %v13115_v51, 16  ;;  %v3473_v35 = vrot.slane %v13115_v51, 5 }
 0x154   : > { %2650 = vst.msk [vmem:[#allocation3 + $0x80] sm:$0xff] %vm1503_vm1, %v13146_v12  ;;  %v3203_v58 = vsel %vm11790_vm13, %v13474_v29, %v13462_v43  ;;  %v3208_v16 = vrot.slane %v3207_v10, 4  ;;  %v1399_v27 = vrot.slane %v1397_v20, 4  ;;  %v1405_v60 = vrot.slane %v1403_v13, 5  ;;  %v11569_v22 = vld [vmem:[#allocation2 + $0x54] sm:$0xf] }
 0x155   : > { %2843 = vst.msk [vmem:[#allocation3 + $0x80] sm:$0xff] %vm1747_vm6, %v13174_v57  ;;  %v1396_v19 = vsel %vm11790_vm13, %v1391_v7, %v1395_v15  ;;  %v9858_v12 = vrot.slane %v13109_v28, 9  ;;  %v9730_v38 = vrot.slane %v13416_v32, 9  ;;  %v1646_v48 = vrot.slane %v13426_v54, 5 }
 0x156   : > { %v1400_v45 = vor.u32 %v1399_v27, %v1395_v15  ;;  %3339 = vst.msk [vmem:[#allocation3 + $0x80] sm:$0xff] %vm1940_vm7, %v13208_v5  ;;  %v1649_v41 = vrot.slane %v906_v39, 5  ;;  %v13505_v43 = vrot.slane %v3473_v35, 4  ;;  %v2102_v50 = vshrl.u32 %v11569_v22, 16  ;;  %v11570_v5 = vld [vmem:[#allocation2 + $0x58] sm:$0xf] }
 0x157   : > { %v13503_v57 = vsel %vm11753_vm9, %v9858_v12, %v3473_v35  ;;  %v2105_v37 = vshll.u32 %v11569_v22, 16  ;;  %v1647_v10 = vsel %vm11753_vm9, %v9730_v38, %v1646_v48  ;;  %v1648_v15 = vrot.slane %v1646_v48, 4  ;;  %v2706_v7 = vld [vmem:[#allocation2 + $0xc8] sm:$0x1]  ;;  %v13513_v12 = vpop.permute.xlu0 %2615 }
 0x158   : > { %v1401_v29 = vrot.slane %v1400_v45, 4  ;;  %v2111_v20 = vshll.u32 %v11570_v5, 16  ;;  %v13509_v13 = vld [vmem:[#allocation2 + $0xc8] sm:$0x1]  ;;  %v2104_v39 = vrot.slane %v2102_v50, 4  ;;  %v9762_v27 = vcombine.low %v13436_v21, %v13444_v4  ;;  %v1476_v52 = vpop.permute.xlu1 %1475 }
 0x159   : > { %v2107_v23 = vrot.slane %v2105_v37, 5  ;;  %v9698_v35 = vcombine.low %v13416_v32, %v13426_v54  ;;  %v3210_v45 = vshll.u32 %v2706_v7, 16  ;;  %v3469_v22 = vrot.slane %v2706_v7, 5  ;;  %1514 = vst.msk [vmem:[#allocation3 + $0xf0] sm:$0xff] %vm1503_vm1, %v1476_v52 }
 0x15a   : > { %v2547_v48 = vrot.slane %v13509_v13, 5  ;;  %v1406_v36 = vsel %vm11790_vm13, %v1401_v29, %v1405_v60  ;;  %v1650_v50 = vsel %vm11753_vm9, %v1648_v15, %v1649_v41  ;;  %v13523_v47 = vrot.slane %v2111_v20, 5  ;;  %v3573_v60 = vld [vmem:[#allocation3 + $0x78] sm:$0xff] }
 0x15b   : > { %v2108_v37 = vor.u32 %v2107_v23, %v2104_v39  ;;  %1019 = vst.msk [vmem:[#allocation3 + $0x168] sm:$0xff] %vm1003_vm15, %v9698_v35  ;;  %v3212_v32 = vrot.slane %v3210_v45, 5  ;;  %v3470_v54 = vsel %vm11753_vm9, %v13458_v26, %v3469_v22  ;;  %v9714_v38 = vcombine.low %v1396_v19, %v1406_v36  ;;  %v2709_v39 = vld [vmem:[#allocation2 + $0xd4] sm:$0x1]  ;;  %v16108_v26 = vld [vmem:[#allocation11_spill] sm:$0xff] }
 0x15c   : > { %v2548_v7 = vsel %vm11753_vm9, %v2546_v61, %v2547_v48  ;;  %v9873_v29 = vcombine.low %v13456_v34, %v3470_v54  ;;  %v9746_v15 = vcombine.low %v1647_v10, %v1650_v50  ;;  %v2115_v35 = vshrl.u32 %v11570_v5, 16  ;;  %v11571_v19 = vld [vmem:[#allocation2 + $0xd0] sm:$0xf]  ;;  %v13545_v10 = vpop.permute.xlu0 %2808 }
 0x15d   : > { %v9810_v41 = vcombine.low %v13466_v31, %v2548_v7  ;;  %v2109_v20 = vrot.slane %v2108_v37, 4  ;;  %v3574_v52 = vld [vmem:[#allocation3 + $0x80] sm:$0xff]  ;;  %v3213_v23 = vsel %vm11790_vm13, %v3208_v16, %v3212_v32  ;;  %1485 = vrot.lane.b32.xlu1 %v9714_v38, %s11666_s8  ;;  %v16109_v45 = vshll.u32 %v16108_v26, 16  ;;  %v11572_v32 = vld [vmem:[#allocation2 + $0x60] sm:$0xf] }
 0x15e   : > { %v3217_v61 = vrot.slane %v3215_v55, 4  ;;  %3877 = vmatprep.mubr.bf16.mxu0 %v3574_v52  ;;  %v9841_v36 = vcombine.low %v3203_v58, %v3213_v23  ;;  %3556 = vst.msk [vmem:[#allocation3 + $0x160] sm:$0xff] %vm1003_vm15, %v9873_v29  ;;  %v3220_v31 = vrot.slane %v3218_v1, 5  ;;  %v3224_v16 = vshll.u32 %v11571_v19, 16  ;;  %v1720_v48 = vpop.permute.xlu1 %1719  ;;  %v11573_v29 = vld [vmem:[#allocation2 + $0x64] sm:$0xf] }
 0x15f   : > { %v2123_v22 = vrot.slane %v16109_v45, 5  ;;  %v2114_v34 = vsel %vm11790_vm13, %v2109_v20, %v13523_v47  ;;  %3878 = vmatmul.mubr.bf16.gmra.mrb[20].mxu0 %v3573_v60  ;;  %v2117_v5 = vrot.slane %v2115_v35, 4  ;;  %v3230_v55 = vrot.slane %v3228_v18, 4  ;;  %1758 = vst.msk [vmem:[#allocation3 + $0xf0] sm:$0xff] %vm1747_vm6, %v1720_v48 }
 0x160   : > { %v3234_v38 = vshll.u32 %v2709_v39, 16  ;;  %v3476_v58 = vrot.slane %v2709_v39, 5  ;;  %3314 = vrot.lane.b32.xlu0 %v9841_v36, %s11667_s9  ;;  %v3221_v50 = vor.u32 %v3220_v31, %v3217_v61  ;;  %v3226_v37 = vrot.slane %v3224_v16, 5 }
 0x161   : > { %v2126_v54 = vshrl.u32 %v11572_v32, 16  ;;  %v2129_v7 = vshll.u32 %v11572_v32, 16  ;;  %1729 = vrot.lane.b32.xlu1 %v9746_v15, %s11665_s30  ;;  %v2118_v1 = vor.u32 %v2117_v5, %v13523_v47  ;;  %v2135_v20 = vshll.u32 %v11573_v29, 16  ;;  %v11574_v5 = vld [vmem:[#allocation2 + $0x6c] sm:$0xf] }
 0x162   : > { %v3236_v60 = vrot.slane %v3234_v38, 5  ;;  %v3477_v18 = vsel %vm11753_vm9, %v13505_v43, %v3476_v58  ;;  %v3222_v39 = vrot.slane %v3221_v50, 4  ;;  %v3231_v52 = vor.u32 %v3230_v55, %v3226_v37  ;;  %v1913_v31 = vpop.permute.xlu1 %1912  ;;  %v16110_v43 = vld [vmem:[#allocation12_spill] sm:$0xff] }
 0x163   : > { %v9874_v23 = vcombine.low %v13503_v57, %v3477_v18  ;;  %v2128_v35 = vrot.slane %v2126_v54, 4  ;;  %v2119_v26 = vrot.slane %v2118_v1, 4  ;;  %v2131_v45 = vrot.slane %v2129_v7, 5  ;;  %v13563_v57 = vpop.permute.xlu0 %3304  ;;  %1951 = vst.msk [vmem:[#allocation3 + $0xf0] sm:$0xff] %vm1940_vm7, %v1913_v31  ;;  %v11575_v54 = vld [vmem:[#allocation2 + $0x70] sm:$0xf] }
 0x164   : > { %v2137_v61 = vrot.slane %v2135_v20, 5  ;;  %v2139_v36 = vshrl.u32 %v11573_v29, 16  ;;  %2627 = vrot.lane.b32.xlu0 %v9810_v41, %s11666_s8  ;;  %v3227_v47 = vsel %vm11790_vm13, %v3222_v39, %v3226_v37  ;;  %v3232_v15 = vrot.slane %v3231_v52, 4 }
 0x165   : > { %3557 = vst.msk [vmem:[#allocation3 + $0x178] sm:$0xff] %vm1003_vm15, %v9874_v23  ;;  %v16111_v19 = vshll.u32 %v16110_v43, 16  ;;  %v2150_v55 = vshrl.u32 %v11574_v5, 16  ;;  %v2124_v38 = vsel %vm11790_vm13, %v2119_v26, %v2123_v22  ;;  %1922 = vrot.lane.b32.xlu1 %v9762_v27, %s11667_s9  ;;  %v2132_v41 = vor.u32 %v2131_v45, %v2128_v35 }
 0x166   : > { %v2141_v58 = vrot.slane %v2139_v36, 4  ;;  %v2153_v48 = vshll.u32 %v11574_v5, 16  ;;  %v9769_v50 = vcombine.low %v2114_v34, %v2124_v38  ;;  %v3237_v37 = vsel %vm11790_vm13, %v3232_v15, %v3236_v60  ;;  %v11576_v60 = vld [vmem:[#allocation2 + $0x78] sm:$0xf]  ;;  %v11578_v38 = vld [vmem:[#allocation2 + $0x84] sm:$0xf] }
 0x167   : > { %v2147_v16 = vrot.slane %v16111_v19, 5  ;;  %v2152_v32 = vrot.slane %v2150_v55, 4  ;;  %v2159_v7 = vshll.u32 %v11575_v54, 16  ;;  %v9842_v1 = vcombine.low %v3227_v47, %v3237_v37 }
 0x168   : > { %v2133_v18 = vrot.slane %v2132_v41, 4  ;;  %v2142_v29 = vor.u32 %v2141_v58, %v2137_v61  ;;  %v2155_v20 = vrot.slane %v2153_v48, 5  ;;  %2820 = vrot.lane.b32.xlu0 %v9826_v44, %s11665_s30  ;;  %2411 = vst.msk [vmem:[#allocation3 + $0x98] sm:$0xff] %vm1003_vm15, %v9769_v50  ;;  %v2163_v22 = vshrl.u32 %v11575_v54, 16  ;;  %v11577_v44 = vld [vmem:[#allocation2 + $0x7c] sm:$0xf] }
 0x169   : > { %v2161_v27 = vrot.slane %v2159_v7, 5  ;;  %v2171_v34 = vrot.slane %v2169_v62, 5  ;;  %v2174_v39 = vshrl.u32 %v11576_v60, 16  ;;  %2651 = vst.msk [vmem:[#allocation3 + $0x98] sm:$0xff] %vm1503_vm1, %v13237_v17  ;;  %v2177_v26 = vshll.u32 %v11576_v60, 16  ;;  %v13587_v62 = vpop.permute.xlu0 %2617  ;;  %v3576_v60 = vld [vmem:[#allocation3 + $0x90] sm:$0xff] }
 0x16a   : > { %v2138_v52 = vsel %vm11790_vm13, %v2133_v18, %v2137_v61  ;;  %v2143_v23 = vrot.slane %v2142_v29, 4  ;;  %v2156_v35 = vor.u32 %v2155_v20, %v2152_v32  ;;  %2844 = vst.msk [vmem:[#allocation3 + $0x98] sm:$0xff] %vm1747_vm6, %v13270_v24  ;;  %v2165_v28 = vrot.slane %v2163_v22, 4  ;;  %v11579_v48 = vld [vmem:[#allocation2 + $0x88] sm:$0xf] }
 0x16b   : > { %v2176_v51 = vrot.slane %v2174_v39, 4  ;;  %v2183_v45 = vshll.u32 %v11577_v44, 16  ;;  %v2187_v59 = vshrl.u32 %v11577_v44, 16  ;;  %3340 = vst.msk [vmem:[#allocation3 + $0x98] sm:$0xff] %vm1940_vm7, %v13304_v63  ;;  %v2179_v36 = vrot.slane %v2177_v26, 5 }
 0x16c   : > { %v2148_v17 = vsel %vm11790_vm13, %v2143_v23, %v2147_v16  ;;  %v2157_v61 = vrot.slane %v2156_v35, 4  ;;  %v16112_v31 = vshll.u32 %v12735_v3, 16  ;;  %3316 = vrot.lane.b32.xlu0 %v9842_v1, %s11667_s9  ;;  %v2166_v15 = vor.u32 %v2165_v28, %v2161_v27  ;;  %v11581_v28 = vld [vmem:[#allocation2 + $0x94] sm:$0xf] }
 0x16d   : > { %v9770_v24 = vcombine.low %v2138_v52, %v2148_v17  ;;  %v2185_v43 = vrot.slane %v2183_v45, 5  ;;  %v2189_v19 = vrot.slane %v2187_v59, 4  ;;  %v2180_v55 = vor.u32 %v2179_v36, %v2176_v51  ;;  %v13607_v22 = vpop.permute.xlu0 %2810  ;;  %v11580_v52 = vld [vmem:[#allocation2 + $0x90] sm:$0xf] }
 0x16e   : > { %v2195_v47 = vrot.slane %v16112_v31, 5  ;;  %v2162_v5 = vsel %vm11790_vm13, %v2157_v61, %v2161_v27  ;;  %v2198_v63 = vshrl.u32 %v11578_v38, 16  ;;  %v2201_v41 = vshll.u32 %v11578_v38, 16  ;;  %v11583_v38 = vld [vmem:[#allocation2 + $0xa0] sm:$0xf] }
 0x16f   : > { %2412 = vst.msk [vmem:[#allocation3 + $0xb0] sm:$0xff] %vm1003_vm15, %v9770_v24  ;;  %v2167_v16 = vrot.slane %v2166_v15, 4  ;;  %v2190_v58 = vor.u32 %v2189_v19, %v2185_v43  ;;  %v2207_v3 = vshll.u32 %v11579_v48, 16  ;;  %v2211_v50 = vshrl.u32 %v11579_v48, 16  ;;  %v11582_v19 = vld [vmem:[#allocation2 + $0x9c] sm:$0xf] }
 0x170   : > { %2652 = vst.msk [vmem:[#allocation3 + $0xb0] sm:$0xff] %vm1503_vm1, %v13331_v46  ;;  %v2181_v37 = vrot.slane %v2180_v55, 4  ;;  %v2200_v32 = vrot.slane %v2198_v63, 4  ;;  %v2203_v54 = vrot.slane %v2201_v41, 5  ;;  %v16113_v7 = vshll.u32 %v12877_v30, 16 }
 0x171   : > { %2845 = vst.msk [vmem:[#allocation3 + $0xb0] sm:$0xff] %vm1747_vm6, %v13364_v0  ;;  %v2172_v18 = vsel %vm11790_vm13, %v2167_v16, %v2171_v34  ;;  %v2191_v29 = vrot.slane %v2190_v58, 4  ;;  %v2209_v20 = vrot.slane %v2207_v3, 5  ;;  %v2213_v27 = vrot.slane %v2211_v50, 4 }
 0x172   : > { %v2219_v1 = vrot.slane %v16113_v7, 5  ;;  %3341 = vst.msk [vmem:[#allocation3 + $0xb0] sm:$0xff] %vm1940_vm7, %v13391_v6  ;;  %v9771_v46 = vcombine.low %v2162_v5, %v2172_v18  ;;  %v2186_v30 = vsel %vm11790_vm13, %v2181_v37, %v2185_v43  ;;  %v2204_v39 = vor.u32 %v2203_v54, %v2200_v32  ;;  %v3577_v0 = vld [vmem:[#allocation3 + $0x98] sm:$0xff]  ;;  %v3579_v7 = vld [vmem:[#allocation3 + $0xa8] sm:$0xff]  ;;  %v11584_v18 = vld [vmem:[#allocation2 + $0xa8] sm:$0xf] }
 0x173   : > { %v2222_v23 = vshrl.u32 %v11580_v52, 16  ;;  %v2196_v34 = vsel %vm11790_vm13, %v2191_v29, %v2195_v47  ;;  %v2214_v35 = vor.u32 %v2213_v27, %v2209_v20  ;;  %v2225_v26 = vshll.u32 %v11580_v52, 16  ;;  %3885 = vmatprep.mubr.bf16.mxu0 %v3577_v0 }
 0x174   : > { %v2231_v51 = vshll.u32 %v11581_v28, 16  ;;  %2413 = vst.msk [vmem:[#allocation3 + $0xc8] sm:$0xff] %vm1003_vm15, %v9771_v46  ;;  %v9772_v44 = vcombine.low %v2186_v30, %v2196_v34  ;;  %v2205_v6 = vrot.slane %v2204_v39, 4  ;;  %v2235_v59 = vshrl.u32 %v11581_v28, 16  ;;  %3886 = vmatmul.mubr.bf16.gmra.mrb[24].mxu0 %v3576_v60  ;;  %v1478_v24 = vpop.permute.xlu1 %1477  ;;  %v11585_v60 = vld [vmem:[#allocation2 + $0xac] sm:$0xf] }
 0x175   : > { %v2224_v45 = vrot.slane %v2222_v23, 4  ;;  %2653 = vst.msk [vmem:[#allocation3 + $0xc8] sm:$0xff] %vm1503_vm1, %v13420_v53  ;;  %v2215_v17 = vrot.slane %v2214_v35, 4  ;;  %v2227_v61 = vrot.slane %v2225_v26, 5  ;;  %v16114_v31 = vshll.u32 %v13008_v8, 16  ;;  %1515 = vst.msk [vmem:[#allocation3 + $0x108] sm:$0xff] %vm1503_vm1, %v1478_v24 }
 0x176   : > { %v2233_v36 = vrot.slane %v2231_v51, 5  ;;  %2846 = vst.msk [vmem:[#allocation3 + $0xc8] sm:$0xff] %vm1747_vm6, %v13450_v2  ;;  %v2210_v15 = vsel %vm11790_vm13, %v2205_v6, %v2209_v20  ;;  %v2237_v43 = vrot.slane %v2235_v59, 4  ;;  %v2246_v53 = vshrl.u32 %v11582_v19, 16  ;;  %v3307_v2 = vpop.permute.xlu0 %3306 }
 0x177   : > { %v2243_v47 = vrot.slane %v16114_v31, 5  ;;  %2414 = vst.msk [vmem:[#allocation3 + $0xe0] sm:$0xff] %vm1003_vm15, %v9772_v44  ;;  %v2249_v5 = vshll.u32 %v11582_v19, 16  ;;  %v2220_v8 = vsel %vm11790_vm13, %v2215_v17, %v2219_v1  ;;  %v2228_v55 = vor.u32 %v2227_v61, %v2224_v45 }
 0x178   : > { %3342 = vst.msk [vmem:[#allocation3 + $0xc8] sm:$0xff] %vm1940_vm7, %v13481_v40  ;;  %v2255_v63 = vshll.u32 %v11583_v38, 16  ;;  %v2259_v41 = vshrl.u32 %v11583_v38, 16  ;;  %v9773_v16 = vcombine.low %v2210_v15, %v2220_v8  ;;  %v2238_v58 = vor.u32 %v2237_v43, %v2233_v36 }
 0x179   : > { %2654 = vst.msk [vmem:[#allocation3 + $0xe0] sm:$0xff] %vm1503_vm1, %v13513_v12  ;;  %v2248_v48 = vrot.slane %v2246_v53, 4  ;;  %v2251_v3 = vrot.slane %v2249_v5, 5  ;;  %v3580_v50 = vld [vmem:[#allocation3 + $0xb0] sm:$0xff]  ;;  %v2229_v40 = vrot.slane %v2228_v55, 4  ;;  %v16115_v32 = vshll.u32 %v13160_v9, 16 }
 0x17a   : > { %2847 = vst.msk [vmem:[#allocation3 + $0xe0] sm:$0xff] %vm1747_vm6, %v13545_v10  ;;  %v2257_v12 = vrot.slane %v2255_v63, 5  ;;  %v2261_v37 = vrot.slane %v2259_v41, 4  ;;  %3893 = vmatprep.mubr.bf16.mxu0 %v3580_v50  ;;  %v2239_v1 = vrot.slane %v2238_v58, 4  ;;  %v2270_v29 = vshrl.u32 %v11584_v18, 16  ;;  %v1722_v39 = vpop.permute.xlu1 %1721  ;;  %v2620_v34 = vpop.permute.xlu0 %2619  ;;  %v3582_v55 = vld [vmem:[#allocation3 + $0xc0] sm:$0xff] }
 0x17b   : > { %3343 = vst.msk [vmem:[#allocation3 + $0xe0] sm:$0xff] %vm1940_vm7, %v13563_v57  ;;  %v2267_v54 = vrot.slane %v16115_v32, 5  ;;  %v2252_v10 = vor.u32 %v2251_v3, %v2248_v48  ;;  %v2273_v20 = vshll.u32 %v11584_v18, 16  ;;  %v2234_v57 = vsel %vm11790_vm13, %v2229_v40, %v2233_v36 }
 0x17c   : > { %2415 = vst.msk [vmem:[#allocation3 + $0xf8] sm:$0xff] %vm1003_vm15, %v9773_v16  ;;  %v2262_v27 = vor.u32 %v2261_v37, %v2257_v12  ;;  %v2279_v46 = vshll.u32 %v11585_v60, 16  ;;  %v2283_v9 = vshrl.u32 %v11585_v60, 16  ;;  %v2244_v30 = vsel %vm11790_vm13, %v2239_v1, %v2243_v47  ;;  %3894 = vmatmul.mubr.bf16.gmra.mrb[28].mxu0 %v3579_v7 }
 0x17d   : > { %2655 = vst.msk [vmem:[#allocation3 + $0xf8] sm:$0xff] %vm1503_vm1, %v13587_v62  ;;  %v2253_v52 = vrot.slane %v2252_v10, 4  ;;  %v2272_v23 = vrot.slane %v2270_v29, 4  ;;  %v2275_v0 = vrot.slane %v2273_v20, 5  ;;  %v9774_v62 = vcombine.low %v2234_v57, %v2244_v30 }
 0x17e   : > { %2848 = vst.msk [vmem:[#allocation3 + $0xf8] sm:$0xff] %vm1747_vm6, %v13607_v22  ;;  %1759 = vst.msk [vmem:[#allocation3 + $0x108] sm:$0xff] %vm1747_vm6, %v1722_v39  ;;  %v2263_v35 = vrot.slane %v2262_v27, 4  ;;  %v2281_v26 = vrot.slane %v2279_v46, 5  ;;  %v2285_v28 = vrot.slane %v2283_v9, 4  ;;  %v16116_v6 = vshll.u32 %v13279_v11, 16  ;;  %v1915_v47 = vpop.permute.xlu1 %1914 }
 0x17f   : > { %3344 = vst.msk [vmem:[#allocation3 + $0xf8] sm:$0xff] %vm1940_vm7, %v3307_v2  ;;  %v3583_v51 = vld [vmem:[#allocation3 + $0xc8] sm:$0xff]  ;;  %v2258_v22 = vsel %vm11790_vm13, %v2253_v52, %v2257_v12  ;;  %v2276_v44 = vor.u32 %v2275_v0, %v2272_v23  ;;  %v2294_v59 = vshrl.u32 %v13355_v42, 16  ;;  %v2297_v36 = vshll.u32 %v13355_v42, 16  ;;  %1952 = vst.msk [vmem:[#allocation3 + $0x108] sm:$0xff] %vm1940_vm7, %v1915_v47  ;;  %v3585_v9 = vld [vmem:[#allocation3 + $0xd8] sm:$0xff] }
 0x180   : > { %v2291_v45 = vrot.slane %v16116_v6, 5  ;;  %3901 = vmatprep.mubr.bf16.mxu0 %v3583_v51  ;;  %2416 = vst.msk [vmem:[#allocation3 + $0x110] sm:$0xff] %vm1003_vm15, %v9774_v62  ;;  %v2268_v17 = vsel %vm11790_vm13, %v2263_v35, %v2267_v54  ;;  %v2286_v61 = vor.u32 %v2285_v28, %v2281_v26  ;;  %v2303_v31 = vshll.u32 %v13338_v33, 16 }
 0x181   : > { %2656 = vst.msk [vmem:[#allocation3 + $0x110] sm:$0xff] %vm1503_vm1, %v2620_v34  ;;  %v9775_v24 = vcombine.low %v2258_v22, %v2268_v17  ;;  %v2277_v15 = vrot.slane %v2276_v44, 4  ;;  %v2296_v11 = vrot.slane %v2294_v59, 4  ;;  %v2307_v43 = vshrl.u32 %v13338_v33, 16  ;;  %v3588_v34 = vld [vmem:[#allocation3 + $0xf0] sm:$0xff] }
 0x182   : > { %v2287_v19 = vrot.slane %v2286_v61, 4  ;;  %v2299_v53 = vrot.slane %v2297_v36, 5  ;;  %v2305_v5 = vrot.slane %v2303_v31, 5  ;;  %v16117_v8 = vshll.u32 %v13393_v25, 16  ;;  %v3586_v33 = vld [vmem:[#allocation3 + $0xe0] sm:$0xff] }
 0x183   : > { %2417 = vst.msk [vmem:[#allocation3 + $0x128] sm:$0xff] %vm1003_vm15, %v9775_v24  ;;  %v2282_v42 = vsel %vm11790_vm13, %v2277_v15, %v2281_v26  ;;  %v2309_v38 = vrot.slane %v2307_v43, 4  ;;  %v2318_v63 = vshrl.u32 %v13436_v21, 16  ;;  %v2321_v41 = vshll.u32 %v13436_v21, 16  ;;  %v2813_v16 = vpop.permute.xlu0 %2812 }
 0x184   : > { %v2315_v2 = vrot.slane %v16117_v8, 5  ;;  %v2292_v58 = vsel %vm11790_vm13, %v2287_v19, %v2291_v45  ;;  %v2300_v48 = vor.u32 %v2299_v53, %v2296_v11  ;;  %v2327_v25 = vshll.u32 %v13444_v4, 16  ;;  %2849 = vst.msk [vmem:[#allocation3 + $0x110] sm:$0xff] %vm1747_vm6, %v2813_v16  ;;  %3902 = vmatmul.mubr.bf16.gmra.mrb[32].mxu0 %v3582_v55 }
 0x185   : > { %v2331_v3 = vshrl.u32 %v13444_v4, 16  ;;  %v9776_v50 = vcombine.low %v2282_v42, %v2292_v58  ;;  %v2310_v40 = vor.u32 %v2309_v38, %v2305_v5  ;;  %v2320_v12 = vrot.slane %v2318_v63, 4  ;;  %3909 = vmatprep.mubr.bf16.mxu0 %v3586_v33  ;;  %v1480_v7 = vpop.permute.xlu1 %1479 }
 0x186   : > { %v2323_v37 = vrot.slane %v2321_v41, 5  ;;  %v2301_v32 = vrot.slane %v2300_v48, 4  ;;  %v2329_v54 = vrot.slane %v2327_v25, 5  ;;  %1516 = vst.msk [vmem:[#allocation3 + $0x120] sm:$0xff] %vm1503_vm1, %v1480_v7  ;;  %v16118_v29 = vshll.u32 %v13509_v13, 16  ;;  %v3589_v39 = vld [vmem:[#allocation3 + $0xf8] sm:$0xff] }
 0x187   : > { %v2333_v21 = vrot.slane %v2331_v3, 4  ;;  %2418 = vst.msk [vmem:[#allocation3 + $0x140] sm:$0xff] %vm1003_vm15, %v9776_v50  ;;  %v2311_v1 = vrot.slane %v2310_v40, 4  ;;  %v3591_v51 = vld [vmem:[#allocation3 + $0x108] sm:$0xff]  ;;  %vm4183_vm0 = vcmask 1040384  }
 0x188   : > { %v2324_v10 = vor.u32 %v2323_v37, %v2320_v12  ;;  %v2306_v4 = vsel %vm11790_vm13, %v2301_v32, %v2305_v5  ;;  %v2339_v20 = vrot.slane %v16118_v29, 5  ;;  %vm13768_vm3 = vmand %vm4183_vm0, %vm341_vm4 }
 0x189   : > { %v2334_v18 = vor.u32 %v2333_v21, %v2329_v54  ;;  %v2316_v57 = vsel %vm11790_vm13, %v2311_v1, %v2315_v2  ;;  %vm13776_vm5 = vmand %vm4183_vm0, %vm291_vm2  ;;  %vm4682_vm2 = vcmask 1043456  }
 0x18a   : > { %v2325_v27 = vrot.slane %v2324_v10, 4  ;;  %v9777_v60 = vcombine.low %v2306_v4, %v2316_v57  ;;  %vm14030_vm8 = vmand %vm4682_vm2, %vm341_vm4  ;;  %vm9524_vm4 = vcmask 523264  }
 0x18b   : > { %v2335_v46 = vrot.slane %v2334_v18, 4  ;;  %v1724_v23 = vpop.permute.xlu1 %1723 }
 0x18c   : > { %v2330_v30 = vsel %vm11790_vm13, %v2325_v27, %v2329_v54  ;;  %2419 = vst.msk [vmem:[#allocation3 + $0x158] sm:$0xff] %vm1003_vm15, %v9777_v60  ;;  %3910 = vmatmul.mubr.bf16.gmra.mrb[36].mxu0 %v3585_v9  ;;  %v3563_v60 = vld [vmem:[#allocation3 + $0x28] sm:$0xff]  ;;  %v3569_v9 = vld [vmem:[#allocation3 + $0x58] sm:$0xff] }
 0x18d   : > { %v2340_v52 = vsel %vm11790_vm13, %v2335_v46, %v2339_v20  ;;  %1760 = vst.msk [vmem:[#allocation3 + $0x120] sm:$0xff] %vm1747_vm6, %v1724_v23  ;;  %3917 = vmatprep.mubr.bf16.mxu0 %v3589_v39  ;;  %v3560_v20 = vld [vmem:[#allocation3 + $0x10] sm:$0xff]  ;;  %v3566_v46 = vld [vmem:[#allocation3 + $0x40] sm:$0xff]  ;;  %v3575_v39 = vld [vmem:[#allocation3 + $0x88] sm:$0xff] }
 0x18e   : > { %v9778_v0 = vcombine.low %v2330_v30, %v2340_v52  ;;  %v3572_v30 = vld [vmem:[#allocation3 + $0x70] sm:$0xff]  ;;  %v3578_v52 = vld [vmem:[#allocation3 + $0xa0] sm:$0xff] }
 0x18f   : > { %v3309_v13 = vpop.permute.xlu0 %3308  ;;  %v1917_v62 = vpop.permute.xlu1 %1916 }
 0x190   : > { %2420 = vst.msk [vmem:[#allocation3 + $0x170] sm:$0xff] %vm1003_vm15, %v9778_v0 }
 0x191   : > { %3345 = vst.msk [vmem:[#allocation3 + $0x110] sm:$0xff] %vm1940_vm7, %v3309_v13  ;;  %1953 = vst.msk [vmem:[#allocation3 + $0x120] sm:$0xff] %vm1940_vm7, %v1917_v62  ;;  %v3581_v13 = vld [vmem:[#allocation3 + $0xb8] sm:$0xff] }
 0x193   : > { %v2622_v35 = vpop.permute.xlu0 %2621 }
 0x194   : > { %2657 = vst.msk [vmem:[#allocation3 + $0x128] sm:$0xff] %vm1503_vm1, %v2622_v35  ;;  %3918 = vmatmul.mubr.bf16.gmra.mrb[40].mxu0 %v3588_v34  ;;  %v3584_v35 = vld [vmem:[#allocation3 + $0xd0] sm:$0xff] }
 0x197   : > { %v2815_v26 = vpop.permute.xlu0 %2814 }
 0x198   : > { %v3592_v28 = vld [vmem:[#allocation3 + $0x110] sm:$0xff]  ;;  %2850 = vst.msk [vmem:[#allocation3 + $0x128] sm:$0xff] %vm1747_vm6, %v2815_v26  ;;  %v3594_v17 = vld [vmem:[#allocation3 + $0x120] sm:$0xff] }
 0x199   : > { %3925 = vmatprep.mubr.bf16.mxu0 %v3592_v28 }
 0x19c   : > { %3926 = vmatmul.mubr.bf16.gmra.mrb[44].mxu0 %v3591_v51  ;;  %v3587_v51 = vld [vmem:[#allocation3 + $0xe8] sm:$0xff] }
 0x1a2   : > { %v1482_v22 = vpop.permute.xlu1 %1481 }
 0x1a3   : > { %1517 = vst.msk [vmem:[#allocation3 + $0x138] sm:$0xff] %vm1503_vm1, %v1482_v22  ;;  %v3590_v22 = vld [vmem:[#allocation3 + $0x100] sm:$0xff] }
 0x1a4   : > { %v3311_v44 = vpop.permute.xlu0 %3310 }
 0x1a5   : > { %3346 = vst.msk [vmem:[#allocation3 + $0x128] sm:$0xff] %vm1940_vm7, %v3311_v44  ;;  %v3593_v44 = vld [vmem:[#allocation3 + $0x118] sm:$0xff] }
 0x1a6   : > { %v1726_v6 = vpop.permute.xlu1 %1725 }
 0x1a7   : > { %1761 = vst.msk [vmem:[#allocation3 + $0x138] sm:$0xff] %vm1747_vm6, %v1726_v6  ;;  %v3596_v6 = vld [vmem:[#allocation3 + $0x130] sm:$0xff] }
 0x1a8   : > { %v2624_v45 = vpop.permute.xlu0 %2623 }
 0x1a9   : > { %2658 = vst.msk [vmem:[#allocation3 + $0x140] sm:$0xff] %vm1503_vm1, %v2624_v45 }
 0x1aa   : > { %v1919_v59 = vpop.permute.xlu1 %1918 }
 0x1ab   : > { %1954 = vst.msk [vmem:[#allocation3 + $0x138] sm:$0xff] %vm1940_vm7, %v1919_v59 }
 0x1ac   : > { %v2817_v61 = vpop.permute.xlu0 %2816  ;;  %v3595_v36 = vld [vmem:[#allocation3 + $0x128] sm:$0xff] }
 0x1ad   : > { %2851 = vst.msk [vmem:[#allocation3 + $0x140] sm:$0xff] %vm1747_vm6, %v2817_v61  ;;  %3933 = vmatprep.mubr.bf16.mxu0 %v3595_v36  ;;  %v3599_v36 = vld [vmem:[#allocation3 + $0x148] sm:$0xff] }
 0x1ae   : > { %3934 = vmatmul.mubr.bf16.gmra.mrb[48].mxu0 %v3594_v17 }
 0x1b2   : > { %v3597_v43 = vld [vmem:[#allocation3 + $0x138] sm:$0xff] }
 0x1b3   : > { %v1484_v31 = vpop.permute.xlu1 %1483 }
 0x1b4   : > { %1518 = vst.msk [vmem:[#allocation3 + $0x150] sm:$0xff] %vm1503_vm1, %v1484_v31 }
 0x1bb   : > { %v1728_v47 = vpop.permute.xlu1 %1727  ;;  %v3313_v24 = vpop.permute.xlu0 %3312 }
 0x1bc   : > { %1762 = vst.msk [vmem:[#allocation3 + $0x150] sm:$0xff] %vm1747_vm6, %v1728_v47  ;;  %v3602_v47 = vld [vmem:[#allocation3 + $0x160] sm:$0xff] }
 0x1bd   : > { %3347 = vst.msk [vmem:[#allocation3 + $0x140] sm:$0xff] %vm1940_vm7, %v3313_v24 }
 0x1bf   : > { %v1921_v15 = vpop.permute.xlu1 %1920  ;;  %v2626_v11 = vpop.permute.xlu0 %2625 }
 0x1c0   : > { %1955 = vst.msk [vmem:[#allocation3 + $0x150] sm:$0xff] %vm1940_vm7, %v1921_v15  ;;  %v3605_v15 = vld [vmem:[#allocation3 + $0x178] sm:$0xff] }
 0x1c1   : > { %2659 = vst.msk [vmem:[#allocation3 + $0x158] sm:$0xff] %vm1503_vm1, %v2626_v11 }
 0x1c3   : > { %v2819_v19 = vpop.permute.xlu0 %2818 }
 0x1c4   : > { %v3598_v53 = vld [vmem:[#allocation3 + $0x140] sm:$0xff]  ;;  %2852 = vst.msk [vmem:[#allocation3 + $0x158] sm:$0xff] %vm1747_vm6, %v2819_v19 }
 0x1c5   : > { %3941 = vmatprep.mubr.bf16.mxu0 %v3598_v53 }
 0x1c6   : > { %3942 = vmatmul.mubr.bf16.gmra.mrb[52].mxu0 %v3597_v43 }
 0x1c7   : > { %v3600_v48 = vld [vmem:[#allocation3 + $0x150] sm:$0xff] }
 0x1cf   : > { %v1486_v5 = vpop.permute.xlu1 %1485 }
 0x1d0   : > { %1519 = vst.msk [vmem:[#allocation3 + $0x168] sm:$0xff] %vm1503_vm1, %v1486_v5 }
 0x1d2   : > { %v3315_v8 = vpop.permute.xlu0 %3314  ;;  %v10260_v2 = vpop.f32.mrb[0].mxu0 }
 0x1d3   : > { %3348 = vst.msk [vmem:[#allocation3 + $0x158] sm:$0xff] %vm1940_vm7, %v3315_v8  ;;  %v1730_v55 = vpop.permute.xlu1 %1729  ;;  %v10261_v42 = vpop.f32.mrb[1].mxu0 }
 0x1d4   : > { %1763 = vst.msk [vmem:[#allocation3 + $0x168] sm:$0xff] %vm1747_vm6, %v1730_v55  ;;  %v13708_v38 = vadd.f32 %v10261_v42, %v10260_v2  ;;  %v10263_v63 = vpop.f32.mrb[2].mxu0  ;;  %v11422_v2 = vld [vmem:[%s15975_s3] sm:$0xff]   ;;  %v11424_v42 = vld [vmem:[%s15975_s3 + $0x8] sm:$0xff]  }
 0x1d5   : > { %v10264_v41 = vpop.f32.mrb[3].mxu0  ;;  %v11423_v55 = vld [vmem:[%s15975_s3 + $0xc0] sm:$0xff]   ;;  %10644 = vmatprep.subr.bf16.mxu0 %v11422_v2 }
 0x1d6   : > { %v2628_v33 = vpop.permute.xlu0 %2627  ;;  %v13710_v16 = vadd.f32 %v10264_v41, %v10263_v63  ;;  %10788 = vmatprep.subr.bf16.mxu1 %v11423_v55  ;;  %v11425_v63 = vld [vmem:[%s15975_s3 + $0xc8] sm:$0xff]   ;;  %v11426_v41 = vld [vmem:[%s15975_s3 + $0x10] sm:$0xff]  }
 0x1d7   : > { %2660 = vst.msk [vmem:[#allocation3 + $0x170] sm:$0xff] %vm1503_vm1, %v2628_v33  ;;  %v1923_v58 = vpop.permute.xlu1 %1922  ;;  %10789 = vmatpush3.bf16.msra.mxu1 %v11423_v55  ;;  %v11435_v55 = vld [vmem:[%s15975_s3 + $0xf0] sm:$0xff]  }
 0x1d8   : > { %1956 = vst.msk [vmem:[#allocation3 + $0x168] sm:$0xff] %vm1940_vm7, %v1923_v58  ;;  %10790 = vmatprep.subr.bf16.mxu1 %v11425_v63  ;;  %v11427_v58 = vld [vmem:[%s15975_s3 + $0xd0] sm:$0xff]  }
 0x1da   : > { %v2821_v25 = vpop.permute.xlu0 %2820  ;;  %v3601_v3 = vld [vmem:[#allocation3 + $0x158] sm:$0xff]  ;;  %v10266_v50 = vpop.f32.mrb[4].mxu0 }
 0x1db   : > { %2853 = vst.msk [vmem:[#allocation3 + $0x170] sm:$0xff] %vm1747_vm6, %v2821_v25  ;;  %3949 = vmatprep.mubr.bf16.mxu0 %v3601_v3  ;;  %v10267_v40 = vpop.f32.mrb[5].mxu0  ;;  %10791 = vmatpush3.bf16.msra.mxu1 %v11425_v63  ;;  %v4188_v25 = vld [vmem:[#allocation4 + $0x18] sm:$0x1]  ;;  %v4197_v63 = vld [vmem:[#allocation4 + $0x3c] sm:$0x1] }
 0x1dc   : > { %3950 = vmatmul.mubr.bf16.gmra.mrb[56].mxu0 %v3600_v48  ;;  %v13715_v12 = vadd.f32 %v10267_v40, %v10266_v50  ;;  %v10269_v37 = vpop.f32.mrb[6].mxu0  ;;  %v4189_v50 = vsel %vm13776_vm5, 0, %v4188_v25  ;;  %v4185_v40 = vld [vmem:[#allocation4 + $0xc] sm:$0x1]  ;;  %10792 = vmatprep.subr.bf16.mxu1 %v11427_v58 }
 0x1dd   : > { %v10270_v32 = vpop.f32.mrb[7].mxu0  ;;  %4190 = vst [vmem:[#allocation4 + $0x18] sm:$0x1] %v4189_v50  ;;  %v11436_v50 = vld [vmem:[%s15975_s3 + $0x38] sm:$0xff]  }
 0x1de   : > { %v3317_v54 = vpop.permute.xlu0 %3316  ;;  %v13717_v21 = vadd.f32 %v10270_v32, %v10269_v37  ;;  %v4186_v32 = vsel %vm13776_vm5, 0, %v4185_v40 }
 0x1df   : > { %3349 = vst.msk [vmem:[#allocation3 + $0x170] sm:$0xff] %vm1940_vm7, %v3317_v54  ;;  %v3603_v10 = vld [vmem:[#allocation3 + $0x168] sm:$0xff]  ;;  %v4237_v54 = vld [vmem:[#allocation4 + $0x20] sm:$0x1]  ;;  %10793 = vmatpush3.bf16.msra.mxu1 %v11427_v58  ;;  %4187 = vst [vmem:[#allocation4 + $0xc] sm:$0x1] %v4186_v32 }
 0x1e0   : > { %v4249_v58 = vld [vmem:[#allocation4 + $0x50] sm:$0x1]  ;;  %v11437_v32 = vld [vmem:[%s15975_s3 + $0xf8] sm:$0xff]  }
 0x1e5   : > { %v10272_v7 = vpop.f32.mrb[8].mxu0 }
 0x1e6   : > { %v10273_v1 = vpop.f32.mrb[9].mxu0  ;;  %v3604_v29 = vld [vmem:[#allocation3 + $0x170] sm:$0xff] }
 0x1e7   : > { %v13720_v4 = vadd.f32 %v10273_v1, %v10272_v7  ;;  %v10275_v18 = vpop.f32.mrb[10].mxu0  ;;  %3957 = vmatprep.mubr.bf16.mxu0 %v3604_v29  ;;  %v11428_v7 = vld [vmem:[%s15975_s3 + $0x18] sm:$0xff]   ;;  %v4234_v29 = vld [vmem:[#allocation4 + $0x14] sm:$0x1] }
 0x1e8   : > { %v10276_v57 = vpop.f32.mrb[11].mxu0  ;;  %3958 = vmatmul.mubr.bf16.gmra.mrb[60].mxu0 %v3603_v10 }
 0x1e9   : > { %v13722_v27 = vadd.f32 %v10276_v57, %v10275_v18  ;;  %10612 = vmatprep.mubr.msk.bf16.mxu0 %vm1003_vm15, %v3560_v20  ;;  %v4238_v18 = vsel %vm13768_vm3, 0, %v4237_v54  ;;  %v11429_v20 = vld [vmem:[%s15975_s3 + $0xd8] sm:$0xff]  }
 0x1ea   : > { %4239 = vst [vmem:[#allocation4 + $0x20] sm:$0x1] %v4238_v18  ;;  %10794 = vmatprep.subr.bf16.mxu1 %v11429_v20  ;;  %v13848_v18 = vld [vmem:[#allocation4] sm:$0xf] }
 0x1eb   : > { %10795 = vmatpush3.bf16.msra.mxu1 %v11429_v20 }
 0x1f0   : > { %10613 = vmatmul.mubr.msk.bf16.vlgmr.msra.gmra.mrb[64].mxu0 %vm1003_vm15, %v3563_v60  ;;  %v4235_v60 = vsel %vm13768_vm3, 0, %v4234_v29  ;;  %v13850_v29 = vld [vmem:[#allocation4 + $0x4] sm:$0xf] }
 0x1f1   : > { %10616 = vmatprep.mubr.msk.bf16.mxu0 %vm1003_vm15, %v3566_v46  ;;  %10645 = vmatpush3.bf16.msra.mxu0 %v11422_v2  ;;  %4236 = vst [vmem:[#allocation4 + $0x14] sm:$0x1] %v4235_v60  ;;  %v4200_v2 = vld [vmem:[#allocation4 + $0x48] sm:$0x1] }
 0x1f2   : > { %10646 = vmatprep.subr.bf16.mxu0 %v11424_v42 }
 0x1f5   : > { %10647 = vmatpush3.bf16.msra.mxu0 %v11424_v42  ;;  %v4201_v42 = vsel %vm13776_vm5, 0, %v4200_v2  ;;  %v4212_v2 = vld [vmem:[#allocation4 + $0x78] sm:$0x1] }
 0x1f6   : > { %10648 = vmatprep.subr.bf16.mxu0 %v11426_v41  ;;  %4202 = vst [vmem:[#allocation4 + $0x48] sm:$0x1] %v4201_v42 }
 0x1f8   : > { %10617 = vmatmul.mubr.msk.bf16.gmra.mrb[68].mxu0 %vm1003_vm15, %v3569_v9  ;;  %v4194_v9 = vld [vmem:[#allocation4 + $0x30] sm:$0x1] }
 0x1f9   : > { %10620 = vmatprep.mubr.msk.bf16.mxu0 %vm1003_vm15, %v3572_v30  ;;  %10649 = vmatpush3.bf16.msra.mxu0 %v11426_v41  ;;  %v4198_v41 = vsel %vm13776_vm5, 0, %v4197_v63 }
 0x1fa   : > { %10650 = vmatprep.subr.bf16.mxu0 %v11428_v7  ;;  %4199 = vst [vmem:[#allocation4 + $0x3c] sm:$0x1] %v4198_v41  ;;  %v4209_v41 = vld [vmem:[#allocation4 + $0x6c] sm:$0x1] }
 0x1fd   : > { %10651 = vmatpush3.bf16.msra.mxu0 %v11428_v7 }
 0x200   : > { %10621 = vmatmul.mubr.msk.bf16.gmra.mrb[72].mxu0 %vm1003_vm15, %v3575_v39  ;;  %v4195_v39 = vsel %vm13776_vm5, 0, %v4194_v9  ;;  %v4206_v9 = vld [vmem:[#allocation4 + $0x60] sm:$0x1] }
 0x201   : > { %10624 = vmatprep.mubr.msk.bf16.mxu0 %vm1003_vm15, %v3578_v52  ;;  %v4191_v52 = vld [vmem:[#allocation4 + $0x24] sm:$0x1]  ;;  %4196 = vst [vmem:[#allocation4 + $0x30] sm:$0x1] %v4195_v39  ;;  %v4203_v39 = vld [vmem:[#allocation4 + $0x54] sm:$0x1] }
 0x204   : > { %v10278_v23 = vpop.f32.mrb[12].mxu0 }
 0x205   : > { %v10279_v0 = vpop.f32.mrb[13].mxu0 }
 0x206   : > { %v13731_v62 = vadd.f32 %v10279_v0, %v10278_v23  ;;  %v10281_v34 = vpop.f32.mrb[14].mxu0  ;;  %v4192_v0 = vsel %vm13776_vm5, 0, %v4191_v52 }
 0x207   : > { %v10282_v26 = vpop.f32.mrb[15].mxu0  ;;  %4193 = vst [vmem:[#allocation4 + $0x24] sm:$0x1] %v4192_v0  ;;  %v4255_v0 = vld [vmem:[#allocation4 + $0x68] sm:$0x1] }
 0x208   : > { %v13733_v28 = vadd.f32 %v10282_v26, %v10281_v34  ;;  %10625 = vmatmul.mubr.msk.bf16.gmra.mrb[76].mxu0 %vm1003_vm15, %v3581_v13  ;;  %v11430_v26 = vld [vmem:[%s15975_s3 + $0x20] sm:$0xff]  }
 0x209   : > { %10628 = vmatprep.mubr.msk.bf16.mxu0 %vm1003_vm15, %v3584_v35  ;;  %10652 = vmatprep.subr.bf16.mxu0 %v11430_v26 }
 0x20a   : > { %10653 = vmatpush3.bf16.msra.mxu0 %v11430_v26  ;;  %v4252_v26 = vld [vmem:[#allocation4 + $0x5c] sm:$0x1] }
 0x210   : > { %10629 = vmatmul.mubr.msk.bf16.gmra.mrb[80].mxu0 %vm1003_vm15, %v3587_v51 }
 0x211   : > { %10632 = vmatprep.mubr.msk.bf16.mxu0 %vm1003_vm15, %v3590_v22  ;;  %v11431_v22 = vld [vmem:[%s15975_s3 + $0xe0] sm:$0xff]  }
 0x212   : > { %10796 = vmatprep.subr.bf16.mxu1 %v11431_v22 }
 0x213   : > { %10797 = vmatpush3.bf16.msra.mxu1 %v11431_v22 }
 0x218   : > { %10633 = vmatmul.mubr.msk.bf16.gmra.mrb[84].mxu0 %vm1003_vm15, %v3593_v44  ;;  %v4243_v44 = vld [vmem:[#allocation4 + $0x38] sm:$0x1] }
 0x219   : > { %10636 = vmatprep.mubr.msk.bf16.mxu0 %vm1003_vm15, %v3596_v6  ;;  %v11432_v6 = vld [vmem:[%s15975_s3 + $0x28] sm:$0xff]  }
 0x21a   : > { %10654 = vmatprep.subr.bf16.mxu0 %v11432_v6 }
 0x21b   : > { %v10284_v45 = vpop.f32.mrb[16].mxu0  ;;  %10655 = vmatpush3.bf16.msra.mxu0 %v11432_v6  ;;  %v4253_v6 = vsel %vm13768_vm3, 0, %v4252_v26 }
 0x21c   : > { %v10285_v59 = vpop.f32.mrb[17].mxu0  ;;  %4254 = vst [vmem:[#allocation4 + $0x5c] sm:$0x1] %v4253_v6 }
 0x21d   : > { %v13741_v17 = vadd.f32 %v10285_v59, %v10284_v45  ;;  %v10287_v61 = vpop.f32.mrb[18].mxu0  ;;  %v4244_v59 = vsel %vm13768_vm3, 0, %v4243_v44 }
 0x21e   : > { %v10288_v31 = vpop.f32.mrb[19].mxu0  ;;  %4245 = vst [vmem:[#allocation4 + $0x38] sm:$0x1] %v4244_v59 }
 0x21f   : > { %v13743_v24 = vadd.f32 %v10288_v31, %v10287_v61  ;;  %v4240_v61 = vld [vmem:[#allocation4 + $0x2c] sm:$0x1] }
 0x220   : > { %10637 = vmatmul.mubr.msk.bf16.gmra.mrb[88].mxu0 %vm1003_vm15, %v3599_v36  ;;  %v4241_v31 = vsel %vm13768_vm3, 0, %v4240_v61 }
 0x221   : > { %10640 = vmatprep.mubr.msk.bf16.mxu0 %vm1003_vm15, %v3602_v47  ;;  %v11433_v47 = vld [vmem:[%s15975_s3 + $0xe8] sm:$0xff]   ;;  %4242 = vst [vmem:[#allocation4 + $0x2c] sm:$0x1] %v4241_v31 }
 0x222   : > { %10798 = vmatprep.subr.bf16.mxu1 %v11433_v47 }
 0x223   : > { %10799 = vmatpush3.bf16.msra.mxu1 %v11433_v47 }
 0x224   : > { %10800 = vmatprep.subr.bf16.mxu1 %v11435_v55 }
 0x227   : > { %10801 = vmatpush3.bf16.msra.mxu1 %v11435_v55  ;;  %v4213_v55 = vsel %vm13776_vm5, 0, %v4212_v2  ;;  %v4273_v2 = vld [vmem:[#allocation4 + $0xb0] sm:$0x1] }
 0x228   : > { %10641 = vmatmul.mubr.msk.bf16.gmra.mrb[92].mxu0 %vm1003_vm15, %v3605_v15  ;;  %10802 = vmatprep.subr.bf16.mxu1 %v11437_v32  ;;  %4214 = vst [vmem:[#allocation4 + $0x78] sm:$0x1] %v4213_v55  ;;  %v4274_v55 = vsel %vm13768_vm3, 0, %v4273_v2 }
 0x229   : > { %4275 = vst [vmem:[#allocation4 + $0xb0] sm:$0x1] %v4274_v55 }
 0x22b   : > { %10803 = vmatpush3.bf16.msra.mxu1 %v11437_v32  ;;  %v4258_v32 = vld [vmem:[#allocation4 + $0x74] sm:$0x1] }
 0x232   : > { %v10290_v11 = vpop.f32.mrb[20].mxu0 }
 0x233   : > { %v10291_v43 = vpop.f32.mrb[21].mxu0 }
 0x234   : > { %v13748_v19 = vadd.f32 %v10291_v43, %v10290_v11  ;;  %v10293_v53 = vpop.f32.mrb[22].mxu0 }
 0x235   : > { %v10294_v5 = vpop.f32.mrb[23].mxu0 }
 0x236   : > { %v13750_v8 = vadd.f32 %v10294_v5, %v10293_v53  ;;  %v11434_v5 = vld [vmem:[%s15975_s3 + $0x30] sm:$0xff]  }
 0x237   : > { %10656 = vmatprep.subr.bf16.mxu0 %v11434_v5 }
 0x238   : > { %10657 = vmatpush3.bf16.msra.mxu0 %v11434_v5  ;;  %v13875_v5 = vld [vmem:[%s15975_s3 + $0x100] sm:$0xff]  }
 0x239   : > { %10658 = vmatprep.subr.bf16.mxu0 %v11436_v50  ;;  %10836 = vmatprep.subr.bf16.mxu1 %v13875_v5 }
 0x23c   : > { %10659 = vmatpush3.bf16.msra.mxu0 %v11436_v50  ;;  %v4210_v50 = vsel %vm13776_vm5, 0, %v4209_v41  ;;  %v4230_v41 = vld [vmem:[#allocation4 + $0xc0] sm:$0x1] }
 0x23d   : > { %4211 = vst [vmem:[#allocation4 + $0x6c] sm:$0x1] %v4210_v50  ;;  %v4227_v50 = vld [vmem:[#allocation4 + $0xb4] sm:$0x1] }
 0x247   : > { %v10296_v3 = vpop.f32.mrb[24].mxu0 }
 0x248   : > { %v10297_v37 = vpop.f32.mrb[25].mxu0 }
 0x249   : > { %v13787_v1 = vadd.f32 %v10297_v37, %v10296_v3  ;;  %v10299_v10 = vpop.f32.mrb[26].mxu0  ;;  %v4250_v3 = vsel %vm13768_vm3, 0, %v4249_v58  ;;  %v4246_v37 = vld [vmem:[#allocation4 + $0x44] sm:$0x1]  ;;  %v4261_v58 = vld [vmem:[#allocation4 + $0x80] sm:$0x1] }
 0x24a   : > { %v10300_v57 = vpop.f32.mrb[27].mxu0  ;;  %4251 = vst [vmem:[#allocation4 + $0x50] sm:$0x1] %v4250_v3 }
 0x24b   : > { %v13796_v46 = vadd.f32 %v10300_v57, %v10299_v10  ;;  %v4247_v10 = vsel %vm13768_vm3, 0, %v4246_v37  ;;  %v9943_v57 = vcombine.low %v13848_v18, %v13850_v29 }
 0x24c   : > { %4248 = vst [vmem:[#allocation4 + $0x44] sm:$0x1] %v4247_v10  ;;  %v4259_v10 = vsel %vm13768_vm3, 0, %v4258_v32  ;;  %v4276_v32 = vld [vmem:[#allocation4 + $0xbc] sm:$0x1] }
 0x24d   : > { %10660 = vmatprep.mubr.bf16.mxu0 %v9943_v57  ;;  %4260 = vst [vmem:[#allocation4 + $0x74] sm:$0x1] %v4259_v10 }
 0x24f   : > { %v10302_v30 = vpop.f32.mrb[28].mxu0 }
 0x250   : > { %v10303_v23 = vpop.f32.mrb[29].mxu0 }
 0x251   : > { %v13802_v13 = vadd.f32 %v10303_v23, %v10302_v30  ;;  %v10305_v34 = vpop.f32.mrb[30].mxu0  ;;  %v4207_v30 = vsel %vm13776_vm5, 0, %v4206_v9  ;;  %v4204_v23 = vsel %vm13776_vm5, 0, %v4203_v39  ;;  %v4215_v9 = vld [vmem:[#allocation4 + $0x84] sm:$0x1] }
 0x252   : > { %v10306_v35 = vpop.f32.mrb[31].mxu0  ;;  %4208 = vst [vmem:[#allocation4 + $0x60] sm:$0x1] %v4207_v30  ;;  %4205 = vst [vmem:[#allocation4 + $0x54] sm:$0x1] %v4204_v23  ;;  %v4216_v30 = vsel %vm13776_vm5, 0, %v4215_v9 }
 0x253   : > { %v13807_v51 = vadd.f32 %v10306_v35, %v10305_v34  ;;  %v4256_v35 = vsel %vm13768_vm3, 0, %v4255_v0  ;;  %v4267_v39 = vld [vmem:[#allocation4 + $0x98] sm:$0x1]  ;;  %4217 = vst [vmem:[#allocation4 + $0x84] sm:$0x1] %v4216_v30 }
 0x254   : > { %4257 = vst [vmem:[#allocation4 + $0x68] sm:$0x1] %v4256_v35  ;;  %v4268_v23 = vsel %vm13768_vm3, 0, %v4267_v39 }
 0x255   : > { %4269 = vst [vmem:[#allocation4 + $0x98] sm:$0x1] %v4268_v23 }
 0x257   : > { %v10308_v45 = vpop.f32.mrb[32].mxu0 }
 0x258   : > { %v10309_v36 = vpop.f32.mrb[33].mxu0 }
 0x259   : > { %v13822_v15 = vadd.f32 %v10309_v36, %v10308_v45  ;;  %v10311_v11 = vpop.f32.mrb[34].mxu0 }
 0x25a   : > { %v10312_v43 = vpop.f32.mrb[35].mxu0 }
 0x25b   : > { %v13824_v53 = vadd.f32 %v10312_v43, %v10311_v11 }
 0x25f   : > { %v10314_v25 = vpop.f32.mrb[36].mxu0 }
 0x260   : > { %v10315_v40 = vpop.f32.mrb[37].mxu0 }
 0x261   : > { %v13844_v54 = vadd.f32 %v10315_v40, %v10314_v25  ;;  %v10317_v7 = vpop.f32.mrb[38].mxu0  ;;  %v4262_v40 = vsel %vm13768_vm3, 0, %v4261_v58  ;;  %v4231_v58 = vsel %vm13776_vm5, 0, %v4230_v41 }
 0x262   : > { %v10318_v20 = vpop.f32.mrb[39].mxu0  ;;  %4263 = vst [vmem:[#allocation4 + $0x80] sm:$0x1] %v4262_v40  ;;  %4232 = vst [vmem:[#allocation4 + $0xc0] sm:$0x1] %v4231_v58  ;;  %v4228_v40 = vsel %vm13776_vm5, 0, %v4227_v50 }
 0x263   : > { %v13854_v60 = vadd.f32 %v10318_v20, %v10317_v7  ;;  %v4218_v20 = vld [vmem:[#allocation4 + $0x90] sm:$0x1]  ;;  %4229 = vst [vmem:[#allocation4 + $0xb4] sm:$0x1] %v4228_v40  ;;  %v5218_v58 = vshrl.u32 %v13850_v29, 16 }
 0x264   : > { %v4219_v57 = vsel %vm13776_vm5, 0, %v4218_v20  ;;  %v4277_v20 = vsel %vm13768_vm3, 0, %v4276_v32 }
 0x265   : > { %4220 = vst [vmem:[#allocation4 + $0x90] sm:$0x1] %v4219_v57  ;;  %4278 = vst [vmem:[#allocation4 + $0xbc] sm:$0x1] %v4277_v20 }
 0x267   : > { %v10320_v52 = vpop.f32.mrb[40].mxu0 }
 0x268   : > { %v10321_v34 = vpop.f32.mrb[41].mxu0 }
 0x269   : > { %v13862_v22 = vadd.f32 %v10321_v34, %v10320_v52  ;;  %v10323_v44 = vpop.f32.mrb[42].mxu0  ;;  %v4264_v52 = vld [vmem:[#allocation4 + $0x8c] sm:$0x1]  ;;  %v4224_v34 = vld [vmem:[#allocation4 + $0xa8] sm:$0x1] }
 0x26a   : > { %v10324_v45 = vpop.f32.mrb[43].mxu0  ;;  %v4265_v0 = vsel %vm13768_vm3, 0, %v4264_v52  ;;  %v4225_v35 = vsel %vm13776_vm5, 0, %v4224_v34 }
 0x26b   : > { %v13866_v59 = vadd.f32 %v10324_v45, %v10323_v44  ;;  %4266 = vst [vmem:[#allocation4 + $0x8c] sm:$0x1] %v4265_v0  ;;  %4226 = vst [vmem:[#allocation4 + $0xa8] sm:$0x1] %v4225_v35  ;;  %v9875_v0 = vld [vmem:[%s15974_s2] ss:$0 sm:$0xff] }
 0x26c   : > { %v3848_v33 = vadd.f32 %v13715_v12, %v9875_v0  ;;  %v13932_v2 = vadd.f32 %v13731_v62, %v9875_v0  ;;  %v13935_v55 = vadd.f32 %v13720_v4, %v9875_v0  ;;  %v13944_v12 = vadd.f32 %v13748_v19, %v9875_v0 }
 0x26d   : > { %v13953_v62 = vadd.f32 %v13750_v8, %v9875_v0  ;;  %v13956_v4 = vadd.f32 %v13802_v13, %v9875_v0  ;;  %v13965_v19 = vadd.f32 %v13807_v51, %v9875_v0  ;;  %v13970_v41 = vadd.f32 %v13822_v15, %v9875_v0 }
 0x26e   : > { %v13973_v8 = vadd.f32 %v13844_v54, %v9875_v0  ;;  %v13982_v13 = vadd.f32 %v13862_v22, %v9875_v0  ;;  %v13992_v54 = vadd.f32 %v13866_v59, %v9875_v0 }
 0x26f   : > { %v10326_v61 = vpop.f32.mrb[44].mxu0 }
 0x270   : > { %v10327_v36 = vpop.f32.mrb[45].mxu0 }
 0x271   : > { %v13868_v31 = vadd.f32 %v10327_v36, %v10326_v61  ;;  %v10329_v47 = vpop.f32.mrb[46].mxu0 }
 0x272   : > { %v10330_v11 = vpop.f32.mrb[47].mxu0 }
 0x273   : > { %v13870_v43 = vadd.f32 %v10330_v11, %v10329_v47  ;;  %v4221_v47 = vld [vmem:[#allocation4 + $0x9c] sm:$0x1] }
 0x274   : > { %v4222_v11 = vsel %vm13776_vm5, 0, %v4221_v47  ;;  %v3843_v47 = vadd.f32 %v13710_v16, %v9875_v0  ;;  %v13950_v16 = vadd.f32 %v13743_v24, %v9875_v0  ;;  %v5208_v24 = vshll.u32 %v13848_v18, 16 }
 0x275   : > { %4223 = vst [vmem:[#allocation4 + $0x9c] sm:$0x1] %v4222_v11  ;;  %v13989_v15 = vadd.f32 %v13870_v43, %v9875_v0 }
 0x276   : > { %v14008_v59 = vrot.slane %v5208_v24, 5 }
 0x281   : > { %v10332_v42 = vpop.f32.mrb[48].mxu0 }
 0x282   : > { %v10333_v63 = vpop.f32.mrb[49].mxu0 }
 0x283   : > { %v13880_v25 = vadd.f32 %v10333_v63, %v10332_v42  ;;  %v10335_v3 = vpop.f32.mrb[50].mxu0  ;;  %v4270_v42 = vld [vmem:[#allocation4 + $0xa4] sm:$0x1] }
 0x284   : > { %v10336_v37 = vpop.f32.mrb[51].mxu0  ;;  %v4271_v63 = vsel %vm13768_vm3, 0, %v4270_v42  ;;  %v13938_v42 = vadd.f32 %v13733_v28, %v9875_v0  ;;  %v13959_v28 = vadd.f32 %v13787_v1, %v9875_v0  ;;  %v13976_v1 = vadd.f32 %v13854_v60, %v9875_v0  ;;  %v4805_v60 = vld [vmem:[#allocation4 + $0x8] sm:$0x1] }
 0x285   : > { %v13886_v7 = vadd.f32 %v10336_v37, %v10335_v3  ;;  %4272 = vst [vmem:[#allocation4 + $0xa4] sm:$0x1] %v4271_v63  ;;  %v13915_v3 = vld [vmem:[%s15975_s3 + $0x40] sm:$0xff]   ;;  %v13998_v22 = vadd.f32 %v13880_v25, %v9875_v0 }
 0x286   : > { %10692 = vmatprep.subr.bf16.mxu0 %v13915_v3  ;;  %v4279_v37 = vld [vmem:[#allocation4 + $0xc8] sm:$0x1] }
 0x287   : > { %v4280_v10 = vsel %vm13768_vm3, 0, %v4279_v37  ;;  %v14001_v37 = vadd.f32 %v13886_v7, %v9875_v0 }
 0x288   : > { %4281 = vst [vmem:[#allocation4 + $0xc8] sm:$0x1] %v4280_v10 }
 0x299   : > { %v10338_v26 = vpop.f32.mrb[52].mxu0 }
 0x29a   : > { %v10339_v44 = vpop.f32.mrb[53].mxu0 }
 0x29b   : > { %v13900_v6 = vadd.f32 %v10339_v44, %v10338_v26  ;;  %v10341_v45 = vpop.f32.mrb[54].mxu0  ;;  %v3840_v26 = vadd.f32 %v13708_v38, %v9875_v0  ;;  %v13941_v38 = vadd.f32 %v13722_v27, %v9875_v0  ;;  %v13962_v27 = vadd.f32 %v13796_v46, %v9875_v0 }
 0x29c   : > { %v10342_v61 = vpop.f32.mrb[55].mxu0  ;;  %v13979_v46 = vadd.f32 %v13824_v53, %v9875_v0 }
 0x29d   : > { %v13902_v36 = vadd.f32 %v10342_v61, %v10341_v45  ;;  %v3851_v61 = vadd.f32 %v13717_v21, %v9875_v0  ;;  %v13947_v21 = vadd.f32 %v13741_v17, %v9875_v0  ;;  %v5205_v17 = vshrl.u32 %v13848_v18, 16 }
 0x29e   : > { %v13986_v18 = vadd.f32 %v13868_v31, %v9875_v0  ;;  %v13995_v53 = vadd.f32 %v13900_v6, %v9875_v0  ;;  %v5214_v6 = vshll.u32 %v13850_v29, 16 }
 0x29f   : > { %v14004_v43 = vadd.f32 %v13902_v36, %v9875_v0  ;;  %v14006_v10 = vrot.slane %v5205_v17, 4  ;;  %v14021_v17 = vrot.slane %v5218_v58, 4 }
 0x2af   : > { %v10344_v57 = vpop.f32.mrb[56].mxu0 }
 0x2b0   : > { %v10345_v9 = vpop.f32.mrb[57].mxu0 }
 0x2b1   : > { %v10346_v30 = vadd.f32 %v10345_v9, %v10344_v57  ;;  %v10347_v39 = vpop.f32.mrb[58].mxu0 }
 0x2b2   : > { %v10348_v52 = vpop.f32.mrb[59].mxu0 }
 0x2b3   : > { %v10349_v23 = vadd.f32 %v10348_v52, %v10347_v39  ;;  %v5224_v39 = vshll.u32 %v4805_v60, 16 }
 0x2b5   : > { %v14013_v7 = vadd.f32 %v10349_v23, %v9875_v0 }
 0x2b7   : > { %16123 = vst [vmem:[#allocation15_spill] sm:$0xff] %v14013_v7 }
 0x2bb   : > { %v10350_v34 = vpop.f32.mrb[60].mxu0 }
 0x2bc   : > { %v10351_v35 = vpop.f32.mrb[61].mxu0 }
 0x2bd   : > { %v10352_v44 = vadd.f32 %v10351_v35, %v10350_v34  ;;  %v10353_v45 = vpop.f32.mrb[62].mxu0  ;;  %v14011_v34 = vadd.f32 %v10346_v30, %v9875_v0  ;;  %v14025_v30 = vrot.slane %v5224_v39, 5 }
 0x2be   : > { %v10354_v11 = vpop.f32.mrb[63].mxu0 }
 0x2bf   : > { %v10355_v63 = vadd.f32 %v10354_v11, %v10353_v45  ;;  %v14015_v36 = vadd.f32 %v10352_v44, %v9875_v0 }
 0x2c1   : > { %v14017_v45 = vadd.f32 %v10355_v63, %v9875_v0 }
 0x2c3   : > { %v10614_v51 = vpop.f32.mrb[64].mxu0  ;;  %16124 = vst [vmem:[#allocation6_spill] sm:$0xff] %v14017_v45 }
 0x2c4   : > { %v4009_v50 = vadd.f32 %v10614_v51, %v3848_v33  ;;  %v4000_v40 = vpop.f32.mrb[65].mxu0 }
 0x2c5   : > { %v4001_v31 = vadd.f32 %v4000_v40, %v3840_v26  ;;  %v10615_v32 = vpop.f32.mrb[66].mxu0 }
 0x2c6   : > { %v4129_v20 = vmax.f32 %v4009_v50, 0.0  ;;  %v4012_v57 = vadd.f32 %v10615_v32, %v3851_v61  ;;  %v4003_v9 = vpop.f32.mrb[67].mxu0  ;;  %v5211_v61 = vor.u32 %v14008_v59, %v14006_v10  ;;  %v4691_v10 = vld [vmem:[#allocation4 + $0x18] sm:$0xf] }
 0x2c7   : > { %v4127_v25 = vmax.f32 %v4001_v31, 0.0  ;;  %v4004_v52 = vadd.f32 %v4003_v9, %v3843_v47  ;;  %v14023_v47 = vrot.slane %v5214_v6, 5 }
 0x2c8   : > { %v10214_v35 = vpack.c.bf16 %v4129_v20, %v4129_v20  ;;  %v4130_v26 = vmax.f32 %v4012_v57, 0.0 }
 0x2c9   : > { %v10212_v33 = vpack.c.bf16 %v4127_v25, %v4127_v25  ;;  %v4128_v11 = vmax.f32 %v4004_v52, 0.0  ;;  %v4684_v52 = vld [vmem:[#allocation4 + $0xc] sm:$0xf] }
 0x2ca   : > { %v4380_v29 = vshrl.u32 %v10214_v35, 16  ;;  %v10215_v24 = vpack.c.bf16 %v4130_v26, %v4130_v26  ;;  %v4383_v23 = vshll.u32 %v10214_v35, 16 }
 0x2cb   : > { %v4363_v51 = vshrl.u32 %v10212_v33, 16  ;;  %v4366_v60 = vshll.u32 %v10212_v33, 16  ;;  %v10213_v44 = vpack.c.bf16 %v4128_v11, %v4128_v11  ;;  %v10618_v50 = vpop.f32.mrb[68].mxu0 }
 0x2cc   : > { %v4382_v0 = vrot.slane %v4380_v29, 7  ;;  %v4388_v63 = vshrl.u32 %v10215_v24, 16  ;;  %v4391_v40 = vshll.u32 %v10215_v24, 16  ;;  %v4025_v31 = vadd.f32 %v10618_v50, %v13932_v2  ;;  %v4016_v32 = vpop.f32.mrb[69].mxu0  ;;  %v4695_v29 = vld [vmem:[#allocation4 + $0x20] sm:$0x1] }
 0x2cd   : > { %v4365_v59 = vrot.slane %v4363_v51, 7  ;;  %v4371_v20 = vshrl.u32 %v10213_v44, 16  ;;  %v4374_v57 = vshll.u32 %v10213_v44, 16  ;;  %v4017_v9 = vadd.f32 %v4016_v32, %v13935_v55  ;;  %v10619_v6 = vpop.f32.mrb[70].mxu0  ;;  %v4688_v44 = vld [vmem:[#allocation4 + $0x14] sm:$0x1] }
 0x2ce   : > { %v4385_v39 = vor.u32 %v4383_v23, %v4382_v0  ;;  %v4386_v25 = vrot.slane %v4382_v0, 4  ;;  %v4390_v35 = vrot.slane %v4388_v63, 7  ;;  %v4133_v26 = vmax.f32 %v4025_v31, 0.0  ;;  %v4019_v2 = vpop.f32.mrb[71].mxu0 }
 0x2cf   : > { %v4368_v33 = vor.u32 %v4366_v60, %v4365_v59  ;;  %v4369_v11 = vrot.slane %v4365_v59, 4  ;;  %v4373_v24 = vrot.slane %v4371_v20, 7  ;;  %v4131_v50 = vmax.f32 %v4017_v9, 0.0 }
 0x2d0   : > { %v4692_v14 = vsel %vm14030_vm8, %v4385_v39, %v4691_v10  ;;  %v4393_v51 = vor.u32 %v4391_v40, %v4390_v35  ;;  %v4395_v7 = vrot.slane %v4390_v35, 4  ;;  %v10218_v45 = vpack.c.bf16 %v4133_v26, %v4133_v26 }
 0x2d1   : > { %4693 = vst [vmem:[#allocation4 + $0x18] sm:$0xf] %v4692_v14  ;;  %v4685_v55 = vsel %vm14030_vm8, %v4368_v33, %v4684_v52  ;;  %v4376_v23 = vor.u32 %v4374_v57, %v4373_v24  ;;  %v4378_v0 = vrot.slane %v4373_v24, 4  ;;  %v10216_v63 = vpack.c.bf16 %v4131_v50, %v4131_v50  ;;  %v4705_v52 = vld [vmem:[#allocation4 + $0x30] sm:$0xf] }
 0x2d2   : > { %4686 = vst [vmem:[#allocation4 + $0xc] sm:$0xf] %v4685_v55  ;;  %v4394_v60 = vsel %vm11799_vm14, %v4386_v25, %v4393_v51  ;;  %v4696_v31 = vsel %vm13776_vm5, %v4395_v7, %v4695_v29  ;;  %v4414_v32 = vshrl.u32 %v10218_v45, 16  ;;  %v14043_v10 = vrot.slane %v5211_v61, 4  ;;  %v4698_v50 = vld [vmem:[#allocation4 + $0x24] sm:$0xf] }
 0x2d3   : > { %4694 = vst [vmem:[#allocation4 + $0x1c] sm:$0xf] %v4394_v60  ;;  %4697 = vst [vmem:[#allocation4 + $0x20] sm:$0x1] %v4696_v31  ;;  %v4377_v14 = vsel %vm11799_vm14, %v4369_v11, %v4376_v23  ;;  %v4689_v40 = vsel %vm13776_vm5, %v4378_v0, %v4688_v44  ;;  %v4417_v59 = vshll.u32 %v10218_v45, 16  ;;  %v4397_v20 = vshrl.u32 %v10216_v63, 16 }
 0x2d4   : > { %v10622_v57 = vpop.f32.mrb[72].mxu0  ;;  %4687 = vst [vmem:[#allocation4 + $0x10] sm:$0xf] %v4377_v14  ;;  %4690 = vst [vmem:[#allocation4 + $0x14] sm:$0x1] %v4689_v40  ;;  %v14049_v9 = vrot.slane %v4414_v32, 7  ;;  %v4028_v7 = vadd.f32 %v10619_v6, %v13938_v42  ;;  %v4020_v61 = vadd.f32 %v4019_v2, %v13941_v38  ;;  %v5221_v45 = vor.u32 %v14021_v17, %v14023_v47 }
 0x2d5   : > { %v4041_v39 = vadd.f32 %v10622_v57, %v13944_v12  ;;  %v4032_v25 = vpop.f32.mrb[73].mxu0  ;;  %v4399_v35 = vrot.slane %v4397_v20, 7  ;;  %v4400_v26 = vshll.u32 %v10216_v63, 16  ;;  %v4709_v20 = vld [vmem:[#allocation4 + $0x38] sm:$0x1] }
 0x2d6   : > { %v4033_v33 = vadd.f32 %v4032_v25, %v13947_v21  ;;  %v10623_v11 = vpop.f32.mrb[74].mxu0  ;;  %v4419_v29 = vor.u32 %v4417_v59, %v14049_v9  ;;  %v4420_v24 = vrot.slane %v14049_v9, 4  ;;  %v4134_v42 = vmax.f32 %v4028_v7, 0.0  ;;  %v4702_v57 = vld [vmem:[#allocation4 + $0x2c] sm:$0x1] }
 0x2d7   : > { %v4132_v6 = vmax.f32 %v4020_v61, 0.0  ;;  %v4035_v38 = vpop.f32.mrb[75].mxu0  ;;  %v4402_v2 = vor.u32 %v4400_v26, %v4399_v35  ;;  %v4403_v12 = vrot.slane %v4399_v35, 4  ;;  %v4137_v51 = vmax.f32 %v4041_v39, 0.0 }
 0x2d8   : > { %v4135_v44 = vmax.f32 %v4033_v33, 0.0  ;;  %v4706_v55 = vsel %vm14030_vm8, %v4419_v29, %v4705_v52  ;;  %v10219_v21 = vpack.c.bf16 %v4134_v42, %v4134_v42  ;;  %v4044_v0 = vadd.f32 %v10623_v11, %v13953_v62 }
 0x2d9   : > { %v10217_v23 = vpack.c.bf16 %v4132_v6, %v4132_v6  ;;  %4707 = vst [vmem:[#allocation4 + $0x30] sm:$0xf] %v4706_v55  ;;  %v4699_v17 = vsel %vm14030_vm8, %v4402_v2, %v4698_v50  ;;  %v10222_v63 = vpack.c.bf16 %v4137_v51, %v4137_v51  ;;  %v4036_v31 = vadd.f32 %v4035_v38, %v13950_v16  ;;  %v4719_v16 = vld [vmem:[#allocation4 + $0x48] sm:$0xf]  ;;  %v4712_v55 = vld [vmem:[#allocation4 + $0x3c] sm:$0xf] }
 0x2da   : > { %v10220_v60 = vpack.c.bf16 %v4135_v44, %v4135_v44  ;;  %4700 = vst [vmem:[#allocation4 + $0x24] sm:$0xf] %v4699_v17  ;;  %v4422_v32 = vshrl.u32 %v10219_v21, 16  ;;  %v4425_v14 = vshll.u32 %v10219_v21, 16  ;;  %v4138_v35 = vmax.f32 %v4044_v0, 0.0 }
 0x2db   : > { %v4405_v40 = vshrl.u32 %v10217_v23, 16  ;;  %v4408_v59 = vshll.u32 %v10217_v23, 16  ;;  %v4448_v9 = vshrl.u32 %v10222_v63, 16  ;;  %v4451_v7 = vshll.u32 %v10222_v63, 16  ;;  %v10626_v62 = vpop.f32.mrb[76].mxu0 }
 0x2dc   : > { %v4431_v61 = vshrl.u32 %v10220_v60, 16  ;;  %v4434_v39 = vshll.u32 %v10220_v60, 16  ;;  %v4424_v25 = vrot.slane %v4422_v32, 7  ;;  %v4136_v26 = vmax.f32 %v4036_v31, 0.0  ;;  %v4048_v33 = vpop.f32.mrb[77].mxu0 }
 0x2dd   : > { %v4407_v52 = vrot.slane %v4405_v40, 7  ;;  %v14065_v11 = vrot.slane %v4448_v9, 7  ;;  %v4057_v50 = vadd.f32 %v10626_v62, %v13956_v4  ;;  %v4049_v42 = vadd.f32 %v4048_v33, %v13959_v28  ;;  %v10627_v6 = vpop.f32.mrb[78].mxu0 }
 0x2de   : > { %v14067_v29 = vrot.slane %v4431_v61, 7  ;;  %v4427_v38 = vor.u32 %v4425_v14, %v4424_v25  ;;  %v4429_v2 = vrot.slane %v4424_v25, 4  ;;  %v4051_v21 = vpop.f32.mrb[79].mxu0  ;;  %v14074_v63 = vrot.slane %v5221_v45, 4  ;;  %v4723_v25 = vld [vmem:[#allocation4 + $0x50] sm:$0x1] }
 0x2df   : > { %v4410_v51 = vor.u32 %v4408_v59, %v4407_v52  ;;  %v4412_v44 = vrot.slane %v4407_v52, 4  ;;  %v4453_v23 = vor.u32 %v4451_v7, %v14065_v11  ;;  %v4454_v0 = vrot.slane %v14065_v11, 4  ;;  %v4716_v52 = vld [vmem:[#allocation4 + $0x44] sm:$0x1] }
 0x2e0   : > { %v4436_v17 = vor.u32 %v4434_v39, %v14067_v29  ;;  %v4428_v4 = vsel %vm11799_vm14, %v4420_v24, %v4427_v38  ;;  %v4710_v28 = vsel %vm13776_vm5, %v4429_v2, %v4709_v20  ;;  %v10223_v24 = vpack.c.bf16 %v4138_v35, %v4138_v35  ;;  %v11465_v38 = vld [vmem:[%s15975_s3 + $0x48] sm:$0xff]  }
 0x2e1   : > { %v4411_v60 = vsel %vm11799_vm14, %v4403_v12, %v4410_v51  ;;  %v4703_v31 = vsel %vm13776_vm5, %v4412_v44, %v4702_v57  ;;  %4708 = vst [vmem:[#allocation4 + $0x34] sm:$0xf] %v4428_v4  ;;  %4711 = vst [vmem:[#allocation4 + $0x38] sm:$0x1] %v4710_v28  ;;  %v4720_v45 = vsel %vm14030_vm8, %v4453_v23, %v4719_v16  ;;  %v4141_v40 = vmax.f32 %v4057_v50, 0.0 }
 0x2e2   : > { %4701 = vst [vmem:[#allocation4 + $0x28] sm:$0xf] %v4411_v60  ;;  %4704 = vst [vmem:[#allocation4 + $0x2c] sm:$0x1] %v4703_v31  ;;  %v4713_v32 = vsel %vm14030_vm8, %v4436_v17, %v4712_v55  ;;  %v10221_v14 = vpack.c.bf16 %v4136_v26, %v4136_v26  ;;  %v4139_v59 = vmax.f32 %v4049_v42, 0.0  ;;  %v4060_v12 = vadd.f32 %v10627_v6, %v13965_v19 }
 0x2e3   : > { %4721 = vst [vmem:[#allocation4 + $0x48] sm:$0xf] %v4720_v45  ;;  %4714 = vst [vmem:[#allocation4 + $0x3c] sm:$0xf] %v4713_v32  ;;  %v4052_v20 = vadd.f32 %v4051_v21, %v13962_v27  ;;  %v14090_v57 = vld [vmem:[#allocation4 + $0x10] sm:$0xf]  ;;  %v10226_v35 = vpack.c.bf16 %v4141_v40, %v4141_v40 }
 0x2e4   : > { %v4437_v9 = vrot.slane %v14067_v29, 4  ;;  %v4456_v7 = vshrl.u32 %v10223_v24, 16  ;;  %v4459_v61 = vshll.u32 %v10223_v24, 16  ;;  %v4439_v39 = vshrl.u32 %v10221_v14, 16  ;;  %v14093_v62 = vpop.f32.mrb[80].mxu0 }
 0x2e5   : > { %v10224_v26 = vpack.c.bf16 %v4139_v59, %v4139_v59  ;;  %v4142_v33 = vmax.f32 %v4060_v12, 0.0  ;;  %v4140_v11 = vmax.f32 %v4052_v20, 0.0  ;;  %v14095_v16 = vld [vmem:[#allocation4 + $0xc] sm:$0xf]  ;;  %v14097_v19 = vpop.f32.mrb[81].mxu0  ;;  %v4442_v42 = vshll.u32 %v10221_v14, 16 }
 0x2e6   : > { %v4458_v27 = vrot.slane %v4456_v7, 7  ;;  %v4441_v50 = vrot.slane %v4439_v39, 7  ;;  %v9944_v29 = vcombine.low %v14095_v16, %v14090_v57  ;;  %v14101_v6 = vpop.f32.mrb[82].mxu0  ;;  %v4482_v2 = vshrl.u32 %v10226_v35, 16  ;;  %v4733_v12 = vld [vmem:[#allocation4 + $0x60] sm:$0xf] }
 0x2e7   : > { %v4485_v51 = vshll.u32 %v10226_v35, 16  ;;  %v4465_v44 = vshrl.u32 %v10224_v26, 16  ;;  %v4468_v55 = vshll.u32 %v10224_v26, 16  ;;  %v14106_v21 = vpop.f32.mrb[83].mxu0  ;;  %v10227_v45 = vpack.c.bf16 %v4142_v33, %v4142_v33  ;;  %v4726_v20 = vld [vmem:[#allocation4 + $0x54] sm:$0xf] }
 0x2e8   : > { %v4461_v23 = vor.u32 %v4459_v61, %v4458_v27  ;;  %v4463_v17 = vrot.slane %v4458_v27, 4  ;;  %v4444_v4 = vor.u32 %v4442_v42, %v4441_v50  ;;  %v4446_v28 = vrot.slane %v4441_v50, 4  ;;  %10661 = vmatmul.mubr.bf16.vlgmr.msra.gmra.mrb[96].mxu0 %v9944_v29  ;;  %v11467_v7 = vld [vmem:[%s15975_s3 + $0x50] sm:$0xff]   ;;  %v14126_v61 = vld [vmem:[#allocation4 + $0xc] sm:$0xf] }
 0x2e9   : > { %v14108_v60 = vrot.slane %v4482_v2, 7  ;;  %v14110_v31 = vrot.slane %v4465_v44, 7  ;;  %v10225_v32 = vpack.c.bf16 %v4140_v11, %v4140_v11  ;;  %10693 = vmatpush3.bf16.msra.mxu0 %v13915_v3  ;;  %16127 = vst [vmem:[#allocation13_spill] sm:$0xff] %v14126_v61  ;;  %v4490_v35 = vshrl.u32 %v10227_v45, 16  ;;  %v4737_v29 = vld [vmem:[#allocation4 + $0x68] sm:$0x1] }
 0x2ea   : > { %v4462_v24 = vsel %vm11799_vm14, %v4454_v0, %v4461_v23  ;;  %v4724_v14 = vsel %vm13776_vm5, %v4463_v17, %v4723_v25  ;;  %v4445_v40 = vsel %vm11799_vm14, %v4437_v9, %v4444_v4  ;;  %v4717_v59 = vsel %vm13776_vm5, %v4446_v28, %v4716_v52  ;;  %10694 = vmatprep.subr.bf16.mxu0 %v11465_v38  ;;  %v14128_v9 = vld [vmem:[#allocation4 + $0x10] sm:$0xf]  ;;  %v4747_v33 = vld [vmem:[#allocation4 + $0x78] sm:$0xf]  ;;  %v4740_v39 = vld [vmem:[#allocation4 + $0x6c] sm:$0xf] }
 0x2eb   : > { %4722 = vst [vmem:[#allocation4 + $0x4c] sm:$0xf] %v4462_v24  ;;  %4725 = vst [vmem:[#allocation4 + $0x50] sm:$0x1] %v4724_v14  ;;  %v4487_v3 = vor.u32 %v4485_v51, %v14108_v60  ;;  %v4470_v0 = vor.u32 %v4468_v55, %v14110_v31  ;;  %v4488_v52 = vrot.slane %v14108_v60, 4  ;;  %v4473_v26 = vshrl.u32 %v10225_v32, 16 }
 0x2ec   : > { %4715 = vst [vmem:[#allocation4 + $0x40] sm:$0xf] %v4445_v40  ;;  %4718 = vst [vmem:[#allocation4 + $0x44] sm:$0x1] %v4717_v59  ;;  %v14140_v11 = vpop.f32.mrb[84].mxu0  ;;  %v4493_v42 = vshll.u32 %v10227_v45, 16  ;;  %v10031_v17 = vcombine.low %v14126_v61, %v14128_v9 }
 0x2ed   : > { %16128 = vst [vmem:[#allocation8_spill] sm:$0xff] %v14128_v9  ;;  %v4734_v27 = vsel %vm14030_vm8, %v4487_v3, %v4733_v12  ;;  %v4727_v50 = vsel %vm14030_vm8, %v4470_v0, %v4726_v20  ;;  %v4476_v2 = vshll.u32 %v10225_v32, 16  ;;  %v4730_v51 = vld [vmem:[#allocation4 + $0x5c] sm:$0x1]  ;;  %v14146_v44 = vpop.f32.mrb[85].mxu0  ;;  %10695 = vmatpush3.bf16.msra.mxu0 %v11465_v38  ;;  %v4492_v55 = vrot.slane %v4490_v35, 7 }
 0x2ee   : > { %4735 = vst [vmem:[#allocation4 + $0x60] sm:$0xf] %v4734_v27  ;;  %4728 = vst [vmem:[#allocation4 + $0x54] sm:$0xf] %v4727_v50  ;;  %v4475_v23 = vrot.slane %v4473_v26, 7  ;;  %v6760_v4 = vshrl.u32 %v14126_v61, 16  ;;  %10696 = vmatprep.subr.bf16.mxu0 %v11467_v7  ;;  %10804 = vmatprep.mubr.bf16.mxu1 %v10031_v17 }
 0x2ef   : > { %v14151_v28 = vpop.f32.mrb[86].mxu0  ;;  %v11472_v60 = vld [vmem:[%s15975_s3 + $0x58] sm:$0xff]   ;;  %v4471_v45 = vrot.slane %v14110_v31, 4  ;;  %v6763_v38 = vshll.u32 %v14126_v61, 16  ;;  %v6769_v32 = vshll.u32 %v14128_v9, 16  ;;  %v6773_v24 = vshrl.u32 %v14128_v9, 16 }
 0x2f0   : > { %v14160_v14 = vpop.f32.mrb[87].mxu0  ;;  %v4495_v40 = vor.u32 %v4493_v42, %v4492_v55  ;;  %v4497_v59 = vrot.slane %v4492_v55, 4  ;;  %v4478_v12 = vor.u32 %v4476_v2, %v4475_v23  ;;  %v4480_v20 = vrot.slane %v4475_v23, 4  ;;  %v14162_v3 = vld [vmem:[#allocation4 + $0x1c] sm:$0xf] }
 0x2f1   : > { %16129 = vst [vmem:[#allocation14_spill] sm:$0xff] %v14162_v3  ;;  %v14164_v0 = vld [vmem:[#allocation4 + $0x18] sm:$0xf]  ;;  %v14168_v26 = vrot.slane %v6760_v4, 4  ;;  %v6362_v50 = vld [vmem:[#allocation4 + $0x1c] sm:$0xf]  ;;  %10697 = vmatpush3.bf16.msra.mxu0 %v11467_v7  ;;  %v4065_v31 = vadd.f32 %v14097_v19, %v13970_v41 }
 0x2f2   : > { %16130 = vst [vmem:[#allocation7_spill] sm:$0xff] %v14164_v0  ;;  %v4496_v42 = vsel %vm11799_vm14, %v4488_v52, %v4495_v40  ;;  %v4738_v2 = vsel %vm13776_vm5, %v4497_v59, %v4737_v29  ;;  %v4479_v55 = vsel %vm11799_vm14, %v4471_v45, %v4478_v12  ;;  %v4731_v23 = vsel %vm13776_vm5, %v4480_v20, %v4730_v51  ;;  %v14179_v17 = vld [vmem:[#allocation4 + $0x18] sm:$0xf]  ;;  %v11474_v4 = vld [vmem:[%s15975_s3 + $0x60] sm:$0xff]   ;;  %v14222_v41 = vld [vmem:[#allocation4 + $0x24] sm:$0xf] }
 0x2f3   : > { %16131 = vst [vmem:[#allocation9_spill] sm:$0xff] %v14179_v17  ;;  %10698 = vmatprep.subr.bf16.mxu0 %v11472_v60  ;;  %4736 = vst [vmem:[#allocation4 + $0x64] sm:$0xf] %v4496_v42  ;;  %v14184_v7 = vrot.slane %v6763_v38, 5  ;;  %v14186_v52 = vrot.slane %v6769_v32, 5  ;;  %v14188_v29 = vrot.slane %v6773_v24, 4  ;;  %v9945_v51 = vcombine.low %v14179_v17, %v14162_v3 }
 0x2f4   : > { %4739 = vst [vmem:[#allocation4 + $0x68] sm:$0x1] %v4738_v2  ;;  %4729 = vst [vmem:[#allocation4 + $0x58] sm:$0xf] %v4479_v55  ;;  %v10032_v40 = vcombine.low %v14164_v0, %v6362_v50  ;;  %v6784_v59 = vshrl.u32 %v14164_v0, 16  ;;  %v6787_v12 = vshll.u32 %v14164_v0, 16  ;;  %v4073_v45 = vadd.f32 %v14093_v62, %v13973_v8 }
 0x2f5   : > { %4732 = vst [vmem:[#allocation4 + $0x5c] sm:$0x1] %v4731_v23  ;;  %v11448_v38 = vld [vmem:[%s15975_s3 + $0x108] sm:$0xff]   ;;  %v14199_v20 = vpop.f32.mrb[88].mxu0  ;;  %10664 = vmatprep.mubr.bf16.mxu0 %v9945_v51  ;;  %v6793_v42 = vshll.u32 %v6362_v50, 16  ;;  %v6797_v2 = vshrl.u32 %v6362_v50, 16  ;;  %10699 = vmatpush3.bf16.msra.mxu0 %v11472_v60  ;;  %v4076_v8 = vadd.f32 %v14101_v6, %v13976_v1  ;;  %v4068_v32 = vadd.f32 %v14106_v21, %v13979_v46 }
 0x2f6   : > { %v14203_v55 = vpop.f32.mrb[89].mxu0  ;;  %10805 = vmatmul.mubr.bf16.vlgmr.msra.gmra.mrb[0].mxu1 %v10032_v40  ;;  %v6786_v23 = vrot.slane %v6784_v59, 4  ;;  %v6789_v27 = vrot.slane %v6787_v12, 5  ;;  %v14209_v35 = vld [vmem:[#allocation4 + $0x28] sm:$0xf]  ;;  %10700 = vmatprep.subr.bf16.mxu0 %v11474_v4  ;;  %v11479_v50 = vld [vmem:[%s15975_s3 + $0x68] sm:$0xff]  }
 0x2f7   : > { %16132 = vst [vmem:[#allocation10_spill] sm:$0xff] %v14209_v35  ;;  %v14211_v51 = vpop.f32.mrb[90].mxu0  ;;  %v14217_v40 = vrot.slane %v6793_v42, 5  ;;  %v6799_v59 = vrot.slane %v6797_v2, 4  ;;  %10837 = vmatpush3.bf16.msra.mxu1 %v13875_v5  ;;  %16134 = vst [vmem:[#allocation12_spill] sm:$0xff] %v14222_v41  ;;  %v4145_v12 = vmax.f32 %v4073_v45, 0.0  ;;  %v9946_v6 = vcombine.low %v14222_v41, %v14209_v35 }
 0x2f8   : > { %v14224_v62 = vpop.f32.mrb[91].mxu0  ;;  %v6790_v19 = vor.u32 %v6789_v27, %v6786_v23  ;;  %v4143_v24 = vmax.f32 %v4065_v31, 0.0  ;;  %10838 = vmatprep.subr.bf16.mxu1 %v11448_v38  ;;  %v11453_v42 = vld [vmem:[%s15975_s3 + $0x110] sm:$0xff]   ;;  %v4146_v1 = vmax.f32 %v4076_v8, 0.0  ;;  %v4144_v31 = vmax.f32 %v4068_v32, 0.0 }
 0x2f9   : > { %16133 = vst [vmem:[#allocation11_spill] sm:$0xff] %v14217_v40  ;;  %v6800_v5 = vor.u32 %v6799_v59, %v14217_v40  ;;  %10701 = vmatpush3.bf16.msra.mxu0 %v11474_v4  ;;  %v10230_v27 = vpack.c.bf16 %v4145_v12, %v4145_v12  ;;  %v14236_v46 = vld [vmem:[#allocation4 + $0x28] sm:$0xf]  ;;  %v11481_v21 = vld [vmem:[%s15975_s3 + $0x70] sm:$0xff]   ;;  %v14246_v12 = vld [vmem:[#allocation4 + $0x24] sm:$0xf] }
 0x2fa   : > { %v10228_v45 = vpack.c.bf16 %v4143_v24, %v4143_v24  ;;  %16135 = vst [vmem:[#allocation16_spill] sm:$0xff] %v14236_v46  ;;  %10702 = vmatprep.subr.bf16.mxu0 %v11479_v50  ;;  %v14241_v59 = vrot.slane %v6790_v19, 4  ;;  %v10231_v8 = vpack.c.bf16 %v4146_v1, %v4146_v1  ;;  %10665 = vmatmul.mubr.bf16.gmra.mrb[100].mxu0 %v9946_v6  ;;  %16138 = vst [vmem:[#allocation19_spill] sm:$0xff] %v14246_v12  ;;  %v11458_v19 = vld [vmem:[%s15975_s3 + $0x118] sm:$0xff]   ;;  %v14254_v25 = vld [vmem:[#allocation4 + $0x30] sm:$0xf] }
 0x2fb   : > { %v14243_v2 = vrot.slane %v6800_v5, 4  ;;  %10839 = vmatpush3.bf16.msra.mxu1 %v11448_v38  ;;  %v4516_v32 = vshrl.u32 %v10230_v27, 16  ;;  %v4519_v24 = vshll.u32 %v10230_v27, 16  ;;  %v10229_v6 = vpack.c.bf16 %v4144_v31, %v4144_v31  ;;  %v14256_v38 = vld [vmem:[#allocation4 + $0x34] sm:$0xf]  ;;  %v14258_v27 = vpop.f32.mrb[92].mxu0 }
 0x2fc   : > { %16136 = vst [vmem:[#allocation17_spill] sm:$0xff] %v14241_v59  ;;  %v4499_v23 = vshrl.u32 %v10228_v45, 16  ;;  %10840 = vmatprep.subr.bf16.mxu1 %v11453_v42  ;;  %v4502_v5 = vshll.u32 %v10228_v45, 16  ;;  %v4524_v1 = vshrl.u32 %v10231_v8, 16  ;;  %v10033_v4 = vcombine.low %v14246_v12, %v14236_v46  ;;  %v14261_v35 = vpop.f32.mrb[93].mxu0  ;;  %v11485_v45 = vld [vmem:[%s15975_s3 + $0x78] sm:$0xff]  }
 0x2fd   : > { %16137 = vst [vmem:[#allocation18_spill] sm:$0xff] %v14243_v2  ;;  %10703 = vmatpush3.bf16.msra.mxu0 %v11479_v50  ;;  %v4518_v60 = vrot.slane %v4516_v32, 7  ;;  %v4527_v61 = vshll.u32 %v10231_v8, 16  ;;  %v4507_v41 = vshrl.u32 %v10229_v6, 16  ;;  %v4510_v2 = vshll.u32 %v10229_v6, 16  ;;  %v14267_v50 = vpop.f32.mrb[94].mxu0 }
 0x2fe   : > { %v4501_v0 = vrot.slane %v4499_v23, 7  ;;  %10704 = vmatprep.subr.bf16.mxu0 %v11481_v21  ;;  %v4526_v31 = vrot.slane %v4524_v1, 7  ;;  %10808 = vmatprep.mubr.bf16.mxu1 %v10033_v4  ;;  %v4751_v9 = vld [vmem:[#allocation4 + $0x80] sm:$0x1]  ;;  %v14270_v3 = vpop.f32.mrb[95].mxu0  ;;  %v11464_v1 = vld [vmem:[%s15975_s3 + $0x120] sm:$0xff]  }
 0x2ff   : > { %10841 = vmatpush3.bf16.msra.mxu1 %v11453_v42  ;;  %v4521_v23 = vor.u32 %v4519_v24, %v4518_v60  ;;  %v4522_v8 = vrot.slane %v4518_v60, 4  ;;  %v4509_v17 = vrot.slane %v4507_v41, 7  ;;  %v9947_v42 = vcombine.low %v14254_v25, %v14256_v38  ;;  %v14277_v59 = vld [vmem:[#allocation4 + $0x30] sm:$0xf]  ;;  %v14279_v60 = vld [vmem:[#allocation4 + $0x34] sm:$0xf] }
 0x300   : > { %v4504_v32 = vor.u32 %v4502_v5, %v4501_v0  ;;  %10842 = vmatprep.subr.bf16.mxu1 %v11458_v19  ;;  %v4529_v6 = vor.u32 %v4527_v61, %v4526_v31  ;;  %v4531_v4 = vrot.slane %v4526_v31, 4  ;;  %v4505_v5 = vrot.slane %v4501_v0, 4  ;;  %v4744_v46 = vld [vmem:[#allocation4 + $0x74] sm:$0x1]  ;;  %v4765_v61 = vld [vmem:[#allocation4 + $0x98] sm:$0x1] }
 0x301   : > { %10705 = vmatpush3.bf16.msra.mxu0 %v11481_v21  ;;  %v4748_v24 = vsel %vm14030_vm8, %v4521_v23, %v4747_v33  ;;  %v4512_v21 = vor.u32 %v4510_v2, %v4509_v17  ;;  %v4514_v12 = vrot.slane %v4509_v17, 4  ;;  %10668 = vmatprep.mubr.bf16.mxu0 %v9947_v42  ;;  %v14290_v33 = vld [vmem:[#allocation4 + $0x40] sm:$0xf]  ;;  %v14302_v2 = vld [vmem:[#allocation4 + $0x3c] sm:$0xf]  ;;  %v4081_v42 = vadd.f32 %v14146_v44, %v13982_v13 }
 0x302   : > { %v4741_v40 = vsel %vm14030_vm8, %v4504_v32, %v4740_v39  ;;  %10706 = vmatprep.subr.bf16.mxu0 %v11485_v45  ;;  %4749 = vst [vmem:[#allocation4 + $0x78] sm:$0xf] %v4748_v24  ;;  %v4530_v41 = vsel %vm11799_vm14, %v4522_v8, %v4529_v6  ;;  %v4752_v31 = vsel %vm13776_vm5, %v4531_v4, %v4751_v9  ;;  %16139 = vst [vmem:[#allocation20_spill] sm:$0xff] %v14290_v33  ;;  %v14295_v39 = vld [vmem:[%s15975_s3 + $0x80] sm:$0xff]   ;;  %v14314_v4 = vld [vmem:[#allocation4 + $0x40] sm:$0xf] }
 0x303   : > { %4742 = vst [vmem:[#allocation4 + $0x6c] sm:$0xf] %v4741_v40  ;;  %10843 = vmatpush3.bf16.msra.mxu1 %v11458_v19  ;;  %4750 = vst [vmem:[#allocation4 + $0x7c] sm:$0xf] %v4530_v41  ;;  %v10034_v9 = vcombine.low %v14277_v59, %v14279_v60  ;;  %v11471_v19 = vld [vmem:[%s15975_s3 + $0x128] sm:$0xff]   ;;  %v4513_v23 = vsel %vm11799_vm14, %v4505_v5, %v4512_v21  ;;  %v4745_v8 = vsel %vm13776_vm5, %v4514_v12, %v4744_v46 }
 0x304   : > { %4753 = vst [vmem:[#allocation4 + $0x80] sm:$0x1] %v4752_v31  ;;  %16140 = vst [vmem:[#allocation21_spill] sm:$0xff] %v14302_v2  ;;  %10844 = vmatprep.subr.bf16.mxu1 %v11464_v1  ;;  %v4089_v6 = vadd.f32 %v14140_v11, %v13986_v18  ;;  %v4092_v24 = vadd.f32 %v14151_v28, %v13989_v15  ;;  %v4084_v46 = vadd.f32 %v14160_v14, %v13992_v54  ;;  %v14324_v5 = vld [vmem:[#allocation4 + $0x3c] sm:$0xf] }
 0x305   : > { %10707 = vmatpush3.bf16.msra.mxu0 %v11485_v45  ;;  %4743 = vst [vmem:[#allocation4 + $0x70] sm:$0xf] %v4513_v23  ;;  %4746 = vst [vmem:[#allocation4 + $0x74] sm:$0x1] %v4745_v8  ;;  %10809 = vmatmul.mubr.bf16.gmra.mrb[4].mxu1 %v10034_v9  ;;  %v9948_v12 = vcombine.low %v14302_v2, %v14290_v33  ;;  %v14329_v31 = vld [vmem:[#allocation4 + $0x4c] sm:$0xf]  ;;  %v10035_v44 = vcombine.low %v14324_v5, %v14314_v4 }
 0x306   : > { %v4149_v11 = vmax.f32 %v4089_v6, 0.0  ;;  %10740 = vmatprep.subr.bf16.mxu0 %v14295_v39  ;;  %v4147_v13 = vmax.f32 %v4081_v42, 0.0  ;;  %v4150_v15 = vmax.f32 %v4092_v24, 0.0  ;;  %v4148_v54 = vmax.f32 %v4084_v46, 0.0  ;;  %v14334_v28 = vld [vmem:[#allocation4 + $0x48] sm:$0xf] }
 0x307   : > { %10845 = vmatpush3.bf16.msra.mxu1 %v11464_v1  ;;  %10669 = vmatmul.mubr.bf16.gmra.mrb[104].mxu0 %v9948_v12  ;;  %16141 = vst [vmem:[#allocation22_spill] sm:$0xff] %v14334_v28  ;;  %v11478_v14 = vld [vmem:[%s15975_s3 + $0x130] sm:$0xff]   ;;  %v9949_v24 = vcombine.low %v14334_v28, %v14329_v31  ;;  %v11484_v46 = vld [vmem:[%s15975_s3 + $0x138] sm:$0xff]   ;;  %v14349_v45 = vld [vmem:[#allocation4 + $0x4c] sm:$0xf] }
 0x308   : > { %10846 = vmatprep.subr.bf16.mxu1 %v11471_v19  ;;  %v10234_v21 = vpack.c.bf16 %v4149_v11, %v4149_v11  ;;  %v10232_v8 = vpack.c.bf16 %v4147_v13, %v4147_v13  ;;  %v10235_v6 = vpack.c.bf16 %v4150_v15, %v4150_v15  ;;  %v10233_v42 = vpack.c.bf16 %v4148_v54, %v4148_v54  ;;  %v14352_v23 = vld [vmem:[#allocation4 + $0x48] sm:$0xf]  ;;  %v4761_v18 = vld [vmem:[#allocation4 + $0x90] sm:$0xf]  ;;  %v4754_v40 = vld [vmem:[#allocation4 + $0x84] sm:$0xf] }
 0x309   : > { %10812 = vmatprep.mubr.bf16.mxu1 %v10035_v44  ;;  %10672 = vmatprep.mubr.bf16.mxu0 %v9949_v24  ;;  %v4758_v2 = vld [vmem:[#allocation4 + $0x8c] sm:$0x1] }
 0x30a   : > { %v4550_v12 = vshrl.u32 %v10234_v21, 16  ;;  %v4553_v41 = vshll.u32 %v10234_v21, 16  ;;  %v4533_v13 = vshrl.u32 %v10232_v8, 16  ;;  %v4536_v15 = vshll.u32 %v10232_v8, 16 }
 0x30b   : > { %10847 = vmatpush3.bf16.msra.mxu1 %v11471_v19  ;;  %v4558_v54 = vshrl.u32 %v10235_v6, 16  ;;  %v4561_v32 = vshll.u32 %v10235_v6, 16  ;;  %v4541_v21 = vshrl.u32 %v10233_v42, 16  ;;  %v4544_v17 = vshll.u32 %v10233_v42, 16  ;;  %v14376_v42 = vld [vmem:[#allocation4 + $0x54] sm:$0xf] }
 0x30c   : > { %10848 = vmatprep.subr.bf16.mxu1 %v11478_v14  ;;  %v4552_v1 = vrot.slane %v4550_v12, 7  ;;  %v4535_v11 = vrot.slane %v4533_v13, 7  ;;  %v10036_v19 = vcombine.low %v14352_v23, %v14349_v45  ;;  %v14362_v13 = vld [vmem:[%s15975_s3 + $0x140] sm:$0xff]  }
 0x30d   : > { %v4560_v9 = vrot.slane %v4558_v54, 7  ;;  %v4543_v44 = vrot.slane %v4541_v21, 7 }
 0x30e   : > { %v4555_v8 = vor.u32 %v4553_v41, %v4552_v1  ;;  %v4556_v24 = vrot.slane %v4552_v1, 4  ;;  %v4538_v12 = vor.u32 %v4536_v15, %v4535_v11  ;;  %10813 = vmatmul.mubr.bf16.gmra.mrb[8].mxu1 %v10036_v19  ;;  %v4539_v1 = vrot.slane %v4535_v11, 4 }
 0x30f   : > { %10849 = vmatpush3.bf16.msra.mxu1 %v11478_v14  ;;  %v4563_v33 = vor.u32 %v4561_v32, %v4560_v9  ;;  %v4565_v6 = vrot.slane %v4560_v9, 4  ;;  %v4546_v54 = vor.u32 %v4544_v17, %v4543_v44  ;;  %v4548_v21 = vrot.slane %v4543_v44, 4  ;;  %v14366_v14 = vld [vmem:[#allocation4 + $0x58] sm:$0xf]  ;;  %v14393_v44 = vld [vmem:[#allocation4 + $0x54] sm:$0xf] }
 0x310   : > { %10850 = vmatprep.subr.bf16.mxu1 %v11484_v46  ;;  %v4762_v41 = vsel %vm14030_vm8, %v4555_v8, %v4761_v18  ;;  %v4755_v32 = vsel %vm14030_vm8, %v4538_v12, %v4754_v40  ;;  %v4105_v19 = vadd.f32 %v14199_v20, %v13995_v53  ;;  %v14386_v18 = vld [vmem:[#allocation4 + $0x58] sm:$0xf]  ;;  %v4100_v11 = vadd.f32 %v14224_v62, %v14001_v37 }
 0x311   : > { %4763 = vst [vmem:[#allocation4 + $0x90] sm:$0xf] %v4762_v41  ;;  %v4564_v9 = vsel %vm11799_vm14, %v4556_v24, %v4563_v33  ;;  %v4766_v15 = vsel %vm13776_vm5, %v4565_v6, %v4765_v61  ;;  %4756 = vst [vmem:[#allocation4 + $0x84] sm:$0xf] %v4755_v32  ;;  %v4547_v17 = vsel %vm11799_vm14, %v4539_v1, %v4546_v54  ;;  %v14405_v54 = vld [vmem:[#allocation4 + $0x60] sm:$0xf] }
 0x312   : > { %4764 = vst [vmem:[#allocation4 + $0x94] sm:$0xf] %v4564_v9  ;;  %4767 = vst [vmem:[#allocation4 + $0x98] sm:$0x1] %v4766_v15  ;;  %v4759_v40 = vsel %vm13776_vm5, %v4548_v21, %v4758_v2  ;;  %v4097_v33 = vadd.f32 %v14203_v55, %v13998_v22  ;;  %v4108_v61 = vadd.f32 %v14211_v51, %v14004_v43  ;;  %v4153_v20 = vmax.f32 %v4105_v19, 0.0 }
 0x313   : > { %10851 = vmatpush3.bf16.msra.mxu1 %v11484_v46  ;;  %4757 = vst [vmem:[#allocation4 + $0x88] sm:$0xf] %v4547_v17  ;;  %4760 = vst [vmem:[#allocation4 + $0x8c] sm:$0x1] %v4759_v40  ;;  %v9950_v2 = vcombine.low %v14376_v42, %v14366_v14  ;;  %v14398_v46 = vld [vmem:[#allocation4 + $0x64] sm:$0xf]  ;;  %v10037_v62 = vcombine.low %v14393_v44, %v14386_v18 }
 0x314   : > { %10884 = vmatprep.subr.bf16.mxu1 %v14362_v13  ;;  %v4151_v22 = vmax.f32 %v4097_v33, 0.0  ;;  %v4154_v43 = vmax.f32 %v4108_v61, 0.0  ;;  %v10238_v8 = vpack.c.bf16 %v4153_v20, %v4153_v20  ;;  %v4152_v24 = vmax.f32 %v4100_v11, 0.0  ;;  %v14410_v61 = vld [vmem:[#allocation4 + $0x64] sm:$0xf] }
 0x315   : > { %10673 = vmatmul.mubr.bf16.gmra.mrb[108].mxu0 %v9950_v2  ;;  %10816 = vmatprep.mubr.bf16.mxu1 %v10037_v62  ;;  %v9951_v15 = vcombine.low %v14405_v54, %v14398_v46  ;;  %v4775_v11 = vld [vmem:[#allocation4 + $0xa8] sm:$0xf]  ;;  %v14414_v55 = vld [vmem:[#allocation4 + $0x60] sm:$0xf]  ;;  %v4768_v9 = vld [vmem:[#allocation4 + $0x9c] sm:$0xf] }
 0x316   : > { %v10236_v12 = vpack.c.bf16 %v4151_v22, %v4151_v22  ;;  %v10239_v6 = vpack.c.bf16 %v4154_v43, %v4154_v43  ;;  %v4584_v21 = vshrl.u32 %v10238_v8, 16  ;;  %v10237_v32 = vpack.c.bf16 %v4152_v24, %v4152_v24 }
 0x317   : > { %v4587_v19 = vshll.u32 %v10238_v8, 16  ;;  %10676 = vmatprep.mubr.bf16.mxu0 %v9951_v15 }
 0x318   : > { %v4567_v17 = vshrl.u32 %v10236_v12, 16  ;;  %v4570_v40 = vshll.u32 %v10236_v12, 16  ;;  %v4592_v33 = vshrl.u32 %v10239_v6, 16  ;;  %v4586_v20 = vrot.slane %v4584_v21, 7  ;;  %v4779_v12 = vld [vmem:[#allocation4 + $0xb0] sm:$0x1] }
 0x319   : > { %v4595_v2 = vshll.u32 %v10239_v6, 16  ;;  %v4575_v22 = vshrl.u32 %v10237_v32, 16  ;;  %v4578_v43 = vshll.u32 %v10237_v32, 16  ;;  %v10038_v6 = vcombine.low %v14414_v55, %v14410_v61 }
 0x31a   : > { %v4569_v37 = vrot.slane %v4567_v17, 7  ;;  %v4594_v24 = vrot.slane %v4592_v33, 7  ;;  %v4589_v8 = vor.u32 %v4587_v19, %v4586_v20  ;;  %v4590_v21 = vrot.slane %v4586_v20, 4  ;;  %v4772_v33 = vld [vmem:[#allocation4 + $0xa4] sm:$0x1] }
 0x31b   : > { %v4577_v1 = vrot.slane %v4575_v22, 7  ;;  %10817 = vmatmul.mubr.bf16.gmra.mrb[12].mxu1 %v10038_v6  ;;  %v14421_v19 = vld [vmem:[#allocation4 + $0x70] sm:$0xf]  ;;  %v16144_v6 = vld [vmem:[#allocation15_spill] sm:$0xff] }
 0x31c   : > { %v4572_v32 = vor.u32 %v4570_v40, %v4569_v37  ;;  %v4597_v15 = vor.u32 %v4595_v2, %v4594_v24  ;;  %v4599_v17 = vrot.slane %v4594_v24, 4  ;;  %v4776_v62 = vsel %vm14030_vm8, %v4589_v8, %v4775_v11  ;;  %16142 = vst [vmem:[#allocation23_spill] sm:$0xff] %v14421_v19  ;;  %v14430_v24 = vld [vmem:[#allocation4 + $0x6c] sm:$0xf]  ;;  %v16143_v8 = vld [vmem:[#allocation6_spill] sm:$0xff] }
 0x31d   : > { %v4573_v51 = vrot.slane %v4569_v37, 4  ;;  %v4580_v53 = vor.u32 %v4578_v43, %v4577_v1  ;;  %v4582_v28 = vrot.slane %v4577_v1, 4  ;;  %4777 = vst [vmem:[#allocation4 + $0xa8] sm:$0xf] %v4776_v62  ;;  %v4121_v11 = vadd.f32 %v14258_v27, %v14015_v36  ;;  %v14439_v43 = vld [vmem:[#allocation4 + $0x70] sm:$0xf] }
 0x31e   : > { %v4769_v22 = vsel %vm14030_vm8, %v4572_v32, %v4768_v9  ;;  %v4598_v20 = vsel %vm11799_vm14, %v4590_v21, %v4597_v15  ;;  %v4780_v40 = vsel %vm13776_vm5, %v4599_v17, %v4779_v12  ;;  %v4113_v62 = vadd.f32 %v14261_v35, %v14011_v34  ;;  %v14454_v15 = vld [vmem:[#allocation4 + $0x7c] sm:$0xf]  ;;  %v14458_v17 = vld [vmem:[#allocation4 + $0x78] sm:$0xf]  ;;  %v14483_v2 = vld [vmem:[#allocation4 + $0x90] sm:$0xf] }
 0x31f   : > { %4770 = vst [vmem:[#allocation4 + $0x9c] sm:$0xf] %v4769_v22  ;;  %4778 = vst [vmem:[#allocation4 + $0xac] sm:$0xf] %v4598_v20  ;;  %v4581_v37 = vsel %vm11799_vm14, %v4573_v51, %v4580_v53  ;;  %v4773_v1 = vsel %vm13776_vm5, %v4582_v28, %v4772_v33  ;;  %v4124_v12 = vadd.f32 %v14267_v50, %v16143_v8  ;;  %v14449_v51 = vld [vmem:[#allocation4 + $0x6c] sm:$0xf] }
 0x320   : > { %4781 = vst [vmem:[#allocation4 + $0xb0] sm:$0x1] %v4780_v40  ;;  %4771 = vst [vmem:[#allocation4 + $0xa0] sm:$0xf] %v4581_v37  ;;  %v4116_v53 = vadd.f32 %v14270_v3, %v16144_v6  ;;  %v9952_v28 = vcombine.low %v14430_v24, %v14421_v19  ;;  %v4157_v27 = vmax.f32 %v4121_v11, 0.0  ;;  %v4155_v34 = vmax.f32 %v4113_v62, 0.0 }
 0x321   : > { %4774 = vst [vmem:[#allocation4 + $0xa4] sm:$0x1] %v4773_v1  ;;  %16145 = vst [vmem:[#allocation6_spill] sm:$0xff] %v14454_v15  ;;  %v4158_v35 = vmax.f32 %v4124_v12, 0.0  ;;  %v10039_v3 = vcombine.low %v14449_v51, %v14439_v43  ;;  %v9953_v62 = vcombine.low %v14458_v17, %v14454_v15  ;;  %v4793_v20 = vld [vmem:[#allocation4 + $0xc8] sm:$0x1] }
 0x322   : > { %v4156_v50 = vmax.f32 %v4116_v53, 0.0  ;;  %10677 = vmatmul.mubr.bf16.gmra.mrb[112].mxu0 %v9952_v28  ;;  %16146 = vst [vmem:[#allocation15_spill] sm:$0xff] %v14458_v17  ;;  %v10242_v33 = vpack.c.bf16 %v4157_v27, %v4157_v27  ;;  %v10240_v37 = vpack.c.bf16 %v4155_v34, %v4155_v34  ;;  %v14467_v28 = vld [vmem:[#allocation4 + $0x7c] sm:$0xf]  ;;  %v4789_v27 = vld [vmem:[#allocation4 + $0xc0] sm:$0xf] }
 0x323   : > { %v10243_v1 = vpack.c.bf16 %v4158_v35, %v4158_v35  ;;  %10820 = vmatprep.mubr.bf16.mxu1 %v10039_v3  ;;  %10680 = vmatprep.mubr.bf16.mxu0 %v9953_v62  ;;  %v14470_v35 = vld [vmem:[#allocation4 + $0x78] sm:$0xf]  ;;  %v4782_v3 = vld [vmem:[#allocation4 + $0xb4] sm:$0xf]  ;;  %v4786_v53 = vld [vmem:[#allocation4 + $0xbc] sm:$0x1] }
 0x324   : > { %v10241_v11 = vpack.c.bf16 %v4156_v50, %v4156_v50  ;;  %v4618_v8 = vshrl.u32 %v10242_v33, 16  ;;  %v4621_v12 = vshll.u32 %v10242_v33, 16  ;;  %v4601_v22 = vshrl.u32 %v10240_v37, 16  ;;  %v14476_v17 = vld [vmem:[#allocation4 + $0x88] sm:$0xf] }
 0x325   : > { %v4604_v32 = vshll.u32 %v10240_v37, 16  ;;  %v4626_v21 = vshrl.u32 %v10243_v1, 16  ;;  %v4629_v40 = vshll.u32 %v10243_v1, 16  ;;  %v10040_v37 = vcombine.low %v14470_v35, %v14467_v28  ;;  %v14487_v15 = vld [vmem:[#allocation4 + $0x88] sm:$0xf] }
 0x326   : > { %v4620_v50 = vrot.slane %v4618_v8, 7  ;;  %v4609_v33 = vshrl.u32 %v10241_v11, 16  ;;  %v4612_v36 = vshll.u32 %v10241_v11, 16  ;;  %v4603_v6 = vrot.slane %v4601_v22, 7  ;;  %v14481_v11 = vld [vmem:[#allocation4 + $0x84] sm:$0xf] }
 0x327   : > { %v4628_v9 = vrot.slane %v4626_v21, 7  ;;  %10821 = vmatmul.mubr.bf16.gmra.mrb[16].mxu1 %v10040_v37  ;;  %v14479_v21 = vld [vmem:[#allocation4 + $0x84] sm:$0xf]  ;;  %v10041_v56 = vcombine.low %v14481_v11, %v14487_v15  ;;  %v6766_v22 = vor.u32 %v14184_v7, %v14168_v26  ;;  %v6776_v26 = vor.u32 %v14188_v29, %v14186_v52  ;;  %v4808_v7 = vld [vmem:[#allocation4 + $0x14] sm:$0x1] }
 0x328   : > { %v4623_v41 = vor.u32 %v4621_v12, %v4620_v50  ;;  %v4624_v62 = vrot.slane %v4620_v50, 4  ;;  %v4611_v0 = vrot.slane %v4609_v33, 7  ;;  %v4606_v8 = vor.u32 %v4604_v32, %v4603_v6  ;;  %v14489_v32 = vld [vmem:[#allocation4 + $0x94] sm:$0xf] }
 0x329   : > { %v4631_v1 = vor.u32 %v4629_v40, %v4628_v9  ;;  %v4633_v19 = vrot.slane %v4628_v9, 4  ;;  %v4607_v50 = vrot.slane %v4603_v6, 4  ;;  %v14499_v6 = vld [vmem:[#allocation4 + $0x90] sm:$0xf]  ;;  %10824 = vmatprep.mubr.bf16.mxu1 %v10041_v56 }
 0x32a   : > { %v4790_v12 = vsel %vm14030_vm8, %v4623_v41, %v4789_v27  ;;  %v4614_v33 = vor.u32 %v4612_v36, %v4611_v0  ;;  %v4616_v34 = vrot.slane %v4611_v0, 4  ;;  %v4783_v9 = vsel %vm14030_vm8, %v4606_v8, %v4782_v3  ;;  %v14501_v0 = vld [vmem:[#allocation4 + $0x94] sm:$0xf]  ;;  %v14503_v36 = vld [vmem:[#allocation4 + $0x9c] sm:$0xf] }
 0x32b   : > { %4791 = vst [vmem:[#allocation4 + $0xc0] sm:$0xf] %v4790_v12  ;;  %v4632_v40 = vsel %vm11799_vm14, %v4624_v62, %v4631_v1  ;;  %v4794_v37 = vsel %vm13776_vm5, %v4633_v19, %v4793_v20  ;;  %v9954_v41 = vcombine.low %v14479_v21, %v14476_v17  ;;  %16147 = vst [vmem:[#allocation24_spill] sm:$0xff] %v14503_v36  ;;  %v14511_v3 = vld [vmem:[#allocation4 + $0xa0] sm:$0xf] }
 0x32c   : > { %4784 = vst [vmem:[#allocation4 + $0xb4] sm:$0xf] %v4783_v9  ;;  %4792 = vst [vmem:[#allocation4 + $0xc4] sm:$0xf] %v4632_v40  ;;  %v4615_v58 = vsel %vm11799_vm14, %v4607_v50, %v4614_v33  ;;  %v4787_v27 = vsel %vm13776_vm5, %v4616_v34, %v4786_v53  ;;  %v14513_v62 = vld [vmem:[#allocation4 + $0x9c] sm:$0xf]  ;;  %v9955_v33 = vcombine.low %v14483_v2, %v14489_v32 }
 0x32d   : > { %4795 = vst [vmem:[#allocation4 + $0xc8] sm:$0x1] %v4794_v37  ;;  %16148 = vst [vmem:[#allocation25_spill] sm:$0xff] %v14511_v3  ;;  %10681 = vmatmul.mubr.bf16.gmra.mrb[116].mxu0 %v9954_v41  ;;  %v14520_v53 = vld [vmem:[#allocation4 + $0xa0] sm:$0xf]  ;;  %v9956_v9 = vcombine.low %v14503_v36, %v14511_v3 }
 0x32e   : > { %4785 = vst [vmem:[#allocation4 + $0xb8] sm:$0xf] %v4615_v58  ;;  %4788 = vst [vmem:[#allocation4 + $0xbc] sm:$0x1] %v4787_v27  ;;  %v14522_v34 = vld [vmem:[#allocation4 + $0xa8] sm:$0xf]  ;;  %v10042_v58 = vcombine.low %v14499_v6, %v14501_v0  ;;  %10684 = vmatprep.mubr.bf16.mxu0 %v9955_v33  ;;  %v10043_v27 = vcombine.low %v14513_v62, %v14520_v53 }
 0x32f   : > { %16149 = vst [vmem:[#allocation26_spill] sm:$0xff] %v14520_v53  ;;  %16150 = vst [vmem:[#allocation27_spill] sm:$0xff] %v14522_v34  ;;  %v14529_v40 = vld [vmem:[#allocation4 + $0xac] sm:$0xf]  ;;  %v14536_v1 = vld [vmem:[#allocation4 + $0xa8] sm:$0xf] }
 0x330   : > { %16151 = vst [vmem:[#allocation28_spill] sm:$0xff] %v14529_v40  ;;  %16152 = vst [vmem:[#allocation29_spill] sm:$0xff] %v14536_v1  ;;  %v14543_v37 = vld [vmem:[#allocation4 + $0xac] sm:$0xf]  ;;  %10825 = vmatmul.mubr.bf16.gmra.mrb[20].mxu1 %v10042_v58  ;;  %v9957_v12 = vcombine.low %v14522_v34, %v14529_v40  ;;  %v6360_v20 = vld [vmem:[#allocation4 + $0x14] sm:$0x1]  ;;  %v16160_v58 = vsel %vm11790_vm13, %v14074_v63, %v14025_v30  ;;  %v16161_v40 = vsel %vm11790_vm13, %v14043_v10, %v14023_v47 }
 0x331   : > { %16153 = vst [vmem:[#allocation30_spill] sm:$0xff] %v14543_v37  ;;  %10828 = vmatprep.mubr.bf16.mxu1 %v10043_v27  ;;  %v10044_v41 = vcombine.low %v14536_v1, %v14543_v37  ;;  %v6767_v37 = vrot.slane %v6766_v22, 4  ;;  %v16163_v22 = vshll.u32 %v14095_v16, 16  ;;  %v16164_v63 = vshrl.u32 %v14090_v57, 16  ;;  %v4811_v3 = vld [vmem:[#allocation4 + $0x20] sm:$0x1] }
 0x332   : > { %v14555_v48 = vld [vmem:[#allocation4 + $0xc0] sm:$0xf] }
 0x333   : > { %16154 = vst [vmem:[#allocation31_spill] sm:$0xff] %v14555_v48  ;;  %v14562_v8 = vld [vmem:[#allocation4 + $0xb4] sm:$0xf]  ;;  %v6772_v29 = vsel %vm11790_vm13, %v6767_v37, %v14186_v52  ;;  %v5244_v1 = vrot.slane %v16164_v63, 4  ;;  %v16168_v53 = vld [vmem:[#allocation14_spill] sm:$0xff] }
 0x334   : > { %16155 = vst [vmem:[#allocation32_spill] sm:$0xff] %v14562_v8  ;;  %v14573_v33 = vld [vmem:[#allocation4 + $0xb4] sm:$0xf]  ;;  %v5262_v52 = vshll.u32 %v16168_v53, 16  ;;  %v16169_v37 = vshrl.u32 %v16168_v53, 16  ;;  %v16170_v53 = vld [vmem:[#allocation11_spill] sm:$0xff] }
 0x335   : > { %v14566_v56 = vld [vmem:[#allocation4 + $0xb8] sm:$0xf]  ;;  %10685 = vmatmul.mubr.bf16.gmra.mrb[120].mxu0 %v9956_v9  ;;  %16157 = vst [vmem:[#allocation34_spill] sm:$0xff] %v14573_v33  ;;  %v16162_v9 = vshrl.u32 %v14095_v16, 16 }
 0x336   : > { %16156 = vst [vmem:[#allocation33_spill] sm:$0xff] %v14566_v56  ;;  %v9958_v50 = vcombine.low %v14562_v8, %v14566_v56  ;;  %v14575_v34 = vld [vmem:[#allocation4 + $0xb8] sm:$0xf]  ;;  %10688 = vmatprep.mubr.bf16.mxu0 %v9957_v12  ;;  %v14584_v8 = vld [vmem:[#allocation4 + $0xc4] sm:$0xf]  ;;  %v6779_v12 = vshll.u32 %v6360_v20, 16  ;;  %v9967_v56 = vcombine.low %v16161_v40, %v16160_v58 }
 0x337   : > { %16158 = vst [vmem:[#allocation35_spill] sm:$0xff] %v14575_v34  ;;  %v10045_v27 = vcombine.low %v14573_v33, %v14575_v34  ;;  %16159 = vst [vmem:[#allocation36_spill] sm:$0xff] %v14584_v8  ;;  %v10046_v19 = vcombine.low %v14555_v48, %v14584_v8  ;;  %v5231_v48 = vrot.slane %v16162_v9, 4  ;;  %v5234_v34 = vrot.slane %v16163_v22, 5  ;;  %v11586_v33 = vld [vmem:[#allocation4 + $0x10] sm:$0xf] }
 0x338   : > { %10829 = vmatmul.mubr.bf16.gmra.mrb[24].mxu1 %v10044_v41  ;;  %v6777_v20 = vrot.slane %v6776_v26, 4  ;;  %v5238_v30 = vshll.u32 %v11586_v33, 16  ;;  %v6781_v47 = vrot.slane %v6779_v12, 5  ;;  %v5248_v40 = vshll.u32 %v4808_v7, 16  ;;  %v16165_v58 = vld [vmem:[#allocation9_spill] sm:$0xff] }
 0x339   : > { %10832 = vmatprep.mubr.bf16.mxu1 %v10045_v27  ;;  %v5235_v10 = vor.u32 %v5234_v34, %v5231_v48  ;;  %v16166_v9 = vshrl.u32 %v16165_v58, 16  ;;  %v16167_v41 = vshll.u32 %v16165_v58, 16  ;;  %v5268_v33 = vrot.slane %v16169_v37, 4  ;;  %v6363_v26 = vld [vmem:[#allocation4 + $0x20] sm:$0x1] }
 0x33a   : > { %v5240_v22 = vrot.slane %v5238_v30, 5  ;;  %v6782_v27 = vsel %vm11790_vm13, %v6777_v20, %v6781_v47  ;;  %v5272_v34 = vshll.u32 %v4811_v3, 16  ;;  %v5264_v63 = vrot.slane %v5262_v52, 5  ;;  %v6366_v8 = vld [vmem:[#allocation4 + $0x2c] sm:$0x1] }
 0x33b   : > { %v5255_v16 = vrot.slane %v16166_v9, 4  ;;  %v5258_v36 = vrot.slane %v16167_v41, 5  ;;  %v5236_v48 = vrot.slane %v5235_v10, 4  ;;  %v10055_v7 = vcombine.low %v6772_v29, %v6782_v27  ;;  %v16171_v41 = vld [vmem:[#allocation17_spill] sm:$0xff] }
 0x33c   : > { %v5245_v12 = vor.u32 %v5244_v1, %v5240_v22  ;;  %v5250_v9 = vrot.slane %v5248_v40, 5  ;;  %v6796_v37 = vsel %vm11790_vm13, %v16171_v41, %v16170_v53  ;;  %v6803_v57 = vshll.u32 %v6363_v26, 16 }
 0x33d   : > { %10689 = vmatmul.mubr.bf16.gmra.mrb[124].mxu0 %v9958_v50  ;;  %v5259_v30 = vor.u32 %v5258_v36, %v5255_v16  ;;  %v5241_v58 = vsel %vm11790_vm13, %v5236_v48, %v5240_v22  ;;  %v5269_v3 = vor.u32 %v5268_v33, %v5264_v63  ;;  %v16172_v50 = vld [vmem:[#allocation19_spill] sm:$0xff]  ;;  %v16175_v16 = vld [vmem:[#allocation16_spill] sm:$0xff]  ;;  %v5274_v48 = vrot.slane %v5272_v34, 5 }
 0x33e   : > { %10708 = vmatprep.mubr.bf16.mxu0 %v9967_v56  ;;  %v5246_v20 = vrot.slane %v5245_v12, 4  ;;  %v16173_v29 = vshrl.u32 %v16172_v50, 16  ;;  %v6805_v36 = vrot.slane %v6803_v57, 5  ;;  %v16174_v56 = vshll.u32 %v16172_v50, 16  ;;  %v16177_v57 = vld [vmem:[#allocation18_spill] sm:$0xff] }
 0x33f   : > { %v5260_v47 = vrot.slane %v5259_v30, 4  ;;  %v6817_v22 = vshll.u32 %v16175_v16, 16  ;;  %v16176_v40 = vshrl.u32 %v16175_v16, 16  ;;  %v5270_v27 = vrot.slane %v5269_v3, 4 }
 0x340   : > { %v6810_v1 = vrot.slane %v16173_v29, 4  ;;  %v6813_v10 = vrot.slane %v16174_v56, 5  ;;  %10833 = vmatmul.mubr.bf16.gmra.mrb[28].mxu1 %v10046_v19  ;;  %v5251_v26 = vsel %vm11790_vm13, %v5246_v20, %v5250_v9  ;;  %v6827_v12 = vshll.u32 %v6366_v8, 16  ;;  %v4814_v56 = vld [vmem:[#allocation4 + $0x2c] sm:$0x1]  ;;  %v16178_v9 = vld [vmem:[#allocation12_spill] sm:$0xff] }
 0x341   : > { %v6823_v52 = vrot.slane %v16176_v40, 4  ;;  %10852 = vmatprep.mubr.bf16.mxu1 %v10055_v7  ;;  %v5265_v33 = vsel %vm11790_vm13, %v5260_v47, %v5264_v63  ;;  %v6806_v30 = vsel %vm11790_vm13, %v16177_v57, %v6805_v36  ;;  %v6819_v41 = vrot.slane %v6817_v22, 5  ;;  %v11492_v8 = vld [vmem:[%s15975_s3 + $0x88] sm:$0xff]   ;;  %v16181_v36 = vld [vmem:[#allocation10_spill] sm:$0xff]  ;;  %v4817_v22 = vld [vmem:[#allocation4 + $0x38] sm:$0x1] }
 0x342   : > { %v6814_v53 = vor.u32 %v6813_v10, %v6810_v1  ;;  %v9968_v50 = vcombine.low %v5241_v58, %v5251_v26  ;;  %v5275_v19 = vsel %vm11790_vm13, %v5270_v27, %v5274_v48  ;;  %v10056_v29 = vcombine.low %v6796_v37, %v6806_v30 }
 0x343   : > { %v16179_v20 = vshrl.u32 %v16178_v9, 16  ;;  %v9969_v7 = vcombine.low %v5265_v33, %v5275_v19  ;;  %v6824_v47 = vor.u32 %v6823_v52, %v6819_v41  ;;  %v16180_v3 = vshll.u32 %v16178_v9, 16  ;;  %v11487_v9 = vld [vmem:[%s15975_s3 + $0x148] sm:$0xff]  }
 0x344   : > { %v6815_v63 = vrot.slane %v6814_v53, 4  ;;  %v6829_v58 = vrot.slane %v6827_v12, 5  ;;  %v5286_v10 = vshll.u32 %v16181_v36, 16  ;;  %v16182_v37 = vshrl.u32 %v16181_v36, 16 }
 0x345   : > { %v5279_v34 = vrot.slane %v16179_v20, 4  ;;  %v5282_v1 = vrot.slane %v16180_v3, 5  ;;  %10709 = vmatmul.mubr.bf16.vlgmr.msra.gmra.mrb[96].mxu0 %v9968_v50  ;;  %v16183_v40 = vshrl.u32 %v14254_v25, 16  ;;  %v6825_v27 = vrot.slane %v6824_v47, 4 }
 0x346   : > { %v5292_v16 = vrot.slane %v16182_v37, 4  ;;  %10712 = vmatprep.mubr.bf16.mxu0 %v9969_v7  ;;  %v5296_v33 = vshll.u32 %v4814_v56, 16  ;;  %v16184_v52 = vshll.u32 %v14254_v25, 16  ;;  %10741 = vmatpush3.bf16.msra.mxu0 %v14295_v39  ;;  %v6820_v12 = vsel %vm11790_vm13, %v6815_v63, %v6819_v41  ;;  %v11493_v41 = vld [vmem:[%s15975_s3 + $0x90] sm:$0xff]  }
 0x347   : > { %v5303_v26 = vrot.slane %v16183_v40, 4  ;;  %v5283_v48 = vor.u32 %v5282_v1, %v5279_v34  ;;  %v5288_v30 = vrot.slane %v5286_v10, 5  ;;  %v5310_v53 = vshll.u32 %v14256_v38, 16  ;;  %10742 = vmatprep.subr.bf16.mxu0 %v11492_v8  ;;  %v14671_v63 = vld [vmem:[#allocation4 + $0x38] sm:$0x1] }
 0x348   : > { %v5306_v57 = vrot.slane %v16184_v52, 5  ;;  %v16185_v50 = vshrl.u32 %v14256_v38, 16  ;;  %v6830_v25 = vsel %vm11790_vm13, %v6825_v27, %v6829_v58  ;;  %v5320_v39 = vshll.u32 %v4817_v22, 16  ;;  %10853 = vmatmul.mubr.bf16.vlgmr.msra.gmra.mrb[0].mxu1 %v10056_v29  ;;  %v11495_v27 = vld [vmem:[%s15975_s3 + $0x98] sm:$0xff]  }
 0x349   : > { %v5284_v56 = vrot.slane %v5283_v48, 4  ;;  %v10057_v34 = vcombine.low %v6820_v12, %v6830_v25  ;;  %v5293_v7 = vor.u32 %v5292_v16, %v5288_v30  ;;  %v5312_v38 = vrot.slane %v5310_v53, 5  ;;  %10885 = vmatpush3.bf16.msra.mxu1 %v14362_v13  ;;  %v11488_v13 = vld [vmem:[%s15975_s3 + $0x150] sm:$0xff]  }
 0x34a   : > { %v5316_v19 = vrot.slane %v16185_v50, 4  ;;  %v5307_v20 = vor.u32 %v5306_v57, %v5303_v26  ;;  %v16186_v47 = vshrl.u32 %v14277_v59, 16  ;;  %v5298_v58 = vrot.slane %v5296_v33, 5  ;;  %10743 = vmatpush3.bf16.msra.mxu0 %v11492_v8  ;;  %10886 = vmatprep.subr.bf16.mxu1 %v11487_v9 }
 0x34b   : > { %v5289_v1 = vsel %vm11790_vm13, %v5284_v56, %v5288_v30  ;;  %v16187_v10 = vshll.u32 %v14277_v59, 16  ;;  %10856 = vmatprep.mubr.bf16.mxu1 %v10057_v34  ;;  %v5294_v29 = vrot.slane %v5293_v7, 4  ;;  %v6841_v22 = vshll.u32 %v14279_v60, 16  ;;  %10744 = vmatprep.subr.bf16.mxu0 %v11493_v41  ;;  %v14694_v30 = vld [vmem:[#allocation4 + $0x44] sm:$0x1] }
 0x34c   : > { %v6834_v3 = vrot.slane %v16186_v47, 4  ;;  %v5308_v36 = vrot.slane %v5307_v20, 4  ;;  %v5317_v16 = vor.u32 %v5316_v19, %v5312_v38  ;;  %v16188_v40 = vshrl.u32 %v14279_v60, 16 }
 0x34d   : > { %v6837_v37 = vrot.slane %v16187_v10, 5  ;;  %v5322_v59 = vrot.slane %v5320_v39, 5  ;;  %v6851_v8 = vshll.u32 %v14671_v63, 16  ;;  %v16189_v33 = vshrl.u32 %v14324_v5, 16  ;;  %10887 = vmatpush3.bf16.msra.mxu1 %v11487_v9 }
 0x34e   : > { %v6847_v26 = vrot.slane %v16188_v40, 4  ;;  %v5299_v60 = vsel %vm11790_vm13, %v5294_v29, %v5298_v58  ;;  %v5318_v57 = vrot.slane %v5317_v16, 4  ;;  %v6843_v12 = vrot.slane %v6841_v22, 5  ;;  %10745 = vmatpush3.bf16.msra.mxu0 %v11493_v41  ;;  %10888 = vmatprep.subr.bf16.mxu1 %v11488_v13  ;;  %v14709_v41 = vld [vmem:[#allocation4 + $0x44] sm:$0x1] }
 0x34f   : > { %v6838_v48 = vor.u32 %v6837_v37, %v6834_v3  ;;  %v6858_v52 = vrot.slane %v16189_v33, 4  ;;  %v16190_v53 = vshll.u32 %v14324_v5, 16  ;;  %v9970_v19 = vcombine.low %v5289_v1, %v5299_v60  ;;  %v11489_v5 = vld [vmem:[%s15975_s3 + $0x158] sm:$0xff]   ;;  %10746 = vmatprep.subr.bf16.mxu0 %v11495_v27  ;;  %v16192_v37 = vld [vmem:[#allocation21_spill] sm:$0xff] }
 0x350   : > { %v5313_v25 = vsel %vm11790_vm13, %v5308_v36, %v5312_v38  ;;  %v6865_v20 = vshll.u32 %v14314_v4, 16  ;;  %v5323_v39 = vsel %vm11790_vm13, %v5318_v57, %v5322_v59  ;;  %v6848_v34 = vor.u32 %v6847_v26, %v6843_v12  ;;  %v11496_v36 = vld [vmem:[%s15975_s3 + $0xa0] sm:$0xff]  }
 0x351   : > { %v6861_v50 = vrot.slane %v16190_v53, 5  ;;  %v6839_v56 = vrot.slane %v6838_v48, 4  ;;  %v16191_v47 = vshrl.u32 %v14314_v4, 16  ;;  %10713 = vmatmul.mubr.bf16.gmra.mrb[100].mxu0 %v9970_v19  ;;  %v9971_v38 = vcombine.low %v5313_v25, %v5323_v39  ;;  %v16195_v48 = vld [vmem:[#allocation20_spill] sm:$0xff]  ;;  %10889 = vmatpush3.bf16.msra.mxu1 %v11488_v13  ;;  %v11491_v13 = vld [vmem:[%s15975_s3 + $0x160] sm:$0xff]  }
 0x352   : > { %v6853_v1 = vrot.slane %v6851_v8, 5  ;;  %v6867_v58 = vrot.slane %v6865_v20, 5  ;;  %v6875_v9 = vshll.u32 %v14694_v30, 16  ;;  %v6849_v4 = vrot.slane %v6848_v34, 4  ;;  %v14726_v19 = vld [vmem:[#allocation4 + $0x50] sm:$0x1]  ;;  %10890 = vmatprep.subr.bf16.mxu1 %v11489_v5  ;;  %10747 = vmatpush3.bf16.msra.mxu0 %v11495_v27 }
 0x353   : > { %v6862_v7 = vor.u32 %v6861_v50, %v6858_v52  ;;  %v6871_v3 = vrot.slane %v16191_v47, 4  ;;  %v16193_v29 = vshrl.u32 %v16192_v37, 16  ;;  %v16194_v22 = vshll.u32 %v16192_v37, 16  ;;  %10716 = vmatprep.mubr.bf16.mxu0 %v9971_v38  ;;  %v16197_v20 = vld [vmem:[#allocation22_spill] sm:$0xff]  ;;  %10748 = vmatprep.subr.bf16.mxu0 %v11496_v36 }
 0x354   : > { %v6844_v26 = vsel %vm11790_vm13, %v6839_v56, %v6843_v12  ;;  %v5334_v8 = vshll.u32 %v16195_v48, 16  ;;  %v16196_v33 = vshrl.u32 %v16195_v48, 16  ;;  %v6854_v60 = vsel %vm11790_vm13, %v6849_v4, %v6853_v1 }
 0x355   : > { %v6863_v10 = vrot.slane %v6862_v7, 4  ;;  %v5327_v16 = vrot.slane %v16193_v29, 4  ;;  %v5330_v40 = vrot.slane %v16194_v22, 5  ;;  %v6872_v59 = vor.u32 %v6871_v3, %v6867_v58  ;;  %v11498_v7 = vld [vmem:[%s15975_s3 + $0xa8] sm:$0xff]   ;;  %10891 = vmatpush3.bf16.msra.mxu1 %v11489_v5  ;;  %v11499_v5 = vld [vmem:[%s15975_s3 + $0xb0] sm:$0xff]  }
 0x356   : > { %v5340_v52 = vrot.slane %v16196_v33, 4  ;;  %v6877_v57 = vrot.slane %v6875_v9, 5  ;;  %v5344_v50 = vshll.u32 %v14709_v41, 16  ;;  %v10058_v25 = vcombine.low %v6844_v26, %v6854_v60  ;;  %10749 = vmatpush3.bf16.msra.mxu0 %v11496_v36  ;;  %10892 = vmatprep.subr.bf16.mxu1 %v11491_v13  ;;  %v11494_v60 = vld [vmem:[%s15975_s3 + $0x168] sm:$0xff]  }
 0x357   : > { %v5331_v53 = vor.u32 %v5330_v40, %v5327_v16  ;;  %v6873_v12 = vrot.slane %v6872_v59, 4  ;;  %v5336_v56 = vrot.slane %v5334_v8, 5  ;;  %v16198_v39 = vshrl.u32 %v16197_v20, 16  ;;  %10750 = vmatprep.subr.bf16.mxu0 %v11498_v7 }
 0x358   : > { %v6868_v47 = vsel %vm11790_vm13, %v6863_v10, %v6867_v58  ;;  %v16199_v27 = vshll.u32 %v16197_v20, 16  ;;  %v5358_v1 = vshll.u32 %v14329_v31, 16  ;;  %10857 = vmatmul.mubr.bf16.gmra.mrb[4].mxu1 %v10058_v25  ;;  %v5346_v37 = vrot.slane %v5344_v50, 5  ;;  %v14746_v10 = vld [vmem:[#allocation4 + $0x50] sm:$0x1] }
 0x359   : > { %v5351_v34 = vrot.slane %v16198_v39, 4  ;;  %v5332_v3 = vrot.slane %v5331_v53, 4  ;;  %v6878_v9 = vsel %vm11790_vm13, %v6873_v12, %v6877_v57  ;;  %v5341_v4 = vor.u32 %v5340_v52, %v5336_v56  ;;  %10893 = vmatpush3.bf16.msra.mxu1 %v11491_v13 }
 0x35a   : > { %v5354_v38 = vrot.slane %v16199_v27, 5  ;;  %v16200_v29 = vshrl.u32 %v14329_v31, 16  ;;  %v10059_v22 = vcombine.low %v6868_v47, %v6878_v9  ;;  %v5360_v26 = vrot.slane %v5358_v1, 5  ;;  %10751 = vmatpush3.bf16.msra.mxu0 %v11498_v7  ;;  %10894 = vmatprep.subr.bf16.mxu1 %v11494_v60 }
 0x35b   : > { %v5368_v58 = vshll.u32 %v14726_v19, 16  ;;  %v5337_v59 = vsel %vm11790_vm13, %v5332_v3, %v5336_v56  ;;  %v5342_v48 = vrot.slane %v5341_v4, 4  ;;  %v16201_v8 = vshrl.u32 %v14352_v23, 16  ;;  %10752 = vmatprep.subr.bf16.mxu0 %v11499_v5 }
 0x35c   : > { %v5364_v16 = vrot.slane %v16200_v29, 4  ;;  %v5355_v40 = vor.u32 %v5354_v38, %v5351_v34  ;;  %v16202_v52 = vshll.u32 %v14352_v23, 16  ;;  %10860 = vmatprep.mubr.bf16.mxu1 %v10059_v22  ;;  %v6889_v53 = vshll.u32 %v14349_v45, 16  ;;  %v14768_v38 = vld [vmem:[#allocation4 + $0x5c] sm:$0x1] }
 0x35d   : > { %v6882_v33 = vrot.slane %v16201_v8, 4  ;;  %v16203_v50 = vshrl.u32 %v14349_v45, 16  ;;  %v5347_v23 = vsel %vm11790_vm13, %v5342_v48, %v5346_v37  ;;  %v6899_v56 = vshll.u32 %v14746_v10, 16  ;;  %v11497_v29 = vld [vmem:[%s15975_s3 + $0x170] sm:$0xff]   ;;  %10895 = vmatpush3.bf16.msra.mxu1 %v11494_v60 }
 0x35e   : > { %v6885_v31 = vrot.slane %v16202_v52, 5  ;;  %v5356_v36 = vrot.slane %v5355_v40, 4  ;;  %v5365_v57 = vor.u32 %v5364_v16, %v5360_v26  ;;  %v16204_v20 = vshrl.u32 %v14393_v44, 16  ;;  %v14786_v8 = vld [vmem:[#allocation4 + $0x5c] sm:$0x1]  ;;  %10753 = vmatpush3.bf16.msra.mxu0 %v11499_v5  ;;  %10896 = vmatprep.subr.bf16.mxu1 %v11497_v29 }
 0x35f   : > { %v6895_v25 = vrot.slane %v16203_v50, 4  ;;  %v9972_v34 = vcombine.low %v5337_v59, %v5347_v23  ;;  %v5370_v3 = vrot.slane %v5368_v58, 5  ;;  %v6891_v27 = vrot.slane %v6889_v53, 5 }
 0x360   : > { %v6886_v12 = vor.u32 %v6885_v31, %v6882_v33  ;;  %v6906_v39 = vrot.slane %v16204_v20, 4  ;;  %v5366_v47 = vrot.slane %v5365_v57, 4  ;;  %v5361_v45 = vsel %vm11790_vm13, %v5356_v36, %v5360_v26 }
 0x361   : > { %v16205_v9 = vshll.u32 %v14393_v44, 16  ;;  %v6913_v37 = vshll.u32 %v14386_v18, 16  ;;  %10717 = vmatmul.mubr.bf16.gmra.mrb[104].mxu0 %v9972_v34  ;;  %v6896_v7 = vor.u32 %v6895_v25, %v6891_v27  ;;  %v6901_v16 = vrot.slane %v6899_v56, 5  ;;  %v11501_v44 = vld [vmem:[%s15975_s3 + $0xb8] sm:$0xff]   ;;  %10897 = vmatpush3.bf16.msra.mxu1 %v11497_v29 }
 0x362   : > { %v6887_v1 = vrot.slane %v6886_v12, 4  ;;  %v5371_v13 = vsel %vm11790_vm13, %v5366_v47, %v5370_v3  ;;  %v16206_v22 = vshrl.u32 %v14386_v18, 16  ;;  %v6923_v48 = vshll.u32 %v14768_v38, 16  ;;  %v11500_v56 = vld [vmem:[%s15975_s3 + $0x178] sm:$0xff]   ;;  %10754 = vmatprep.subr.bf16.mxu0 %v11501_v44 }
 0x363   : > { %v6909_v4 = vrot.slane %v16205_v9, 5  ;;  %v9973_v26 = vcombine.low %v5361_v45, %v5371_v13  ;;  %v6915_v59 = vrot.slane %v6913_v37, 5  ;;  %v6897_v52 = vrot.slane %v6896_v7, 4  ;;  %10755 = vmatpush3.bf16.msra.mxu0 %v11501_v44  ;;  %10898 = vmatprep.subr.bf16.mxu1 %v11500_v56  ;;  %v14822_v44 = vld [vmem:[#allocation4 + $0x68] sm:$0x1] }
 0x364   : > { %v6919_v40 = vrot.slane %v16206_v22, 4  ;;  %v6892_v33 = vsel %vm11790_vm13, %v6887_v1, %v6891_v27  ;;  %v16207_v31 = vshrl.u32 %v14376_v42, 16  ;;  %v16208_v18 = vshll.u32 %v14376_v42, 16  ;;  %v14805_v27 = vld [vmem:[#allocation4 + $0x68] sm:$0x1] }
 0x365   : > { %v6910_v58 = vor.u32 %v6909_v4, %v6906_v39  ;;  %10720 = vmatprep.mubr.bf16.mxu0 %v9973_v26  ;;  %v5382_v25 = vshll.u32 %v14366_v14, 16  ;;  %v16209_v23 = vshrl.u32 %v14366_v14, 16  ;;  %v6902_v20 = vsel %vm11790_vm13, %v6897_v52, %v6901_v16  ;;  %v14819_v26 = vld [vmem:[%s15975_s3 + $0x180] sm:$0xff]   ;;  %10899 = vmatpush3.bf16.msra.mxu1 %v11500_v56 }
 0x366   : > { %v5375_v36 = vrot.slane %v16207_v31, 4  ;;  %v5378_v57 = vrot.slane %v16208_v18, 5  ;;  %v6920_v50 = vor.u32 %v6919_v40, %v6915_v59  ;;  %v5392_v60 = vshll.u32 %v14786_v8, 16  ;;  %10932 = vmatprep.subr.bf16.mxu1 %v14819_v26 }
 0x367   : > { %v6911_v53 = vrot.slane %v6910_v58, 4  ;;  %v5388_v12 = vrot.slane %v16209_v23, 4  ;;  %v16210_v5 = vshrl.u32 %v14405_v54, 16  ;;  %v10060_v34 = vcombine.low %v6892_v33, %v6902_v20 }
 0x368   : > { %v5379_v42 = vor.u32 %v5378_v57, %v5375_v36  ;;  %v6921_v47 = vrot.slane %v6920_v50, 4  ;;  %v6925_v3 = vrot.slane %v6923_v48, 5  ;;  %v5384_v14 = vrot.slane %v5382_v25, 5 }
 0x369   : > { %v5399_v39 = vrot.slane %v16210_v5, 4  ;;  %v6916_v45 = vsel %vm11790_vm13, %v6911_v53, %v6915_v59  ;;  %v16211_v9 = vshll.u32 %v14405_v54, 16  ;;  %v5406_v37 = vshll.u32 %v14398_v46, 16  ;;  %10861 = vmatmul.mubr.bf16.gmra.mrb[8].mxu1 %v10060_v34 }
 0x36a   : > { %v5380_v1 = vrot.slane %v5379_v42, 4  ;;  %v6926_v13 = vsel %vm11790_vm13, %v6921_v47, %v6925_v3  ;;  %v5389_v7 = vor.u32 %v5388_v12, %v5384_v14  ;;  %v5394_v16 = vrot.slane %v5392_v60, 5  ;;  %v14839_v47 = vld [vmem:[#allocation4 + $0x74] sm:$0x1] }
 0x36b   : > { %v5402_v4 = vrot.slane %v16211_v9, 5  ;;  %v16212_v22 = vshrl.u32 %v14398_v46, 16  ;;  %v10061_v54 = vcombine.low %v6916_v45, %v6926_v13  ;;  %v5408_v59 = vrot.slane %v5406_v37, 5 }
 0x36c   : > { %v5416_v29 = vshll.u32 %v14805_v27, 16  ;;  %v5385_v48 = vsel %vm11790_vm13, %v5380_v1, %v5384_v14  ;;  %v5390_v33 = vrot.slane %v5389_v7, 4  ;;  %v16213_v46 = vshrl.u32 %v14414_v55, 16 }
 0x36d   : > { %v5412_v40 = vrot.slane %v16212_v22, 4  ;;  %v5403_v58 = vor.u32 %v5402_v4, %v5399_v39  ;;  %v16214_v31 = vshll.u32 %v14414_v55, 16  ;;  %10864 = vmatprep.mubr.bf16.mxu1 %v10061_v54  ;;  %v6937_v53 = vshll.u32 %v14410_v61, 16  ;;  %v14851_v54 = vld [vmem:[#allocation4 + $0x74] sm:$0x1] }
 0x36e   : > { %v6930_v52 = vrot.slane %v16213_v46, 4  ;;  %v16215_v50 = vshrl.u32 %v14410_v61, 16  ;;  %v5395_v23 = vsel %vm11790_vm13, %v5390_v33, %v5394_v16  ;;  %v6947_v20 = vshll.u32 %v14822_v44, 16 }
 0x36f   : > { %v6933_v36 = vrot.slane %v16214_v31, 5  ;;  %v5404_v18 = vrot.slane %v5403_v58, 4  ;;  %v5413_v57 = vor.u32 %v5412_v40, %v5408_v59  ;;  %v16216_v42 = vshrl.u32 %v14449_v51, 16 }
 0x370   : > { %v6943_v25 = vrot.slane %v16215_v50, 4  ;;  %v9974_v55 = vcombine.low %v5385_v48, %v5395_v23  ;;  %v5418_v39 = vrot.slane %v5416_v29, 5  ;;  %v6939_v34 = vrot.slane %v6937_v53, 5 }
 0x371   : > { %v6934_v12 = vor.u32 %v6933_v36, %v6930_v52  ;;  %v6954_v60 = vrot.slane %v16216_v42, 4  ;;  %v5414_v5 = vrot.slane %v5413_v57, 4  ;;  %v5409_v61 = vsel %vm11790_vm13, %v5404_v18, %v5408_v59  ;;  %v16221_v52 = vld [vmem:[#allocation23_spill] sm:$0xff] }
 0x372   : > { %v16217_v3 = vshll.u32 %v14449_v51, 16  ;;  %v6961_v45 = vshll.u32 %v14439_v43, 16  ;;  %10721 = vmatmul.mubr.bf16.gmra.mrb[108].mxu0 %v9974_v55  ;;  %v6944_v9 = vor.u32 %v6943_v25, %v6939_v34  ;;  %v6949_v4 = vrot.slane %v6947_v20, 5  ;;  %v16223_v25 = vld [vmem:[#allocation15_spill] sm:$0xff]  ;;  %v14867_v55 = vld [vmem:[#allocation4 + $0x80] sm:$0x1] }
 0x373   : > { %v6935_v56 = vrot.slane %v6934_v12, 4  ;;  %v5419_v1 = vsel %vm11790_vm13, %v5414_v5, %v5418_v39  ;;  %v16218_v37 = vshrl.u32 %v14439_v43, 16  ;;  %v6971_v40 = vshll.u32 %v14839_v47, 16 }
 0x374   : > { %v6957_v14 = vrot.slane %v16217_v3, 5  ;;  %v9975_v7 = vcombine.low %v5409_v61, %v5419_v1  ;;  %v6963_v22 = vrot.slane %v6961_v45, 5  ;;  %v6945_v58 = vrot.slane %v6944_v9, 4 }
 0x375   : > { %v6967_v13 = vrot.slane %v16218_v37, 4  ;;  %v6940_v51 = vsel %vm11790_vm13, %v6935_v56, %v6939_v34  ;;  %v16219_v59 = vshrl.u32 %v14430_v24, 16  ;;  %v16220_v48 = vshll.u32 %v14430_v24, 16  ;;  %v16226_v56 = vld [vmem:[#allocation6_spill] sm:$0xff] }
 0x376   : > { %v6958_v16 = vor.u32 %v6957_v14, %v6954_v60  ;;  %10724 = vmatprep.mubr.bf16.mxu0 %v9975_v7  ;;  %v5430_v31 = vshll.u32 %v16221_v52, 16  ;;  %v16222_v36 = vshrl.u32 %v16221_v52, 16  ;;  %v6950_v57 = vsel %vm11790_vm13, %v6945_v58, %v6949_v4 }
 0x377   : > { %v5423_v29 = vrot.slane %v16219_v59, 4  ;;  %v5426_v33 = vrot.slane %v16220_v48, 5  ;;  %v6968_v46 = vor.u32 %v6967_v13, %v6963_v22  ;;  %v5440_v50 = vshll.u32 %v14851_v54, 16 }
 0x378   : > { %v6959_v43 = vrot.slane %v6958_v16, 4  ;;  %v5436_v18 = vrot.slane %v16222_v36, 4  ;;  %v16224_v23 = vshrl.u32 %v16223_v25, 16  ;;  %v10062_v20 = vcombine.low %v6940_v51, %v6950_v57 }
 0x379   : > { %v5427_v53 = vor.u32 %v5426_v33, %v5423_v29  ;;  %v6969_v24 = vrot.slane %v6968_v46, 4  ;;  %v6973_v42 = vrot.slane %v6971_v40, 5  ;;  %v5432_v60 = vrot.slane %v5430_v31, 5 }
 0x37a   : > { %v5447_v12 = vrot.slane %v16224_v23, 4  ;;  %v6964_v5 = vsel %vm11790_vm13, %v6959_v43, %v6963_v22  ;;  %v16225_v34 = vshll.u32 %v16223_v25, 16  ;;  %v5454_v3 = vshll.u32 %v16226_v56, 16  ;;  %10865 = vmatmul.mubr.bf16.gmra.mrb[12].mxu1 %v10062_v20  ;;  %v14879_v22 = vld [vmem:[#allocation4 + $0x80] sm:$0x1] }
 0x37b   : > { %v5428_v39 = vrot.slane %v5427_v53, 4  ;;  %v6974_v14 = vsel %vm11790_vm13, %v6969_v24, %v6973_v42  ;;  %v5437_v45 = vor.u32 %v5436_v18, %v5432_v60  ;;  %v5442_v1 = vrot.slane %v5440_v50, 5  ;;  %v14895_v20 = vld [vmem:[#allocation4 + $0x8c] sm:$0x1] }
 0x37c   : > { %v5450_v61 = vrot.slane %v16225_v34, 5  ;;  %v16227_v9 = vshrl.u32 %v16226_v56, 16  ;;  %v10063_v37 = vcombine.low %v6964_v5, %v6974_v14  ;;  %v5456_v7 = vrot.slane %v5454_v3, 5 }
 0x37d   : > { %v5464_v16 = vshll.u32 %v14867_v55, 16  ;;  %v5433_v40 = vsel %vm11790_vm13, %v5428_v39, %v5432_v60  ;;  %v5438_v51 = vrot.slane %v5437_v45, 4  ;;  %v16228_v58 = vshrl.u32 %v14470_v35, 16 }
 0x37e   : > { %v5460_v4 = vrot.slane %v16227_v9, 4  ;;  %v5451_v13 = vor.u32 %v5450_v61, %v5447_v12  ;;  %v16229_v29 = vshll.u32 %v14470_v35, 16  ;;  %10868 = vmatprep.mubr.bf16.mxu1 %v10063_v37  ;;  %v6985_v46 = vshll.u32 %v14467_v28, 16 }
 0x37f   : > { %v6978_v59 = vrot.slane %v16228_v58, 4  ;;  %v16230_v52 = vshrl.u32 %v14467_v28, 16  ;;  %v5443_v36 = vsel %vm11790_vm13, %v5438_v51, %v5442_v1  ;;  %v6995_v57 = vshll.u32 %v14879_v22, 16 }
 0x380   : > { %v6981_v48 = vrot.slane %v16229_v29, 5  ;;  %v5452_v33 = vrot.slane %v5451_v13, 4  ;;  %v5461_v43 = vor.u32 %v5460_v4, %v5456_v7  ;;  %v16231_v53 = vshrl.u32 %v14481_v11, 16  ;;  %v14907_v4 = vld [vmem:[#allocation4 + $0x8c] sm:$0x1] }
 0x381   : > { %v6991_v31 = vrot.slane %v16230_v52, 4  ;;  %v9976_v25 = vcombine.low %v5433_v40, %v5443_v36  ;;  %v5466_v23 = vrot.slane %v5464_v16, 5  ;;  %v6987_v12 = vrot.slane %v6985_v46, 5 }
 0x382   : > { %v6982_v18 = vor.u32 %v6981_v48, %v6978_v59  ;;  %v7002_v50 = vrot.slane %v16231_v53, 4  ;;  %v5462_v35 = vrot.slane %v5461_v43, 4  ;;  %v5457_v24 = vsel %vm11790_vm13, %v5452_v33, %v5456_v7 }
 0x383   : > { %v16232_v42 = vshll.u32 %v14481_v11, 16  ;;  %v7009_v5 = vshll.u32 %v14487_v15, 16  ;;  %10725 = vmatmul.mubr.bf16.gmra.mrb[112].mxu0 %v9976_v25  ;;  %v6992_v34 = vor.u32 %v6991_v31, %v6987_v12  ;;  %v6997_v61 = vrot.slane %v6995_v57, 5  ;;  %v14923_v57 = vld [vmem:[#allocation4 + $0x98] sm:$0x1] }
 0x384   : > { %v6983_v28 = vrot.slane %v6982_v18, 4  ;;  %v5467_v39 = vsel %vm11790_vm13, %v5462_v35, %v5466_v23  ;;  %v16233_v56 = vshrl.u32 %v14487_v15, 16  ;;  %v7019_v9 = vshll.u32 %v14895_v20, 16 }
 0x385   : > { %v7005_v60 = vrot.slane %v16232_v42, 5  ;;  %v9977_v14 = vcombine.low %v5457_v24, %v5467_v39  ;;  %v7011_v1 = vrot.slane %v7009_v5, 5  ;;  %v6993_v37 = vrot.slane %v6992_v34, 4 }
 0x386   : > { %v7015_v3 = vrot.slane %v16233_v56, 4  ;;  %v6988_v11 = vsel %vm11790_vm13, %v6983_v28, %v6987_v12  ;;  %v16234_v13 = vshrl.u32 %v14479_v21, 16  ;;  %v16235_v16 = vshll.u32 %v14479_v21, 16 }
 0x387   : > { %v7006_v45 = vor.u32 %v7005_v60, %v7002_v50  ;;  %10728 = vmatprep.mubr.bf16.mxu0 %v9977_v14  ;;  %v5478_v58 = vshll.u32 %v14476_v17, 16  ;;  %v16236_v59 = vshrl.u32 %v14476_v17, 16  ;;  %v6998_v48 = vsel %vm11790_vm13, %v6993_v37, %v6997_v61  ;;  %v14935_v61 = vld [vmem:[#allocation4 + $0x98] sm:$0x1] }
 0x388   : > { %v5471_v7 = vrot.slane %v16234_v13, 4  ;;  %v5474_v40 = vrot.slane %v16235_v16, 5  ;;  %v7016_v51 = vor.u32 %v7015_v3, %v7011_v1  ;;  %v5488_v43 = vshll.u32 %v14907_v4, 16 }
 0x389   : > { %v7007_v15 = vrot.slane %v7006_v45, 4  ;;  %v5484_v29 = vrot.slane %v16236_v59, 4  ;;  %v16237_v46 = vshrl.u32 %v14483_v2, 16  ;;  %v10064_v31 = vcombine.low %v6988_v11, %v6998_v48  ;;  %v14951_v48 = vld [vmem:[#allocation4 + $0xa4] sm:$0x1] }
 0x38a   : > { %v5475_v33 = vor.u32 %v5474_v40, %v5471_v7  ;;  %v7017_v21 = vrot.slane %v7016_v51, 4  ;;  %v7021_v36 = vrot.slane %v7019_v9, 5  ;;  %v5480_v18 = vrot.slane %v5478_v58, 5 }
 0x38b   : > { %v5495_v52 = vrot.slane %v16237_v46, 4  ;;  %v7012_v53 = vsel %vm11790_vm13, %v7007_v15, %v7011_v1  ;;  %v16238_v50 = vshll.u32 %v14483_v2, 16  ;;  %v5502_v35 = vshll.u32 %v14489_v32, 16  ;;  %10869 = vmatmul.mubr.bf16.gmra.mrb[16].mxu1 %v10064_v31 }
 0x38c   : > { %v5476_v17 = vrot.slane %v5475_v33, 4  ;;  %v7022_v23 = vsel %vm11790_vm13, %v7017_v21, %v7021_v36  ;;  %v5485_v12 = vor.u32 %v5484_v29, %v5480_v18  ;;  %v5490_v24 = vrot.slane %v5488_v43, 5 }
 0x38d   : > { %v5498_v25 = vrot.slane %v16238_v50, 5  ;;  %v16239_v28 = vshrl.u32 %v14489_v32, 16  ;;  %v10065_v60 = vcombine.low %v7012_v53, %v7022_v23  ;;  %v5504_v39 = vrot.slane %v5502_v35, 5 }
 0x38e   : > { %v5512_v34 = vshll.u32 %v14923_v57, 16  ;;  %v5481_v2 = vsel %vm11790_vm13, %v5476_v17, %v5480_v18  ;;  %v5486_v56 = vrot.slane %v5485_v12, 4  ;;  %v16240_v3 = vshrl.u32 %v14499_v6, 16  ;;  %v14963_v12 = vld [vmem:[#allocation4 + $0xa4] sm:$0x1] }
 0x38f   : > { %v5508_v42 = vrot.slane %v16239_v28, 4  ;;  %v5499_v5 = vor.u32 %v5498_v25, %v5495_v52  ;;  %v16241_v45 = vshll.u32 %v14499_v6, 16  ;;  %10872 = vmatprep.mubr.bf16.mxu1 %v10065_v60  ;;  %v7033_v11 = vshll.u32 %v14501_v0, 16  ;;  %v16245_v52 = vld [vmem:[#allocation26_spill] sm:$0xff]  ;;  %v16247_v28 = vld [vmem:[#allocation24_spill] sm:$0xff] }
 0x390   : > { %v7026_v14 = vrot.slane %v16240_v3, 4  ;;  %v16242_v37 = vshrl.u32 %v14501_v0, 16  ;;  %v5491_v7 = vsel %vm11790_vm13, %v5486_v56, %v5490_v24  ;;  %v7043_v40 = vshll.u32 %v14935_v61, 16  ;;  %v16250_v56 = vld [vmem:[#allocation25_spill] sm:$0xff] }
 0x391   : > { %v7029_v1 = vrot.slane %v16241_v45, 5  ;;  %v5500_v32 = vrot.slane %v5499_v5, 4  ;;  %v5509_v9 = vor.u32 %v5508_v42, %v5504_v39  ;;  %v16243_v15 = vshrl.u32 %v14513_v62, 16 }
 0x392   : > { %v7039_v13 = vrot.slane %v16242_v37, 4  ;;  %v9978_v58 = vcombine.low %v5481_v2, %v5491_v7  ;;  %v5514_v59 = vrot.slane %v5512_v34, 5  ;;  %v7035_v29 = vrot.slane %v7033_v11, 5  ;;  %v16252_v11 = vld [vmem:[#allocation27_spill] sm:$0xff] }
 0x393   : > { %v7030_v16 = vor.u32 %v7029_v1, %v7026_v14  ;;  %v7050_v51 = vrot.slane %v16243_v15, 4  ;;  %v5510_v6 = vrot.slane %v5509_v9, 4  ;;  %v5505_v33 = vsel %vm11790_vm13, %v5500_v32, %v5504_v39 }
 0x394   : > { %v16244_v43 = vshll.u32 %v14513_v62, 16  ;;  %v7057_v31 = vshll.u32 %v16245_v52, 16  ;;  %10729 = vmatmul.mubr.bf16.gmra.mrb[116].mxu0 %v9978_v58  ;;  %v7040_v36 = vor.u32 %v7039_v13, %v7035_v29  ;;  %v7045_v18 = vrot.slane %v7043_v40, 5 }
 0x395   : > { %v7031_v0 = vrot.slane %v7030_v16, 4  ;;  %v5515_v21 = vsel %vm11790_vm13, %v5510_v6, %v5514_v59  ;;  %v16246_v53 = vshrl.u32 %v16245_v52, 16  ;;  %v7067_v23 = vshll.u32 %v14951_v48, 16 }
 0x396   : > { %v7053_v46 = vrot.slane %v16244_v43, 5  ;;  %v9979_v50 = vcombine.low %v5505_v33, %v5515_v21  ;;  %v7059_v35 = vrot.slane %v7057_v31, 5  ;;  %v7041_v24 = vrot.slane %v7040_v36, 4  ;;  %v16255_v33 = vld [vmem:[#allocation28_spill] sm:$0xff] }
 0x397   : > { %v7063_v17 = vrot.slane %v16246_v53, 4  ;;  %v7036_v62 = vsel %vm11790_vm13, %v7031_v0, %v7035_v29  ;;  %v16248_v42 = vshrl.u32 %v16247_v28, 16  ;;  %v16249_v5 = vshll.u32 %v16247_v28, 16 }
 0x398   : > { %v7054_v25 = vor.u32 %v7053_v46, %v7050_v51  ;;  %10732 = vmatprep.mubr.bf16.mxu0 %v9979_v50  ;;  %v5526_v3 = vshll.u32 %v16250_v56, 16  ;;  %v16251_v14 = vshrl.u32 %v16250_v56, 16  ;;  %v7046_v1 = vsel %vm11790_vm13, %v7041_v24, %v7045_v18  ;;  %v14979_v51 = vld [vmem:[#allocation4 + $0xb0] sm:$0x1] }
 0x399   : > { %v5519_v60 = vrot.slane %v16248_v42, 4  ;;  %v5522_v39 = vrot.slane %v16249_v5, 5  ;;  %v7064_v2 = vor.u32 %v7063_v17, %v7059_v35  ;;  %v5536_v9 = vshll.u32 %v14963_v12, 16  ;;  %v14991_v50 = vld [vmem:[#allocation4 + $0xb0] sm:$0x1] }
 0x39a   : > { %v7055_v34 = vrot.slane %v7054_v25, 4  ;;  %v5532_v45 = vrot.slane %v16251_v14, 4  ;;  %v16253_v37 = vshrl.u32 %v16252_v11, 16  ;;  %v10066_v7 = vcombine.low %v7036_v62, %v7046_v1  ;;  %v15005_v1 = vld [vmem:[#allocation4 + $0xbc] sm:$0x1] }
 0x39b   : > { %v5523_v32 = vor.u32 %v5522_v39, %v5519_v60  ;;  %v7065_v16 = vrot.slane %v7064_v2, 4  ;;  %v7069_v40 = vrot.slane %v7067_v23, 5  ;;  %v5528_v15 = vrot.slane %v5526_v3, 5  ;;  %v16257_v23 = vld [vmem:[#allocation29_spill] sm:$0xff]  ;;  %v16260_v39 = vld [vmem:[#allocation30_spill] sm:$0xff] }
 0x39c   : > { %v5543_v13 = vrot.slane %v16253_v37, 4  ;;  %v7060_v58 = vsel %vm11790_vm13, %v7055_v34, %v7059_v35  ;;  %v16254_v59 = vshll.u32 %v16252_v11, 16  ;;  %v5550_v0 = vshll.u32 %v16255_v33, 16  ;;  %10873 = vmatmul.mubr.bf16.gmra.mrb[20].mxu1 %v10066_v7 }
 0x39d   : > { %v5524_v6 = vrot.slane %v5523_v32, 4  ;;  %v7070_v43 = vsel %vm11790_vm13, %v7065_v16, %v7069_v40  ;;  %v5533_v46 = vor.u32 %v5532_v45, %v5528_v15  ;;  %v5538_v52 = vrot.slane %v5536_v9, 5  ;;  %v16262_v32 = vld [vmem:[#allocation34_spill] sm:$0xff] }
 0x39e   : > { %v5546_v29 = vrot.slane %v16254_v59, 5  ;;  %v16256_v31 = vshrl.u32 %v16255_v33, 16  ;;  %v10067_v36 = vcombine.low %v7060_v58, %v7070_v43  ;;  %v5552_v53 = vrot.slane %v5550_v0, 5  ;;  %v16265_v59 = vld [vmem:[#allocation35_spill] sm:$0xff] }
 0x39f   : > { %v5560_v17 = vshll.u32 %v14979_v51, 16  ;;  %v5529_v25 = vsel %vm11790_vm13, %v5524_v6, %v5528_v15  ;;  %v5534_v35 = vrot.slane %v5533_v46, 4  ;;  %v16258_v62 = vshrl.u32 %v16257_v23, 16 }
 0x3a0   : > { %v5556_v21 = vrot.slane %v16256_v31, 4  ;;  %v5547_v18 = vor.u32 %v5546_v29, %v5543_v13  ;;  %v16259_v28 = vshll.u32 %v16257_v23, 16  ;;  %10876 = vmatprep.mubr.bf16.mxu1 %v10067_v36  ;;  %v7081_v34 = vshll.u32 %v16260_v39, 16 }
 0x3a1   : > { %v7074_v24 = vrot.slane %v16258_v62, 4  ;;  %v16261_v2 = vshrl.u32 %v16260_v39, 16  ;;  %v5539_v3 = vsel %vm11790_vm13, %v5534_v35, %v5538_v52  ;;  %v7091_v45 = vshll.u32 %v14991_v50, 16  ;;  %v16267_v35 = vld [vmem:[#allocation32_spill] sm:$0xff] }
 0x3a2   : > { %v7077_v42 = vrot.slane %v16259_v28, 5  ;;  %v5548_v60 = vrot.slane %v5547_v18, 4  ;;  %v5557_v5 = vor.u32 %v5556_v21, %v5552_v53  ;;  %v16263_v9 = vshrl.u32 %v16262_v32, 16 }
 0x3a3   : > { %v7087_v56 = vrot.slane %v16261_v2, 4  ;;  %v9980_v37 = vcombine.low %v5529_v25, %v5539_v3  ;;  %v5562_v7 = vrot.slane %v5560_v17, 5  ;;  %v7083_v16 = vrot.slane %v7081_v34, 5  ;;  %v15021_v25 = vld [vmem:[#allocation4 + $0xbc] sm:$0x1] }
 0x3a4   : > { %v7078_v14 = vor.u32 %v7077_v42, %v7074_v24  ;;  %v7098_v11 = vrot.slane %v16263_v9, 4  ;;  %v5558_v13 = vrot.slane %v5557_v5, 4  ;;  %v5553_v40 = vsel %vm11790_vm13, %v5548_v60, %v5552_v53  ;;  %v15027_v5 = vld [vmem:[#allocation4 + $0xb8] sm:$0xf] }
 0x3a5   : > { %v16264_v58 = vshll.u32 %v16262_v32, 16  ;;  %v7105_v29 = vshll.u32 %v16265_v59, 16  ;;  %10733 = vmatmul.mubr.bf16.gmra.mrb[120].mxu0 %v9980_v37  ;;  %v7088_v0 = vor.u32 %v7087_v56, %v7083_v16  ;;  %v16266_v43 = vshrl.u32 %v16265_v59, 16  ;;  %v16270_v34 = vld [vmem:[#allocation33_spill] sm:$0xff]  ;;  %v16272_v32 = vld [vmem:[#allocation31_spill] sm:$0xff] }
 0x3a6   : > { %v7079_v15 = vrot.slane %v7078_v14, 4  ;;  %v5563_v33 = vsel %vm11790_vm13, %v5558_v13, %v5562_v7  ;;  %v7115_v52 = vshll.u32 %v15005_v1, 16  ;;  %v7093_v21 = vrot.slane %v7091_v45, 5 }
 0x3a7   : > { %v7101_v6 = vrot.slane %v16264_v58, 5  ;;  %v7111_v46 = vrot.slane %v16266_v43, 4  ;;  %v9981_v31 = vcombine.low %v5553_v40, %v5563_v33  ;;  %v7107_v18 = vrot.slane %v7105_v29, 5  ;;  %v15037_v40 = vld [vmem:[#allocation4 + $0xc8] sm:$0x1] }
 0x3a8   : > { %v7084_v53 = vsel %vm11790_vm13, %v7079_v15, %v7083_v16  ;;  %v7089_v17 = vrot.slane %v7088_v0, 4  ;;  %v16268_v23 = vshrl.u32 %v16267_v35, 16  ;;  %v16269_v24 = vshll.u32 %v16267_v35, 16  ;;  %v15039_v15 = vld [vmem:[#allocation4 + $0x1c] sm:$0xf] }
 0x3a9   : > { %v7102_v36 = vor.u32 %v7101_v6, %v7098_v11  ;;  %10736 = vmatprep.mubr.bf16.mxu0 %v9981_v31  ;;  %v7112_v60 = vor.u32 %v7111_v46, %v7107_v18  ;;  %v5574_v39 = vshll.u32 %v15027_v5, 16  ;;  %v16271_v2 = vshrl.u32 %v16270_v34, 16  ;;  %v15046_v33 = vld [vmem:[#allocation4 + $0xc4] sm:$0xf]  ;;  %v16275_v31 = vld [vmem:[#allocation36_spill] sm:$0xff] }
 0x3aa   : > { %v5567_v62 = vrot.slane %v16268_v23, 4  ;;  %v5570_v28 = vrot.slane %v16269_v24, 5  ;;  %v7094_v3 = vsel %vm11790_vm13, %v7089_v17, %v7093_v21  ;;  %v7117_v14 = vrot.slane %v7115_v52, 5  ;;  %v16277_v24 = vld [vmem:[#allocation8_spill] sm:$0xff] }
 0x3ab   : > { %v7103_v42 = vrot.slane %v7102_v36, 4  ;;  %v5580_v56 = vrot.slane %v16271_v2, 4  ;;  %v16273_v9 = vshrl.u32 %v16272_v32, 16  ;;  %v10068_v37 = vcombine.low %v7084_v53, %v7094_v3 }
 0x3ac   : > { %v5571_v45 = vor.u32 %v5570_v28, %v5567_v62  ;;  %v7113_v13 = vrot.slane %v7112_v60, 4  ;;  %v5576_v7 = vrot.slane %v5574_v39, 5  ;;  %v5584_v16 = vshll.u32 %v15021_v25, 16 }
 0x3ad   : > { %v7122_v11 = vrot.slane %v16273_v9, 4  ;;  %v7489_v58 = vrot.slane %v15039_v15, 5  ;;  %v7108_v6 = vsel %vm11790_vm13, %v7103_v42, %v7107_v18  ;;  %v16274_v59 = vshll.u32 %v16272_v32, 16  ;;  %10877 = vmatmul.mubr.bf16.gmra.mrb[24].mxu1 %v10068_v37  ;;  %v16279_v42 = vld [vmem:[#allocation13_spill] sm:$0xff]  ;;  %v11591_v9 = vld [vmem:[#allocation4] sm:$0xf] }
 0x3ae   : > { %v7129_v0 = vshll.u32 %v15046_v33, 16  ;;  %v7118_v43 = vsel %vm11790_vm13, %v7113_v13, %v7117_v14  ;;  %v5572_v46 = vrot.slane %v5571_v45, 4  ;;  %v5581_v52 = vor.u32 %v5580_v56, %v5576_v7  ;;  %v11590_v45 = vld [vmem:[#allocation4 + $0x14] sm:$0x1] }
 0x3af   : > { %v7125_v29 = vrot.slane %v16274_v59, 5  ;;  %v16276_v21 = vshrl.u32 %v16275_v31, 16  ;;  %v10069_v53 = vcombine.low %v7108_v6, %v7118_v43  ;;  %v7139_v18 = vshll.u32 %v15037_v40, 16  ;;  %v11593_v6 = vld [vmem:[#allocation4 + $0x8] sm:$0x1] }
 0x3b0   : > { %v7131_v35 = vrot.slane %v7129_v0, 5  ;;  %v5582_v23 = vrot.slane %v5581_v52, 4  ;;  %v5586_v62 = vrot.slane %v5584_v16, 5  ;;  %v16278_v28 = vrot.slane %v16277_v24, 5  ;;  %v11592_v16 = vld [vmem:[#allocation4 + $0x4] sm:$0xf] }
 0x3b1   : > { %v7135_v36 = vrot.slane %v16276_v21, 4  ;;  %v7126_v17 = vor.u32 %v7125_v29, %v7122_v11  ;;  %v16280_v60 = vrot.slane %v16279_v42, 9  ;;  %10880 = vmatprep.mubr.bf16.mxu1 %v10069_v53  ;;  %v7485_v32 = vrot.slane %v11590_v45, 5  ;;  %v11594_v53 = vld [vmem:[#allocation4 + $0x10] sm:$0xf] }
 0x3b2   : > { %v16282_v2 = vmov %v16278_v28  ;;  %v9991_v11 = vrot.slane %v11591_v9, 9  ;;  %v5577_v37 = vsel %vm11790_vm13, %v5572_v46, %v5576_v7  ;;  %v5587_v13 = vsel %vm11790_vm13, %v5582_v23, %v5586_v62  ;;  %v11595_v62 = vld [vmem:[#allocation4 + $0x1c] sm:$0xf] }
 0x3b3   : > { %v7483_v34 = vsel %vm11753_vm9, %v16280_v60, %v16278_v28  ;;  %v7484_v56 = vrot.slane %v16282_v2, 4  ;;  %v7127_v3 = vrot.slane %v7126_v17, 4  ;;  %v7136_v14 = vor.u32 %v7135_v36, %v7131_v35  ;;  %v11596_v60 = vld [vmem:[#allocation4 + $0x14] sm:$0x1] }
 0x3b4   : > { %v5927_v15 = vrot.slane %v11592_v16, 5  ;;  %v5930_v59 = vrot.slane %v11593_v6, 5  ;;  %v9982_v29 = vcombine.low %v5577_v37, %v5587_v13  ;;  %v7141_v43 = vrot.slane %v7139_v18, 5  ;;  %v16283_v37 = vld [vmem:[#allocation7_spill] sm:$0xff] }
 0x3b5   : > { %v7137_v0 = vrot.slane %v7136_v14, 4  ;;  %v7486_v52 = vsel %vm11753_vm9, %v7484_v56, %v7485_v32  ;;  %v5934_v7 = vrot.slane %v11594_v53, 5  ;;  %v7491_v46 = vrot.slane %v7489_v58, 4  ;;  %v11597_v56 = vld [vmem:[#allocation4 + $0xc] sm:$0xf] }
 0x3b6   : > { %v10095_v31 = vcombine.low %v7483_v34, %v7486_v52  ;;  %v5928_v21 = vsel %vm11753_vm9, %v9991_v11, %v5927_v15  ;;  %v5929_v36 = vrot.slane %v5927_v15, 4  ;;  %10737 = vmatmul.mubr.bf16.gmra.mrb[124].mxu0 %v9982_v29  ;;  %v7132_v17 = vsel %vm11790_vm13, %v7127_v3, %v7131_v35  ;;  %v11598_v32 = vld [vmem:[#allocation4 + $0x20] sm:$0x1]  ;;  %v11599_v3 = vld [vmem:[#allocation4 + $0x18] sm:$0xf] }
 0x3b7   : > { %v7142_v23 = vsel %vm11790_vm13, %v7137_v0, %v7141_v43  ;;  %v5941_v18 = vrot.slane %v11595_v62, 5  ;;  %v5936_v42 = vrot.slane %v5934_v7, 4  ;;  %v5937_v34 = vrot.slane %v11596_v60, 5  ;;  %v11600_v15 = vld [vmem:[#allocation4 + $0x20] sm:$0x1] }
 0x3b8   : > { %v10070_v24 = vcombine.low %v7132_v17, %v7142_v23  ;;  %v5931_v28 = vsel %vm11753_vm9, %v5929_v36, %v5930_v59  ;;  %v9992_v14 = vrot.slane %v11597_v56, 9  ;;  %v5944_v9 = vrot.slane %v11598_v32, 5  ;;  %v11601_v29 = vld [vmem:[#allocation4 + $0x28] sm:$0xf]  ;;  %v11603_v23 = vld [vmem:[#allocation4 + $0x2c] sm:$0x1] }
 0x3b9   : > { %v10007_v2 = vcombine.low %v5928_v21, %v5931_v28  ;;  %v5943_v45 = vrot.slane %v5941_v18, 4  ;;  %v5938_v35 = vsel %vm11753_vm9, %v5936_v42, %v5937_v34  ;;  %v9993_v11 = vrot.slane %v11599_v3, 9  ;;  %v11602_v36 = vld [vmem:[#allocation4 + $0x28] sm:$0xf]  ;;  %v11604_v28 = vld [vmem:[#allocation4 + $0x24] sm:$0xf] }
 0x3ba   : > { %10881 = vmatmul.mubr.bf16.gmra.mrb[28].mxu1 %v10070_v24  ;;  %v16284_v13 = vrot.slane %v16283_v37, 9  ;;  %v7492_v6 = vrot.slane %v11600_v15, 5  ;;  %v7496_v0 = vrot.slane %v11601_v29, 5  ;;  %v5935_v43 = vsel %vm11753_vm9, %v9992_v14, %v5934_v7  ;;  %v11605_v34 = vld [vmem:[#allocation4 + $0x34] sm:$0xf] }
 0x3bb   : > { %10900 = vmatprep.mubr.bf16.mxu1 %v10095_v31  ;;  %10756 = vmatprep.mubr.bf16.mxu0 %v10007_v2  ;;  %v5945_v59 = vsel %vm11753_vm9, %v5943_v45, %v5944_v9  ;;  %v5942_v52 = vsel %vm11753_vm9, %v9993_v11, %v5941_v18  ;;  %v10008_v53 = vcombine.low %v5935_v43, %v5938_v35  ;;  %v7499_v62 = vrot.slane %v11603_v23, 5  ;;  %v11606_v18 = vld [vmem:[#allocation4 + $0x34] sm:$0xf]  ;;  %v11607_v14 = vld [vmem:[#allocation4 + $0x2c] sm:$0x1] }
 0x3bc   : > { %v7490_v16 = vsel %vm11753_vm9, %v16284_v13, %v7489_v58  ;;  %v7493_v21 = vsel %vm11753_vm9, %v7491_v46, %v7492_v6  ;;  %v5948_v58 = vrot.slane %v11602_v36, 5  ;;  %v7498_v31 = vrot.slane %v7496_v0, 4  ;;  %v11503_v9 = vld [vmem:[%s15975_s3 + $0x188] sm:$0xff]   ;;  %v11608_v3 = vld [vmem:[#allocation4 + $0x24] sm:$0xf] }
 0x3bd   : > { %v10096_v17 = vcombine.low %v7490_v16, %v7493_v21  ;;  %v10009_v24 = vcombine.low %v5942_v52, %v5945_v59  ;;  %v10081_v42 = vrot.slane %v11604_v28, 9  ;;  %v5955_v2 = vrot.slane %v11605_v34, 5  ;;  %v11609_v37 = vld [vmem:[#allocation4 + $0x38] sm:$0x1]  ;;  %v11610_v6 = vld [vmem:[#allocation4 + $0x30] sm:$0xf] }
 0x3be   : > { %v5950_v60 = vrot.slane %v5948_v58, 4  ;;  %10757 = vmatmul.mubr.bf16.vlgmr.msra.gmra.mrb[96].mxu0 %v10008_v53  ;;  %v7500_v7 = vsel %vm11753_vm9, %v7498_v31, %v7499_v62  ;;  %v7503_v56 = vrot.slane %v11606_v18, 5  ;;  %v5951_v45 = vrot.slane %v11607_v14, 5  ;;  %v11611_v29 = vld [vmem:[#allocation4 + $0x40] sm:$0xf] }
 0x3bf   : > { %10760 = vmatprep.mubr.bf16.mxu0 %v10009_v24  ;;  %v7497_v46 = vsel %vm11753_vm9, %v10081_v42, %v7496_v0  ;;  %v5957_v32 = vrot.slane %v5955_v2, 4  ;;  %v9994_v11 = vrot.slane %v11608_v3, 9  ;;  %v5958_v13 = vrot.slane %v11609_v37, 5  ;;  %v11612_v36 = vld [vmem:[#allocation4 + $0x40] sm:$0xf] }
 0x3c0   : > { %v10097_v35 = vcombine.low %v7497_v46, %v7500_v7  ;;  %v7505_v16 = vrot.slane %v7503_v56, 4  ;;  %v5952_v15 = vsel %vm11753_vm9, %v5950_v60, %v5951_v45  ;;  %v9995_v59 = vrot.slane %v11610_v6, 9  ;;  %v11613_v31 = vld [vmem:[#allocation4 + $0x30] sm:$0xf]  ;;  %v11615_v60 = vld [vmem:[#allocation4 + $0x4c] sm:$0xf] }
 0x3c1   : > { %v7510_v0 = vrot.slane %v11611_v29, 5  ;;  %v5949_v43 = vsel %vm11753_vm9, %v9994_v11, %v5948_v58  ;;  %v5959_v52 = vsel %vm11753_vm9, %v5957_v32, %v5958_v13  ;;  %v7506_v21 = vrot.slane %v14671_v63, 5  ;;  %v11614_v63 = vld [vmem:[#allocation4 + $0x3c] sm:$0xf]  ;;  %v11616_v46 = vld [vmem:[#allocation4 + $0x4c] sm:$0xf] }
 0x3c2   : > { %10901 = vmatmul.mubr.bf16.vlgmr.msra.gmra.mrb[0].mxu1 %v10096_v17  ;;  %v5962_v53 = vrot.slane %v11612_v36, 5  ;;  %v5956_v17 = vsel %vm11753_vm9, %v9995_v59, %v5955_v2  ;;  %v10082_v23 = vrot.slane %v11613_v31, 9  ;;  %v7513_v24 = vrot.slane %v14694_v30, 5  ;;  %v11505_v11 = vld [vmem:[%s15975_s3 + $0x198] sm:$0xff]   ;;  %v11619_v29 = vld [vmem:[#allocation4 + $0x58] sm:$0xf] }
 0x3c3   : > { %10904 = vmatprep.mubr.bf16.mxu1 %v10097_v35  ;;  %10933 = vmatpush3.bf16.msra.mxu1 %v14819_v26  ;;  %v7512_v62 = vrot.slane %v7510_v0, 4  ;;  %v11504_v26 = vld [vmem:[%s15975_s3 + $0x190] sm:$0xff]   ;;  %v10010_v58 = vcombine.low %v5949_v43, %v5952_v15  ;;  %v7507_v28 = vsel %vm11753_vm9, %v7505_v16, %v7506_v21  ;;  %v10083_v42 = vrot.slane %v11614_v63, 9  ;;  %v11623_v63 = vld [vmem:[#allocation4 + $0x64] sm:$0xf] }
 0x3c4   : > { %10934 = vmatprep.subr.bf16.mxu1 %v11503_v9  ;;  %v5969_v34 = vrot.slane %v11615_v60, 5  ;;  %v10011_v7 = vcombine.low %v5956_v17, %v5959_v52  ;;  %v5964_v18 = vrot.slane %v5962_v53, 4  ;;  %v7517_v14 = vrot.slane %v11616_v46, 5  ;;  %v11617_v15 = vld [vmem:[#allocation4 + $0x58] sm:$0xf] }
 0x3c5   : > { %v7514_v2 = vsel %vm11753_vm9, %v7512_v62, %v7513_v24  ;;  %v7504_v30 = vsel %vm11753_vm9, %v10082_v23, %v7503_v56  ;;  %v7511_v35 = vsel %vm11753_vm9, %v10083_v42, %v7510_v0  ;;  %v5965_v3 = vrot.slane %v14709_v41, 5  ;;  %v11620_v41 = vld [vmem:[#allocation4 + $0x48] sm:$0xf]  ;;  %v11622_v62 = vld [vmem:[#allocation4 + $0x64] sm:$0xf] }
 0x3c6   : > { %10761 = vmatmul.mubr.bf16.gmra.mrb[100].mxu0 %v10010_v58  ;;  %v5971_v45 = vrot.slane %v5969_v34, 4  ;;  %v10098_v32 = vcombine.low %v7504_v30, %v7507_v28  ;;  %v10099_v37 = vcombine.low %v7511_v35, %v7514_v2  ;;  %v5972_v13 = vrot.slane %v14726_v19, 5  ;;  %v11621_v17 = vld [vmem:[#allocation4 + $0x48] sm:$0xf]  ;;  %v11624_v60 = vld [vmem:[#allocation4 + $0x54] sm:$0xf] }
 0x3c7   : > { %10935 = vmatpush3.bf16.msra.mxu1 %v11503_v9  ;;  %10764 = vmatprep.mubr.bf16.mxu0 %v10011_v7  ;;  %v7519_v16 = vrot.slane %v7517_v14, 4  ;;  %v7524_v56 = vrot.slane %v11617_v15, 5  ;;  %v11618_v9 = vld [vmem:[#allocation4 + $0x3c] sm:$0xf]  ;;  %v5966_v59 = vsel %vm11753_vm9, %v5964_v18, %v5965_v3  ;;  %v5976_v0 = vrot.slane %v11619_v29, 5  ;;  %v11506_v58 = vld [vmem:[%s15975_s3 + $0x1a0] sm:$0xff]  }
 0x3c8   : > { %10936 = vmatprep.subr.bf16.mxu1 %v11504_v26  ;;  %v9996_v6 = vrot.slane %v11618_v9, 9  ;;  %v9997_v43 = vrot.slane %v11620_v41, 9  ;;  %v5973_v52 = vsel %vm11753_vm9, %v5971_v45, %v5972_v13  ;;  %v7520_v21 = vrot.slane %v14746_v10, 5  ;;  %v11507_v3 = vld [vmem:[%s15975_s3 + $0x1a8] sm:$0xff]  }
 0x3c9   : > { %v7526_v19 = vrot.slane %v7524_v56, 4  ;;  %v10084_v31 = vrot.slane %v11621_v17, 9  ;;  %v7527_v23 = vrot.slane %v14768_v38, 5  ;;  %v5983_v24 = vrot.slane %v11622_v62, 5  ;;  %v11627_v9 = vld [vmem:[#allocation4 + $0x70] sm:$0xf] }
 0x3ca   : > { %10905 = vmatmul.mubr.bf16.gmra.mrb[4].mxu1 %v10098_v32  ;;  %v5963_v36 = vsel %vm11753_vm9, %v9996_v6, %v5962_v53  ;;  %v5970_v10 = vsel %vm11753_vm9, %v9997_v43, %v5969_v34  ;;  %v7531_v53 = vrot.slane %v11623_v63, 5  ;;  %v10085_v7 = vrot.slane %v11624_v60, 9  ;;  %v11625_v32 = vld [vmem:[#allocation4 + $0x70] sm:$0xf]  ;;  %v11628_v6 = vld [vmem:[#allocation4 + $0x60] sm:$0xf] }
 0x3cb   : > { %10908 = vmatprep.mubr.bf16.mxu1 %v10099_v37  ;;  %10937 = vmatpush3.bf16.msra.mxu1 %v11504_v26  ;;  %v10012_v28 = vcombine.low %v5963_v36, %v5966_v59  ;;  %v7521_v26 = vsel %vm11753_vm9, %v7519_v16, %v7520_v21  ;;  %v10013_v42 = vcombine.low %v5970_v10, %v5973_v52  ;;  %v5978_v2 = vrot.slane %v5976_v0, 4  ;;  %v11629_v43 = vld [vmem:[#allocation4 + $0x7c] sm:$0xf]  ;;  %v11630_v21 = vld [vmem:[#allocation4 + $0x60] sm:$0xf] }
 0x3cc   : > { %10938 = vmatprep.subr.bf16.mxu1 %v11505_v11  ;;  %v7528_v38 = vsel %vm11753_vm9, %v7526_v19, %v7527_v23  ;;  %v7518_v18 = vsel %vm11753_vm9, %v10084_v31, %v7517_v14  ;;  %v5985_v46 = vrot.slane %v5983_v24, 4  ;;  %v7525_v30 = vsel %vm11753_vm9, %v10085_v7, %v7524_v56  ;;  %v11508_v17 = vld [vmem:[%s15975_s3 + $0x1b0] sm:$0xff]   ;;  %v11633_v60 = vld [vmem:[#allocation4 + $0x88] sm:$0xf] }
 0x3cd   : > { %v10100_v34 = vcombine.low %v7518_v18, %v7521_v26  ;;  %v5979_v45 = vrot.slane %v14786_v8, 5  ;;  %v7538_v35 = vrot.slane %v11625_v32, 5  ;;  %v10101_v37 = vcombine.low %v7525_v30, %v7528_v38  ;;  %v11631_v62 = vld [vmem:[#allocation4 + $0x7c] sm:$0xf]  ;;  %v11509_v18 = vld [vmem:[%s15975_s3 + $0x1b8] sm:$0xff]  }
 0x3ce   : > { %10765 = vmatmul.mubr.bf16.gmra.mrb[104].mxu0 %v10012_v28  ;;  %v5986_v13 = vrot.slane %v14805_v27, 5  ;;  %v7533_v14 = vrot.slane %v7531_v53, 4  ;;  %v5990_v8 = vrot.slane %v11627_v9, 5  ;;  %v9999_v59 = vrot.slane %v11628_v6, 9  ;;  %v11638_v9 = vld [vmem:[#allocation4 + $0x78] sm:$0xf] }
 0x3cf   : > { %10939 = vmatpush3.bf16.msra.mxu1 %v11505_v11  ;;  %10768 = vmatprep.mubr.bf16.mxu0 %v10013_v42  ;;  %v11626_v11 = vld [vmem:[#allocation4 + $0x54] sm:$0xf]  ;;  %v5980_v15 = vsel %vm11753_vm9, %v5978_v2, %v5979_v45  ;;  %v7540_v56 = vrot.slane %v7538_v35, 4  ;;  %v7534_v41 = vrot.slane %v14822_v44, 5  ;;  %v5997_v27 = vrot.slane %v11629_v43, 5 }
 0x3d0   : > { %10940 = vmatprep.subr.bf16.mxu1 %v11506_v58  ;;  %v9998_v16 = vrot.slane %v11626_v11, 9  ;;  %v5987_v29 = vsel %vm11753_vm9, %v5985_v46, %v5986_v13  ;;  %v10086_v19 = vrot.slane %v11630_v21, 9  ;;  %v7541_v36 = vrot.slane %v14839_v47, 5  ;;  %v11636_v13 = vld [vmem:[#allocation4 + $0x88] sm:$0xf] }
 0x3d1   : > { %v5984_v23 = vsel %vm11753_vm9, %v9999_v59, %v5983_v24  ;;  %v7535_v44 = vsel %vm11753_vm9, %v7533_v14, %v7534_v41  ;;  %v5992_v26 = vrot.slane %v5990_v8, 4  ;;  %v5999_v42 = vrot.slane %v5997_v27, 4  ;;  %v11639_v43 = vld [vmem:[#allocation4 + $0x84] sm:$0xf] }
 0x3d2   : > { %10909 = vmatmul.mubr.bf16.gmra.mrb[8].mxu1 %v10100_v34  ;;  %v5977_v52 = vsel %vm11753_vm9, %v9998_v16, %v5976_v0  ;;  %v10015_v28 = vcombine.low %v5984_v23, %v5987_v29  ;;  %v11632_v0 = vld [vmem:[#allocation4 + $0x6c] sm:$0xf]  ;;  %v7542_v47 = vsel %vm11753_vm9, %v7540_v56, %v7541_v36  ;;  %v7532_v63 = vsel %vm11753_vm9, %v10086_v19, %v7531_v53  ;;  %v11637_v16 = vld [vmem:[#allocation4 + $0x94] sm:$0xf] }
 0x3d3   : > { %10912 = vmatprep.mubr.bf16.mxu1 %v10101_v37  ;;  %10941 = vmatpush3.bf16.msra.mxu1 %v11506_v58  ;;  %v10014_v31 = vcombine.low %v5977_v52, %v5980_v15  ;;  %v7545_v58 = vrot.slane %v11631_v62, 5  ;;  %v10087_v10 = vrot.slane %v11632_v0, 9  ;;  %v7552_v7 = vrot.slane %v11633_v60, 5  ;;  %v11634_v34 = vld [vmem:[#allocation4 + $0x6c] sm:$0xf] }
 0x3d4   : > { %10942 = vmatprep.subr.bf16.mxu1 %v11507_v3  ;;  %v10102_v24 = vcombine.low %v7532_v63, %v7535_v44  ;;  %v5993_v2 = vrot.slane %v14851_v54, 5  ;;  %v10000_v30 = vrot.slane %v11634_v34, 9  ;;  %v6000_v53 = vrot.slane %v14867_v55, 5  ;;  %v15189_v29 = vld [vmem:[%s15975_s3 + $0x1c0] sm:$0xff]  }
 0x3d5   : > { %v7539_v38 = vsel %vm11753_vm9, %v10087_v10, %v7538_v35  ;;  %v7547_v45 = vrot.slane %v7545_v58, 4  ;;  %v7554_v35 = vrot.slane %v7552_v7, 4  ;;  %v6004_v54 = vrot.slane %v11636_v13, 5  ;;  %v11642_v10 = vld [vmem:[#allocation4 + $0x84] sm:$0xf] }
 0x3d6   : > { %10769 = vmatmul.mubr.bf16.gmra.mrb[108].mxu0 %v10014_v31  ;;  %v10103_v46 = vcombine.low %v7539_v38, %v7542_v47  ;;  %v5994_v32 = vsel %vm11753_vm9, %v5992_v26, %v5993_v2  ;;  %v6001_v14 = vsel %vm11753_vm9, %v5999_v42, %v6000_v53  ;;  %v7548_v11 = vrot.slane %v14879_v22, 5  ;;  %v11643_v42 = vld [vmem:[#allocation4 + $0x90] sm:$0xf]  ;;  %v11644_v38 = vld [vmem:[#allocation4 + $0xa0] sm:$0xf] }
 0x3d7   : > { %10943 = vmatpush3.bf16.msra.mxu1 %v11507_v3  ;;  %10772 = vmatprep.mubr.bf16.mxu0 %v10015_v28  ;;  %v11635_v3 = vld [vmem:[#allocation4 + $0x78] sm:$0xf]  ;;  %v6011_v15 = vrot.slane %v11637_v16, 5  ;;  %v5991_v55 = vsel %vm11753_vm9, %v10000_v30, %v5990_v8  ;;  %v10088_v6 = vrot.slane %v11638_v9, 9  ;;  %v7555_v59 = vrot.slane %v14895_v20, 5 }
 0x3d8   : > { %10944 = vmatprep.subr.bf16.mxu1 %v11508_v17  ;;  %v10001_v37 = vrot.slane %v11635_v3, 9  ;;  %v10016_v22 = vcombine.low %v5991_v55, %v5994_v32  ;;  %v7549_v41 = vsel %vm11753_vm9, %v7547_v45, %v7548_v11  ;;  %v10089_v52 = vrot.slane %v11639_v43, 9  ;;  %v11640_v8 = vld [vmem:[#allocation4 + $0x94] sm:$0xf]  ;;  %v11641_v20 = vld [vmem:[#allocation4 + $0xa0] sm:$0xf] }
 0x3d9   : > { %v7559_v21 = vrot.slane %v11640_v8, 5  ;;  %v6006_v36 = vrot.slane %v6004_v54, 4  ;;  %v7546_v31 = vsel %vm11753_vm9, %v10088_v6, %v7545_v58  ;;  %v6013_v23 = vrot.slane %v6011_v15, 4  ;;  %v11646_v30 = vld [vmem:[#allocation4 + $0x90] sm:$0xf] }
 0x3da   : > { %10913 = vmatmul.mubr.bf16.gmra.mrb[12].mxu1 %v10102_v24  ;;  %v5998_v56 = vsel %vm11753_vm9, %v10001_v37, %v5997_v27  ;;  %v7556_v27 = vsel %vm11753_vm9, %v7554_v35, %v7555_v59  ;;  %v10104_v44 = vcombine.low %v7546_v31, %v7549_v41  ;;  %v7553_v62 = vsel %vm11753_vm9, %v10089_v52, %v7552_v7  ;;  %v11647_v37 = vld [vmem:[#allocation4 + $0x9c] sm:$0xf]  ;;  %v11648_v13 = vld [vmem:[#allocation4 + $0xac] sm:$0xf]  ;;  %v11649_v16 = vld [vmem:[#allocation4 + $0xb8] sm:$0xf] }
 0x3db   : > { %10916 = vmatprep.mubr.bf16.mxu1 %v10103_v46  ;;  %10945 = vmatpush3.bf16.msra.mxu1 %v11508_v17  ;;  %v10017_v19 = vcombine.low %v5998_v56, %v6001_v14  ;;  %v7566_v17 = vrot.slane %v11641_v20, 5  ;;  %v6007_v28 = vrot.slane %v14907_v4, 5  ;;  %v10105_v0 = vcombine.low %v7553_v62, %v7556_v27  ;;  %v11650_v43 = vld [vmem:[#allocation4 + $0x9c] sm:$0xf]  ;;  %v11651_v27 = vld [vmem:[#allocation4 + $0xa8] sm:$0xf] }
 0x3dc   : > { %10946 = vmatprep.subr.bf16.mxu1 %v11509_v18  ;;  %v10002_v47 = vrot.slane %v11642_v10, 9  ;;  %v6014_v26 = vrot.slane %v14923_v57, 5  ;;  %v7561_v63 = vrot.slane %v7559_v21, 4  ;;  %v10003_v60 = vrot.slane %v11643_v42, 9  ;;  %v11653_v10 = vld [vmem:[#allocation4 + $0xb4] sm:$0xf] }
 0x3dd   : > { %v6008_v58 = vsel %vm11753_vm9, %v6006_v36, %v6007_v28  ;;  %v7568_v24 = vrot.slane %v7566_v17, 4  ;;  %v6018_v2 = vrot.slane %v11644_v38, 5  ;;  %v7562_v7 = vrot.slane %v14935_v61, 5 }
 0x3de   : > { %10773 = vmatmul.mubr.bf16.gmra.mrb[112].mxu0 %v10016_v22  ;;  %v6015_v4 = vsel %vm11753_vm9, %v6013_v23, %v6014_v26  ;;  %v6005_v57 = vsel %vm11753_vm9, %v10002_v47, %v6004_v54  ;;  %v6012_v34 = vsel %vm11753_vm9, %v10003_v60, %v6011_v15  ;;  %v10090_v53 = vrot.slane %v11646_v30, 9 }
 0x3df   : > { %10947 = vmatpush3.bf16.msra.mxu1 %v11509_v18  ;;  %10776 = vmatprep.mubr.bf16.mxu0 %v10017_v19  ;;  %v11645_v18 = vld [vmem:[#allocation4 + $0xac] sm:$0xf]  ;;  %v7569_v45 = vrot.slane %v14951_v48, 5  ;;  %v10018_v32 = vcombine.low %v6005_v57, %v6008_v58  ;;  %v7563_v3 = vsel %vm11753_vm9, %v7561_v63, %v7562_v7  ;;  %v10091_v35 = vrot.slane %v11647_v37, 9  ;;  %v15262_v37 = vld [vmem:[#allocation4 + $0x24] sm:$0xf] }
 0x3e0   : > { %10980 = vmatprep.subr.bf16.mxu1 %v15189_v29  ;;  %v6025_v46 = vrot.slane %v11645_v18, 5  ;;  %v7573_v61 = vrot.slane %v11648_v13, 5  ;;  %v10019_v14 = vcombine.low %v6012_v34, %v6015_v4  ;;  %v6020_v54 = vrot.slane %v6018_v2, 4  ;;  %v15250_v34 = vld [vmem:[#allocation4 + $0x1c] sm:$0xf]  ;;  %16286 = vst [vmem:[#allocation14_spill] sm:$0xff] %v15262_v37 }
 0x3e1   : > { %v7570_v11 = vsel %vm11753_vm9, %v7568_v24, %v7569_v45  ;;  %v7580_v55 = vrot.slane %v11649_v16, 5  ;;  %v7560_v15 = vsel %vm11753_vm9, %v10090_v53, %v7559_v21  ;;  %v7567_v9 = vsel %vm11753_vm9, %v10091_v35, %v7566_v17  ;;  %v11652_v17 = vld [vmem:[#allocation4 + $0xa8] sm:$0xf]  ;;  %v11654_v24 = vld [vmem:[#allocation4 + $0xb4] sm:$0xf] }
 0x3e2   : > { %10917 = vmatmul.mubr.bf16.gmra.mrb[16].mxu1 %v10104_v44  ;;  %v6027_v48 = vrot.slane %v6025_v46, 4  ;;  %v10106_v56 = vcombine.low %v7560_v15, %v7563_v3  ;;  %v6021_v6 = vrot.slane %v14963_v12, 5  ;;  %v10107_v59 = vcombine.low %v7567_v9, %v7570_v11  ;;  %v15254_v45 = vld [vmem:[#allocation4 + $0x18] sm:$0xf]  ;;  %v15260_v3 = vld [vmem:[#allocation4 + $0x34] sm:$0xf] }
 0x3e3   : > { %10920 = vmatprep.mubr.bf16.mxu1 %v10105_v0  ;;  %v6028_v22 = vrot.slane %v14979_v51, 5  ;;  %v7575_v41 = vrot.slane %v7573_v61, 4  ;;  %v10004_v52 = vrot.slane %v11650_v43, 9  ;;  %v7582_v19 = vrot.slane %v7580_v55, 4  ;;  %16285 = vst [vmem:[#allocation9_spill] sm:$0xff] %v15260_v3  ;;  %v11518_v11 = vld [vmem:[%s15975_s3 + $0x1d0] sm:$0xff]  }
 0x3e4   : > { %v6022_v8 = vsel %vm11753_vm9, %v6020_v54, %v6021_v6  ;;  %v6032_v21 = vrot.slane %v15027_v5, 5  ;;  %v10005_v36 = vrot.slane %v11651_v27, 9  ;;  %v7576_v12 = vrot.slane %v14991_v50, 5  ;;  %v15266_v13 = vld [vmem:[#allocation4 + $0x30] sm:$0xf]  ;;  %v11524_v9 = vld [vmem:[%s15975_s3 + $0x1e0] sm:$0xff]  }
 0x3e5   : > { %v6029_v20 = vsel %vm11753_vm9, %v6027_v48, %v6028_v22  ;;  %v6019_v51 = vsel %vm11753_vm9, %v10004_v52, %v6018_v2  ;;  %v10092_v31 = vrot.slane %v11652_v17, 9  ;;  %v7583_v23 = vrot.slane %v15005_v1, 5  ;;  %16287 = vst [vmem:[#allocation11_spill] sm:$0xff] %v15266_v13  ;;  %v15277_v54 = vld [vmem:[#allocation4 + $0x40] sm:$0xf]  ;;  %v11527_v52 = vld [vmem:[%s15975_s3 + $0x1e8] sm:$0xff]  }
 0x3e6   : > { %10777 = vmatmul.mubr.bf16.gmra.mrb[116].mxu0 %v10018_v32  ;;  %v10020_v44 = vcombine.low %v6019_v51, %v6022_v8  ;;  %v6026_v62 = vsel %vm11753_vm9, %v10005_v36, %v6025_v46  ;;  %v7577_v5 = vsel %vm11753_vm9, %v7575_v41, %v7576_v12  ;;  %v7587_v28 = vrot.slane %v15046_v33, 5  ;;  %v11655_v46 = vld [vmem:[#allocation4 + $0xc0] sm:$0xf]  ;;  %v15258_v32 = vld [vmem:[#allocation4 + $0x28] sm:$0xf]  ;;  %16288 = vst [vmem:[#allocation17_spill] sm:$0xff] %v15277_v54 }
 0x3e7   : > { %10780 = vmatprep.mubr.bf16.mxu0 %v10019_v14  ;;  %v10021_v0 = vcombine.low %v6026_v62, %v6029_v20  ;;  %v10093_v47 = vrot.slane %v11653_v10, 9  ;;  %v7584_v50 = vsel %vm11753_vm9, %v7582_v19, %v7583_v23  ;;  %v6034_v26 = vrot.slane %v6032_v21, 4  ;;  %v15279_v16 = vld [vmem:[#allocation4 + $0x4c] sm:$0xf]  ;;  %v15285_v48 = vld [vmem:[#allocation4 + $0x48] sm:$0xf] }
 0x3e8   : > { %v7574_v1 = vsel %vm11753_vm9, %v10092_v31, %v7573_v61  ;;  %v6035_v42 = vrot.slane %v15021_v25, 5  ;;  %v7589_v33 = vrot.slane %v7587_v28, 4  ;;  %v10006_v38 = vrot.slane %v11654_v24, 9  ;;  %v11515_v61 = vld [vmem:[%s15975_s3 + $0x1c8] sm:$0xff]   ;;  %16289 = vst [vmem:[#allocation19_spill] sm:$0xff] %v15279_v16  ;;  %v11530_v19 = vld [vmem:[%s15975_s3 + $0x1f0] sm:$0xff]  }
 0x3e9   : > { %v10108_v63 = vcombine.low %v7574_v1, %v7577_v5  ;;  %v7581_v58 = vsel %vm11753_vm9, %v10093_v47, %v7580_v55  ;;  %v7590_v4 = vrot.slane %v15037_v40, 5  ;;  %v10094_v57 = vrot.slane %v11655_v46, 9  ;;  %v15281_v55 = vld [vmem:[#allocation4 + $0x3c] sm:$0xf]  ;;  %v15295_v6 = vld [vmem:[#allocation4 + $0x58] sm:$0xf] }
 0x3ea   : > { %10921 = vmatmul.mubr.bf16.gmra.mrb[20].mxu1 %v10106_v56  ;;  %v10109_v60 = vcombine.low %v7581_v58, %v7584_v50  ;;  %v6036_v2 = vsel %vm11753_vm9, %v6034_v26, %v6035_v42  ;;  %v6033_v7 = vsel %vm11753_vm9, %v10006_v38, %v6032_v21  ;;  %v10119_v40 = vcombine.low %v15254_v45, %v15250_v34  ;;  %v15299_v22 = vld [vmem:[#allocation4 + $0x54] sm:$0xf]  ;;  %v15303_v43 = vld [vmem:[#allocation4 + $0x60] sm:$0xf]  ;;  %v15313_v21 = vld [vmem:[#allocation4 + $0x70] sm:$0xf] }
 0x3eb   : > { %10924 = vmatprep.mubr.bf16.mxu1 %v10107_v59  ;;  %v10022_v18 = vcombine.low %v6033_v7, %v6036_v2  ;;  %v7591_v25 = vsel %vm11753_vm9, %v7589_v33, %v7590_v4  ;;  %v7588_v30 = vsel %vm11753_vm9, %v10094_v57, %v7587_v28  ;;  %v10120_v35 = vcombine.low %v15262_v37, %v15258_v32  ;;  %v15297_v59 = vld [vmem:[#allocation4 + $0x64] sm:$0xf]  ;;  %v15315_v27 = vld [vmem:[#allocation4 + $0x7c] sm:$0xf]  ;;  %v15317_v36 = vld [vmem:[#allocation4 + $0x6c] sm:$0xf] }
 0x3ec   : > { %v10110_v53 = vcombine.low %v7588_v30, %v7591_v25  ;;  %v10121_v14 = vcombine.low %v15266_v13, %v15260_v3  ;;  %16290 = vst [vmem:[#allocation16_spill] sm:$0xff] %v15281_v55  ;;  %v10122_v15 = vcombine.low %v15281_v55, %v15277_v54  ;;  %v10123_v56 = vcombine.low %v15285_v48, %v15279_v16  ;;  %v15321_v12 = vld [vmem:[#allocation4 + $0x78] sm:$0xf]  ;;  %v11533_v51 = vld [vmem:[%s15975_s3 + $0x1f8] sm:$0xff]   ;;  %v15331_v31 = vld [vmem:[%s15975_s3 + $0x200] sm:$0xff]  }
 0x3ed   : > { %v10124_v41 = vcombine.low %v15299_v22, %v15295_v6  ;;  %16291 = vst [vmem:[#allocation18_spill] sm:$0xff] %v15303_v43  ;;  %v10125_v8 = vcombine.low %v15303_v43, %v15297_v59  ;;  %16292 = vst [vmem:[#allocation12_spill] sm:$0xff] %v15317_v36  ;;  %v10126_v20 = vcombine.low %v15317_v36, %v15313_v21  ;;  %v15333_v23 = vld [vmem:[#allocation4 + $0x88] sm:$0xf]  ;;  %v15337_v62 = vld [vmem:[#allocation4 + $0x84] sm:$0xf] }
 0x3ee   : > { %10781 = vmatmul.mubr.bf16.gmra.mrb[120].mxu0 %v10020_v44  ;;  %16293 = vst [vmem:[#allocation10_spill] sm:$0xff] %v15321_v12  ;;  %v10127_v17 = vcombine.low %v15321_v12, %v15315_v27  ;;  %16294 = vst [vmem:[#allocation21_spill] sm:$0xff] %v15333_v23  ;;  %v15335_v44 = vld [vmem:[#allocation4 + $0x94] sm:$0xf]  ;;  %v10128_v5 = vcombine.low %v15337_v62, %v15333_v23  ;;  %v15341_v28 = vld [vmem:[#allocation4 + $0x90] sm:$0xf] }
 0x3ef   : > { %10784 = vmatprep.mubr.bf16.mxu0 %v10021_v0  ;;  %16295 = vst [vmem:[#allocation20_spill] sm:$0xff] %v15335_v44  ;;  %16296 = vst [vmem:[#allocation22_spill] sm:$0xff] %v15337_v62  ;;  %v10129_v0 = vcombine.low %v15341_v28, %v15335_v44  ;;  %v15346_v10 = vld [vmem:[#allocation4 + $0xa0] sm:$0xf]  ;;  %v8329_v47 = vshrl.u32 %v15250_v34, 16  ;;  %v8325_v26 = vshll.u32 %v15250_v34, 16 }
 0x3f0   : > { %16297 = vst [vmem:[#allocation23_spill] sm:$0xff] %v15341_v28  ;;  %v15349_v50 = vld [vmem:[#allocation4 + $0xac] sm:$0xf]  ;;  %v8316_v1 = vshrl.u32 %v15254_v45, 16  ;;  %v15354_v58 = vld [vmem:[#allocation4 + $0x9c] sm:$0xf] }
 0x3f1   : > { %v10130_v42 = vcombine.low %v15354_v58, %v15346_v10  ;;  %v15362_v24 = vrot.slane %v8325_v26, 5  ;;  %v8331_v38 = vrot.slane %v8329_v47, 4  ;;  %v8340_v2 = vshrl.u32 %v15262_v37, 16  ;;  %v15369_v30 = vld [vmem:[#allocation4 + $0x20] sm:$0x1] }
 0x3f2   : > { %10925 = vmatmul.mubr.bf16.gmra.mrb[24].mxu1 %v10108_v63  ;;  %v8319_v63 = vshll.u32 %v15254_v45, 16  ;;  %v8343_v4 = vshll.u32 %v15262_v37, 16  ;;  %v8318_v7 = vrot.slane %v8316_v1, 4  ;;  %v8353_v46 = vshrl.u32 %v15258_v32, 16 }
 0x3f3   : > { %10928 = vmatprep.mubr.bf16.mxu1 %v10109_v60  ;;  %v15358_v60 = vld [vmem:[#allocation4 + $0xa8] sm:$0xf]  ;;  %v8364_v57 = vshrl.u32 %v15266_v13, 16  ;;  %v8367_v25 = vshll.u32 %v15266_v13, 16  ;;  %v8342_v1 = vrot.slane %v8340_v2, 4 }
 0x3f4   : > { %16298 = vst [vmem:[#allocation15_spill] sm:$0xff] %v15358_v60  ;;  %v10131_v33 = vcombine.low %v15358_v60, %v15349_v50  ;;  %v8355_v26 = vrot.slane %v8353_v46, 4  ;;  %v15415_v46 = vld [vmem:[#allocation4 + $0x38] sm:$0x1] }
 0x3f5   : > { %v8383_v13 = vshll.u32 %v15415_v46, 16 }
 0x3f6   : > { %10785 = vmatmul.mubr.bf16.gmra.mrb[124].mxu0 %v10022_v18  ;;  %v8321_v18 = vrot.slane %v8319_v63, 5 }
 0x3fa   : > { %10929 = vmatmul.mubr.bf16.gmra.mrb[28].mxu1 %v10110_v53  ;;  %v8349_v53 = vshll.u32 %v15258_v32, 16 }
 0x3fb   : > { %10948 = vmatprep.mubr.bf16.mxu1 %v10119_v40  ;;  %v8377_v40 = vshrl.u32 %v15260_v3, 16 }
 0x3fc   : > { %v15394_v47 = vrot.slane %v8349_v53, 5 }
 0x3fd   : > { %v8379_v53 = vrot.slane %v8377_v40, 4 }
 0x402   : > { %10949 = vmatmul.mubr.bf16.vlgmr.msra.gmra.mrb[0].mxu1 %v10120_v35  ;;  %v8388_v35 = vshrl.u32 %v15281_v55, 16 }
 0x403   : > { %10952 = vmatprep.mubr.bf16.mxu1 %v10121_v14  ;;  %10981 = vmatpush3.bf16.msra.mxu1 %v15189_v29  ;;  %v11521_v29 = vld [vmem:[%s15975_s3 + $0x1d8] sm:$0xff]   ;;  %v8401_v14 = vshrl.u32 %v15277_v54, 16 }
 0x404   : > { %10982 = vmatprep.subr.bf16.mxu1 %v11515_v61 }
 0x407   : > { %10983 = vmatpush3.bf16.msra.mxu1 %v11515_v61  ;;  %v8391_v61 = vshll.u32 %v15281_v55, 16  ;;  %v8369_v55 = vrot.slane %v8367_v25, 5 }
 0x408   : > { %10984 = vmatprep.subr.bf16.mxu1 %v11518_v11 }
 0x40a   : > { %10953 = vmatmul.mubr.bf16.gmra.mrb[4].mxu1 %v10122_v15  ;;  %v15409_v15 = vld [vmem:[#allocation4 + $0x2c] sm:$0x1] }
 0x40b   : > { %10956 = vmatprep.mubr.bf16.mxu1 %v10123_v56  ;;  %10985 = vmatpush3.bf16.msra.mxu1 %v11518_v11  ;;  %v15376_v11 = vld [vmem:[#allocation4 + $0xb8] sm:$0xf]  ;;  %v15380_v56 = vld [vmem:[#allocation4 + $0xc4] sm:$0xf]  ;;  %v8359_v40 = vshll.u32 %v15409_v15, 16 }
 0x40c   : > { %10986 = vmatprep.subr.bf16.mxu1 %v11521_v29  ;;  %16299 = vst [vmem:[#allocation6_spill] sm:$0xff] %v15376_v11  ;;  %16300 = vst [vmem:[#allocation26_spill] sm:$0xff] %v15380_v56 }
 0x40f   : > { %10987 = vmatpush3.bf16.msra.mxu1 %v11521_v29 }
 0x410   : > { %10988 = vmatprep.subr.bf16.mxu1 %v11524_v9 }
 0x412   : > { %10957 = vmatmul.mubr.bf16.gmra.mrb[8].mxu1 %v10124_v41  ;;  %v8373_v41 = vshll.u32 %v15260_v3, 16 }
 0x413   : > { %10960 = vmatprep.mubr.bf16.mxu1 %v10125_v8  ;;  %10989 = vmatpush3.bf16.msra.mxu1 %v11524_v9  ;;  %v8332_v9 = vor.u32 %v8331_v38, %v15362_v24  ;;  %v15407_v8 = vld [vmem:[#allocation4 + $0xd0] sm:$0xf]  ;;  %v8356_v38 = vor.u32 %v8355_v26, %v15394_v47 }
 0x414   : > { %10990 = vmatprep.subr.bf16.mxu1 %v11527_v52 }
 0x417   : > { %10991 = vmatpush3.bf16.msra.mxu1 %v11527_v52  ;;  %v8425_v52 = vshrl.u32 %v15279_v16, 16 }
 0x418   : > { %10992 = vmatprep.subr.bf16.mxu1 %v11530_v19 }
 0x41a   : > { %10961 = vmatmul.mubr.bf16.gmra.mrb[12].mxu1 %v10126_v20  ;;  %v15387_v20 = vld [vmem:[#allocation4 + $0xb4] sm:$0xf] }
 0x41b   : > { %10964 = vmatprep.mubr.bf16.mxu1 %v10127_v17  ;;  %10993 = vmatpush3.bf16.msra.mxu1 %v11530_v19  ;;  %16301 = vst [vmem:[#allocation24_spill] sm:$0xff] %v15387_v20  ;;  %v10132_v17 = vcombine.low %v15387_v20, %v15376_v11  ;;  %v15404_v19 = vrot.slane %v8373_v41, 5 }
 0x41c   : > { %10994 = vmatprep.subr.bf16.mxu1 %v11533_v51 }
 0x41f   : > { %10995 = vmatpush3.bf16.msra.mxu1 %v11533_v51  ;;  %v8322_v51 = vor.u32 %v8321_v18, %v8318_v7  ;;  %v15402_v7 = vld [vmem:[#allocation4 + $0xcc] sm:$0xf]  ;;  %v8333_v18 = vrot.slane %v8332_v9, 4  ;;  %v8357_v9 = vrot.slane %v8356_v38, 4  ;;  %v8385_v38 = vrot.slane %v8383_v13, 5 }
 0x420   : > { %11028 = vmatprep.subr.bf16.mxu1 %v15331_v31  ;;  %v10134_v2 = vcombine.low %v15402_v7, %v15407_v8 }
 0x421   : > { %v8323_v63 = vrot.slane %v8322_v51, 4  ;;  %v8380_v51 = vor.u32 %v8379_v53, %v15404_v19  ;;  %v8403_v53 = vrot.slane %v8401_v14, 4  ;;  %v16303_v14 = vshrl.u32 %v15285_v48, 16 }
 0x422   : > { %10965 = vmatmul.mubr.bf16.gmra.mrb[16].mxu1 %v10128_v5  ;;  %v15391_v5 = vld [vmem:[#allocation4 + $0xc0] sm:$0xf] }
 0x423   : > { %10968 = vmatprep.mubr.bf16.mxu1 %v10129_v0  ;;  %16302 = vst [vmem:[#allocation25_spill] sm:$0xff] %v15391_v5  ;;  %v8335_v0 = vshll.u32 %v15369_v30, 16  ;;  %v8381_v25 = vrot.slane %v8380_v51, 4  ;;  %v15447_v51 = vld [vmem:[#allocation4 + $0x50] sm:$0x1] }
 0x425   : > { %v8337_v29 = vrot.slane %v8335_v0, 5  ;;  %v8328_v0 = vsel %vm11790_vm13, %v8323_v63, %v15362_v24  ;;  %v8427_v24 = vrot.slane %v8425_v52, 4 }
 0x42a   : > { %10969 = vmatmul.mubr.bf16.gmra.mrb[20].mxu1 %v10130_v42  ;;  %v8345_v42 = vrot.slane %v8343_v4, 5  ;;  %v8338_v4 = vsel %vm11790_vm13, %v8333_v18, %v8337_v29  ;;  %v8393_v29 = vrot.slane %v8391_v61, 5  ;;  %v15437_v61 = vld [vmem:[#allocation4 + $0x44] sm:$0x1] }
 0x42b   : > { %10972 = vmatprep.mubr.bf16.mxu1 %v10131_v33  ;;  %v10133_v33 = vcombine.low %v15391_v5, %v15380_v56  ;;  %v10143_v37 = vcombine.low %v8328_v0, %v8338_v4  ;;  %v8469_v0 = vshll.u32 %v15297_v59, 16 }
 0x42c   : > { %v8346_v26 = vor.u32 %v8345_v42, %v8342_v1  ;;  %v8445_v42 = vshll.u32 %v15295_v6, 16  ;;  %v16308_v1 = vshrl.u32 %v15297_v59, 16 }
 0x42e   : > { %v8347_v63 = vrot.slane %v8346_v26, 4 }
 0x430   : > { %v8352_v26 = vsel %vm11790_vm13, %v8347_v63, %v15394_v47 }
 0x432   : > { %10973 = vmatmul.mubr.bf16.gmra.mrb[24].mxu1 %v10132_v17  ;;  %v8366_v17 = vrot.slane %v8364_v57, 4  ;;  %v8421_v57 = vshll.u32 %v15279_v16, 16 }
 0x433   : > { %10976 = vmatprep.mubr.bf16.mxu1 %v10133_v33  ;;  %v8397_v33 = vshll.u32 %v15277_v54, 16  ;;  %v8390_v54 = vrot.slane %v8388_v35, 4 }
 0x434   : > { %v8370_v41 = vor.u32 %v8369_v55, %v8366_v17  ;;  %v15433_v3 = vrot.slane %v8421_v57, 5  ;;  %v8361_v55 = vrot.slane %v8359_v40, 5  ;;  %v8414_v17 = vrot.slane %v16303_v14, 4 }
 0x435   : > { %v15430_v18 = vrot.slane %v8397_v33, 5  ;;  %v16304_v33 = vshll.u32 %v15285_v48, 16  ;;  %v8431_v14 = vshll.u32 %v15447_v51, 16 }
 0x436   : > { %v8371_v35 = vrot.slane %v8370_v41, 4  ;;  %v8362_v52 = vsel %vm11790_vm13, %v8357_v9, %v8361_v55  ;;  %v8386_v41 = vsel %vm11790_vm13, %v8381_v25, %v8385_v38  ;;  %v8428_v57 = vor.u32 %v8427_v24, %v15433_v3  ;;  %v11535_v24 = vld [vmem:[%s15975_s3 + $0x208] sm:$0xff]  }
 0x437   : > { %v8404_v40 = vor.u32 %v8403_v53, %v15430_v18  ;;  %v8407_v9 = vshll.u32 %v15437_v61, 16  ;;  %v10144_v55 = vcombine.low %v8352_v26, %v8362_v52  ;;  %v15471_v52 = vld [vmem:[#allocation4 + $0x5c] sm:$0x1]  ;;  %v16307_v26 = vshll.u32 %v15299_v22, 16 }
 0x438   : > { %v8376_v25 = vsel %vm11790_vm13, %v8371_v35, %v15404_v19  ;;  %v15475_v35 = vrot.slane %v8469_v0, 5  ;;  %v8517_v0 = vshll.u32 %v15315_v27, 16 }
 0x439   : > { %v10145_v47 = vcombine.low %v8376_v25, %v8386_v41  ;;  %v8441_v19 = vrot.slane %v16307_v26, 5  ;;  %v16309_v41 = vshrl.u32 %v15303_v43, 16  ;;  %v8433_v26 = vrot.slane %v8431_v14, 5 }
 0x43a   : > { %10977 = vmatmul.mubr.bf16.gmra.mrb[28].mxu1 %v10134_v2  ;;  %v8417_v2 = vrot.slane %v16304_v33, 5  ;;  %v8405_v33 = vrot.slane %v8404_v40, 4  ;;  %v15481_v40 = vld [vmem:[#allocation4 + $0x68] sm:$0x1] }
 0x43b   : > { %10996 = vmatprep.mubr.bf16.mxu1 %v10143_v37  ;;  %v8394_v37 = vor.u32 %v8393_v29, %v8390_v54  ;;  %v15458_v54 = vrot.slane %v8445_v42, 5  ;;  %v16305_v29 = vshrl.u32 %v15295_v6, 16  ;;  %v16306_v42 = vshrl.u32 %v15299_v22, 16 }
 0x43c   : > { %v8418_v38 = vor.u32 %v8417_v2, %v8414_v17  ;;  %v8475_v17 = vrot.slane %v16308_v1, 4  ;;  %v8409_v2 = vrot.slane %v8407_v9, 5  ;;  %v8493_v1 = vshll.u32 %v15313_v21, 16 }
 0x43d   : > { %v8451_v53 = vrot.slane %v16305_v29, 4  ;;  %v8395_v63 = vrot.slane %v8394_v37, 4  ;;  %v8438_v4 = vrot.slane %v16306_v42, 4  ;;  %v8429_v29 = vrot.slane %v8428_v57, 4 }
 0x43e   : > { %v8462_v57 = vrot.slane %v16309_v41, 4  ;;  %v8419_v42 = vrot.slane %v8418_v38, 4  ;;  %v8455_v41 = vshll.u32 %v15471_v52, 16  ;;  %v8476_v14 = vor.u32 %v8475_v17, %v15475_v35 }
 0x43f   : > { %v8452_v37 = vor.u32 %v8451_v53, %v15458_v54  ;;  %v8569_v53 = vshrl.u32 %v15335_v44, 16  ;;  %v8442_v38 = vor.u32 %v8441_v19, %v8438_v4  ;;  %v8400_v13 = vsel %vm11790_vm13, %v8395_v63, %v15430_v18  ;;  %v11537_v18 = vld [vmem:[%s15975_s3 + $0x218] sm:$0xff]  }
 0x440   : > { %v15508_v4 = vrot.slane %v8493_v1, 5  ;;  %v8457_v63 = vrot.slane %v8455_v41, 5  ;;  %v16312_v17 = vshrl.u32 %v15317_v36, 16 }
 0x441   : > { %v8453_v9 = vrot.slane %v8452_v37, 4 }
 0x442   : > { %10997 = vmatmul.mubr.bf16.vlgmr.msra.gmra.mrb[0].mxu1 %v10144_v55  ;;  %v16310_v55 = vshll.u32 %v15303_v43, 16  ;;  %v8479_v43 = vshll.u32 %v15481_v40, 16  ;;  %v8486_v37 = vrot.slane %v16312_v17, 4  ;;  %v16317_v17 = vshll.u32 %v15321_v12, 16 }
 0x443   : > { %11000 = vmatprep.mubr.bf16.mxu1 %v10145_v47  ;;  %11029 = vmatpush3.bf16.msra.mxu1 %v15331_v31  ;;  %v11536_v31 = vld [vmem:[%s15975_s3 + $0x210] sm:$0xff]   ;;  %v8410_v47 = vsel %vm11790_vm13, %v8405_v33, %v8409_v2  ;;  %v8424_v2 = vsel %vm11790_vm13, %v8419_v42, %v15433_v3  ;;  %v8443_v3 = vrot.slane %v8442_v38, 4  ;;  %v15519_v42 = vrot.slane %v8517_v0, 5  ;;  %v15529_v38 = vld [vmem:[#allocation4 + $0x80] sm:$0x1] }
 0x444   : > { %v8465_v25 = vrot.slane %v16310_v55, 5  ;;  %11030 = vmatprep.subr.bf16.mxu1 %v11535_v24  ;;  %v8434_v55 = vsel %vm11790_vm13, %v8429_v29, %v8433_v26  ;;  %v10146_v33 = vcombine.low %v8400_v13, %v8410_v47  ;;  %v16311_v29 = vshrl.u32 %v15313_v21, 16  ;;  %16315 = vst [vmem:[#allocation27_spill] sm:$0xff] %v15529_v38 }
 0x445   : > { %v16313_v13 = vshll.u32 %v15317_v36, 16  ;;  %v16314_v26 = vshrl.u32 %v15315_v27, 16  ;;  %v8458_v41 = vsel %vm11790_vm13, %v8453_v9, %v8457_v63  ;;  %v16316_v0 = vshrl.u32 %v15321_v12, 16 }
 0x446   : > { %v8466_v16 = vor.u32 %v8465_v25, %v8462_v57  ;;  %v8499_v19 = vrot.slane %v16311_v29, 4  ;;  %v8477_v25 = vrot.slane %v8476_v14, 4  ;;  %v15526_v29 = vld [vmem:[#allocation4 + $0x74] sm:$0x1]  ;;  %v8448_v63 = vsel %vm11790_vm13, %v8443_v3, %v15458_v54 }
 0x447   : > { %11031 = vmatpush3.bf16.msra.mxu1 %v11535_v24  ;;  %v10147_v24 = vcombine.low %v8424_v2, %v8434_v55  ;;  %v8489_v57 = vrot.slane %v16313_v13, 5  ;;  %v8523_v1 = vrot.slane %v16314_v26, 4  ;;  %v8481_v2 = vrot.slane %v8479_v43, 5 }
 0x448   : > { %11032 = vmatprep.subr.bf16.mxu1 %v11536_v31  ;;  %v8467_v55 = vrot.slane %v8466_v16, 4  ;;  %v8510_v14 = vrot.slane %v16316_v0, 4  ;;  %v8513_v13 = vrot.slane %v16317_v17, 5  ;;  %v11538_v16 = vld [vmem:[%s15975_s3 + $0x220] sm:$0xff]   ;;  %v8583_v43 = vshll.u32 %v15354_v58, 16 }
 0x449   : > { %v8490_v9 = vor.u32 %v8489_v57, %v8486_v37  ;;  %v8482_v26 = vsel %vm11790_vm13, %v8477_v25, %v8481_v2  ;;  %v8503_v0 = vshll.u32 %v15526_v29, 16  ;;  %v8524_v17 = vor.u32 %v8523_v1, %v15519_v42  ;;  %v11539_v1 = vld [vmem:[%s15975_s3 + $0x228] sm:$0xff]  }
 0x44a   : > { %11001 = vmatmul.mubr.bf16.gmra.mrb[4].mxu1 %v10146_v33  ;;  %v8500_v33 = vor.u32 %v8499_v19, %v15508_v4  ;;  %v8565_v19 = vshll.u32 %v15335_v44, 16  ;;  %v10148_v12 = vcombine.low %v8448_v63, %v8458_v41  ;;  %v8472_v37 = vsel %vm11790_vm13, %v8467_v55, %v15475_v35 }
 0x44b   : > { %11004 = vmatprep.mubr.bf16.mxu1 %v10147_v24  ;;  %11033 = vmatpush3.bf16.msra.mxu1 %v11536_v31  ;;  %v8541_v24 = vshll.u32 %v15333_v23, 16  ;;  %v8593_v31 = vshrl.u32 %v15346_v10, 16  ;;  %v8527_v57 = vshll.u32 %v15529_v38, 16  ;;  %v8514_v36 = vor.u32 %v8513_v13, %v8510_v14 }
 0x44c   : > { %11034 = vmatprep.subr.bf16.mxu1 %v11537_v18  ;;  %v8501_v44 = vrot.slane %v8500_v33, 4  ;;  %v16318_v3 = vshrl.u32 %v15333_v23, 16  ;;  %v10149_v41 = vcombine.low %v8472_v37, %v8482_v26  ;;  %v8491_v2 = vrot.slane %v8490_v9, 4  ;;  %v15569_v23 = vld [vmem:[#allocation4 + $0x8c] sm:$0x1] }
 0x44d   : > { %v15554_v54 = vrot.slane %v8541_v24, 5  ;;  %v15561_v63 = vrot.slane %v8565_v19, 5  ;;  %v8571_v35 = vrot.slane %v8569_v53, 4  ;;  %v8505_v55 = vrot.slane %v8503_v0, 5 }
 0x44e   : > { %v8547_v25 = vrot.slane %v16318_v3, 4  ;;  %v16319_v33 = vshrl.u32 %v15337_v62, 16  ;;  %v16320_v13 = vshll.u32 %v15337_v62, 16  ;;  %v8607_v3 = vshll.u32 %v15358_v60, 16 }
 0x44f   : > { %11035 = vmatpush3.bf16.msra.mxu1 %v11537_v18  ;;  %v8525_v18 = vrot.slane %v8524_v17, 4  ;;  %v8617_v47 = vshrl.u32 %v15349_v50, 16  ;;  %v16321_v9 = vshrl.u32 %v15341_v28, 16  ;;  %v8506_v26 = vsel %vm11790_vm13, %v8501_v44, %v8505_v55 }
 0x450   : > { %11036 = vmatprep.subr.bf16.mxu1 %v11538_v16  ;;  %v8534_v14 = vrot.slane %v16319_v33, 4  ;;  %v8537_v24 = vrot.slane %v16320_v13, 5  ;;  %v8515_v0 = vrot.slane %v8514_v36, 4  ;;  %v8529_v17 = vrot.slane %v8527_v57, 5  ;;  %v15578_v33 = vld [vmem:[#allocation4 + $0x98] sm:$0x1] }
 0x451   : > { %v8558_v19 = vrot.slane %v16321_v9, 4  ;;  %v8548_v37 = vor.u32 %v8547_v25, %v15554_v54  ;;  %v8628_v13 = vshrl.u32 %v15387_v20, 16  ;;  %v8572_v9 = vor.u32 %v8571_v35, %v15561_v63 }
 0x452   : > { %11005 = vmatmul.mubr.bf16.gmra.mrb[8].mxu1 %v10148_v12  ;;  %v16322_v12 = vshll.u32 %v15341_v28, 16  ;;  %v8589_v36 = vshll.u32 %v15346_v10, 16  ;;  %v8530_v44 = vsel %vm11790_vm13, %v8525_v18, %v8529_v17  ;;  %v8538_v57 = vor.u32 %v8537_v24, %v8534_v14  ;;  %v11541_v24 = vld [vmem:[%s15975_s3 + $0x238] sm:$0xff]  }
 0x453   : > { %11008 = vmatprep.mubr.bf16.mxu1 %v10149_v41  ;;  %11037 = vmatpush3.bf16.msra.mxu1 %v11538_v16  ;;  %v11540_v41 = vld [vmem:[%s15975_s3 + $0x230] sm:$0xff]   ;;  %v8496_v16 = vsel %vm11790_vm13, %v8491_v2, %v15508_v4  ;;  %v8551_v25 = vshll.u32 %v15569_v23, 16  ;;  %v8613_v55 = vshll.u32 %v15349_v50, 16  ;;  %v8575_v38 = vshll.u32 %v15578_v33, 16 }
 0x454   : > { %v8561_v53 = vrot.slane %v16322_v12, 5  ;;  %11038 = vmatprep.subr.bf16.mxu1 %v11539_v1  ;;  %v8631_v12 = vshll.u32 %v15387_v20, 16  ;;  %v10150_v28 = vcombine.low %v8496_v16, %v8506_v26  ;;  %v8520_v4 = vsel %vm11790_vm13, %v8515_v0, %v15519_v42 }
 0x455   : > { %v8549_v2 = vrot.slane %v8548_v37, 4  ;;  %v16323_v35 = vshrl.u32 %v15354_v58, 16  ;;  %v8585_v14 = vrot.slane %v8583_v43, 5  ;;  %v10151_v17 = vcombine.low %v8520_v4, %v8530_v44 }
 0x456   : > { %v8562_v62 = vor.u32 %v8561_v53, %v8558_v19  ;;  %v8573_v26 = vrot.slane %v8572_v9, 4  ;;  %v15603_v19 = vrot.slane %v8589_v36, 5  ;;  %v8595_v53 = vrot.slane %v8593_v31, 4  ;;  %v15611_v36 = vld [vmem:[#allocation4 + $0xa4] sm:$0x1] }
 0x457   : > { %11039 = vmatpush3.bf16.msra.mxu1 %v11539_v1  ;;  %v8582_v18 = vrot.slane %v16323_v35, 4  ;;  %v8539_v1 = vrot.slane %v8538_v57, 4  ;;  %v8553_v16 = vrot.slane %v8551_v25, 5  ;;  %v15605_v20 = vrot.slane %v8613_v55, 5 }
 0x458   : > { %11040 = vmatprep.subr.bf16.mxu1 %v11540_v41  ;;  %v8619_v42 = vrot.slane %v8617_v47, 4  ;;  %v8641_v0 = vshrl.u32 %v15376_v11, 16  ;;  %v8652_v43 = vshrl.u32 %v15391_v5, 16  ;;  %v8563_v37 = vrot.slane %v8562_v62, 4 }
 0x459   : > { %v8577_v35 = vrot.slane %v8575_v38, 5  ;;  %v8554_v9 = vsel %vm11790_vm13, %v8549_v2, %v8553_v16  ;;  %v8586_v31 = vor.u32 %v8585_v14, %v8582_v18  ;;  %v8609_v57 = vrot.slane %v8607_v3, 5  ;;  %v15619_v38 = vld [vmem:[#allocation4 + $0xb0] sm:$0x1] }
 0x45a   : > { %11009 = vmatmul.mubr.bf16.gmra.mrb[12].mxu1 %v10150_v28  ;;  %v16324_v28 = vshrl.u32 %v15358_v60, 16  ;;  %v8655_v47 = vshll.u32 %v15391_v5, 16  ;;  %v8596_v62 = vor.u32 %v8595_v53, %v15603_v19  ;;  %v8665_v55 = vshrl.u32 %v15380_v56, 16 }
 0x45b   : > { %11012 = vmatprep.mubr.bf16.mxu1 %v10151_v17  ;;  %11041 = vmatpush3.bf16.msra.mxu1 %v11540_v41  ;;  %v8578_v25 = vsel %vm11790_vm13, %v8573_v26, %v8577_v35  ;;  %v8637_v41 = vshll.u32 %v15376_v11, 16  ;;  %v8544_v4 = vsel %vm11790_vm13, %v8539_v1, %v15554_v54  ;;  %v8620_v3 = vor.u32 %v8619_v42, %v15605_v20 }
 0x45c   : > { %v8606_v44 = vrot.slane %v16324_v28, 4  ;;  %11042 = vmatprep.subr.bf16.mxu1 %v11541_v24  ;;  %v8661_v2 = vshll.u32 %v15380_v56, 16  ;;  %v8676_v18 = vshrl.u32 %v15402_v7, 16  ;;  %v10152_v14 = vcombine.low %v8544_v4, %v8554_v9 }
 0x45d   : > { %v8568_v17 = vsel %vm11790_vm13, %v8563_v37, %v15561_v63  ;;  %v8599_v26 = vshll.u32 %v15611_v36, 16  ;;  %v8587_v16 = vrot.slane %v8586_v31, 4  ;;  %v8623_v28 = vshll.u32 %v15619_v38, 16  ;;  %v15636_v37 = vld [vmem:[#allocation4 + $0xbc] sm:$0x1] }
 0x45e   : > { %v10153_v53 = vcombine.low %v8568_v17, %v8578_v25  ;;  %v8610_v35 = vor.u32 %v8609_v57, %v8606_v44  ;;  %v8597_v54 = vrot.slane %v8596_v62, 4  ;;  %v8630_v1 = vrot.slane %v8628_v13, 4 }
 0x45f   : > { %11043 = vmatpush3.bf16.msra.mxu1 %v11541_v24  ;;  %v8639_v42 = vrot.slane %v8637_v41, 5  ;;  %v8643_v5 = vrot.slane %v8641_v0, 4  ;;  %v8621_v56 = vrot.slane %v8620_v3, 4  ;;  %v8633_v60 = vrot.slane %v8631_v12, 5  ;;  %v15644_v41 = vld [vmem:[#allocation4 + $0xc8] sm:$0x1] }
 0x460   : > { %v8663_v9 = vrot.slane %v8661_v2, 5  ;;  %v8667_v4 = vrot.slane %v8665_v55, 4  ;;  %v8679_v11 = vshll.u32 %v15402_v7, 16  ;;  %v8689_v63 = vshrl.u32 %v15407_v8, 16 }
 0x461   : > { %v8601_v24 = vrot.slane %v8599_v26, 5  ;;  %v8685_v31 = vshll.u32 %v15407_v8, 16  ;;  %v8611_v44 = vrot.slane %v8610_v35, 4  ;;  %v8625_v57 = vrot.slane %v8623_v28, 5  ;;  %v15653_v35 = vld [vmem:[#allocation4 + $0xd4] sm:$0x1] }
 0x462   : > { %11013 = vmatmul.mubr.bf16.gmra.mrb[16].mxu1 %v10152_v14  ;;  %v8654_v13 = vrot.slane %v8652_v43, 4  ;;  %v8657_v25 = vrot.slane %v8655_v47, 5  ;;  %v8592_v12 = vsel %vm11790_vm13, %v8587_v16, %v15603_v19  ;;  %v8644_v62 = vor.u32 %v8643_v5, %v8639_v42 }
 0x463   : > { %11016 = vmatprep.mubr.bf16.mxu1 %v10153_v53  ;;  %v8602_v0 = vsel %vm11790_vm13, %v8597_v54, %v8601_v24  ;;  %v8626_v55 = vsel %vm11790_vm13, %v8621_v56, %v8625_v57  ;;  %v8634_v3 = vor.u32 %v8633_v60, %v8630_v1  ;;  %v8647_v2 = vshll.u32 %v15636_v37, 16 }
 0x464   : > { %v8668_v14 = vor.u32 %v8667_v4, %v8663_v9  ;;  %v8678_v17 = vrot.slane %v8676_v18, 4  ;;  %v8681_v43 = vrot.slane %v8679_v11, 5  ;;  %v8687_v47 = vrot.slane %v8685_v31, 5 }
 0x465   : > { %v8691_v26 = vrot.slane %v8689_v63, 4  ;;  %v10154_v53 = vcombine.low %v8592_v12, %v8602_v0  ;;  %v8616_v19 = vsel %vm11790_vm13, %v8611_v44, %v15605_v20  ;;  %v8658_v16 = vor.u32 %v8657_v25, %v8654_v13 }
 0x466   : > { %v8671_v5 = vshll.u32 %v15644_v41, 16  ;;  %v10155_v28 = vcombine.low %v8616_v19, %v8626_v55  ;;  %v8645_v56 = vrot.slane %v8644_v62, 4  ;;  %v8635_v60 = vrot.slane %v8634_v3, 4 }
 0x467   : > { %v8669_v54 = vrot.slane %v8668_v14, 4  ;;  %v8649_v18 = vrot.slane %v8647_v2, 5  ;;  %v8682_v11 = vor.u32 %v8681_v43, %v8678_v17  ;;  %v8692_v1 = vor.u32 %v8691_v26, %v8687_v47  ;;  %v16325_v26 = vld [vmem:[#allocation9_spill] sm:$0xff] }
 0x468   : > { %v8695_v4 = vshll.u32 %v15653_v35, 16  ;;  %v8659_v63 = vrot.slane %v8658_v16, 4  ;;  %v8673_v24 = vrot.slane %v8671_v5, 5  ;;  %v9038_v44 = vrot.slane %v15250_v34, 5  ;;  %v16326_v5 = vld [vmem:[#allocation14_spill] sm:$0xff] }
 0x469   : > { %v8650_v20 = vsel %vm11790_vm13, %v8645_v56, %v8649_v18  ;;  %v8640_v57 = vsel %vm11790_vm13, %v8635_v60, %v8639_v42  ;;  %v8683_v13 = vrot.slane %v8682_v11, 4  ;;  %v8693_v25 = vrot.slane %v8692_v1, 4  ;;  %v16327_v56 = vld [vmem:[#allocation17_spill] sm:$0xff]  ;;  %v16329_v1 = vld [vmem:[#allocation19_spill] sm:$0xff] }
 0x46a   : > { %11017 = vmatmul.mubr.bf16.gmra.mrb[20].mxu1 %v10154_v53  ;;  %v8674_v31 = vsel %vm11790_vm13, %v8669_v54, %v8673_v24  ;;  %v8697_v12 = vrot.slane %v8695_v4, 5  ;;  %v10156_v0 = vcombine.low %v8640_v57, %v8650_v20  ;;  %v8664_v62 = vsel %vm11790_vm13, %v8659_v63, %v8663_v9  ;;  %v16328_v54 = vld [vmem:[#allocation11_spill] sm:$0xff] }
 0x46b   : > { %11020 = vmatprep.mubr.bf16.mxu1 %v10155_v28  ;;  %v10157_v55 = vcombine.low %v8664_v62, %v8674_v31  ;;  %v9040_v3 = vrot.slane %v9038_v44, 4  ;;  %v8688_v2 = vsel %vm11790_vm13, %v8683_v13, %v8687_v47  ;;  %v9041_v14 = vrot.slane %v15369_v30, 5  ;;  %v16330_v13 = vld [vmem:[#allocation16_spill] sm:$0xff] }
 0x46c   : > { %v8698_v34 = vsel %vm11790_vm13, %v8693_v25, %v8697_v12  ;;  %v9045_v42 = vrot.slane %v15258_v32, 5  ;;  %v10167_v43 = vrot.slane %v15254_v45, 9  ;;  %v9052_v53 = vrot.slane %v16325_v26, 5 }
 0x46d   : > { %v10158_v17 = vcombine.low %v8688_v2, %v8698_v34  ;;  %v9042_v9 = vsel %vm11753_vm9, %v9040_v3, %v9041_v14  ;;  %v9048_v30 = vrot.slane %v15409_v15, 5  ;;  %v9055_v32 = vrot.slane %v15415_v46, 5 }
 0x46e   : > { %v9039_v19 = vsel %vm11753_vm9, %v10167_v43, %v9038_v44  ;;  %v9047_v47 = vrot.slane %v9045_v42, 4  ;;  %v9054_v49 = vrot.slane %v9052_v53, 4  ;;  %v10168_v28 = vrot.slane %v16326_v5, 9 }
 0x46f   : > { %v10183_v16 = vcombine.low %v9039_v19, %v9042_v9  ;;  %v9059_v60 = vrot.slane %v16327_v56, 5  ;;  %v10169_v18 = vrot.slane %v16328_v54, 9  ;;  %v9066_v4 = vrot.slane %v16329_v1, 5  ;;  %v16331_v9 = vld [vmem:[#allocation18_spill] sm:$0xff]  ;;  %v16333_v56 = vld [vmem:[#allocation12_spill] sm:$0xff] }
 0x470   : > { %v9049_v45 = vsel %vm11753_vm9, %v9047_v47, %v9048_v30  ;;  %v9056_v11 = vsel %vm11753_vm9, %v9054_v49, %v9055_v32  ;;  %v9046_v63 = vsel %vm11753_vm9, %v10168_v28, %v9045_v42  ;;  %v9062_v44 = vrot.slane %v15437_v61, 5  ;;  %v16335_v1 = vld [vmem:[#allocation10_spill] sm:$0xff] }
 0x471   : > { %v10184_v15 = vcombine.low %v9046_v63, %v9049_v45  ;;  %v9053_v46 = vsel %vm11753_vm9, %v10169_v18, %v9052_v53  ;;  %v9061_v20 = vrot.slane %v9059_v60, 4  ;;  %v9068_v31 = vrot.slane %v9066_v4, 4  ;;  %v16334_v18 = vld [vmem:[#allocation21_spill] sm:$0xff] }
 0x472   : > { %11021 = vmatmul.mubr.bf16.gmra.mrb[24].mxu1 %v10156_v0  ;;  %v10185_v24 = vcombine.low %v9053_v46, %v9056_v11  ;;  %v9069_v57 = vrot.slane %v15447_v51, 5  ;;  %v10170_v25 = vrot.slane %v16330_v13, 9  ;;  %v9073_v0 = vrot.slane %v15295_v6, 5 }
 0x473   : > { %11024 = vmatprep.mubr.bf16.mxu1 %v10157_v55  ;;  %v9063_v12 = vsel %vm11753_vm9, %v9061_v20, %v9062_v44  ;;  %v10171_v62 = vrot.slane %v15285_v48, 9  ;;  %v9080_v3 = vrot.slane %v15297_v59, 5  ;;  %v9076_v6 = vrot.slane %v15471_v52, 5 }
 0x474   : > { %v9070_v55 = vsel %vm11753_vm9, %v9068_v31, %v9069_v57  ;;  %v9060_v2 = vsel %vm11753_vm9, %v10170_v25, %v9059_v60  ;;  %v9075_v14 = vrot.slane %v9073_v0, 4  ;;  %v9083_v48 = vrot.slane %v15481_v40, 5 }
 0x475   : > { %v10186_v61 = vcombine.low %v9060_v2, %v9063_v12  ;;  %v9067_v51 = vsel %vm11753_vm9, %v10171_v62, %v9066_v4  ;;  %v9082_v42 = vrot.slane %v9080_v3, 4  ;;  %v9087_v43 = vrot.slane %v15313_v21, 5 }
 0x476   : > { %v10187_v34 = vcombine.low %v9067_v51, %v9070_v55  ;;  %v9077_v59 = vsel %vm11753_vm9, %v9075_v14, %v9076_v6  ;;  %v10173_v26 = vrot.slane %v16331_v9, 9  ;;  %v9094_v19 = vrot.slane %v15315_v27, 5  ;;  %v16332_v27 = vld [vmem:[#allocation27_spill] sm:$0xff] }
 0x477   : > { %v9084_v53 = vsel %vm11753_vm9, %v9082_v42, %v9083_v48  ;;  %v9089_v47 = vrot.slane %v9087_v43, 4  ;;  %v9090_v32 = vrot.slane %v15526_v29, 5  ;;  %v9097_v28 = vrot.slane %v16332_v27, 5  ;;  %v16341_v27 = vld [vmem:[#allocation26_spill] sm:$0xff] }
 0x478   : > { %v9081_v40 = vsel %vm11753_vm9, %v10173_v26, %v9080_v3  ;;  %v9096_v21 = vrot.slane %v9094_v19, 4  ;;  %v10174_v60 = vrot.slane %v16333_v56, 9  ;;  %v9101_v11 = vrot.slane %v16334_v18, 5  ;;  %v16337_v3 = vld [vmem:[#allocation22_spill] sm:$0xff] }
 0x479   : > { %v9091_v54 = vsel %vm11753_vm9, %v9089_v47, %v9090_v32  ;;  %v10175_v4 = vrot.slane %v16335_v1, 9  ;;  %v9104_v12 = vrot.slane %v15569_v23, 5  ;;  %v9111_v62 = vrot.slane %v15578_v33, 5  ;;  %v16340_v47 = vld [vmem:[#allocation15_spill] sm:$0xff] }
 0x47a   : > { %11025 = vmatmul.mubr.bf16.gmra.mrb[28].mxu1 %v10158_v17  ;;  %v10172_v17 = vrot.slane %v15299_v22, 9  ;;  %v10189_v22 = vcombine.low %v9081_v40, %v9084_v53  ;;  %v9098_v63 = vsel %vm11753_vm9, %v9096_v21, %v9097_v28  ;;  %v9088_v46 = vsel %vm11753_vm9, %v10174_v60, %v9087_v43  ;;  %v16339_v40 = vld [vmem:[#allocation6_spill] sm:$0xff] }
 0x47b   : > { %11044 = vmatprep.mubr.bf16.mxu1 %v10183_v16  ;;  %v9095_v20 = vsel %vm11753_vm9, %v10175_v4, %v9094_v19  ;;  %v9103_v44 = vrot.slane %v9101_v11, 4  ;;  %v10176_v2 = vrot.slane %v16337_v3, 9  ;;  %v9115_v51 = vrot.slane %v15346_v10, 5 }
 0x47c   : > { %v9074_v16 = vsel %vm11753_vm9, %v10172_v17, %v9073_v0  ;;  %v10191_v31 = vcombine.low %v9095_v20, %v9098_v63  ;;  %v9122_v23 = vrot.slane %v15349_v50, 5  ;;  %v9118_v26 = vrot.slane %v15611_v36, 5 }
 0x47d   : > { %v10188_v52 = vcombine.low %v9074_v16, %v9077_v59  ;;  %v9102_v6 = vsel %vm11753_vm9, %v10176_v2, %v9101_v11  ;;  %v9117_v59 = vrot.slane %v9115_v51, 4  ;;  %v9125_v50 = vrot.slane %v15619_v38, 5 }
 0x47e   : > { %v9124_v10 = vrot.slane %v9122_v23, 4  ;;  %v10178_v16 = vrot.slane %v15354_v58, 9  ;;  %v10179_v21 = vrot.slane %v16340_v47, 9  ;;  %v9136_v36 = vrot.slane %v16341_v27, 5  ;;  %v15857_v47 = vld [vmem:[%s15976_s4] ss:$0 sm:$0xff] }
 0x47f   : > { %v9132_v1 = vrot.slane %v15636_v37, 5  ;;  %v9143_v4 = vrot.slane %v15407_v8, 5  ;;  %v10182_v8 = vrot.slane %v15402_v7, 9 }
 0x480   : > { %v9126_v32 = vsel %vm11753_vm9, %v9124_v10, %v9125_v50  ;;  %v9116_v28 = vsel %vm11753_vm9, %v10178_v16, %v9115_v51  ;;  %v9123_v56 = vsel %vm11753_vm9, %v10179_v21, %v9122_v23  ;;  %v9138_v18 = vrot.slane %v9136_v36, 4 }
 0x481   : > { %v10195_v58 = vcombine.low %v9123_v56, %v9126_v32 }
 0x482   : > { %11045 = vmatmul.mubr.bf16.vlgmr.msra.gmra.mrb[0].mxu1 %v10184_v15  ;;  %v16336_v15 = vld [vmem:[#allocation20_spill] sm:$0xff] }
 0x483   : > { %11048 = vmatprep.mubr.bf16.mxu1 %v10185_v24  ;;  %v9108_v29 = vrot.slane %v16336_v15, 5  ;;  %v10190_v24 = vcombine.low %v9088_v46, %v9091_v54  ;;  %v9139_v15 = vrot.slane %v15644_v41, 5  ;;  %v16342_v46 = vld [vmem:[#allocation24_spill] sm:$0xff]  ;;  %v9146_v41 = vrot.slane %v15653_v35, 5 }
 0x485   : > { %v9110_v13 = vrot.slane %v9108_v29, 4 }
 0x487   : > { %v9112_v42 = vsel %vm11753_vm9, %v9110_v13, %v9111_v62  ;;  %v9140_v13 = vsel %vm11753_vm9, %v9138_v18, %v9139_v15 }
 0x48a   : > { %11049 = vmatmul.mubr.bf16.gmra.mrb[4].mxu1 %v10186_v61  ;;  %v9105_v61 = vsel %vm11753_vm9, %v9103_v44, %v9104_v12  ;;  %v9145_v12 = vrot.slane %v9143_v4, 4 }
 0x48b   : > { %11052 = vmatprep.mubr.bf16.mxu1 %v10187_v34  ;;  %v16338_v34 = vld [vmem:[#allocation23_spill] sm:$0xff]  ;;  %v10192_v33 = vcombine.low %v9102_v6, %v9105_v61 }
 0x48c   : > { %v10177_v14 = vrot.slane %v16338_v34, 9  ;;  %v9144_v34 = vsel %vm11753_vm9, %v10182_v8, %v9143_v4  ;;  %v9147_v7 = vsel %vm11753_vm9, %v9145_v12, %v9146_v41 }
 0x48e   : > { %v9109_v48 = vsel %vm11753_vm9, %v10177_v14, %v9108_v29 }
 0x48f   : > { %v10193_v17 = vcombine.low %v9109_v48, %v9112_v42  ;;  %v10198_v42 = vcombine.low %v9144_v34, %v9147_v7 }
 0x491   : > { %v15719_v49 = vpop.f32.mrb[96].mxu0 }
 0x492   : > { %11053 = vmatmul.mubr.bf16.gmra.mrb[8].mxu1 %v10188_v52  ;;  %v15721_v30 = vpop.f32.mrb[97].mxu0  ;;  %v9119_v52 = vsel %vm11753_vm9, %v9117_v59, %v9118_v26  ;;  %v11076_v21 = vadd.f32 %v15719_v49, %v15857_v47 }
 0x493   : > { %11056 = vmatprep.mubr.bf16.mxu1 %v10189_v22  ;;  %v15724_v5 = vpop.f32.mrb[98].mxu0  ;;  %v9129_v22 = vrot.slane %v16339_v40, 5  ;;  %v10194_v38 = vcombine.low %v9116_v28, %v9119_v52  ;;  %v15847_v40 = vld [vmem:[%s15977_s5] sm:$0x7]  ;;  %v11078_v32 = vadd.f32 %v15857_v47, %v15721_v30 }
 0x494   : > { %v15727_v45 = vpop.f32.mrb[99].mxu0  ;;  %10606 = vmatprep.mubr.msk.bf16.mxu0 %vm9524_vm4, %v15847_v40 }
 0x495   : > { %v9131_v60 = vrot.slane %v9129_v22, 4  ;;  %v11082_v56 = vadd.f32 %v15857_v47, %v15727_v45 }
 0x497   : > { %v9133_v20 = vsel %vm11753_vm9, %v9131_v60, %v9132_v1 }
 0x499   : > { %v15741_v57 = vpop.f32.mrb[100].mxu0 }
 0x49a   : > { %11057 = vmatmul.mubr.bf16.gmra.mrb[12].mxu1 %v10190_v24  ;;  %v15743_v25 = vpop.f32.mrb[101].mxu0  ;;  %v10180_v24 = vrot.slane %v16342_v46, 9  ;;  %v11084_v30 = vadd.f32 %v15741_v57, %v15857_v47 }
 0x49b   : > { %11060 = vmatprep.mubr.bf16.mxu1 %v10191_v31  ;;  %v15746_v0 = vpop.f32.mrb[102].mxu0  ;;  %v16343_v31 = vld [vmem:[#allocation25_spill] sm:$0xff] }
 0x49c   : > { %v15749_v55 = vpop.f32.mrb[103].mxu0  ;;  %v10181_v44 = vrot.slane %v16343_v31, 9  ;;  %v9130_v37 = vsel %vm11753_vm9, %v10180_v24, %v9129_v22  ;;  %v9518_v22 = vld [vmem:[%s15978_s6] sm:$0x3f] }
 0x49d   : > { %v10196_v62 = vcombine.low %v9130_v37, %v9133_v20  ;;  %9521 = vperm.xlu0 %11384, %v9518_v22   ;;  %v11090_v8 = vadd.f32 %v15857_v47, %v15749_v55 }
 0x49e   : > { %v9137_v3 = vsel %vm11753_vm9, %v10181_v44, %v9136_v36  ;;  %v11080_v36 = vadd.f32 %v15724_v5, %v15857_v47  ;;  %v11086_v5 = vadd.f32 %v15857_v47, %v15743_v25  ;;  %v11088_v44 = vadd.f32 %v15746_v0, %v15857_v47 }
 0x49f   : > { %v10197_v2 = vcombine.low %v9137_v3, %v9140_v13 }
 0x4a1   : > { %v15763_v43 = vpop.f32.mrb[104].mxu0 }
 0x4a2   : > { %11061 = vmatmul.mubr.bf16.gmra.mrb[16].mxu1 %v10192_v33  ;;  %v15765_v9 = vpop.f32.mrb[105].mxu0 }
 0x4a3   : > { %11064 = vmatprep.mubr.bf16.mxu1 %v10193_v17  ;;  %v15768_v53 = vpop.f32.mrb[106].mxu0  ;;  %v11094_v0 = vadd.f32 %v15857_v47, %v15765_v9 }
 0x4a4   : > { %v15771_v19 = vpop.f32.mrb[107].mxu0 }
 0x4a9   : > { %v15785_v54 = vpop.f32.mrb[108].mxu0 }
 0x4aa   : > { %11065 = vmatmul.mubr.bf16.gmra.mrb[20].mxu1 %v10194_v38  ;;  %v15787_v11 = vpop.f32.mrb[109].mxu0 }
 0x4ab   : > { %11068 = vmatprep.mubr.bf16.mxu1 %v10195_v58  ;;  %v15791_v63 = vpop.f32.mrb[110].mxu0 }
 0x4ac   : > { %v15794_v29 = vpop.f32.mrb[111].mxu0 }
 0x4b1   : > { %v15808_v61 = vpop.f32.mrb[112].mxu0 }
 0x4b2   : > { %11069 = vmatmul.mubr.bf16.gmra.mrb[24].mxu1 %v10196_v62  ;;  %v15810_v51 = vpop.f32.mrb[113].mxu0 }
 0x4b3   : > { %11072 = vmatprep.mubr.bf16.mxu1 %v10197_v2  ;;  %v15816_v14 = vpop.f32.mrb[114].mxu0 }
 0x4b4   : > { %v15818_v35 = vpop.f32.mrb[115].mxu0 }
 0x4b9   : > { %v15820_v23 = vpop.f32.mrb[116].mxu0 }
 0x4ba   : > { %11073 = vmatmul.mubr.bf16.gmra.mrb[28].mxu1 %v10198_v42  ;;  %v15822_v6 = vpop.f32.mrb[117].mxu0  ;;  %v11092_v42 = vadd.f32 %v15763_v43, %v15857_v47 }
 0x4bb   : > { %v15824_v33 = vpop.f32.mrb[118].mxu0 }
 0x4bc   : > { %v15826_v48 = vpop.f32.mrb[119].mxu0 }
 0x4c1   : > { %v15828_v17 = vpop.f32.mrb[120].mxu0 }
 0x4c2   : > { %v15830_v59 = vpop.f32.mrb[121].mxu0 }
 0x4c3   : > { %v15832_v39 = vpop.f32.mrb[122].mxu0 }
 0x4c4   : > { %v15834_v10 = vpop.f32.mrb[123].mxu0 }
 0x4c9   : > { %v15836_v26 = vpop.f32.mrb[124].mxu0 }
 0x4ca   : > { %v15838_v50 = vpop.f32.mrb[125].mxu0 }
 0x4cb   : > { %v15840_v16 = vpop.f32.mrb[126].mxu0 }
 0x4cc   : > { %v15842_v52 = vpop.f32.mrb[127].mxu0 }
 0x555   : > { %v11046_v27 = vpop.f32.mrb[0].mxu1 }
 0x556   : > { %v11077_v28 = vadd.f32 %v11076_v21, %v11046_v27  ;;  %v9310_v38 = vpop.f32.mrb[1].mxu1 }
 0x557   : > { %v11079_v58 = vadd.f32 %v11078_v32, %v9310_v38  ;;  %v11047_v60 = vpop.f32.mrb[2].mxu1  ;;  %v11096_v32 = vadd.f32 %v15768_v53, %v15857_v47  ;;  %v11102_v53 = vadd.f32 %v15857_v47, %v15787_v11 }
 0x558   : > { %v11081_v18 = vadd.f32 %v11080_v36, %v11047_v60  ;;  %v9313_v1 = vpop.f32.mrb[3].mxu1  ;;  %v9471_v15 = vmax.f32 %v11077_v28, 0.0  ;;  %v11098_v28 = vadd.f32 %v15857_v47, %v15771_v19 }
 0x559   : > { %v11083_v4 = vadd.f32 %v11082_v56, %v9313_v1  ;;  %v9469_v49 = vmax.f32 %v11079_v58, 0.0 }
 0x55a   : > { %v9472_v46 = vmax.f32 %v11081_v18, 0.0 }
 0x55b   : > { %v9470_v24 = vmax.f32 %v11083_v4, 0.0 }
 0x55c   : > { %v15869_v20 = vpack.c.bf16 %v9472_v46, %v9471_v15  ;;  %v11100_v15 = vadd.f32 %v15785_v54, %v15857_v47 }
 0x55d   : > { %v15873_v31 = vpack.c.bf16 %v9470_v24, %v9469_v49  ;;  %v11050_v45 = vpop.f32.mrb[4].mxu1  ;;  %v11104_v24 = vadd.f32 %v15791_v63, %v15857_v47  ;;  %v11110_v63 = vadd.f32 %v15857_v47, %v15810_v51 }
 0x55e   : > { %v11085_v13 = vadd.f32 %v11084_v30, %v11050_v45  ;;  %v9326_v37 = vpop.f32.mrb[5].mxu1  ;;  %v11106_v45 = vadd.f32 %v15857_v47, %v15794_v29 }
 0x55f   : > { %v11087_v12 = vadd.f32 %v11086_v5, %v9326_v37  ;;  %v11051_v41 = vpop.f32.mrb[6].mxu1 }
 0x560   : > { %v11089_v62 = vadd.f32 %v11088_v44, %v11051_v41  ;;  %v9329_v57 = vpop.f32.mrb[7].mxu1  ;;  %v9475_v2 = vmax.f32 %v11085_v13, 0.0 }
 0x561   : > { %v11091_v3 = vadd.f32 %v11090_v8, %v9329_v57  ;;  %v9473_v7 = vmax.f32 %v11087_v12, 0.0  ;;  %v11108_v57 = vadd.f32 %v15808_v61, %v15857_v47 }
 0x562   : > { %v9476_v34 = vmax.f32 %v11089_v62, 0.0 }
 0x563   : > { %v9474_v25 = vmax.f32 %v11091_v3, 0.0 }
 0x564   : > { %v15881_v22 = vpack.c.bf16 %v9476_v34, %v9475_v2  ;;  %v11112_v34 = vadd.f32 %v15816_v14, %v15857_v47  ;;  %v11118_v14 = vadd.f32 %v15857_v47, %v15822_v6 }
 0x565   : > { %v15885_v21 = vpack.c.bf16 %v9474_v25, %v9473_v7  ;;  %v11054_v55 = vpop.f32.mrb[8].mxu1 }
 0x566   : > { %v11093_v27 = vadd.f32 %v11092_v42, %v11054_v55  ;;  %v9342_v36 = vpop.f32.mrb[9].mxu1  ;;  %v11114_v42 = vadd.f32 %v15857_v47, %v15818_v35  ;;  %v11120_v35 = vadd.f32 %v15824_v33, %v15857_v47 }
 0x567   : > { %v11095_v38 = vadd.f32 %v11094_v0, %v9342_v36  ;;  %v11055_v56 = vpop.f32.mrb[10].mxu1 }
 0x568   : > { %v11097_v58 = vadd.f32 %v11096_v32, %v11055_v56  ;;  %v9345_v43 = vpop.f32.mrb[11].mxu1  ;;  %v9479_v18 = vmax.f32 %v11093_v27, 0.0  ;;  %v11116_v56 = vadd.f32 %v15820_v23, %v15857_v47  ;;  %v9529_v23 = vsel %vm9524_vm4, %v15873_v31, 0 }
 0x569   : > { %v11099_v60 = vadd.f32 %v11098_v28, %v9345_v43  ;;  %v9477_v4 = vmax.f32 %v11095_v38, 0.0  ;;  %v11128_v31 = vadd.f32 %v15832_v39, %v15857_v47 }
 0x56a   : > { %v9480_v1 = vmax.f32 %v11097_v58, 0.0 }
 0x56b   : > { %v9478_v9 = vmax.f32 %v11099_v60, 0.0 }
 0x56c   : > { %v15893_v46 = vpack.c.bf16 %v9480_v1, %v9479_v18 }
 0x56d   : > { %v15897_v49 = vpack.c.bf16 %v9478_v9, %v9477_v4  ;;  %v11058_v19 = vpop.f32.mrb[12].mxu1  ;;  %v11122_v4 = vadd.f32 %v15857_v47, %v15826_v48  ;;  %v11124_v48 = vadd.f32 %v15828_v17, %v15857_v47 }
 0x56e   : > { %v11101_v30 = vadd.f32 %v11100_v15, %v11058_v19  ;;  %v9358_v5 = vpop.f32.mrb[13].mxu1 }
 0x56f   : > { %v11103_v44 = vadd.f32 %v11102_v53, %v9358_v5  ;;  %v11059_v13 = vpop.f32.mrb[14].mxu1 }
 0x570   : > { %v11105_v37 = vadd.f32 %v11104_v24, %v11059_v13  ;;  %v9361_v54 = vpop.f32.mrb[15].mxu1  ;;  %v9483_v12 = vmax.f32 %v11101_v30, 0.0 }
 0x571   : > { %v11107_v8 = vadd.f32 %v11106_v45, %v9361_v54  ;;  %v9481_v62 = vmax.f32 %v11103_v44, 0.0  ;;  %v11126_v44 = vadd.f32 %v15857_v47, %v15830_v59 }
 0x572   : > { %v9484_v41 = vmax.f32 %v11105_v37, 0.0 }
 0x573   : > { %v9482_v11 = vmax.f32 %v11107_v8, 0.0 }
 0x574   : > { %v15905_v3 = vpack.c.bf16 %v9484_v41, %v9483_v12  ;;  %v11130_v12 = vadd.f32 %v15857_v47, %v15834_v10  ;;  %v11134_v10 = vadd.f32 %v15857_v47, %v15838_v50 }
 0x575   : > { %v15909_v2 = vpack.c.bf16 %v9482_v11, %v9481_v62  ;;  %v11062_v29 = vpop.f32.mrb[16].mxu1  ;;  %v9532_v11 = vsel %vm9524_vm4, %v15869_v20, 0  ;;  %v11136_v20 = vadd.f32 %v15840_v16, %v15857_v47 }
 0x576   : > { %v11109_v7 = vadd.f32 %v11108_v57, %v11062_v29  ;;  %v9374_v25 = vpop.f32.mrb[17].mxu1 }
 0x577   : > { %v11111_v0 = vadd.f32 %v11110_v63, %v9374_v25  ;;  %v11063_v55 = vpop.f32.mrb[18].mxu1 }
 0x578   : > { %v11113_v32 = vadd.f32 %v11112_v34, %v11063_v55  ;;  %v9377_v61 = vpop.f32.mrb[19].mxu1  ;;  %v9487_v36 = vmax.f32 %v11109_v7, 0.0  ;;  %v11132_v7 = vadd.f32 %v15836_v26, %v15857_v47 }
 0x579   : > { %v11115_v27 = vadd.f32 %v11114_v42, %v9377_v61  ;;  %v9485_v38 = vmax.f32 %v11111_v0, 0.0  ;;  %v11138_v61 = vadd.f32 %v15857_v47, %v15842_v52  ;;  %v9538_v52 = vsel %vm9524_vm4, %v15881_v22, 0 }
 0x57a   : > { %v9488_v28 = vmax.f32 %v11113_v32, 0.0  ;;  %v9541_v47 = vsel %vm9524_vm4, %v15897_v49, 0  ;;  %v9550_v22 = vsel %vm9524_vm4, %v15905_v3, 0  ;;  %v9522_v49 = vpop.permute.xlu0 %9521 }
 0x57b   : > { %v9486_v51 = vmax.f32 %v11115_v27, 0.0 }
 0x57c   : > { %v9510_v58 = vpack.c.bf16 %v9488_v28, %v9487_v36  ;;  %v9535_v28 = vsel %vm9524_vm4, %v15885_v21, 0  ;;  %v9544_v21 = vsel %vm9524_vm4, %v15893_v46, 0 }
 0x57d   : > { %v9509_v43 = vpack.c.bf16 %v9486_v51, %v9485_v38  ;;  %v11066_v60 = vpop.f32.mrb[20].mxu1 }
 0x57e   : > { %v11117_v18 = vadd.f32 %v11116_v56, %v11066_v60  ;;  %v9390_v1 = vpop.f32.mrb[21].mxu1  ;;  %v9547_v60 = vsel %vm9524_vm4, %v15909_v2, 0 }
 0x57f   : > { %v11119_v9 = vadd.f32 %v11118_v14, %v9390_v1  ;;  %v11067_v15 = vpop.f32.mrb[22].mxu1  ;;  %11364 = vmatprep.subr.msk.bf16.mxu0 %vm9524_vm4, %v9509_v43 }
 0x580   : > { %v11121_v53 = vadd.f32 %v11120_v35, %v11067_v15  ;;  %v9393_v19 = vpop.f32.mrb[23].mxu1  ;;  %10591 = vmatpush3.bf16.xpose.msra.mxu0 %v9529_v23  ;;  %v9491_v24 = vmax.f32 %v11117_v18, 0.0 }
 0x581   : > { %v11123_v6 = vadd.f32 %v11122_v4, %v9393_v19  ;;  %11365 = vmatprep.subr.msk.bf16.mxu0 %vm9524_vm4, %v9510_v58  ;;  %v9489_v30 = vmax.f32 %v11119_v9, 0.0 }
 0x582   : > { %v9492_v33 = vmax.f32 %v11121_v53, 0.0 }
 0x583   : > { %v9490_v5 = vmax.f32 %v11123_v6, 0.0 }
 0x584   : > { %v9512_v45 = vpack.c.bf16 %v9492_v33, %v9491_v24 }
 0x585   : > { %v9511_v13 = vpack.c.bf16 %v9490_v5, %v9489_v30  ;;  %v11070_v37 = vpop.f32.mrb[24].mxu1 }
 0x586   : > { %v11125_v54 = vadd.f32 %v11124_v48, %v11070_v37  ;;  %v9406_v8 = vpop.f32.mrb[25].mxu1 }
 0x587   : > { %v11127_v41 = vadd.f32 %v11126_v44, %v9406_v8  ;;  %v11071_v62 = vpop.f32.mrb[26].mxu1 }
 0x588   : > { %v11129_v17 = vadd.f32 %v11128_v31, %v11071_v62  ;;  %v9409_v57 = vpop.f32.mrb[27].mxu1  ;;  %10593 = vmatpush3.bf16.xpose.msra.mxu0 %v9532_v11  ;;  %v9495_v59 = vmax.f32 %v11125_v54, 0.0 }
 0x589   : > { %v11131_v63 = vadd.f32 %v11130_v12, %v9409_v57  ;;  %11366 = vmatprep.subr.msk.bf16.mxu0 %vm9524_vm4, %v9511_v13  ;;  %v9493_v34 = vmax.f32 %v11127_v41, 0.0 }
 0x58a   : > { %v9496_v29 = vmax.f32 %v11129_v17, 0.0 }
 0x58b   : > { %v9494_v39 = vmax.f32 %v11131_v63, 0.0 }
 0x58c   : > { %v9514_v25 = vpack.c.bf16 %v9496_v29, %v9495_v59 }
 0x58d   : > { %v9513_v42 = vpack.c.bf16 %v9494_v39, %v9493_v34  ;;  %v11074_v0 = vpop.f32.mrb[28].mxu1 }
 0x58e   : > { %v11133_v55 = vadd.f32 %v11132_v7, %v11074_v0  ;;  %v9422_v32 = vpop.f32.mrb[29].mxu1 }
 0x58f   : > { %v11135_v27 = vadd.f32 %v11134_v10, %v9422_v32  ;;  %v11075_v36 = vpop.f32.mrb[30].mxu1 }
 0x590   : > { %v11137_v26 = vadd.f32 %v11136_v20, %v11075_v36  ;;  %v9425_v38 = vpop.f32.mrb[31].mxu1  ;;  %10595 = vmatpush3.bf16.xpose.msra.mxu0 %v9535_v28  ;;  %v9499_v50 = vmax.f32 %v11133_v55, 0.0 }
 0x591   : > { %v11139_v51 = vadd.f32 %v11138_v61, %v9425_v38  ;;  %11367 = vmatprep.subr.msk.bf16.mxu0 %vm9524_vm4, %v9512_v45  ;;  %v9497_v58 = vmax.f32 %v11135_v27, 0.0 }
 0x592   : > { %v9500_v56 = vmax.f32 %v11137_v26, 0.0 }
 0x593   : > { %v9498_v16 = vmax.f32 %v11139_v51, 0.0 }
 0x594   : > { %v9516_v14 = vpack.c.bf16 %v9500_v56, %v9499_v50 }
 0x595   : > { %v9515_v43 = vpack.c.bf16 %v9498_v16, %v9497_v58 }
 0x598   : > { %10597 = vmatpush3.bf16.xpose.msra.mxu0 %v9538_v52 }
 0x599   : > { %11368 = vmatprep.subr.msk.bf16.mxu0 %vm9524_vm4, %v9513_v42 }
 0x5a0   : > { %10599 = vmatpush3.bf16.xpose.msra.mxu0 %v9541_v47 }
 0x5a1   : > { %11369 = vmatprep.subr.msk.bf16.mxu0 %vm9524_vm4, %v9514_v25 }
 0x5a8   : > { %10601 = vmatpush3.bf16.xpose.msra.mxu0 %v9544_v21 }
 0x5a9   : > { %11370 = vmatprep.subr.msk.bf16.mxu0 %vm9524_vm4, %v9515_v43 }
 0x5b0   : > { %10603 = vmatpush3.bf16.xpose.msra.mxu0 %v9547_v60 }
 0x5b1   : > { %11371 = vmatprep.subr.msk.bf16.mxu0 %vm9524_vm4, %v9516_v14 }
 0x5b8   : > { %10605 = vmatpush3.bf16.xpose.msra.mxu0 %v9550_v22 }
 0x5bf   : > { %10607 = vmatmul.mubr.msk.bf16.vlgmr.msra.gmra.mrb[128].mxu0 %vm9524_vm4, %v15847_v40 }
 0x692   : > { %v9610_v35 = vpop.f32.mrb[128].mxu0 }
 0x693   : > { %v9611_v46 = vadd.f32 %v9610_v35, %v9522_v49  ;;  %v9612_v18 = vpop.f32.mrb[129].mxu0 }
 0x694   : > { %v9613_v2 = vadd.f32 %v9612_v18, %v9522_v49  ;;  %v9614_v1 = vpop.f32.mrb[130].mxu0 }
 0x695   : > { %9617 = vst [vmem:[%s278_s16] sm:$0x3f] %v9611_v46  ;;  %v9615_v4 = vpop.f32.mrb[131].mxu0 }
 0x696   : > { %9618 = vst [vmem:[%s278_s16 + $0x8] sm:$0x3f] %v9613_v2 }
 0x697 PF: > { %s17_s24 = sadd.s32 1, %s11662_s24  }
 0x698   : > { %p14_p4 = scmp.ge.s32.totalorder %s17_s24, 4  }
 0x69a   :  { %16 = sbr.rel (!%p14_p4) target bundleno = 1 (0x1), region = 84 }

</bundles_post_ra>
